<compile_context>
chip_gen: v6e
topology: v6e:2x2x1
jax: 0.10.0
libtpu: 0.0.40
codegen_flags: <defaults>
</compile_context>

<pallas_src>
import math
import functools
import numpy as np

import jax
import jax.numpy as jnp
from jax import lax
from jax.experimental import pallas as pl
from jax.experimental.pallas import tpu as pltpu

# ----------------------------- config ---------------------------------------
D_MODEL = 64
DEXTRA_PROJ = 2
PROJ = D_MODEL // DEXTRA_PROJ                 # 32
WIDTH_MULT = 2.0
DEXTRA_DEPTH = 4
ENC_FFN_RED = 2
LIGHT_FFN = D_MODEL // ENC_FFN_RED            # 32
MAX_GROUPS = 2 ** math.ceil(math.log(D_MODEL // 32, 2))   # 2

N_WIN = 4                                     # windows per region
M_TOK = 16                                    # padded slots per window
VALID_PER_WIN = 12                            # valid voxels per window (demo data)
M_PER_REGION = N_WIN * VALID_PER_WIN          # 48 valid voxels per region

# regions per grid step -> 192 rows/step; tune ~128 rows on v5e, ~256 on v6e/v7x.
REG_PER_TILE = 4

LN_EPS = 1e-5

# ---- weight-slab layout (all segment starts 128-lane aligned) ----------------
# slab A: matrices with 64 input rows          (D_MODEL, A_COLS) bf16
A_WIN, A_W2A, A_W3A, A_FW1 = 0, 128, 256, 384
A_COLS = 512
# slab B: matrices with 32 input rows          (PROJ, B_COLS) bf16
B_W0, B_WHB, B_W1A, B_QKV, B_WO, B_FW2 = 0, 128, 384, 512, 640, 768
B_COLS = 896
# vector slab: one bias / gamma / beta per row (V_ROWS, 128) f32
(V_B_IN, V_G_IN, V_BE_IN,
 V_B0, V_G0, V_BE0,
 V_B1, V_G1, V_BE1,
 V_B2, V_G2, V_BE2,
 V_B3, V_G3, V_BE3,
 V_BQKV, V_BO, V_GLN1, V_BELN1,
 V_FB1, V_FB2, V_GLN2, V_BELN2) = range(23)
V_ROWS = 24


# --------------------------- in-kernel math ----------------------------------
def _gelu(x):
    # tanh approximation -> EUP slot (deviates <~1e-3 from torch's exact erf GELU)
    c = 0.7978845608028654  # sqrt(2/pi)
    return 0.5 * x * (1.0 + jnp.tanh(c * (x + 0.044715 * x * x * x)))


def _layer_norm(x, gamma, beta):
    # one-pass form: the two cross-lane reductions are independent (overlap in XLU)
    mean = jnp.mean(x, axis=-1, keepdims=True)
    meansq = jnp.mean(x * x, axis=-1, keepdims=True)
    var = meansq - mean * mean
    return (x - mean) * lax.rsqrt(var + LN_EPS) * gamma + beta


def _layer_norm_ref(x, gamma, beta):
    mean = jnp.mean(x, axis=-1, keepdims=True)
    var = jnp.mean((x - mean) ** 2, axis=-1, keepdims=True)
    return (x - mean) * lax.rsqrt(var + LN_EPS) * gamma + beta


# ------------------------------ fused kernel ---------------------------------
def fused_encoder_kernel(x_ref, winq_ref, wink_ref, wa_ref, wb_ref, vec_ref,
                         o_ref, *, scaling):
    f32, bf16 = jnp.float32, jnp.bfloat16
    P = PROJ
    D = D_MODEL
    n_reg, m_reg, _ = winq_ref.shape            # regions per tile, rows per region

    def vrow(row, n):                            # (1, n) f32 bias / LN vector
        return vec_ref[row:row + 1, :n]

    # ---- weight views (bf16 slabs, VMEM-resident across the whole grid) ------
    w_in = wa_ref[:, A_WIN:A_WIN + P]            # (64, 32)
    w2a = wa_ref[:, A_W2A:A_W2A + 2 * P]         # (64, 64)
    w3a = wa_ref[:, A_W3A:A_W3A + P]             # (64, 32)
    fw1 = wa_ref[:, A_FW1:A_FW1 + LIGHT_FFN]     # (64, 32)
    w0 = wb_ref[:, B_W0:B_W0 + P]                # (32, 32)
    whb = wb_ref[:, B_WHB:B_WHB + 5 * P]         # (32, 160) = [W1b | W2b | W3b]
    w1a = wb_ref[:, B_W1A:B_W1A + 2 * P]         # (32, 64)
    wqkv = wb_ref[:, B_QKV:B_QKV + 3 * P]        # (32, 96)
    wo = wb_ref[:, B_WO:B_WO + D]                # (32, 64)
    fw2 = wb_ref[:, B_FW2:B_FW2 + D]             # (32, 64)

    x0 = x_ref[...]                              # (T, 64) f32  (= src + pos, residual)
    x0b = x0.astype(bf16)

    # ---- DExTra input projection: Linear -> LN -> GELU ------------------------
    h = jnp.dot(x0b, w_in, preferred_element_type=f32) + vrow(V_B_IN, P)
    h = _gelu(_layer_norm(h, vrow(V_G_IN, P), vrow(V_BE_IN, P)))      # (T, 32)
    hb = h.astype(bf16)

    # feature-sharing matmuls of GLT layers 1..3 fused into one (h @ [W1b|W2b|W3b])
    hs = jnp.dot(hb, whb, preferred_element_type=f32)                 # (T, 160)
    h1 = hs[:, 0 * P:2 * P]
    h2 = hs[:, 2 * P:4 * P]
    h3 = hs[:, 4 * P:5 * P]

    # ---- DExTra GLT stack (concat([y, h]) @ W == y @ Wa + h @ Wb) -------------
    y = jnp.dot(hb, w0, preferred_element_type=f32) + vrow(V_B0, P)
    y = _gelu(_layer_norm(y, vrow(V_G0, P), vrow(V_BE0, P)))

    y = jnp.dot(y.astype(bf16), w1a, preferred_element_type=f32) + h1 + vrow(V_B1, 2 * P)
    y = _gelu(_layer_norm(y, vrow(V_G1, 2 * P), vrow(V_BE1, 2 * P)))

    y = jnp.dot(y.astype(bf16), w2a, preferred_element_type=f32) + h2 + vrow(V_B2, 2 * P)
    y = _gelu(_layer_norm(y, vrow(V_G2, 2 * P), vrow(V_BE2, 2 * P)))

    y = jnp.dot(y.astype(bf16), w3a, preferred_element_type=f32) + h3 + vrow(V_B3, P)
    dex = _gelu(_layer_norm(y, vrow(V_G3, P), vrow(V_BE3, P)))        # (T, 32)

    # ---- single-head attention: per-region batched, window-id-masked softmax --
    qkv = jnp.dot(dex.astype(bf16), wqkv, preferred_element_type=f32) + vrow(V_BQKV, 3 * P)
    q = (qkv[:, :P] * scaling).reshape(n_reg, m_reg, P)
    k = qkv[:, P:2 * P].reshape(n_reg, m_reg, P)
    v = qkv[:, 2 * P:].reshape(n_reg, m_reg, P)

    scores = jnp.einsum("bqd,bkd->bqk", q.astype(bf16), k.astype(bf16),
                        preferred_element_type=f32)                   # (B, m, m)
    allowed = winq_ref[...] == wink_ref[...]                          # (B, m, m)
    scores = jnp.where(allowed, scores, f32(-1e30))
    scores = scores - jnp.max(scores, axis=-1, keepdims=True)
    p = jnp.exp(scores)
    probs = p * pl.reciprocal(jnp.sum(p, axis=-1, keepdims=True), approx=True)
    ctx = jnp.einsum("bqk,bkd->bqd", probs.astype(bf16), v.astype(bf16),
                     preferred_element_type=f32).reshape(n_reg * m_reg, P)

    attn = jnp.dot(ctx.astype(bf16), wo, preferred_element_type=f32) + vrow(V_BO, D)

    # ---- residual + post-LN + light FFN + residual + final post-LN ------------
    xn = _layer_norm(x0 + attn, vrow(V_GLN1, D), vrow(V_BELN1, D))
    hh = _gelu(jnp.dot(xn.astype(bf16), fw1, preferred_element_type=f32)
               + vrow(V_FB1, LIGHT_FFN))
    y2 = jnp.dot(hh.astype(bf16), fw2, preferred_element_type=f32) + vrow(V_FB2, D)
    o_ref[...] = _layer_norm(xn + y2, vrow(V_GLN2, D), vrow(V_BELN2, D))


# ----------------------------- pallas wrapper ---------------------------------
def intra_region_encoder_forward(src, pos, inds, key_padding_mask, packed):
    """src: (R*Mreg, d) voxel features, regions contiguous; pos: (R, n_win, m_tok, d);
    inds: (R, Mreg) flat2win slot indices; key_padding_mask: (R, n_win, m_tok) bool
    (redundant here: padded slots never appear as rows in the packed layout)."""
    del key_padding_mask
    R, n_win, m_tok, D = pos.shape
    Mreg = inds.shape[1]
    n_slot = n_win * m_tok
    total = R * Mreg
    assert Mreg % 8 == 0, "rows per region must be a multiple of 8 (pad ragged regions)"
    assert R % REG_PER_TILE == 0, "pad the region batch to a multiple of REG_PER_TILE"
    n_tiles = R // REG_PER_TILE
    T = REG_PER_TILE * Mreg

    inds = inds.astype(jnp.int32)
    # gather pos into flat voxel order and pre-add to src (one fused XLA gather + add)
    pos_flat = jax.vmap(lambda p, i: p[i])(pos.reshape(R, n_slot, D), inds)
    x0 = (src.reshape(R, Mreg, D) + pos_flat).reshape(total, D)

    # per-voxel window id: the same-window mask replaces the padded-slot key mask
    win = (inds // m_tok).astype(jnp.int32)
    win_q = win.reshape(n_tiles, REG_PER_TILE, Mreg, 1)
    win_k = win.reshape(n_tiles, REG_PER_TILE, 1, Mreg)

    kern = functools.partial(fused_encoder_kernel, scaling=float(PROJ) ** -0.5)
    return pl.pallas_call(
        kern,
        out_shape=jax.ShapeDtypeStruct((total, D), jnp.float32),
        grid=(n_tiles,),
        in_specs=[
            pl.BlockSpec((T, D), lambda i: (i, 0)),
            pl.BlockSpec((None, REG_PER_TILE, Mreg, 1), lambda i: (i, 0, 0, 0)),
            pl.BlockSpec((None, REG_PER_TILE, 1, Mreg), lambda i: (i, 0, 0, 0)),
            pl.BlockSpec((D_MODEL, A_COLS), lambda i: (0, 0)),   # resident weights
            pl.BlockSpec((PROJ, B_COLS), lambda i: (0, 0)),      # resident weights
            pl.BlockSpec((V_ROWS, 128), lambda i: (0, 0)),       # resident vectors
        ],
        out_specs=pl.BlockSpec((T, D), lambda i: (i, 0)),
        compiler_params=pltpu.CompilerParams(
            dimension_semantics=("parallel",)),
    )(x0, win_q, win_k, packed["wa"], packed["wb"], packed["vec"])


# ------------------------- DExTra configuration -------------------------------
def dextra_config(in_feat, out_feat, max_groups, n_layers, width_mult):
    """DeLighT DExTra expand/reduce schedule (widths + groups per GLT layer)."""
    mid = int(math.ceil(n_layers / 2.0))
    groups = [min(2 ** (i + 1), max_groups) for i in range(mid)]
    sizes = np.linspace(in_feat, int(math.ceil(width_mult * in_feat)), mid).astype(int).tolist()
    if n_layers % 2 == 0:
        groups = groups + groups[::-1]
        sizes = sizes + sizes[::-1]
    else:
        groups = groups + groups[::-1][1:]
        sizes = sizes + sizes[::-1][1:]
    sizes[-1] = out_feat
    return sizes, groups


def glt_to_dense(w_g, b_g, shuffle):
    """Grouped linear (g, in_g, out_g) + channel shuffle as an equivalent dense matmul."""
    g, in_g, out_g = w_g.shape
    W = jax.scipy.linalg.block_diag(*[w_g[i] for i in range(g)])   # (g*in_g, g*out_g)
    b = b_g.reshape(-1)
    if shuffle and g > 1:
        perm = np.arange(g * out_g).reshape(g, out_g).T.reshape(-1)
        W = W[:, perm]
        b = b[perm]
    return W, b


# ------------------------------ parameters ------------------------------------
def init_params(key):
    sizes, groups = dextra_config(PROJ, PROJ, MAX_GROUPS, DEXTRA_DEPTH, WIDTH_MULT)
    keys = iter(jax.random.split(key, 64))

    def w(shape, scale=0.05):
        return scale * jax.random.normal(next(keys), shape, jnp.float32)

    def ones_ish(n):
        return 1.0 + 0.05 * jax.random.normal(next(keys), (n,), jnp.float32)

    def small(n):
        return 0.02 * jax.random.normal(next(keys), (n,), jnp.float32)

    params = {}
    params["w_in"] = w((D_MODEL, PROJ))
    params["b_in"] = small(PROJ)
    params["g_in"] = ones_ish(PROJ)
    params["be_in"] = small(PROJ)

    glt_dense = []
    in_f = PROJ
    for out_f, g in zip(sizes, groups):
        w_g = w((g, in_f // g, out_f // g))
        b_g = small(out_f).reshape(g, out_f // g)
        W, b = glt_to_dense(w_g, b_g, shuffle=True)        # glt_shuffle=True
        glt_dense.append((W, b, ones_ish(out_f), small(out_f)))
        in_f = out_f + PROJ                                # feature-sharing concat width
    params["glt_dense"] = glt_dense

    wq, bq = w((PROJ, PROJ)), small(PROJ)
    wk, bk = w((PROJ, PROJ)), small(PROJ)
    wv, bv = w((PROJ, PROJ)), small(PROJ)
    params["attn"] = dict(
        w_qkv=jnp.concatenate([wq, wk, wv], axis=1),
        b_qkv=jnp.concatenate([bq, bk, bv]),
        wo=w((PROJ, D_MODEL)), bo=small(D_MODEL),
    )

    params["g_ln1"] = ones_ish(D_MODEL)
    params["be_ln1"] = small(D_MODEL)
    params["fw1"] = w((D_MODEL, LIGHT_FFN))
    params["fb1"] = small(LIGHT_FFN)
    params["fw2"] = w((LIGHT_FFN, D_MODEL))
    params["fb2"] = small(D_MODEL)
    params["g_ln2"] = ones_ish(D_MODEL)
    params["be_ln2"] = small(D_MODEL)
    return params


def pack_params(params):
    """One-time parameter preparation: split the feature-sharing weights, pack all
    matrices into two bf16 slabs (128-lane-aligned segments) and all 1-D vectors into
    one f32 (24, 128) slab.  Keeps the jitted forward free of per-call param ops."""
    P = PROJ
    (W0, b0, g0, be0), (W1, b1, g1, be1), (W2, b2, g2, be2), (W3, b3, g3, be3) = \
        params["glt_dense"]
    # split the feature-sharing concat:  concat([y, h]) @ W == y @ W[:-P] + h @ W[-P:]
    W1a, W1b = W1[:-P], W1[-P:]
    W2a, W2b = W2[:-P], W2[-P:]
    W3a, W3b = W3[:-P], W3[-P:]
    pa = params["attn"]
    whb = jnp.concatenate([W1b, W2b, W3b], axis=1)          # (32, 160)

    wa = jnp.zeros((D_MODEL, A_COLS), jnp.float32)
    wa = wa.at[:, A_WIN:A_WIN + P].set(params["w_in"])
    wa = wa.at[:, A_W2A:A_W2A + 2 * P].set(W2a)
    wa = wa.at[:, A_W3A:A_W3A + P].set(W3a)
    wa = wa.at[:, A_FW1:A_FW1 + LIGHT_FFN].set(params["fw1"])

    wb = jnp.zeros((PROJ, B_COLS), jnp.float32)
    wb = wb.at[:, B_W0:B_W0 + P].set(W0)
    wb = wb.at[:, B_WHB:B_WHB + 5 * P].set(whb)
    wb = wb.at[:, B_W1A:B_W1A + 2 * P].set(W1a)
    wb = wb.at[:, B_QKV:B_QKV + 3 * P].set(pa["w_qkv"])
    wb = wb.at[:, B_WO:B_WO + D_MODEL].set(pa["wo"])
    wb = wb.at[:, B_FW2:B_FW2 + D_MODEL].set(params["fw2"])

    vec = jnp.zeros((V_ROWS, 128), jnp.float32)

    def put(v, row, val):
        return v.at[row, :val.shape[0]].set(val)

    vec = put(vec, V_B_IN, params["b_in"])
    vec = put(vec, V_G_IN, params["g_in"])
    vec = put(vec, V_BE_IN, params["be_in"])
    vec = put(vec, V_B0, b0); vec = put(vec, V_G0, g0); vec = put(vec, V_BE0, be0)
    vec = put(vec, V_B1, b1); vec = put(vec, V_G1, g1); vec = put(vec, V_BE1, be1)
    vec = put(vec, V_B2, b2); vec = put(vec, V_G2, g2); vec = put(vec, V_BE2, be2)
    vec = put(vec, V_B3, b3); vec = put(vec, V_G3, g3); vec = put(vec, V_BE3, be3)
    vec = put(vec, V_BQKV, pa["b_qkv"])
    vec = put(vec, V_BO, pa["bo"])
    vec = put(vec, V_GLN1, params["g_ln1"]); vec = put(vec, V_BELN1, params["be_ln1"])
    vec = put(vec, V_FB1, params["fb1"]); vec = put(vec, V_FB2, params["fb2"])
    vec = put(vec, V_GLN2, params["g_ln2"]); vec = put(vec, V_BELN2, params["be_ln2"])

    return dict(wa=wa.astype(jnp.bfloat16), wb=wb.astype(jnp.bfloat16), vec=vec)


# -------------------------- pure-JAX reference --------------------------------
def reference_forward(src, pos, inds, key_padding_mask, params):
    """Padded-window reference mirroring the kernel's numerics choices (bf16 matmul
    operands with f32 accumulation, tanh-GELU); softmax / reciprocal / LN are exact."""
    bf16 = jnp.bfloat16
    R, n_win, m_tok, Dm = pos.shape
    Mreg = inds.shape[1]
    n_slot = n_win * m_tok
    P = PROJ

    def bdot(a, w):
        return jnp.dot(a.astype(bf16), w.astype(bf16),
                       preferred_element_type=jnp.float32)

    pos_flat = jax.vmap(lambda p, i: p[i])(pos.reshape(R, n_slot, Dm), inds)
    x0 = (src.reshape(R, Mreg, Dm) + pos_flat).reshape(R * Mreg, Dm)

    # DExTra
    h = _gelu(_layer_norm_ref(bdot(x0, params["w_in"]) + params["b_in"],
                              params["g_in"], params["be_in"]))
    out = h
    n_glt = len(params["glt_dense"])
    for l, (W, b, g, be) in enumerate(params["glt_dense"]):
        out = _gelu(_layer_norm_ref(bdot(out, W) + b, g, be))
        if l < n_glt - 1:
            out = jnp.concatenate([out, h], axis=-1)
    dex = out                                               # (R*Mreg, P)

    # windowed single-head attention on the padded layout (module semantics)
    pa = params["attn"]
    wq, wk, wv = pa["w_qkv"][:, :P], pa["w_qkv"][:, P:2 * P], pa["w_qkv"][:, 2 * P:]
    bq, bk, bv = pa["b_qkv"][:P], pa["b_qkv"][P:2 * P], pa["b_qkv"][2 * P:]

    dex_r = dex.reshape(R, Mreg, P)
    xw = jax.vmap(lambda f, i: jnp.zeros((n_slot, P), f.dtype).at[i].set(f))(dex_r, inds)
    xw = xw.reshape(R, n_win, m_tok, P)
    q = (bdot(xw.reshape(-1, P), wq).reshape(R, n_win, m_tok, P) + bq) * (float(P) ** -0.5)
    k = bdot(xw.reshape(-1, P), wk).reshape(R, n_win, m_tok, P) + bk
    v = bdot(xw.reshape(-1, P), wv).reshape(R, n_win, m_tok, P) + bv
    scores = jnp.einsum("rwqc,rwkc->rwqk", q.astype(bf16), k.astype(bf16),
                        preferred_element_type=jnp.float32)
    scores = jnp.where(key_padding_mask[:, :, None, :], jnp.float32(-1e30), scores)
    probs = jax.nn.softmax(scores, axis=-1)
    ctx = jnp.einsum("rwqk,rwkc->rwqc", probs.astype(bf16), v.astype(bf16),
                     preferred_element_type=jnp.float32)
    ctx_flat = jax.vmap(lambda c, i: c[i])(ctx.reshape(R, n_slot, P), inds)
    attn_out = bdot(ctx_flat.reshape(R * Mreg, P), pa["wo"]) + pa["bo"]

    xn = _layer_norm_ref(x0 + attn_out, params["g_ln1"], params["be_ln1"])
    hh = _gelu(bdot(xn, params["fw1"]) + params["fb1"])
    y2 = bdot(hh, params["fw2"]) + params["fb2"]
    return _layer_norm_ref(xn + y2, params["g_ln2"], params["be_ln2"])


# --------------------------------- main ----------------------------------------
if __name__ == "__main__":
    R = 8                                     # regions batched into one pallas_call
    rng = np.random.RandomState(0)
    inds_np = np.zeros((R, M_PER_REGION), np.int32)
    mask_np = np.ones((R, N_WIN, M_TOK), bool)
    for r in range(R):
        rows = []
        for wdx in range(N_WIN):
            slots = np.sort(rng.choice(M_TOK, VALID_PER_WIN, replace=False))
            mask_np[r, wdx, slots] = False
            rows.append(wdx * M_TOK + slots)
        inds_np[r] = np.concatenate(rows)
    inds = jnp.asarray(inds_np, jnp.int32)                      # (R, 48)
    key_padding_mask = jnp.asarray(mask_np)                     # (R, n_win, m_tok) bool

    key = jax.random.PRNGKey(0)
    k_src, k_pos, k_par = jax.random.split(key, 3)
    M_total = R * M_PER_REGION
    src = jax.random.normal(k_src, (M_total, D_MODEL), jnp.float32)
    pos = 0.1 * jax.random.normal(k_pos, (R, N_WIN, M_TOK, D_MODEL), jnp.float32)

    params = init_params(k_par)
    packed = pack_params(params)              # one-time parameter preparation

    fwd = jax.jit(intra_region_encoder_forward)
    out = jax.block_until_ready(fwd(src, pos, inds, key_padding_mask, packed))

    ref = jax.block_until_ready(
        reference_forward(src, pos, inds, key_padding_mask, params))

    assert out.shape == (M_total, D_MODEL)
    assert bool(jnp.all(jnp.isfinite(out)))
    np.testing.assert_allclose(np.asarray(out), np.asarray(ref), rtol=5e-3, atol=5e-3)
    print("KERNEL_OK")
</pallas_src>

<mosaic_0001>
module attributes {stable_mosaic.version = 11 : i64} {
  func.func @fused_encoder_kernel(%arg0: i32, %arg1: memref<192x64xf32, #tpu.memory_space<vmem>>, %arg2: memref<1x4x48x1xi32, #tpu.memory_space<vmem>>, %arg3: memref<1x4x1x48xi32, #tpu.memory_space<vmem>>, %arg4: memref<64x512xbf16, #tpu.memory_space<vmem>>, %arg5: memref<32x896xbf16, #tpu.memory_space<vmem>>, %arg6: memref<24x128xf32, #tpu.memory_space<vmem>>, %arg7: memref<192x64xf32, #tpu.memory_space<vmem>>) attributes {dimension_semantics = [#tpu.dimension_semantics<parallel>], iteration_bounds = array<i64: 2>, scalar_prefetch = 0 : i64, scratch_operands = 0 : i64, tpu.core_type = #tpu.core_type<tc>, window_params = [{transform_indices = @transform_0, window_bounds = array<i64: 192, 64>}, {transform_indices = @transform_1, window_bounds = array<i64: 1, 4, 48, 1>}, {transform_indices = @transform_2, window_bounds = array<i64: 1, 4, 1, 48>}, {pipeline_mode = #tpu.pipeline_mode<synchronous>, transform_indices = @transform_3, window_bounds = array<i64: 64, 512>}, {pipeline_mode = #tpu.pipeline_mode<synchronous>, transform_indices = @transform_4, window_bounds = array<i64: 32, 896>}, {pipeline_mode = #tpu.pipeline_mode<synchronous>, transform_indices = @transform_5, window_bounds = array<i64: 24, 128>}, {transform_indices = @transform_6, window_bounds = array<i64: 192, 64>}]} {
    %c0 = arith.constant 0 : index
    %c0_0 = arith.constant 0 : index
    %0 = vector.load %arg4[%c0, %c0_0] : memref<64x512xbf16, #tpu.memory_space<vmem>>, vector<64x32xbf16>
    %c0_1 = arith.constant 0 : index
    %c128 = arith.constant 128 : index
    %1 = vector.load %arg4[%c0_1, %c128] : memref<64x512xbf16, #tpu.memory_space<vmem>>, vector<64x64xbf16>
    %c0_2 = arith.constant 0 : index
    %c256 = arith.constant 256 : index
    %2 = vector.load %arg4[%c0_2, %c256] : memref<64x512xbf16, #tpu.memory_space<vmem>>, vector<64x32xbf16>
    %c0_3 = arith.constant 0 : index
    %c384 = arith.constant 384 : index
    %3 = vector.load %arg4[%c0_3, %c384] : memref<64x512xbf16, #tpu.memory_space<vmem>>, vector<64x32xbf16>
    %c0_4 = arith.constant 0 : index
    %c0_5 = arith.constant 0 : index
    %4 = vector.load %arg5[%c0_4, %c0_5] : memref<32x896xbf16, #tpu.memory_space<vmem>>, vector<32x32xbf16>
    %c0_6 = arith.constant 0 : index
    %c128_7 = arith.constant 128 : index
    %5 = vector.load %arg5[%c0_6, %c128_7] : memref<32x896xbf16, #tpu.memory_space<vmem>>, vector<32x160xbf16>
    %c0_8 = arith.constant 0 : index
    %c384_9 = arith.constant 384 : index
    %6 = vector.load %arg5[%c0_8, %c384_9] : memref<32x896xbf16, #tpu.memory_space<vmem>>, vector<32x64xbf16>
    %c0_10 = arith.constant 0 : index
    %c512 = arith.constant 512 : index
    %7 = vector.load %arg5[%c0_10, %c512] : memref<32x896xbf16, #tpu.memory_space<vmem>>, vector<32x96xbf16>
    %c0_11 = arith.constant 0 : index
    %c640 = arith.constant 640 : index
    %8 = vector.load %arg5[%c0_11, %c640] : memref<32x896xbf16, #tpu.memory_space<vmem>>, vector<32x64xbf16>
    %c0_12 = arith.constant 0 : index
    %c768 = arith.constant 768 : index
    %9 = vector.load %arg5[%c0_12, %c768] : memref<32x896xbf16, #tpu.memory_space<vmem>>, vector<32x64xbf16>
    %c0_13 = arith.constant 0 : index
    %c0_14 = arith.constant 0 : index
    %10 = vector.load %arg1[%c0_13, %c0_14] : memref<192x64xf32, #tpu.memory_space<vmem>>, vector<192x64xf32>
    %11 = arith.truncf %10 : vector<192x64xf32> to vector<192x64xbf16>
    %cst = arith.constant dense<0.000000e+00> : vector<192x32xf32>
    %12 = tpu.matmul %11, %0, %cst {dimension_numbers = #tpu.dot_dimension_numbers<[1], [0], [0], [1], [0, 0, 1, 1], [], []>} : vector<192x64xbf16>, vector<64x32xbf16>, vector<192x32xf32> -> vector<192x32xf32>
    %c0_15 = arith.constant 0 : index
    %c0_16 = arith.constant 0 : index
    %13 = vector.load %arg6[%c0_15, %c0_16] : memref<24x128xf32, #tpu.memory_space<vmem>>, vector<1x32xf32>
    %14 = vector.broadcast %13 : vector<1x32xf32> to vector<192x32xf32>
    %15 = arith.addf %12, %14 : vector<192x32xf32>
    %c1 = arith.constant 1 : index
    %c0_17 = arith.constant 0 : index
    %16 = vector.load %arg6[%c1, %c0_17] : memref<24x128xf32, #tpu.memory_space<vmem>>, vector<1x32xf32>
    %c2 = arith.constant 2 : index
    %c0_18 = arith.constant 0 : index
    %17 = vector.load %arg6[%c2, %c0_18] : memref<24x128xf32, #tpu.memory_space<vmem>>, vector<1x32xf32>
    %cst_19 = arith.constant dense<0.000000e+00> : vector<192xf32>
    %18 = vector.multi_reduction <add>, %15, %cst_19 [1] : vector<192x32xf32> to vector<192xf32>
    %19 = vector.shape_cast %18 : vector<192xf32> to vector<192x1xf32>
    %cst_20 = arith.constant 3.200000e+01 : f32
    %20 = vector.broadcast %cst_20 : f32 to vector<192x1xf32>
    %21 = arith.divf %19, %20 : vector<192x1xf32>
    %22 = arith.mulf %15, %15 : vector<192x32xf32>
    %cst_21 = arith.constant dense<0.000000e+00> : vector<192xf32>
    %23 = vector.multi_reduction <add>, %22, %cst_21 [1] : vector<192x32xf32> to vector<192xf32>
    %24 = vector.shape_cast %23 : vector<192xf32> to vector<192x1xf32>
    %cst_22 = arith.constant 3.200000e+01 : f32
    %25 = vector.broadcast %cst_22 : f32 to vector<192x1xf32>
    %26 = arith.divf %24, %25 : vector<192x1xf32>
    %27 = arith.mulf %21, %21 : vector<192x1xf32>
    %28 = arith.subf %26, %27 : vector<192x1xf32>
    %29 = vector.broadcast %21 : vector<192x1xf32> to vector<192x32xf32>
    %30 = arith.subf %15, %29 : vector<192x32xf32>
    %cst_23 = arith.constant 9.99999974E-6 : f32
    %31 = vector.broadcast %cst_23 : f32 to vector<192x1xf32>
    %32 = arith.addf %28, %31 : vector<192x1xf32>
    %33 = math.rsqrt %32 : vector<192x1xf32>
    %34 = vector.broadcast %33 : vector<192x1xf32> to vector<192x32xf32>
    %35 = arith.mulf %30, %34 : vector<192x32xf32>
    %36 = vector.broadcast %16 : vector<1x32xf32> to vector<192x32xf32>
    %37 = arith.mulf %35, %36 : vector<192x32xf32>
    %38 = vector.broadcast %17 : vector<1x32xf32> to vector<192x32xf32>
    %39 = arith.addf %37, %38 : vector<192x32xf32>
    %cst_24 = arith.constant 5.000000e-01 : f32
    %40 = vector.broadcast %cst_24 : f32 to vector<192x32xf32>
    %41 = arith.mulf %40, %39 : vector<192x32xf32>
    %cst_25 = arith.constant 4.471500e-02 : f32
    %42 = vector.broadcast %cst_25 : f32 to vector<192x32xf32>
    %43 = arith.mulf %42, %39 : vector<192x32xf32>
    %44 = arith.mulf %43, %39 : vector<192x32xf32>
    %45 = arith.mulf %44, %39 : vector<192x32xf32>
    %46 = arith.addf %39, %45 : vector<192x32xf32>
    %cst_26 = arith.constant 0.797884583 : f32
    %47 = vector.broadcast %cst_26 : f32 to vector<192x32xf32>
    %48 = arith.mulf %47, %46 : vector<192x32xf32>
    %49 = math.tanh %48 : vector<192x32xf32>
    %cst_27 = arith.constant 1.000000e+00 : f32
    %50 = vector.broadcast %cst_27 : f32 to vector<192x32xf32>
    %51 = arith.addf %50, %49 : vector<192x32xf32>
    %52 = arith.mulf %41, %51 : vector<192x32xf32>
    %53 = arith.truncf %52 : vector<192x32xf32> to vector<192x32xbf16>
    %cst_28 = arith.constant dense<0.000000e+00> : vector<192x160xf32>
    %54 = tpu.matmul %53, %5, %cst_28 {dimension_numbers = #tpu.dot_dimension_numbers<[1], [0], [0], [1], [0, 0, 1, 1], [], []>} : vector<192x32xbf16>, vector<32x160xbf16>, vector<192x160xf32> -> vector<192x160xf32>
    %55 = vector.extract_strided_slice %54 {offsets = [0, 0], sizes = [192, 64], strides = [1, 1]} : vector<192x160xf32> to vector<192x64xf32>
    %56 = vector.extract_strided_slice %54 {offsets = [0, 64], sizes = [192, 64], strides = [1, 1]} : vector<192x160xf32> to vector<192x64xf32>
    %57 = vector.extract_strided_slice %54 {offsets = [0, 128], sizes = [192, 32], strides = [1, 1]} : vector<192x160xf32> to vector<192x32xf32>
    %cst_29 = arith.constant dense<0.000000e+00> : vector<192x32xf32>
    %58 = tpu.matmul %53, %4, %cst_29 {dimension_numbers = #tpu.dot_dimension_numbers<[1], [0], [0], [1], [0, 0, 1, 1], [], []>} : vector<192x32xbf16>, vector<32x32xbf16>, vector<192x32xf32> -> vector<192x32xf32>
    %c3 = arith.constant 3 : index
    %c0_30 = arith.constant 0 : index
    %59 = vector.load %arg6[%c3, %c0_30] : memref<24x128xf32, #tpu.memory_space<vmem>>, vector<1x32xf32>
    %60 = vector.broadcast %59 : vector<1x32xf32> to vector<192x32xf32>
    %61 = arith.addf %58, %60 : vector<192x32xf32>
    %c4 = arith.constant 4 : index
    %c0_31 = arith.constant 0 : index
    %62 = vector.load %arg6[%c4, %c0_31] : memref<24x128xf32, #tpu.memory_space<vmem>>, vector<1x32xf32>
    %c5 = arith.constant 5 : index
    %c0_32 = arith.constant 0 : index
    %63 = vector.load %arg6[%c5, %c0_32] : memref<24x128xf32, #tpu.memory_space<vmem>>, vector<1x32xf32>
    %cst_33 = arith.constant dense<0.000000e+00> : vector<192xf32>
    %64 = vector.multi_reduction <add>, %61, %cst_33 [1] : vector<192x32xf32> to vector<192xf32>
    %65 = vector.shape_cast %64 : vector<192xf32> to vector<192x1xf32>
    %cst_34 = arith.constant 3.200000e+01 : f32
    %66 = vector.broadcast %cst_34 : f32 to vector<192x1xf32>
    %67 = arith.divf %65, %66 : vector<192x1xf32>
    %68 = arith.mulf %61, %61 : vector<192x32xf32>
    %cst_35 = arith.constant dense<0.000000e+00> : vector<192xf32>
    %69 = vector.multi_reduction <add>, %68, %cst_35 [1] : vector<192x32xf32> to vector<192xf32>
    %70 = vector.shape_cast %69 : vector<192xf32> to vector<192x1xf32>
    %cst_36 = arith.constant 3.200000e+01 : f32
    %71 = vector.broadcast %cst_36 : f32 to vector<192x1xf32>
    %72 = arith.divf %70, %71 : vector<192x1xf32>
    %73 = arith.mulf %67, %67 : vector<192x1xf32>
    %74 = arith.subf %72, %73 : vector<192x1xf32>
    %75 = vector.broadcast %67 : vector<192x1xf32> to vector<192x32xf32>
    %76 = arith.subf %61, %75 : vector<192x32xf32>
    %cst_37 = arith.constant 9.99999974E-6 : f32
    %77 = vector.broadcast %cst_37 : f32 to vector<192x1xf32>
    %78 = arith.addf %74, %77 : vector<192x1xf32>
    %79 = math.rsqrt %78 : vector<192x1xf32>
    %80 = vector.broadcast %79 : vector<192x1xf32> to vector<192x32xf32>
    %81 = arith.mulf %76, %80 : vector<192x32xf32>
    %82 = vector.broadcast %62 : vector<1x32xf32> to vector<192x32xf32>
    %83 = arith.mulf %81, %82 : vector<192x32xf32>
    %84 = vector.broadcast %63 : vector<1x32xf32> to vector<192x32xf32>
    %85 = arith.addf %83, %84 : vector<192x32xf32>
    %cst_38 = arith.constant 5.000000e-01 : f32
    %86 = vector.broadcast %cst_38 : f32 to vector<192x32xf32>
    %87 = arith.mulf %86, %85 : vector<192x32xf32>
    %cst_39 = arith.constant 4.471500e-02 : f32
    %88 = vector.broadcast %cst_39 : f32 to vector<192x32xf32>
    %89 = arith.mulf %88, %85 : vector<192x32xf32>
    %90 = arith.mulf %89, %85 : vector<192x32xf32>
    %91 = arith.mulf %90, %85 : vector<192x32xf32>
    %92 = arith.addf %85, %91 : vector<192x32xf32>
    %cst_40 = arith.constant 0.797884583 : f32
    %93 = vector.broadcast %cst_40 : f32 to vector<192x32xf32>
    %94 = arith.mulf %93, %92 : vector<192x32xf32>
    %95 = math.tanh %94 : vector<192x32xf32>
    %cst_41 = arith.constant 1.000000e+00 : f32
    %96 = vector.broadcast %cst_41 : f32 to vector<192x32xf32>
    %97 = arith.addf %96, %95 : vector<192x32xf32>
    %98 = arith.mulf %87, %97 : vector<192x32xf32>
    %99 = arith.truncf %98 : vector<192x32xf32> to vector<192x32xbf16>
    %cst_42 = arith.constant dense<0.000000e+00> : vector<192x64xf32>
    %100 = tpu.matmul %99, %6, %cst_42 {dimension_numbers = #tpu.dot_dimension_numbers<[1], [0], [0], [1], [0, 0, 1, 1], [], []>} : vector<192x32xbf16>, vector<32x64xbf16>, vector<192x64xf32> -> vector<192x64xf32>
    %101 = arith.addf %100, %55 : vector<192x64xf32>
    %c6 = arith.constant 6 : index
    %c0_43 = arith.constant 0 : index
    %102 = vector.load %arg6[%c6, %c0_43] : memref<24x128xf32, #tpu.memory_space<vmem>>, vector<1x64xf32>
    %103 = vector.broadcast %102 : vector<1x64xf32> to vector<192x64xf32>
    %104 = arith.addf %101, %103 : vector<192x64xf32>
    %c7 = arith.constant 7 : index
    %c0_44 = arith.constant 0 : index
    %105 = vector.load %arg6[%c7, %c0_44] : memref<24x128xf32, #tpu.memory_space<vmem>>, vector<1x64xf32>
    %c8 = arith.constant 8 : index
    %c0_45 = arith.constant 0 : index
    %106 = vector.load %arg6[%c8, %c0_45] : memref<24x128xf32, #tpu.memory_space<vmem>>, vector<1x64xf32>
    %cst_46 = arith.constant dense<0.000000e+00> : vector<192xf32>
    %107 = vector.multi_reduction <add>, %104, %cst_46 [1] : vector<192x64xf32> to vector<192xf32>
    %108 = vector.shape_cast %107 : vector<192xf32> to vector<192x1xf32>
    %cst_47 = arith.constant 6.400000e+01 : f32
    %109 = vector.broadcast %cst_47 : f32 to vector<192x1xf32>
    %110 = arith.divf %108, %109 : vector<192x1xf32>
    %111 = arith.mulf %104, %104 : vector<192x64xf32>
    %cst_48 = arith.constant dense<0.000000e+00> : vector<192xf32>
    %112 = vector.multi_reduction <add>, %111, %cst_48 [1] : vector<192x64xf32> to vector<192xf32>
    %113 = vector.shape_cast %112 : vector<192xf32> to vector<192x1xf32>
    %cst_49 = arith.constant 6.400000e+01 : f32
    %114 = vector.broadcast %cst_49 : f32 to vector<192x1xf32>
    %115 = arith.divf %113, %114 : vector<192x1xf32>
    %116 = arith.mulf %110, %110 : vector<192x1xf32>
    %117 = arith.subf %115, %116 : vector<192x1xf32>
    %118 = vector.broadcast %110 : vector<192x1xf32> to vector<192x64xf32>
    %119 = arith.subf %104, %118 : vector<192x64xf32>
    %cst_50 = arith.constant 9.99999974E-6 : f32
    %120 = vector.broadcast %cst_50 : f32 to vector<192x1xf32>
    %121 = arith.addf %117, %120 : vector<192x1xf32>
    %122 = math.rsqrt %121 : vector<192x1xf32>
    %123 = vector.broadcast %122 : vector<192x1xf32> to vector<192x64xf32>
    %124 = arith.mulf %119, %123 : vector<192x64xf32>
    %125 = vector.broadcast %105 : vector<1x64xf32> to vector<192x64xf32>
    %126 = arith.mulf %124, %125 : vector<192x64xf32>
    %127 = vector.broadcast %106 : vector<1x64xf32> to vector<192x64xf32>
    %128 = arith.addf %126, %127 : vector<192x64xf32>
    %cst_51 = arith.constant 5.000000e-01 : f32
    %129 = vector.broadcast %cst_51 : f32 to vector<192x64xf32>
    %130 = arith.mulf %129, %128 : vector<192x64xf32>
    %cst_52 = arith.constant 4.471500e-02 : f32
    %131 = vector.broadcast %cst_52 : f32 to vector<192x64xf32>
    %132 = arith.mulf %131, %128 : vector<192x64xf32>
    %133 = arith.mulf %132, %128 : vector<192x64xf32>
    %134 = arith.mulf %133, %128 : vector<192x64xf32>
    %135 = arith.addf %128, %134 : vector<192x64xf32>
    %cst_53 = arith.constant 0.797884583 : f32
    %136 = vector.broadcast %cst_53 : f32 to vector<192x64xf32>
    %137 = arith.mulf %136, %135 : vector<192x64xf32>
    %138 = math.tanh %137 : vector<192x64xf32>
    %cst_54 = arith.constant 1.000000e+00 : f32
    %139 = vector.broadcast %cst_54 : f32 to vector<192x64xf32>
    %140 = arith.addf %139, %138 : vector<192x64xf32>
    %141 = arith.mulf %130, %140 : vector<192x64xf32>
    %142 = arith.truncf %141 : vector<192x64xf32> to vector<192x64xbf16>
    %cst_55 = arith.constant dense<0.000000e+00> : vector<192x64xf32>
    %143 = tpu.matmul %142, %1, %cst_55 {dimension_numbers = #tpu.dot_dimension_numbers<[1], [0], [0], [1], [0, 0, 1, 1], [], []>} : vector<192x64xbf16>, vector<64x64xbf16>, vector<192x64xf32> -> vector<192x64xf32>
    %144 = arith.addf %143, %56 : vector<192x64xf32>
    %c9 = arith.constant 9 : index
    %c0_56 = arith.constant 0 : index
    %145 = vector.load %arg6[%c9, %c0_56] : memref<24x128xf32, #tpu.memory_space<vmem>>, vector<1x64xf32>
    %146 = vector.broadcast %145 : vector<1x64xf32> to vector<192x64xf32>
    %147 = arith.addf %144, %146 : vector<192x64xf32>
    %c10 = arith.constant 10 : index
    %c0_57 = arith.constant 0 : index
    %148 = vector.load %arg6[%c10, %c0_57] : memref<24x128xf32, #tpu.memory_space<vmem>>, vector<1x64xf32>
    %c11 = arith.constant 11 : index
    %c0_58 = arith.constant 0 : index
    %149 = vector.load %arg6[%c11, %c0_58] : memref<24x128xf32, #tpu.memory_space<vmem>>, vector<1x64xf32>
    %cst_59 = arith.constant dense<0.000000e+00> : vector<192xf32>
    %150 = vector.multi_reduction <add>, %147, %cst_59 [1] : vector<192x64xf32> to vector<192xf32>
    %151 = vector.shape_cast %150 : vector<192xf32> to vector<192x1xf32>
    %cst_60 = arith.constant 6.400000e+01 : f32
    %152 = vector.broadcast %cst_60 : f32 to vector<192x1xf32>
    %153 = arith.divf %151, %152 : vector<192x1xf32>
    %154 = arith.mulf %147, %147 : vector<192x64xf32>
    %cst_61 = arith.constant dense<0.000000e+00> : vector<192xf32>
    %155 = vector.multi_reduction <add>, %154, %cst_61 [1] : vector<192x64xf32> to vector<192xf32>
    %156 = vector.shape_cast %155 : vector<192xf32> to vector<192x1xf32>
    %cst_62 = arith.constant 6.400000e+01 : f32
    %157 = vector.broadcast %cst_62 : f32 to vector<192x1xf32>
    %158 = arith.divf %156, %157 : vector<192x1xf32>
    %159 = arith.mulf %153, %153 : vector<192x1xf32>
    %160 = arith.subf %158, %159 : vector<192x1xf32>
    %161 = vector.broadcast %153 : vector<192x1xf32> to vector<192x64xf32>
    %162 = arith.subf %147, %161 : vector<192x64xf32>
    %cst_63 = arith.constant 9.99999974E-6 : f32
    %163 = vector.broadcast %cst_63 : f32 to vector<192x1xf32>
    %164 = arith.addf %160, %163 : vector<192x1xf32>
    %165 = math.rsqrt %164 : vector<192x1xf32>
    %166 = vector.broadcast %165 : vector<192x1xf32> to vector<192x64xf32>
    %167 = arith.mulf %162, %166 : vector<192x64xf32>
    %168 = vector.broadcast %148 : vector<1x64xf32> to vector<192x64xf32>
    %169 = arith.mulf %167, %168 : vector<192x64xf32>
    %170 = vector.broadcast %149 : vector<1x64xf32> to vector<192x64xf32>
    %171 = arith.addf %169, %170 : vector<192x64xf32>
    %cst_64 = arith.constant 5.000000e-01 : f32
    %172 = vector.broadcast %cst_64 : f32 to vector<192x64xf32>
    %173 = arith.mulf %172, %171 : vector<192x64xf32>
    %cst_65 = arith.constant 4.471500e-02 : f32
    %174 = vector.broadcast %cst_65 : f32 to vector<192x64xf32>
    %175 = arith.mulf %174, %171 : vector<192x64xf32>
    %176 = arith.mulf %175, %171 : vector<192x64xf32>
    %177 = arith.mulf %176, %171 : vector<192x64xf32>
    %178 = arith.addf %171, %177 : vector<192x64xf32>
    %cst_66 = arith.constant 0.797884583 : f32
    %179 = vector.broadcast %cst_66 : f32 to vector<192x64xf32>
    %180 = arith.mulf %179, %178 : vector<192x64xf32>
    %181 = math.tanh %180 : vector<192x64xf32>
    %cst_67 = arith.constant 1.000000e+00 : f32
    %182 = vector.broadcast %cst_67 : f32 to vector<192x64xf32>
    %183 = arith.addf %182, %181 : vector<192x64xf32>
    %184 = arith.mulf %173, %183 : vector<192x64xf32>
    %185 = arith.truncf %184 : vector<192x64xf32> to vector<192x64xbf16>
    %cst_68 = arith.constant dense<0.000000e+00> : vector<192x32xf32>
    %186 = tpu.matmul %185, %2, %cst_68 {dimension_numbers = #tpu.dot_dimension_numbers<[1], [0], [0], [1], [0, 0, 1, 1], [], []>} : vector<192x64xbf16>, vector<64x32xbf16>, vector<192x32xf32> -> vector<192x32xf32>
    %187 = arith.addf %186, %57 : vector<192x32xf32>
    %c12 = arith.constant 12 : index
    %c0_69 = arith.constant 0 : index
    %188 = vector.load %arg6[%c12, %c0_69] : memref<24x128xf32, #tpu.memory_space<vmem>>, vector<1x32xf32>
    %189 = vector.broadcast %188 : vector<1x32xf32> to vector<192x32xf32>
    %190 = arith.addf %187, %189 : vector<192x32xf32>
    %c13 = arith.constant 13 : index
    %c0_70 = arith.constant 0 : index
    %191 = vector.load %arg6[%c13, %c0_70] : memref<24x128xf32, #tpu.memory_space<vmem>>, vector<1x32xf32>
    %c14 = arith.constant 14 : index
    %c0_71 = arith.constant 0 : index
    %192 = vector.load %arg6[%c14, %c0_71] : memref<24x128xf32, #tpu.memory_space<vmem>>, vector<1x32xf32>
    %cst_72 = arith.constant dense<0.000000e+00> : vector<192xf32>
    %193 = vector.multi_reduction <add>, %190, %cst_72 [1] : vector<192x32xf32> to vector<192xf32>
    %194 = vector.shape_cast %193 : vector<192xf32> to vector<192x1xf32>
    %cst_73 = arith.constant 3.200000e+01 : f32
    %195 = vector.broadcast %cst_73 : f32 to vector<192x1xf32>
    %196 = arith.divf %194, %195 : vector<192x1xf32>
    %197 = arith.mulf %190, %190 : vector<192x32xf32>
    %cst_74 = arith.constant dense<0.000000e+00> : vector<192xf32>
    %198 = vector.multi_reduction <add>, %197, %cst_74 [1] : vector<192x32xf32> to vector<192xf32>
    %199 = vector.shape_cast %198 : vector<192xf32> to vector<192x1xf32>
    %cst_75 = arith.constant 3.200000e+01 : f32
    %200 = vector.broadcast %cst_75 : f32 to vector<192x1xf32>
    %201 = arith.divf %199, %200 : vector<192x1xf32>
    %202 = arith.mulf %196, %196 : vector<192x1xf32>
    %203 = arith.subf %201, %202 : vector<192x1xf32>
    %204 = vector.broadcast %196 : vector<192x1xf32> to vector<192x32xf32>
    %205 = arith.subf %190, %204 : vector<192x32xf32>
    %cst_76 = arith.constant 9.99999974E-6 : f32
    %206 = vector.broadcast %cst_76 : f32 to vector<192x1xf32>
    %207 = arith.addf %203, %206 : vector<192x1xf32>
    %208 = math.rsqrt %207 : vector<192x1xf32>
    %209 = vector.broadcast %208 : vector<192x1xf32> to vector<192x32xf32>
    %210 = arith.mulf %205, %209 : vector<192x32xf32>
    %211 = vector.broadcast %191 : vector<1x32xf32> to vector<192x32xf32>
    %212 = arith.mulf %210, %211 : vector<192x32xf32>
    %213 = vector.broadcast %192 : vector<1x32xf32> to vector<192x32xf32>
    %214 = arith.addf %212, %213 : vector<192x32xf32>
    %cst_77 = arith.constant 5.000000e-01 : f32
    %215 = vector.broadcast %cst_77 : f32 to vector<192x32xf32>
    %216 = arith.mulf %215, %214 : vector<192x32xf32>
    %cst_78 = arith.constant 4.471500e-02 : f32
    %217 = vector.broadcast %cst_78 : f32 to vector<192x32xf32>
    %218 = arith.mulf %217, %214 : vector<192x32xf32>
    %219 = arith.mulf %218, %214 : vector<192x32xf32>
    %220 = arith.mulf %219, %214 : vector<192x32xf32>
    %221 = arith.addf %214, %220 : vector<192x32xf32>
    %cst_79 = arith.constant 0.797884583 : f32
    %222 = vector.broadcast %cst_79 : f32 to vector<192x32xf32>
    %223 = arith.mulf %222, %221 : vector<192x32xf32>
    %224 = math.tanh %223 : vector<192x32xf32>
    %cst_80 = arith.constant 1.000000e+00 : f32
    %225 = vector.broadcast %cst_80 : f32 to vector<192x32xf32>
    %226 = arith.addf %225, %224 : vector<192x32xf32>
    %227 = arith.mulf %216, %226 : vector<192x32xf32>
    %228 = arith.truncf %227 : vector<192x32xf32> to vector<192x32xbf16>
    %cst_81 = arith.constant dense<0.000000e+00> : vector<192x96xf32>
    %229 = tpu.matmul %228, %7, %cst_81 {dimension_numbers = #tpu.dot_dimension_numbers<[1], [0], [0], [1], [0, 0, 1, 1], [], []>} : vector<192x32xbf16>, vector<32x96xbf16>, vector<192x96xf32> -> vector<192x96xf32>
    %c15 = arith.constant 15 : index
    %c0_82 = arith.constant 0 : index
    %230 = vector.load %arg6[%c15, %c0_82] : memref<24x128xf32, #tpu.memory_space<vmem>>, vector<1x96xf32>
    %231 = vector.broadcast %230 : vector<1x96xf32> to vector<192x96xf32>
    %232 = arith.addf %229, %231 : vector<192x96xf32>
    %233 = vector.extract_strided_slice %232 {offsets = [0, 0], sizes = [192, 32], strides = [1, 1]} : vector<192x96xf32> to vector<192x32xf32>
    %cst_83 = arith.constant 0.176776692 : f32
    %234 = vector.broadcast %cst_83 : f32 to vector<192x32xf32>
    %235 = arith.mulf %233, %234 : vector<192x32xf32>
    %236 = vector.shape_cast %235 : vector<192x32xf32> to vector<4x48x32xf32>
    %237 = vector.extract_strided_slice %232 {offsets = [0, 32], sizes = [192, 32], strides = [1, 1]} : vector<192x96xf32> to vector<192x32xf32>
    %238 = vector.shape_cast %237 : vector<192x32xf32> to vector<4x48x32xf32>
    %239 = vector.extract_strided_slice %232 {offsets = [0, 64], sizes = [192, 32], strides = [1, 1]} : vector<192x96xf32> to vector<192x32xf32>
    %240 = vector.shape_cast %239 : vector<192x32xf32> to vector<4x48x32xf32>
    %241 = arith.truncf %236 : vector<4x48x32xf32> to vector<4x48x32xbf16>
    %242 = arith.truncf %238 : vector<4x48x32xf32> to vector<4x48x32xbf16>
    "tpu.trace_start"() <{level = 10 : i32, message = "bqd,bkd->bqk"}> : () -> ()
    %cst_84 = arith.constant dense<0.000000e+00> : vector<4x48x48xf32>
    %243 = tpu.matmul %241, %242, %cst_84 {dimension_numbers = #tpu.dot_dimension_numbers<[2], [2], [1], [1], [0, 0, 0, 1, 1, 1], [0], [0]>} : vector<4x48x32xbf16>, vector<4x48x32xbf16>, vector<4x48x48xf32> -> vector<4x48x48xf32>
    "tpu.trace_stop"() : () -> ()
    %c0_85 = arith.constant 0 : index
    %c0_86 = arith.constant 0 : index
    %c0_87 = arith.constant 0 : index
    %c0_88 = arith.constant 0 : index
    %244 = vector.load %arg2[%c0_85, %c0_86, %c0_87, %c0_88] : memref<1x4x48x1xi32, #tpu.memory_space<vmem>>, vector<1x4x48x1xi32>
    %245 = vector.shape_cast %244 : vector<1x4x48x1xi32> to vector<4x48x1xi32>
    %c0_89 = arith.constant 0 : index
    %c0_90 = arith.constant 0 : index
    %c0_91 = arith.constant 0 : index
    %c0_92 = arith.constant 0 : index
    %246 = vector.load %arg3[%c0_89, %c0_90, %c0_91, %c0_92] : memref<1x4x1x48xi32, #tpu.memory_space<vmem>>, vector<1x4x1x48xi32>
    %247 = vector.shape_cast %246 : vector<1x4x1x48xi32> to vector<4x1x48xi32>
    %248 = vector.broadcast %245 : vector<4x48x1xi32> to vector<4x48x48xi32>
    %249 = vector.broadcast %247 : vector<4x1x48xi32> to vector<4x48x48xi32>
    %250 = arith.cmpi eq, %248, %249 : vector<4x48x48xi32>
    %cst_93 = arith.constant -1.000000e+30 : f32
    %251 = vector.broadcast %cst_93 : f32 to vector<4x48x48xf32>
    %252 = arith.select %250, %243, %251 : vector<4x48x48xi1>, vector<4x48x48xf32>
    %cst_94 = arith.constant dense<0xFF800000> : vector<4x48xf32>
    %253 = vector.multi_reduction <maximumf>, %252, %cst_94 [2] : vector<4x48x48xf32> to vector<4x48xf32>
    %254 = vector.shape_cast %253 : vector<4x48xf32> to vector<4x48x1xf32>
    %255 = vector.broadcast %254 : vector<4x48x1xf32> to vector<4x48x48xf32>
    %256 = arith.subf %252, %255 : vector<4x48x48xf32>
    %257 = math.exp %256 : vector<4x48x48xf32>
    %cst_95 = arith.constant dense<0.000000e+00> : vector<4x48xf32>
    %258 = vector.multi_reduction <add>, %257, %cst_95 [2] : vector<4x48x48xf32> to vector<4x48xf32>
    %259 = vector.shape_cast %258 : vector<4x48xf32> to vector<4x48x1xf32>
    %260 = tpu.reciprocal %259 {approx = true} : vector<4x48x1xf32> -> vector<4x48x1xf32>
    %261 = vector.broadcast %260 : vector<4x48x1xf32> to vector<4x48x48xf32>
    %262 = arith.mulf %257, %261 : vector<4x48x48xf32>
    %263 = arith.truncf %262 : vector<4x48x48xf32> to vector<4x48x48xbf16>
    %264 = arith.truncf %240 : vector<4x48x32xf32> to vector<4x48x32xbf16>
    "tpu.trace_start"() <{level = 10 : i32, message = "bqk,bkd->bqd"}> : () -> ()
    %cst_96 = arith.constant dense<0.000000e+00> : vector<4x48x32xf32>
    %265 = tpu.matmul %263, %264, %cst_96 {dimension_numbers = #tpu.dot_dimension_numbers<[2], [1], [1], [2], [0, 0, 0, 1, 1, 2], [0], [0]>} : vector<4x48x48xbf16>, vector<4x48x32xbf16>, vector<4x48x32xf32> -> vector<4x48x32xf32>
    "tpu.trace_stop"() : () -> ()
    %266 = vector.shape_cast %265 : vector<4x48x32xf32> to vector<192x32xf32>
    %267 = arith.truncf %266 : vector<192x32xf32> to vector<192x32xbf16>
    %cst_97 = arith.constant dense<0.000000e+00> : vector<192x64xf32>
    %268 = tpu.matmul %267, %8, %cst_97 {dimension_numbers = #tpu.dot_dimension_numbers<[1], [0], [0], [1], [0, 0, 1, 1], [], []>} : vector<192x32xbf16>, vector<32x64xbf16>, vector<192x64xf32> -> vector<192x64xf32>
    %c16 = arith.constant 16 : index
    %c0_98 = arith.constant 0 : index
    %269 = vector.load %arg6[%c16, %c0_98] : memref<24x128xf32, #tpu.memory_space<vmem>>, vector<1x64xf32>
    %270 = vector.broadcast %269 : vector<1x64xf32> to vector<192x64xf32>
    %271 = arith.addf %268, %270 : vector<192x64xf32>
    %272 = arith.addf %10, %271 : vector<192x64xf32>
    %c17 = arith.constant 17 : index
    %c0_99 = arith.constant 0 : index
    %273 = vector.load %arg6[%c17, %c0_99] : memref<24x128xf32, #tpu.memory_space<vmem>>, vector<1x64xf32>
    %c18 = arith.constant 18 : index
    %c0_100 = arith.constant 0 : index
    %274 = vector.load %arg6[%c18, %c0_100] : memref<24x128xf32, #tpu.memory_space<vmem>>, vector<1x64xf32>
    %cst_101 = arith.constant dense<0.000000e+00> : vector<192xf32>
    %275 = vector.multi_reduction <add>, %272, %cst_101 [1] : vector<192x64xf32> to vector<192xf32>
    %276 = vector.shape_cast %275 : vector<192xf32> to vector<192x1xf32>
    %cst_102 = arith.constant 6.400000e+01 : f32
    %277 = vector.broadcast %cst_102 : f32 to vector<192x1xf32>
    %278 = arith.divf %276, %277 : vector<192x1xf32>
    %279 = arith.mulf %272, %272 : vector<192x64xf32>
    %cst_103 = arith.constant dense<0.000000e+00> : vector<192xf32>
    %280 = vector.multi_reduction <add>, %279, %cst_103 [1] : vector<192x64xf32> to vector<192xf32>
    %281 = vector.shape_cast %280 : vector<192xf32> to vector<192x1xf32>
    %cst_104 = arith.constant 6.400000e+01 : f32
    %282 = vector.broadcast %cst_104 : f32 to vector<192x1xf32>
    %283 = arith.divf %281, %282 : vector<192x1xf32>
    %284 = arith.mulf %278, %278 : vector<192x1xf32>
    %285 = arith.subf %283, %284 : vector<192x1xf32>
    %286 = vector.broadcast %278 : vector<192x1xf32> to vector<192x64xf32>
    %287 = arith.subf %272, %286 : vector<192x64xf32>
    %cst_105 = arith.constant 9.99999974E-6 : f32
    %288 = vector.broadcast %cst_105 : f32 to vector<192x1xf32>
    %289 = arith.addf %285, %288 : vector<192x1xf32>
    %290 = math.rsqrt %289 : vector<192x1xf32>
    %291 = vector.broadcast %290 : vector<192x1xf32> to vector<192x64xf32>
    %292 = arith.mulf %287, %291 : vector<192x64xf32>
    %293 = vector.broadcast %273 : vector<1x64xf32> to vector<192x64xf32>
    %294 = arith.mulf %292, %293 : vector<192x64xf32>
    %295 = vector.broadcast %274 : vector<1x64xf32> to vector<192x64xf32>
    %296 = arith.addf %294, %295 : vector<192x64xf32>
    %297 = arith.truncf %296 : vector<192x64xf32> to vector<192x64xbf16>
    %cst_106 = arith.constant dense<0.000000e+00> : vector<192x32xf32>
    %298 = tpu.matmul %297, %3, %cst_106 {dimension_numbers = #tpu.dot_dimension_numbers<[1], [0], [0], [1], [0, 0, 1, 1], [], []>} : vector<192x64xbf16>, vector<64x32xbf16>, vector<192x32xf32> -> vector<192x32xf32>
    %c19 = arith.constant 19 : index
    %c0_107 = arith.constant 0 : index
    %299 = vector.load %arg6[%c19, %c0_107] : memref<24x128xf32, #tpu.memory_space<vmem>>, vector<1x32xf32>
    %300 = vector.broadcast %299 : vector<1x32xf32> to vector<192x32xf32>
    %301 = arith.addf %298, %300 : vector<192x32xf32>
    %cst_108 = arith.constant 5.000000e-01 : f32
    %302 = vector.broadcast %cst_108 : f32 to vector<192x32xf32>
    %303 = arith.mulf %302, %301 : vector<192x32xf32>
    %cst_109 = arith.constant 4.471500e-02 : f32
    %304 = vector.broadcast %cst_109 : f32 to vector<192x32xf32>
    %305 = arith.mulf %304, %301 : vector<192x32xf32>
    %306 = arith.mulf %305, %301 : vector<192x32xf32>
    %307 = arith.mulf %306, %301 : vector<192x32xf32>
    %308 = arith.addf %301, %307 : vector<192x32xf32>
    %cst_110 = arith.constant 0.797884583 : f32
    %309 = vector.broadcast %cst_110 : f32 to vector<192x32xf32>
    %310 = arith.mulf %309, %308 : vector<192x32xf32>
    %311 = math.tanh %310 : vector<192x32xf32>
    %cst_111 = arith.constant 1.000000e+00 : f32
    %312 = vector.broadcast %cst_111 : f32 to vector<192x32xf32>
    %313 = arith.addf %312, %311 : vector<192x32xf32>
    %314 = arith.mulf %303, %313 : vector<192x32xf32>
    %315 = arith.truncf %314 : vector<192x32xf32> to vector<192x32xbf16>
    %cst_112 = arith.constant dense<0.000000e+00> : vector<192x64xf32>
    %316 = tpu.matmul %315, %9, %cst_112 {dimension_numbers = #tpu.dot_dimension_numbers<[1], [0], [0], [1], [0, 0, 1, 1], [], []>} : vector<192x32xbf16>, vector<32x64xbf16>, vector<192x64xf32> -> vector<192x64xf32>
    %c20 = arith.constant 20 : index
    %c0_113 = arith.constant 0 : index
    %317 = vector.load %arg6[%c20, %c0_113] : memref<24x128xf32, #tpu.memory_space<vmem>>, vector<1x64xf32>
    %318 = vector.broadcast %317 : vector<1x64xf32> to vector<192x64xf32>
    %319 = arith.addf %316, %318 : vector<192x64xf32>
    %320 = arith.addf %296, %319 : vector<192x64xf32>
    %c21 = arith.constant 21 : index
    %c0_114 = arith.constant 0 : index
    %321 = vector.load %arg6[%c21, %c0_114] : memref<24x128xf32, #tpu.memory_space<vmem>>, vector<1x64xf32>
    %c22 = arith.constant 22 : index
    %c0_115 = arith.constant 0 : index
    %322 = vector.load %arg6[%c22, %c0_115] : memref<24x128xf32, #tpu.memory_space<vmem>>, vector<1x64xf32>
    %cst_116 = arith.constant dense<0.000000e+00> : vector<192xf32>
    %323 = vector.multi_reduction <add>, %320, %cst_116 [1] : vector<192x64xf32> to vector<192xf32>
    %324 = vector.shape_cast %323 : vector<192xf32> to vector<192x1xf32>
    %cst_117 = arith.constant 6.400000e+01 : f32
    %325 = vector.broadcast %cst_117 : f32 to vector<192x1xf32>
    %326 = arith.divf %324, %325 : vector<192x1xf32>
    %327 = arith.mulf %320, %320 : vector<192x64xf32>
    %cst_118 = arith.constant dense<0.000000e+00> : vector<192xf32>
    %328 = vector.multi_reduction <add>, %327, %cst_118 [1] : vector<192x64xf32> to vector<192xf32>
    %329 = vector.shape_cast %328 : vector<192xf32> to vector<192x1xf32>
    %cst_119 = arith.constant 6.400000e+01 : f32
    %330 = vector.broadcast %cst_119 : f32 to vector<192x1xf32>
    %331 = arith.divf %329, %330 : vector<192x1xf32>
    %332 = arith.mulf %326, %326 : vector<192x1xf32>
    %333 = arith.subf %331, %332 : vector<192x1xf32>
    %334 = vector.broadcast %326 : vector<192x1xf32> to vector<192x64xf32>
    %335 = arith.subf %320, %334 : vector<192x64xf32>
    %cst_120 = arith.constant 9.99999974E-6 : f32
    %336 = vector.broadcast %cst_120 : f32 to vector<192x1xf32>
    %337 = arith.addf %333, %336 : vector<192x1xf32>
    %338 = math.rsqrt %337 : vector<192x1xf32>
    %339 = vector.broadcast %338 : vector<192x1xf32> to vector<192x64xf32>
    %340 = arith.mulf %335, %339 : vector<192x64xf32>
    %341 = vector.broadcast %321 : vector<1x64xf32> to vector<192x64xf32>
    %342 = arith.mulf %340, %341 : vector<192x64xf32>
    %343 = vector.broadcast %322 : vector<1x64xf32> to vector<192x64xf32>
    %344 = arith.addf %342, %343 : vector<192x64xf32>
    %c0_121 = arith.constant 0 : index
    %c0_122 = arith.constant 0 : index
    %345 = vector.load %arg7[%c0_121, %c0_122] : memref<192x64xf32, #tpu.memory_space<vmem>>, vector<192x64xf32>
    tpu.vector_store %arg7[%c0_121, %c0_122], %344 {strides = array<i32>} : memref<192x64xf32, #tpu.memory_space<vmem>>, vector<192x64xf32>,
    return
  }
  func.func @transform_0(%arg0: i32) -> (i32, i32) {
    %c0_i32 = arith.constant 0 : i32
    %c0_i32_0 = arith.constant 0 : i32
    return %arg0, %c0_i32 : i32, i32
  }
  func.func @transform_1(%arg0: i32) -> (i32, i32, i32, i32) {
    %c0_i32 = arith.constant 0 : i32
    %c0_i32_0 = arith.constant 0 : i32
    %c0_i32_1 = arith.constant 0 : i32
    %c0_i32_2 = arith.constant 0 : i32
    return %arg0, %c0_i32, %c0_i32_0, %c0_i32_1 : i32, i32, i32, i32
  }
  func.func @transform_2(%arg0: i32) -> (i32, i32, i32, i32) {
    %c0_i32 = arith.constant 0 : i32
    %c0_i32_0 = arith.constant 0 : i32
    %c0_i32_1 = arith.constant 0 : i32
    %c0_i32_2 = arith.constant 0 : i32
    return %arg0, %c0_i32, %c0_i32_0, %c0_i32_1 : i32, i32, i32, i32
  }
  func.func @transform_3(%arg0: i32) -> (i32, i32) {
    %c0_i32 = arith.constant 0 : i32
    %c0_i32_0 = arith.constant 0 : i32
    %c0_i32_1 = arith.constant 0 : i32
    return %c0_i32, %c0_i32_0 : i32, i32
  }
  func.func @transform_4(%arg0: i32) -> (i32, i32) {
    %c0_i32 = arith.constant 0 : i32
    %c0_i32_0 = arith.constant 0 : i32
    %c0_i32_1 = arith.constant 0 : i32
    return %c0_i32, %c0_i32_0 : i32, i32
  }
  func.func @transform_5(%arg0: i32) -> (i32, i32) {
    %c0_i32 = arith.constant 0 : i32
    %c0_i32_0 = arith.constant 0 : i32
    %c0_i32_1 = arith.constant 0 : i32
    return %c0_i32, %c0_i32_0 : i32, i32
  }
  func.func @transform_6(%arg0: i32) -> (i32, i32) {
    %c0_i32 = arith.constant 0 : i32
    %c0_i32_0 = arith.constant 0 : i32
    return %arg0, %c0_i32 : i32, i32
  }
}

</mosaic_0001>

<bundles_post_ra>
// kernel: intra_region_encoder_forward.1
= control target key start
LH: loop header
LB: loop body
LE: loop exit
PB: predicated region body
PF: predicated region fallthrough
CT: control target
= control target key end

     0   :  { %s9661_s21 = smov 0   ;;  %s14855_s0 = inlined_call_operand.vmem [shape: f32[384,64], index: 0, kind: input, shape index: {}]   ;;  %s14856_s1 = inlined_call_operand.vmem [shape: s32[2,4,48,1], index: 1, kind: input, shape index: {}]   ;;  %s14857_s2 = inlined_call_operand.vmem [shape: s32[2,4,1,48], index: 2, kind: input, shape index: {}]   ;;  %s14858_s3 = inlined_call_operand.vmem [shape: bf16[64,512], index: 3, kind: input, shape index: {}]   ;;  %s14859_s4 = inlined_call_operand.vmem [shape: bf16[32,896], index: 4, kind: input, shape index: {}]   ;;  %s14860_s5 = inlined_call_operand.vmem [shape: f32[24,128], index: 5, kind: input, shape index: {}]   ;;  %s14861_s6 = inlined_call_operand.vmem [shape: f32[384,64], index: 6, kind: output, shape index: {}]  }
   0x1 LB: > { %s9667_s22 = sadd.s32 4294967295, %s9619_s21   ;;  %p8015_p0 = scmp.ge.s32.totalorder %s9619_s21, 1  ;;  %s9619_s21 = sphi %s9661_s21, %s16_s21  }
   0x2   : > { %p232_p1 = scmp.lt.s32.totalorder %s9619_s21, 3 }
   0x4   : > { %p233_p2 = pnand %p8015_p0, %p232_p1 }
   0x6   : > { %236 = sbr.rel (%p233_p2) target bundleno = 4293 (0x10c5), region = 44 }
   0xb   : > { %v8837_v0 = vld [vmem:[%s14858_s3 + $0x60] ss:$16 sps:$4 sm:$0xff]   ;;  %s271_s29 = smul.u32 24, %s9667_s22  ;;  %vm414_vm0 = vcmask 523264   ;;  %vm582_vm1 = vcmask 261120   ;;  %s9622_s12 = smov 64  }
   0xc   : > { %v8838_v1 = vld [vmem:[%s14858_s3 + $0x40] ss:$16 sps:$4 sm:$0xff]   ;;  %8405 = vmatprep.subr.bf16.mxu0 %v8837_v0  ;;  %s9623_s27 = smov 96   ;;  %vm9625_vm2 = vmmov 0   ;;  %p277_p4 = scmp.lt.s32.totalorder %s9667_s22, 1  ;;  %vm5636_vm4 = vcmask 392192  }
   0xd   : > { %8406 = vmatpush3.bf16.msra.mxu0 %v8837_v0  ;;  %v8839_v2 = vld [vmem:[%s14858_s3 + $0x20] ss:$16 sps:$4 sm:$0xff]   ;;  %p272_p3 = scmp.lt.s32.totalorder %s271_s29, 47 }
   0xe   : > { %8407 = vmatprep.subr.bf16.mxu0 %v8838_v1  ;;  %v8840_v3 = vld [vmem:[%s14858_s3] ss:$16 sps:$4 sm:$0xff]   ;;  %s14918_s22 = smov (!%p277_p4, %s9667_s22), 1 }
   0xf   : > { %s14916_s29 = smov (!%p272_p3, %s271_s29), 47  ;;  %v9733_v40 = vld [vmem:[%s14860_s5] ss:$0 sm:$0xff]  ;;  %s8821_s28 = smul.u32 192, %s14918_s22 }
  0x10   : > { %s8016_s8 = sshll.u32 %s14916_s29, 3  ;;  %s8018_s10 = sshll.u32 %s14918_s22, 2 }
  0x11   : > { %8408 = vmatpush3.bf16.msra.mxu0 %v8838_v1  ;;  %s9692_s11 = scalar_lea.vmem %s14855_s0, %s8016_s8  ;;  %s13142_s9 = scalar_lea.vmem %s14856_s1, %s8821_s28 }
  0x12   : > { %8409 = vmatprep.subr.bf16.mxu0 %v8839_v2  ;;  %v349_v4 = vld [vmem:[%s9692_s11] sm:$0xff]  ;;  %v350_v5 = vld [vmem:[%s9692_s11 + $0x8] sm:$0xff]  ;;  %v351_v6 = vld [vmem:[%s9692_s11 + $0x10] sm:$0xff]  ;;  %s13357_s15 = scalar_lea.vmem %s14857_s2, %s8018_s10 }
  0x13   : > { %v373_v7 = vpack.c.bf16 %v350_v5, %v349_v4  ;;  %v352_v8 = vld [vmem:[%s9692_s11 + $0x18] sm:$0xff]  ;;  %v353_v9 = vld [vmem:[%s9692_s11 + $0x20] sm:$0xff]  ;;  %v354_v10 = vld [vmem:[%s9692_s11 + $0x28] sm:$0xff] }
  0x14   : > { %v374_v11 = vpack.c.bf16 %v352_v8, %v351_v6  ;;  %v375_v12 = vpack.c.bf16 %v354_v10, %v353_v9  ;;  %v355_v13 = vld [vmem:[%s9692_s11 + $0x30] sm:$0xff]  ;;  %v356_v14 = vld [vmem:[%s9692_s11 + $0x38] sm:$0xff]  ;;  %v357_v15 = vld [vmem:[%s9692_s11 + $0x40] sm:$0xff] }
  0x15   : > { %8410 = vmatpush3.bf16.msra.mxu0 %v8839_v2  ;;  %8413 = vmatprep.mubr.msk.bf16.mxu0 %vm414_vm0, %v373_v7  ;;  %v358_v16 = vld [vmem:[%s9692_s11 + $0x48] sm:$0xff]  ;;  %v376_v17 = vpack.c.bf16 %v356_v14, %v355_v13  ;;  %v359_v19 = vld [vmem:[%s9692_s11 + $0x50] sm:$0xff]  ;;  %v360_v20 = vld [vmem:[%s9692_s11 + $0x58] sm:$0xff] }
  0x16   : > { %8411 = vmatprep.subr.bf16.mxu0 %v8840_v3  ;;  %v377_v18 = vpack.c.bf16 %v358_v16, %v357_v15  ;;  %v361_v21 = vld [vmem:[%s9692_s11 + $0x60] sm:$0xff]  ;;  %v362_v22 = vld [vmem:[%s9692_s11 + $0x68] sm:$0xff]  ;;  %v378_v23 = vpack.c.bf16 %v360_v20, %v359_v19  ;;  %v363_v25 = vld [vmem:[%s9692_s11 + $0x70] sm:$0xff] }
  0x17   : > { %v379_v24 = vpack.c.bf16 %v362_v22, %v361_v21  ;;  %v364_v26 = vld [vmem:[%s9692_s11 + $0x78] sm:$0xff]  ;;  %v365_v27 = vld [vmem:[%s9692_s11 + $0x80] sm:$0xff]  ;;  %v366_v28 = vld [vmem:[%s9692_s11 + $0x88] sm:$0xff] }
  0x18   : > { %v380_v29 = vpack.c.bf16 %v364_v26, %v363_v25  ;;  %v381_v30 = vpack.c.bf16 %v366_v28, %v365_v27  ;;  %v367_v31 = vld [vmem:[%s9692_s11 + $0x90] sm:$0xff]  ;;  %v368_v32 = vld [vmem:[%s9692_s11 + $0x98] sm:$0xff]  ;;  %v369_v33 = vld [vmem:[%s9692_s11 + $0xa0] sm:$0xff] }
  0x19   : > { %8412 = vmatpush3.bf16.msra.mxu0 %v8840_v3  ;;  %v370_v34 = vld [vmem:[%s9692_s11 + $0xa8] sm:$0xff]  ;;  %v382_v35 = vpack.c.bf16 %v368_v32, %v367_v31  ;;  %v371_v37 = vld [vmem:[%s9692_s11 + $0xb0] sm:$0xff]  ;;  %v372_v38 = vld [vmem:[%s9692_s11 + $0xb8] sm:$0xff] }
  0x1a   : > { %v383_v36 = vpack.c.bf16 %v370_v34, %v369_v33  ;;  %v384_v39 = vpack.c.bf16 %v372_v38, %v371_v37 }
  0x1c   : > { %8414 = vmatmul.mubr.msk.bf16.vlgmr.msra.gmra.mxu0 %vm414_vm0, %v374_v11 }
  0x1d   : > { %8417 = vmatprep.mubr.msk.bf16.mxu0 %vm414_vm0, %v375_v12 }
  0x24   : > { %8418 = vmatmul.mubr.msk.bf16.gmra.mxu0 %vm414_vm0, %v376_v17 }
  0x25   : > { %8421 = vmatprep.mubr.msk.bf16.mxu0 %vm414_vm0, %v377_v18 }
  0x2c   : > { %8422 = vmatmul.mubr.msk.bf16.gmra.mxu0 %vm414_vm0, %v378_v23 }
  0x2d   : > { %8425 = vmatprep.mubr.msk.bf16.mxu0 %vm414_vm0, %v379_v24 }
  0x34   : > { %8426 = vmatmul.mubr.msk.bf16.gmra.mxu0 %vm414_vm0, %v380_v29 }
  0x35   : > { %8429 = vmatprep.mubr.msk.bf16.mxu0 %vm414_vm0, %v381_v30 }
  0x3c   : > { %8430 = vmatmul.mubr.msk.bf16.gmra.mxu0 %vm414_vm0, %v382_v35 }
  0x3d   : > { %8433 = vmatprep.mubr.msk.bf16.mxu0 %vm414_vm0, %v383_v36 }
  0x44   : > { %8434 = vmatmul.mubr.msk.bf16.gmra.mxu0 %vm414_vm0, %v384_v39 }
  0xdc   : > { %v8415_v41 = vpop.f32.mrf.mxu0 }
  0xdd   : > { %v9736_v42 = vadd.f32 %v8415_v41, %v9733_v40 }
  0xde   : > { %v485_v43 = vpop.f32.mrf.mxu0 }
  0xdf   : > { %v9739_v44 = vadd.f32 %v9733_v40, %v485_v43  ;;  %v589_v45 = vsel %vm582_vm1, %v9736_v42, 0.0  ;;  %v682_v52 = vmul.f32 %v9736_v42, %v9736_v42 }
  0xe0   : > { %590 = vadd.xlane.f32.xlu0 %v589_v45  ;;  %v8416_v46 = vpop.f32.mrf.mxu0 }
  0xe1   : > { %v680_v47 = vmul.f32 %v9739_v44, %v9739_v44  ;;  %v9746_v49 = vadd.f32 %v8416_v46, %v9733_v40  ;;  %v583_v51 = vsel %vm582_vm1, %v9739_v44, 0.0  ;;  %v710_v57 = vsel %vm582_vm1, %v682_v52, 0.0 }
  0xe2   : > { %v488_v48 = vpop.f32.mrf.mxu0 }
  0xe3   : > { %v704_v50 = vsel %vm582_vm1, %v680_v47, 0.0  ;;  %v9754_v55 = vadd.f32 %v9733_v40, %v488_v48  ;;  %v592_v56 = vsel %vm582_vm1, %v9746_v49, 0.0  ;;  %v683_v58 = vmul.f32 %v9746_v49, %v9746_v49 }
  0xe4   : > { %705 = vadd.xlane.f32.xlu1 %v704_v50  ;;  %584 = vadd.xlane.f32.xlu0 %v583_v51  ;;  %v8419_v53 = vpop.f32.mrf.mxu0 }
  0xe5   : > { %v9762_v59 = vadd.f32 %v8419_v53, %v9733_v40  ;;  %v713_v61 = vsel %vm582_vm1, %v683_v58, 0.0  ;;  %v586_v62 = vsel %vm582_vm1, %v9754_v55, 0.0  ;;  %v681_v63 = vmul.f32 %v9754_v55, %v9754_v55 }
  0xe6   : > { %v501_v54 = vpop.f32.mrf.mxu0 }
  0xe7   : > { %v9770_v0 = vadd.f32 %v9733_v40, %v501_v54  ;;  %v601_v2 = vsel %vm582_vm1, %v9762_v59, 0.0  ;;  %v707_v4 = vsel %vm582_vm1, %v681_v63, 0.0  ;;  %v686_v8 = vmul.f32 %v9762_v59, %v9762_v59 }
  0xe8   : > { %593 = vadd.xlane.f32.xlu1 %v592_v56  ;;  %711 = vadd.xlane.f32.xlu0 %v710_v57  ;;  %v8420_v60 = vpop.f32.mrf.mxu0 }
  0xe9   : > { %v9773_v1 = vadd.f32 %v8420_v60, %v9733_v40  ;;  %v595_v7 = vsel %vm582_vm1, %v9770_v0, 0.0  ;;  %v722_v11 = vsel %vm582_vm1, %v686_v8, 0.0  ;;  %v684_v13 = vmul.f32 %v9770_v0, %v9770_v0 }
  0xea   : > { %v504_v3 = vpop.f32.mrf.mxu0 }
  0xeb   : > { %v9779_v5 = vadd.f32 %v9733_v40, %v504_v3  ;;  %v604_v6 = vsel %vm582_vm1, %v9773_v1, 0.0  ;;  %v687_v12 = vmul.f32 %v9773_v1, %v9773_v1  ;;  %v716_v17 = vsel %vm582_vm1, %v684_v13, 0.0 }
  0xec   : > { %714 = vadd.xlane.f32.xlu1 %v713_v61  ;;  %587 = vadd.xlane.f32.xlu0 %v586_v62  ;;  %v8423_v9 = vpop.f32.mrf.mxu0 }
  0xed   : > { %v598_v10 = vsel %vm582_vm1, %v9779_v5, 0.0  ;;  %v9795_v15 = vadd.f32 %v8423_v9, %v9733_v40  ;;  %v725_v16 = vsel %vm582_vm1, %v687_v12, 0.0  ;;  %v685_v18 = vmul.f32 %v9779_v5, %v9779_v5 }
  0xee   : > { %v517_v14 = vpop.f32.mrf.mxu0 }
  0xef   : > { %v9802_v20 = vadd.f32 %v9733_v40, %v517_v14  ;;  %v719_v22 = vsel %vm582_vm1, %v685_v18, 0.0  ;;  %v613_v23 = vsel %vm582_vm1, %v9795_v15, 0.0  ;;  %v690_v28 = vmul.f32 %v9795_v15, %v9795_v15 }
  0xf0   : > { %708 = vadd.xlane.f32.xlu1 %v707_v4  ;;  %602 = vadd.xlane.f32.xlu0 %v601_v2  ;;  %v8424_v19 = vpop.f32.mrf.mxu0 }
  0xf1   : > { %v9805_v21 = vadd.f32 %v8424_v19, %v9733_v40  ;;  %v607_v27 = vsel %vm582_vm1, %v9802_v20, 0.0  ;;  %v734_v31 = vsel %vm582_vm1, %v690_v28, 0.0  ;;  %v688_v33 = vmul.f32 %v9802_v20, %v9802_v20 }
  0xf2   : > { %v520_v24 = vpop.f32.mrf.mxu0 }
  0xf3   : > { %v9811_v25 = vadd.f32 %v9733_v40, %v520_v24  ;;  %v616_v26 = vsel %vm582_vm1, %v9805_v21, 0.0  ;;  %v691_v32 = vmul.f32 %v9805_v21, %v9805_v21  ;;  %v728_v37 = vsel %vm582_vm1, %v688_v33, 0.0 }
  0xf4   : > { %605 = vadd.xlane.f32.xlu1 %v604_v6  ;;  %596 = vadd.xlane.f32.xlu0 %v595_v7  ;;  %v8427_v29 = vpop.f32.mrf.mxu0 }
  0xf5   : > { %v610_v30 = vsel %vm582_vm1, %v9811_v25, 0.0  ;;  %v9827_v35 = vadd.f32 %v8427_v29, %v9733_v40  ;;  %v737_v36 = vsel %vm582_vm1, %v691_v32, 0.0  ;;  %v689_v38 = vmul.f32 %v9811_v25, %v9811_v25  ;;  %v8843_v29 = vld [vmem:[%s14859_s4 + $0x40] ss:$28 sps:$4 sm:$0xff]  }
  0xf6   : > { %v533_v34 = vpop.f32.mrf.mxu0  ;;  %1296 = vmatprep.subr.bf16.mxu0 %v8843_v29  ;;  %8817 = vmatprep.subr.bf16.mxu1 %v8843_v29 }
  0xf7   : > { %v9834_v41 = vadd.f32 %v9733_v40, %v533_v34  ;;  %v731_v45 = vsel %vm582_vm1, %v689_v38, 0.0  ;;  %v625_v46 = vsel %vm582_vm1, %v9827_v35, 0.0  ;;  %v694_v52 = vmul.f32 %v9827_v35, %v9827_v35  ;;  %v8844_v38 = vld [vmem:[%s14859_s4 + $0x4] ss:$28 sps:$4 sm:$0xff]  }
  0xf8   : > { %599 = vadd.xlane.f32.xlu1 %v598_v10  ;;  %723 = vadd.xlane.f32.xlu0 %v722_v11  ;;  %v8428_v39 = vpop.f32.mrf.mxu0 }
  0xf9   : > { %v9837_v43 = vadd.f32 %v8428_v39, %v9733_v40  ;;  %v619_v51 = vsel %vm582_vm1, %v9834_v41, 0.0  ;;  %v746_v56 = vsel %vm582_vm1, %v694_v52, 0.0  ;;  %v692_v58 = vmul.f32 %v9834_v41, %v9834_v41 }
  0xfa   : > { %v536_v47 = vpop.f32.mrf.mxu0 }
  0xfb   : > { %v9843_v48 = vadd.f32 %v9733_v40, %v536_v47  ;;  %v628_v50 = vsel %vm582_vm1, %v9837_v43, 0.0  ;;  %v695_v57 = vmul.f32 %v9837_v43, %v9837_v43  ;;  %v740_v63 = vsel %vm582_vm1, %v692_v58, 0.0 }
  0xfc   : > { %726 = vadd.xlane.f32.xlu1 %v725_v16  ;;  %717 = vadd.xlane.f32.xlu0 %v716_v17  ;;  %v8431_v53 = vpop.f32.mrf.mxu0 }
  0xfd   : > { %v622_v54 = vsel %vm582_vm1, %v9843_v48, 0.0  ;;  %v9859_v61 = vadd.f32 %v8431_v53, %v9733_v40  ;;  %v749_v62 = vsel %vm582_vm1, %v695_v57, 0.0  ;;  %v693_v2 = vmul.f32 %v9843_v48, %v9843_v48 }
  0xfe   : > { %v549_v60 = vpop.f32.mrf.mxu0 }
  0xff   : > { %v9866_v4 = vadd.f32 %v9733_v40, %v549_v60  ;;  %v743_v7 = vsel %vm582_vm1, %v693_v2, 0.0  ;;  %v637_v8 = vsel %vm582_vm1, %v9859_v61, 0.0  ;;  %v698_v13 = vmul.f32 %v9859_v61, %v9859_v61  ;;  %v9946_v60 = vld [vmem:[%s14859_s4 + $0x38] ss:$28 sps:$4 sm:$0xff]  }
 0x100   : > { %720 = vadd.xlane.f32.xlu1 %v719_v22  ;;  %614 = vadd.xlane.f32.xlu0 %v613_v23  ;;  %v8432_v3 = vpop.f32.mrf.mxu0 }
 0x101   : > { %v9869_v6 = vadd.f32 %v8432_v3, %v9733_v40  ;;  %v631_v12 = vsel %vm582_vm1, %v9866_v4, 0.0  ;;  %v758_v17 = vsel %vm582_vm1, %v698_v13, 0.0  ;;  %v696_v19 = vmul.f32 %v9866_v4, %v9866_v4 }
 0x102   : > { %v552_v9 = vpop.f32.mrf.mxu0 }
 0x103   : > { %v9875_v10 = vadd.f32 %v9733_v40, %v552_v9  ;;  %v640_v11 = vsel %vm582_vm1, %v9869_v6, 0.0  ;;  %v699_v18 = vmul.f32 %v9869_v6, %v9869_v6 }
 0x104   : > { %617 = vadd.xlane.f32.xlu1 %v616_v26  ;;  %608 = vadd.xlane.f32.xlu0 %v607_v27  ;;  %v8435_v14 = vpop.f32.mrf.mxu0  ;;  %v752_v26 = vsel %vm582_vm1, %v696_v19, 0.0 }
 0x105   : > { %v634_v16 = vsel %vm582_vm1, %v9875_v10, 0.0  ;;  %v9891_v23 = vadd.f32 %v8435_v14, %v9733_v40  ;;  %v761_v24 = vsel %vm582_vm1, %v699_v18, 0.0  ;;  %v697_v27 = vmul.f32 %v9875_v10, %v9875_v10 }
 0x106   : > { %v565_v22 = vpop.f32.mrf.mxu0 }
 0x107   : > { %v755_v33 = vsel %vm582_vm1, %v697_v27, 0.0  ;;  %v649_v34 = vsel %vm582_vm1, %v9891_v23, 0.0  ;;  %v702_v53 = vmul.f32 %v9891_v23, %v9891_v23 }
 0x108   : > { %611 = vadd.xlane.f32.xlu1 %v610_v30  ;;  %735 = vadd.xlane.f32.xlu0 %v734_v31  ;;  %v8436_v28 = vpop.f32.mrf.mxu0  ;;  %v8841_v30 = vld [vmem:[%s14859_s4 + $0x3c] ss:$28 sps:$4 sm:$0xff]   ;;  %v9904_v31 = vadd.f32 %v9733_v40, %v565_v22 }
 0x109   : > { %v9907_v32 = vadd.f32 %v8436_v28, %v9733_v40  ;;  %1297 = vmatpush1.bf16.msra.mxu0 %v8841_v30  ;;  %8819 = vmatpush1.bf16.msra.mxu1 %v8841_v30 }
 0x10a   : > { %v700_v47 = vmul.f32 %v9904_v31, %v9904_v31 }
 0x10b   : > { %v703_v57 = vmul.f32 %v9907_v32, %v9907_v32 }
 0x10c   : > { %738 = vadd.xlane.f32.xlu1 %v737_v36  ;;  %729 = vadd.xlane.f32.xlu0 %v728_v37  ;;  %v568_v36 = vpop.f32.mrf.mxu0  ;;  %v8846_v37 = vld [vmem:[%s14859_s4 + $0x8] ss:$28 sps:$4 sm:$0xff]  }
 0x10d   : > { %v9919_v39 = vadd.f32 %v9733_v40, %v568_v36  ;;  %1298 = vmatprep.subr.bf16.mxu0 %v8846_v37  ;;  %8818 = vmatprep.subr.bf16.mxu1 %v8846_v37  ;;  %v773_v58 = vsel %vm582_vm1, %v703_v57, 0.0 }
 0x10e   : > { %1299 = vmatpush1.bf16.msra.mxu0 %v8844_v38  ;;  %8820 = vmatpush1.bf16.msra.mxu1 %v8844_v38 }
 0x10f   : > { %v646_v40 = vsel %vm582_vm1, %v9919_v39, 0.0  ;;  %v701_v52 = vmul.f32 %v9919_v39, %v9919_v39  ;;  %8437 = vmatprep.subr.bf16.mxu0 %v9946_v60 }
 0x110   : > { %732 = vadd.xlane.f32.xlu1 %v731_v45  ;;  %626 = vadd.xlane.f32.xlu0 %v625_v46  ;;  %v652_v45 = vsel %vm582_vm1, %v9907_v32, 0.0  ;;  %v643_v46 = vsel %vm582_vm1, %v9904_v31, 0.0 }
 0x114   : > { %629 = vadd.xlane.f32.xlu1 %v628_v50  ;;  %620 = vadd.xlane.f32.xlu0 %v619_v51  ;;  %v9621_v50 = vmov 0   ;;  %v764_v51 = vsel %vm582_vm1, %v700_v47, 0.0 }
 0x115   : > { %1316 = vmatprep.mubr.bf16.mxu0 %v9621_v50  ;;  %1336 = vmatprep.mubr.bf16.mxu1 %v9621_v50 }
 0x116   : > { %8836 = vset.pattern.permute.xlu1 %v9621_v50  ;;  %8835 = vset.pattern.permute.xlu0 %v9621_v50 }
 0x118   : > { %623 = vadd.xlane.f32.xlu1 %v622_v54  ;;  %747 = vadd.xlane.f32.xlu0 %v746_v56  ;;  %v767_v54 = vsel %vm582_vm1, %v701_v52, 0.0  ;;  %v770_v56 = vsel %vm582_vm1, %v702_v53, 0.0 }
 0x11c   : > { %750 = vadd.xlane.f32.xlu1 %v749_v62  ;;  %741 = vadd.xlane.f32.xlu0 %v740_v63 }
 0x120   : > { %744 = vadd.xlane.f32.xlu1 %v743_v7  ;;  %638 = vadd.xlane.f32.xlu0 %v637_v8 }
 0x124   : > { %641 = vadd.xlane.f32.xlu1 %v640_v11  ;;  %632 = vadd.xlane.f32.xlu0 %v631_v12 }
 0x128   : > { %635 = vadd.xlane.f32.xlu1 %v634_v16  ;;  %759 = vadd.xlane.f32.xlu0 %v758_v17 }
 0x12c   : > { %762 = vadd.xlane.f32.xlu1 %v761_v24  ;;  %753 = vadd.xlane.f32.xlu0 %v752_v26 }
 0x130   : > { %756 = vadd.xlane.f32.xlu1 %v755_v33  ;;  %650 = vadd.xlane.f32.xlu0 %v649_v34 }
 0x134   : > { %653 = vadd.xlane.f32.xlu1 %v652_v45  ;;  %644 = vadd.xlane.f32.xlu0 %v643_v46 }
 0x138   : > { %647 = vadd.xlane.f32.xlu1 %v646_v40  ;;  %765 = vadd.xlane.f32.xlu0 %v764_v51 }
 0x13c   : > { %768 = vadd.xlane.f32.xlu1 %v767_v54  ;;  %771 = vadd.xlane.f32.xlu0 %v770_v56 }
 0x140   : > { %774 = vadd.xlane.f32.xlu1 %v773_v58 }
 0x169   : > { %v591_v62 = vpop.xlane.xlu0 %590 }
 0x16a   : > { %v658_v3 = vmul.f32 0.03125, %v591_v62 }
 0x16c   : > { %v802_v13 = vmul.f32 %v658_v3, %v658_v3 }
 0x16d   : > { %v706_v63 = vpop.xlane.xlu1 %705  ;;  %v585_v2 = vpop.xlane.xlu0 %584 }
 0x16e   : > { %v656_v7 = vmul.f32 0.03125, %v585_v2  ;;  %v776_v8 = vmul.f32 0.03125, %v706_v63  ;;  %v9963_v63 = vld [vmem:[%s14860_s5 + $0x1] ss:$0 sm:$0xff] }
 0x170   : > { %v800_v9 = vmul.f32 %v656_v7, %v656_v7  ;;  %v848_v56 = vsub.f32 %v9739_v44, %v656_v7  ;;  %v9973_v44 = vld [vmem:[%s14860_s5 + $0x2] ss:$0 sm:$0xff] }
 0x171   : > { %v594_v11 = vpop.xlane.xlu1 %593  ;;  %v712_v12 = vpop.xlane.xlu0 %711 }
 0x172   : > { %v824_v14 = vsub.f32 %v776_v8, %v800_v9  ;;  %v659_v16 = vmul.f32 0.03125, %v594_v11  ;;  %v778_v17 = vmul.f32 0.03125, %v712_v12  ;;  %v850_v8 = vsub.f32 %v9736_v42, %v658_v3 }
 0x174   : > { %v872_v18 = vadd.f32 1e-05, %v824_v14  ;;  %v826_v19 = vsub.f32 %v778_v17, %v802_v13  ;;  %v803_v22 = vmul.f32 %v659_v16, %v659_v16 }
 0x175   : > { %v715_v24 = vpop.xlane.xlu1 %714  ;;  %v588_v26 = vpop.xlane.xlu0 %587 }
 0x176   : > { %8869 = vrsqrt.f32 %v872_v18  ;;  %v874_v27 = vadd.f32 1e-05, %v826_v19  ;;  %v779_v28 = vmul.f32 0.03125, %v715_v24  ;;  %v9949_v29 = vmul.f32 0.03125, %v588_v26 }
 0x178   : > { %8871 = vrsqrt.f32 %v874_v27  ;;  %v827_v30 = vsub.f32 %v779_v28, %v803_v22  ;;  %v801_v37 = vmul.f32 %v9949_v29, %v9949_v29  ;;  %v851_v27 = vsub.f32 %v9746_v49, %v659_v16 }
 0x179   : > { %v709_v33 = vpop.xlane.xlu1 %708  ;;  %v603_v34 = vpop.xlane.xlu0 %602  ;;  %v849_v49 = vsub.f32 %v9754_v55, %v9949_v29 }
 0x17a   : > { %v875_v36 = vadd.f32 1e-05, %v827_v30  ;;  %v777_v38 = vmul.f32 0.03125, %v709_v33  ;;  %v9953_v51 = vmul.f32 0.03125, %v603_v34 }
 0x17c   : > { %8873 = vrsqrt.f32 %v875_v36  ;;  %v825_v45 = vsub.f32 %v777_v38, %v801_v37  ;;  %v806_v52 = vmul.f32 %v9953_v51, %v9953_v51 }
 0x17d   : > { %v606_v46 = vpop.xlane.xlu1 %605  ;;  %v597_v47 = vpop.xlane.xlu0 %596 }
 0x17e   : > { %v873_v40 = vadd.f32 1e-05, %v825_v45  ;;  %v9958_v57 = vmul.f32 0.03125, %v606_v46  ;;  %v9965_v2 = vmul.f32 0.03125, %v597_v47 }
 0x180   : > { %8875 = vrsqrt.f32 %v873_v40  ;;  %v807_v11 = vmul.f32 %v9958_v57, %v9958_v57  ;;  %v804_v7 = vmul.f32 %v9965_v2, %v9965_v2 }
 0x181   : > { %v600_v53 = vpop.xlane.xlu1 %599  ;;  %v724_v54 = vpop.xlane.xlu0 %723 }
 0x182   : > { %v782_v58 = vmul.f32 0.03125, %v724_v54  ;;  %v9978_v22 = vmul.f32 0.03125, %v600_v53 }
 0x183   : > { %v8870_v62 = vpop.eup %8869 }
 0x184   : > { %v920_v9 = vmul.f32 %v8870_v62, %v848_v56  ;;  %v830_v12 = vsub.f32 %v782_v58, %v806_v52  ;;  %v805_v34 = vmul.f32 %v9978_v22, %v9978_v22 }
 0x185   : > { %v8872_v13 = vpop.eup %8871  ;;  %v727_v14 = vpop.xlane.xlu1 %726 }
 0x186   : > { %v718_v17 = vpop.xlane.xlu0 %717  ;;  %v948_v18 = vmul.f32 %v9963_v63, %v920_v9  ;;  %v922_v19 = vmul.f32 %v8872_v13, %v850_v8  ;;  %v878_v42 = vadd.f32 1e-05, %v830_v12  ;;  %v783_v3 = vmul.f32 0.03125, %v727_v14 }
 0x187   : > { %v780_v24 = vmul.f32 0.03125, %v718_v17 }
 0x188   : > { %v976_v26 = vadd.f32 %v9973_v44, %v948_v18  ;;  %8877 = vrsqrt.f32 %v878_v42  ;;  %v831_v28 = vsub.f32 %v783_v3, %v807_v11  ;;  %v950_v33 = vmul.f32 %v9963_v63, %v922_v19 }
 0x189   : > { %v8874_v30 = vpop.eup %8873  ;;  %v828_v36 = vsub.f32 %v780_v24, %v804_v7  ;;  %v721_v37 = vpop.xlane.xlu1 %720 }
 0x18a   : > { %v615_v38 = vpop.xlane.xlu0 %614  ;;  %v1024_v45 = vmul.f32 0.044715, %v976_v26  ;;  %v923_v46 = vmul.f32 %v8874_v30, %v851_v27  ;;  %v879_v47 = vadd.f32 1e-05, %v831_v28  ;;  %v781_v52 = vmul.f32 0.03125, %v721_v37 }
 0x18b   : > { %v876_v40 = vadd.f32 1e-05, %v828_v36  ;;  %v9989_v56 = vadd.f32 %v9973_v44, %v950_v33  ;;  %v9991_v12 = vmul.f32 0.03125, %v615_v38  ;;  %v854_v28 = vsub.f32 %v9762_v59, %v9953_v51 }
 0x18c   : > { %v1048_v53 = vmul.f32 %v1024_v45, %v976_v26  ;;  %v951_v54 = vmul.f32 %v9963_v63, %v923_v46  ;;  %8879 = vrsqrt.f32 %v879_v47  ;;  %v829_v58 = vsub.f32 %v781_v52, %v805_v34 }
 0x18d   : > { %v8876_v16 = vpop.eup %8875  ;;  %8881 = vrsqrt.f32 %v876_v40  ;;  %v618_v62 = vpop.xlane.xlu1 %617  ;;  %v810_v55 = vmul.f32 %v9991_v12, %v9991_v12  ;;  %v1026_v19 = vmul.f32 0.044715, %v9989_v56  ;;  %v855_v30 = vsub.f32 %v9773_v1, %v9958_v57 }
 0x18e   : > { %v609_v8 = vpop.xlane.xlu0 %608  ;;  %v1072_v9 = vmul.f32 %v1048_v53, %v976_v26  ;;  %v921_v11 = vmul.f32 %v8876_v16, %v849_v49  ;;  %v979_v13 = vadd.f32 %v9973_v44, %v951_v54  ;;  %v877_v7 = vadd.f32 1e-05, %v829_v58 }
 0x18f   : > { %v10001_v3 = vmul.f32 0.03125, %v618_v62  ;;  %v10003_v24 = vmul.f32 0.03125, %v609_v8  ;;  %v852_v33 = vsub.f32 %v9770_v0, %v9965_v2  ;;  %v853_v36 = vsub.f32 %v9779_v5, %v9978_v22 }
 0x190   : > { %v949_v14 = vmul.f32 %v9963_v63, %v921_v11  ;;  %v1096_v29 = vadd.f32 %v1072_v9, %v976_v26  ;;  %8883 = vrsqrt.f32 %v877_v7  ;;  %v1027_v34 = vmul.f32 0.044715, %v979_v13 }
 0x191   : > { %v612_v17 = vpop.xlane.xlu1 %611  ;;  %v811_v37 = vmul.f32 %v10001_v3, %v10001_v3  ;;  %v808_v38 = vmul.f32 %v10003_v24, %v10003_v24  ;;  %v1050_v57 = vmul.f32 %v1026_v19, %v9989_v56  ;;  %v10021_v53 = vmul.f32 0.5, %v976_v26 }
 0x192   : > { %v736_v18 = vpop.xlane.xlu0 %735  ;;  %v9999_v42 = vadd.f32 %v9973_v44, %v949_v14  ;;  %v1120_v47 = vmul.f32 0.7978846, %v1096_v29  ;;  %v1051_v0 = vmul.f32 %v1027_v34, %v979_v13  ;;  %v10019_v22 = vmul.f32 0.03125, %v612_v17 }
 0x193   : > { %v786_v27 = vmul.f32 0.03125, %v736_v18  ;;  %v10025_v49 = vmul.f32 0.5, %v9989_v56  ;;  %v1074_v26 = vmul.f32 %v1050_v57, %v9989_v56 }
 0x194   : > { %v1025_v1 = vmul.f32 0.044715, %v9999_v42  ;;  %v1075_v62 = vmul.f32 %v1051_v0, %v979_v13  ;;  %v809_v9 = vmul.f32 %v10019_v22, %v10019_v22 }
 0x195   : > { %v834_v45 = vsub.f32 %v786_v27, %v810_v55  ;;  %v8878_v46 = vpop.eup %8877  ;;  %v739_v59 = vpop.xlane.xlu1 %738 }
 0x196   : > { %v730_v51 = vpop.xlane.xlu0 %729  ;;  %v926_v2 = vmul.f32 %v8878_v46, %v854_v28  ;;  %v787_v52 = vmul.f32 0.03125, %v739_v59  ;;  %v1049_v54 = vmul.f32 %v1025_v1, %v9999_v42  ;;  %v858_v28 = vsub.f32 %v9795_v15, %v9991_v12 }
 0x197   : > { %v882_v40 = vadd.f32 1e-05, %v834_v45  ;;  %v784_v5 = vmul.f32 0.03125, %v730_v51  ;;  %v856_v45 = vsub.f32 %v9802_v20, %v10003_v24  ;;  %v10039_v46 = vmul.f32 0.5, %v979_v13 }
 0x198   : > { %v835_v16 = vsub.f32 %v787_v52, %v811_v37  ;;  %v1073_v14 = vmul.f32 %v1049_v54, %v9999_v42  ;;  %v954_v29 = vmul.f32 %v9963_v63, %v926_v2  ;;  %v1098_v15 = vadd.f32 %v1074_v26, %v9989_v56 }
 0x199   : > { %8885 = vrsqrt.f32 %v882_v40  ;;  %v832_v58 = vsub.f32 %v784_v5, %v808_v38  ;;  %v8880_v8 = vpop.eup %8879  ;;  %v733_v11 = vpop.xlane.xlu1 %732  ;;  %v859_v38 = vsub.f32 %v9805_v21, %v10001_v3  ;;  %v857_v5 = vsub.f32 %v9811_v25, %v10019_v22 }
 0x19a   : > { %8887 = vtanh.f32 %v1120_v47  ;;  %v627_v7 = vpop.xlane.xlu0 %626  ;;  %v8882_v55 = vpop.eup %8881  ;;  %v927_v17 = vmul.f32 %v8880_v8, %v855_v30  ;;  %v883_v18 = vadd.f32 1e-05, %v835_v16  ;;  %v785_v34 = vmul.f32 0.03125, %v733_v11 }
 0x19b   : > { %v880_v19 = vadd.f32 1e-05, %v832_v58  ;;  %v924_v27 = vmul.f32 %v8882_v55, %v852_v33  ;;  %v1097_v37 = vadd.f32 %v1073_v14, %v9999_v42  ;;  %v1099_v47 = vadd.f32 %v1075_v62, %v979_v13 }
 0x19c   : > { %v833_v59 = vsub.f32 %v785_v34, %v809_v9  ;;  %v10044_v1 = vadd.f32 %v9973_v44, %v954_v29  ;;  %v955_v57 = vmul.f32 %v9963_v63, %v927_v17  ;;  %v10047_v0 = vmul.f32 0.03125, %v627_v7 }
 0x19d   : > { %v952_v30 = vmul.f32 %v9963_v63, %v924_v27  ;;  %8889 = vrsqrt.f32 %v880_v19  ;;  %v630_v33 = vpop.xlane.xlu1 %629  ;;  %v8884_v12 = vpop.eup %8883  ;;  %v1121_v52 = vmul.f32 0.7978846, %v1097_v37  ;;  %v10055_v54 = vmul.f32 0.5, %v9999_v42 }
 0x19e   : > { %v621_v51 = vpop.xlane.xlu0 %620  ;;  %8891 = vrsqrt.f32 %v883_v18  ;;  %v925_v13 = vmul.f32 %v8884_v12, %v853_v36  ;;  %v881_v40 = vadd.f32 1e-05, %v833_v59  ;;  %v814_v56 = vmul.f32 %v10047_v0, %v10047_v0 }
 0x19f   : > { %v980_v2 = vadd.f32 %v9973_v44, %v952_v30  ;;  %v1123_v16 = vmul.f32 0.7978846, %v1099_v47  ;;  %v10058_v62 = vmul.f32 0.03125, %v630_v33  ;;  %v10060_v11 = vmul.f32 0.03125, %v621_v51 }
 0x1a0   : > { %v953_v58 = vmul.f32 %v9963_v63, %v925_v13  ;;  %8893 = vrsqrt.f32 %v881_v40  ;;  %v1122_v14 = vmul.f32 0.7978846, %v1098_v15  ;;  %v10063_v26 = vadd.f32 %v9973_v44, %v955_v57 }
 0x1a1   : > { %v624_v8 = vpop.xlane.xlu1 %623  ;;  %v1028_v36 = vmul.f32 0.044715, %v980_v2  ;;  %8895 = vtanh.f32 %v1121_v52  ;;  %v10069_v29 = vmul.f32 0.5, %v10044_v1  ;;  %v862_v17 = vsub.f32 %v9827_v35, %v10047_v0 }
 0x1a2   : > { %v748_v9 = vpop.xlane.xlu0 %747  ;;  %v10066_v42 = vadd.f32 %v9973_v44, %v953_v58  ;;  %v815_v18 = vmul.f32 %v10058_v62, %v10058_v62  ;;  %v812_v19 = vmul.f32 %v10060_v11, %v10060_v11  ;;  %v863_v37 = vsub.f32 %v9837_v43, %v10058_v62 }
 0x1a3   : > { %v790_v7 = vmul.f32 0.03125, %v748_v9  ;;  %v1052_v55 = vmul.f32 %v1028_v36, %v980_v2  ;;  %v10079_v47 = vmul.f32 0.03125, %v624_v8  ;;  %8897 = vtanh.f32 %v1123_v16 }
 0x1a4   : > { %v1029_v33 = vmul.f32 0.044715, %v10066_v42  ;;  %8899 = vtanh.f32 %v1122_v14  ;;  %v1031_v9 = vmul.f32 0.044715, %v10063_v26  ;;  %v860_v16 = vsub.f32 %v9834_v41, %v10060_v11 }
 0x1a5   : > { %v838_v27 = vsub.f32 %v790_v7, %v814_v56  ;;  %v751_v30 = vpop.xlane.xlu1 %750  ;;  %v1076_v13 = vmul.f32 %v1052_v55, %v980_v2  ;;  %v1030_v56 = vmul.f32 0.044715, %v10044_v1  ;;  %v813_v36 = vmul.f32 %v10079_v47, %v10079_v47 }
 0x1a6   : > { %v8886_v34 = vpop.eup %8885  ;;  %v742_v59 = vpop.xlane.xlu0 %741  ;;  %v791_v12 = vmul.f32 0.03125, %v751_v30  ;;  %v1053_v52 = vmul.f32 %v1029_v33, %v10066_v42 }
 0x1a7   : > { %v8888_v51 = vpop.eup %8887  ;;  %v886_v15 = vadd.f32 1e-05, %v838_v27  ;;  %v788_v57 = vmul.f32 0.03125, %v742_v59  ;;  %v930_v40 = vmul.f32 %v8886_v34, %v858_v28  ;;  %v1100_v59 = vadd.f32 %v1076_v13, %v980_v2 }
 0x1a8   : > { %v839_v58 = vsub.f32 %v791_v12, %v815_v18  ;;  %v1168_v55 = vadd.f32 1.0, %v8888_v51  ;;  %v1077_v28 = vmul.f32 %v1053_v52, %v10066_v42  ;;  %v1054_v18 = vmul.f32 %v1030_v56, %v10044_v1 }
 0x1a9   : > { %8901 = vrsqrt.f32 %v886_v15  ;;  %v836_v8 = vsub.f32 %v788_v57, %v812_v19  ;;  %v745_v7 = vpop.xlane.xlu1 %744  ;;  %v958_v33 = vmul.f32 %v9963_v63, %v930_v40  ;;  %v10095_v57 = vmul.f32 0.5, %v980_v2 }
 0x1aa   : > { %v639_v27 = vpop.xlane.xlu0 %638  ;;  %v8890_v14 = vpop.eup %8889  ;;  %v887_v34 = vadd.f32 1e-05, %v839_v58  ;;  %v789_v12 = vmul.f32 0.03125, %v745_v7  ;;  %v1101_v51 = vadd.f32 %v1077_v28, %v10066_v42  ;;  %v10099_v52 = vmul.f32 0.5, %v10063_v26 }
 0x1ab   : > { %v884_v30 = vadd.f32 1e-05, %v836_v8  ;;  %v8892_v19 = vpop.eup %8891  ;;  %v928_v15 = vmul.f32 %v8890_v14, %v856_v45  ;;  %v1055_v13 = vmul.f32 %v1031_v9, %v10063_v26  ;;  %v861_v56 = vsub.f32 %v9843_v48, %v10079_v47 }
 0x1ac   : > { %8903 = vrsqrt.f32 %v887_v34  ;;  %v837_v40 = vsub.f32 %v789_v12, %v813_v36  ;;  %v1192_v20 = vmul.f32 %v1168_v55, %v10021_v53  ;;  %v931_v45 = vmul.f32 %v8892_v19, %v859_v38 }
 0x1ad   : > { %8905 = vrsqrt.f32 %v884_v30  ;;  %v642_v58 = vpop.xlane.xlu1 %641  ;;  %v8894_v24 = vpop.eup %8893  ;;  %v10108_v2 = vmul.f32 0.03125, %v639_v27  ;;  %v1124_v7 = vmul.f32 0.7978846, %v1100_v59  ;;  %v1078_v28 = vmul.f32 %v1054_v18, %v10044_v1 }
 0x1ae   : > { %v633_v8 = vpop.xlane.xlu0 %632  ;;  %v8896_v9 = vpop.eup %8895  ;;  %v10112_v14 = vadd.f32 %v9973_v44, %v958_v33  ;;  %v956_v36 = vmul.f32 %v9963_v63, %v928_v15  ;;  %v929_v53 = vmul.f32 %v8894_v24, %v857_v5  ;;  %v885_v55 = vadd.f32 1e-05, %v837_v40 }
 0x1af   : > { %v818_v21 = vmul.f32 %v10108_v2, %v10108_v2  ;;  %v10120_v3 = vmul.f32 0.03125, %v642_v58  ;;  %v1125_v38 = vmul.f32 0.7978846, %v1101_v51  ;;  %v1079_v27 = vmul.f32 %v1055_v13, %v10063_v26 }
 0x1b0   : > { %v957_v34 = vmul.f32 %v9963_v63, %v929_v53  ;;  %8907 = vrsqrt.f32 %v885_v55  ;;  %v10124_v30 = vmul.f32 0.03125, %v633_v8  ;;  %v1169_v19 = vadd.f32 1.0, %v8896_v9  ;;  %v8898_v33 = vpop.eup %8897 }
 0x1b1   : > { %v636_v59 = vpop.xlane.xlu1 %635  ;;  %v959_v25 = vmul.f32 %v9963_v63, %v931_v45  ;;  %8909 = vtanh.f32 %v1124_v7  ;;  %v1102_v5 = vadd.f32 %v1078_v28, %v10044_v1  ;;  %v10129_v15 = vadd.f32 %v9973_v44, %v956_v36  ;;  %v8900_v40 = vpop.eup %8899  ;;  %v8848_v36 = vld [vmem:[%s14859_s4] ss:$28 sps:$4 sm:$0xff]  }
 0x1b2   : > { %v760_v18 = vpop.xlane.xlu0 %759  ;;  %v819_v12 = vmul.f32 %v10120_v3, %v10120_v3  ;;  %v816_v51 = vmul.f32 %v10124_v30, %v10124_v30  ;;  %v1193_v13 = vmul.f32 %v1169_v19, %v10055_v54  ;;  %v10137_v58 = vadd.f32 %v9973_v44, %v957_v34 }
 0x1b3   : > { %v794_v22 = vmul.f32 0.03125, %v760_v18  ;;  %v10139_v8 = vmul.f32 0.03125, %v636_v59  ;;  %8911 = vtanh.f32 %v1125_v38  ;;  %v1171_v9 = vadd.f32 1.0, %v8898_v33 }
 0x1b4   : > { %v10141_v45 = vpack.c.bf16 %v1193_v13, %v1192_v20  ;;  %v1103_v54 = vadd.f32 %v1079_v27, %v10063_v26  ;;  %v1126_v53 = vmul.f32 0.7978846, %v1102_v5  ;;  %v10148_v55 = vadd.f32 %v9973_v44, %v959_v25 }
 0x1b5   : > { %v842_v24 = vsub.f32 %v794_v22, %v818_v21  ;;  %v763_v7 = vpop.xlane.xlu1 %762  ;;  %v817_v20 = vmul.f32 %v10139_v8, %v10139_v8  ;;  %v1170_v38 = vadd.f32 1.0, %v8900_v40  ;;  %v10160_v33 = vmul.f32 0.5, %v10066_v42 }
 0x1b6   : > { %v8902_v1 = vpop.eup %8901  ;;  %v754_v28 = vpop.xlane.xlu0 %753  ;;  %v795_v59 = vmul.f32 0.03125, %v763_v7  ;;  %8043 = vmatmul.mubr.msk.bf16.vlgmr.msra.gmra.mxu0 %vm582_vm1, %v10141_v45  ;;  %v1127_v18 = vmul.f32 0.7978846, %v1103_v54  ;;  %8913 = vtanh.f32 %v1126_v53  ;;  %v1195_v13 = vmul.f32 %v1171_v9, %v10039_v46 }
 0x1b7   : > { %v890_v34 = vadd.f32 1e-05, %v842_v24  ;;  %v792_v21 = vmul.f32 0.03125, %v754_v28  ;;  %v934_v26 = vmul.f32 %v8902_v1, %v862_v17  ;;  %1326 = vmatprep.mubr.bf16.mxu0 %v9621_v50  ;;  %8438 = vmatpush3.bf16.msra.mxu0 %v9946_v60  ;;  %v1032_v40 = vmul.f32 0.044715, %v10129_v15 }
 0x1b8   : > { %v843_v27 = vsub.f32 %v795_v59, %v819_v12  ;;  %8439 = vmatprep.subr.bf16.mxu0 %v8848_v36  ;;  %8915 = vtanh.f32 %v1127_v18  ;;  %v1033_v35 = vmul.f32 0.044715, %v10137_v58  ;;  %v866_v17 = vsub.f32 %v9859_v61, %v10108_v2 }
 0x1b9   : > { %v840_v19 = vsub.f32 %v792_v21, %v816_v51  ;;  %v8904_v25 = vpop.eup %8903  ;;  %v757_v22 = vpop.xlane.xlu1 %756  ;;  %v867_v60 = vsub.f32 %v9869_v6, %v10120_v3  ;;  %8917 = vrsqrt.f32 %v890_v34  ;;  %v1194_v51 = vmul.f32 %v1170_v38, %v10025_v49 }
 0x1ba   : > { %v651_v5 = vpop.xlane.xlu0 %650  ;;  %v8906_v0 = vpop.eup %8905  ;;  %v935_v12 = vmul.f32 %v8904_v25, %v863_v37  ;;  %v793_v46 = vmul.f32 0.03125, %v757_v22  ;;  %v1056_v24 = vmul.f32 %v1032_v40, %v10129_v15  ;;  %v962_v1 = vmul.f32 %v9963_v63, %v934_v26 }
 0x1bb   : > { %v888_v42 = vadd.f32 1e-05, %v840_v19  ;;  %v932_v7 = vmul.f32 %v8906_v0, %v860_v16  ;;  %v864_v28 = vsub.f32 %v9866_v4, %v10124_v30  ;;  %v891_v9 = vadd.f32 1e-05, %v843_v27  ;;  %8440 = vmatpush3.bf16.msra.mxu0 %v8848_v36 }
 0x1bc   : > { %v841_v54 = vsub.f32 %v793_v46, %v817_v20  ;;  %v1217_v43 = vpack.c.bf16 %v1195_v13, %v1194_v51  ;;  %v1057_v49 = vmul.f32 %v1033_v35, %v10137_v58  ;;  %v865_v34 = vsub.f32 %v9875_v10, %v10139_v8 }
 0x1bd   : > { %8919 = vrsqrt.f32 %v888_v42  ;;  %v654_v62 = vpop.xlane.xlu1 %653  ;;  %v8908_v53 = vpop.eup %8907  ;;  %v10186_v41 = vmul.f32 0.5, %v10129_v15  ;;  %v10189_v11 = vmul.f32 0.5, %v10137_v58  ;;  %v963_v36 = vmul.f32 %v9963_v63, %v935_v12 }
 0x1be   : > { %v645_v37 = vpop.xlane.xlu0 %644  ;;  %v8910_v16 = vpop.eup %8909  ;;  %v889_v21 = vadd.f32 1e-05, %v841_v54  ;;  %v10192_v20 = vmul.f32 0.03125, %v651_v5  ;;  %8044 = vmatmul.mubr.msk.bf16.gmra.mxu0 %vm582_vm1, %v1217_v43  ;;  %v1080_v38 = vmul.f32 %v1056_v24, %v10129_v15  ;;  %v10197_v18 = vadd.f32 %v9973_v44, %v962_v1 }
 0x1bf   : > { %v10183_v59 = vmul.f32 0.03125, %v645_v37  ;;  %v960_v26 = vmul.f32 %v9963_v63, %v932_v7  ;;  %8921 = vrsqrt.f32 %v891_v9  ;;  %8441 = vmatprep.mubr.msk.bf16.mxu0 %vm582_vm1, %v10141_v45  ;;  %v933_v25 = vmul.f32 %v8908_v53, %v861_v56 }
 0x1c0   : > { %v8912_v19 = vpop.eup %8911  ;;  %8923 = vrsqrt.f32 %v889_v21  ;;  %v1172_v13 = vadd.f32 1.0, %v8910_v16  ;;  %v1081_v40 = vmul.f32 %v1057_v49, %v10137_v58  ;;  %v1104_v45 = vadd.f32 %v1080_v38, %v10129_v15 }
 0x1c1   : > { %v820_v27 = vmul.f32 %v10183_v59, %v10183_v59  ;;  %v648_v22 = vpop.xlane.xlu1 %647  ;;  %v1173_v42 = vadd.f32 1.0, %v8912_v19  ;;  %v10212_v12 = vadd.f32 %v9973_v44, %v963_v36  ;;  %v822_v46 = vmul.f32 %v10192_v20, %v10192_v20 }
 0x1c2   : > { %v766_v5 = vpop.xlane.xlu0 %765  ;;  %v10208_v35 = vmul.f32 0.03125, %v648_v22  ;;  %v870_v48 = vsub.f32 %v9891_v23, %v10192_v20  ;;  %v1105_v47 = vadd.f32 %v1081_v40, %v10137_v58  ;;  %v1196_v1 = vmul.f32 %v1172_v13, %v10095_v57 }
 0x1c3   : > { %v796_v0 = vmul.f32 0.03125, %v766_v5  ;;  %v8914_v56 = vpop.eup %8913  ;;  %v1197_v15 = vmul.f32 %v1173_v42, %v10160_v33  ;;  %v10224_v7 = vadd.f32 %v9973_v44, %v960_v26  ;;  %v10226_v9 = vmul.f32 0.03125, %v654_v62 }
 0x1c4   : > { %v821_v51 = vmul.f32 %v10208_v35, %v10208_v35  ;;  %v1128_v49 = vmul.f32 0.7978846, %v1104_v45  ;;  %v1129_v53 = vmul.f32 0.7978846, %v1105_v47  ;;  %v961_v58 = vmul.f32 %v9963_v63, %v933_v25 }
 0x1c5   : > { %v844_v24 = vsub.f32 %v796_v0, %v820_v27  ;;  %v769_v54 = vpop.xlane.xlu1 %768  ;;  %v8916_v16 = vpop.eup %8915  ;;  %v1218_v21 = vpack.c.bf16 %v1197_v15, %v1196_v1  ;;  %v1174_v33 = vadd.f32 1.0, %v8914_v56  ;;  %v823_v62 = vmul.f32 %v10226_v9, %v10226_v9 }
 0x1c6   : > { %v772_v37 = vpop.xlane.xlu0 %771  ;;  %v797_v38 = vmul.f32 0.03125, %v769_v54  ;;  %v8918_v27 = vpop.eup %8917  ;;  %8442 = vmatmul.mubr.msk.bf16.vlgmr.msra.gmra.mxu0 %vm582_vm1, %v1217_v43  ;;  %v1175_v19 = vadd.f32 1.0, %v8916_v16  ;;  %8925 = vtanh.f32 %v1128_v49  ;;  %v1034_v25 = vmul.f32 0.044715, %v10112_v14 }
 0x1c7   : > { %v892_v36 = vadd.f32 1e-05, %v844_v24  ;;  %v798_v57 = vmul.f32 0.03125, %v772_v37  ;;  %8045 = vmatmul.mubr.msk.bf16.vlgmr.msra.gmra.mxu1 %vm582_vm1, %v1218_v21  ;;  %8445 = vmatprep.mubr.msk.bf16.mxu0 %vm582_vm1, %v1218_v21  ;;  %v1035_v13 = vmul.f32 0.044715, %v10148_v55  ;;  %v10239_v0 = vadd.f32 %v9973_v44, %v961_v58 }
 0x1c8   : > { %v845_v26 = vsub.f32 %v797_v38, %v821_v51  ;;  %1346 = vmatprep.mubr.bf16.mxu1 %v9621_v50  ;;  %v1199_v43 = vmul.f32 %v1175_v19, %v10099_v52  ;;  %v938_v42 = vmul.f32 %v8918_v27, %v866_v17  ;;  %v1198_v52 = vmul.f32 %v1174_v33, %v10069_v29 }
 0x1c9   : > { %8927 = vrsqrt.f32 %v892_v36  ;;  %v846_v22 = vsub.f32 %v798_v57, %v822_v46  ;;  %v775_v5 = vpop.xlane.xlu1 %774  ;;  %v1058_v51 = vmul.f32 %v1034_v25, %v10112_v14  ;;  %v868_v24 = vsub.f32 %v9904_v31, %v10183_v59 }
 0x1ca   : > { %8929 = vtanh.f32 %v1129_v53  ;;  %v8920_v40 = vpop.eup %8919  ;;  %v893_v45 = vadd.f32 1e-05, %v845_v26  ;;  %v799_v47 = vmul.f32 0.03125, %v775_v5  ;;  %v1059_v15 = vmul.f32 %v1035_v13, %v10148_v55 }
 0x1cb   : > { %v936_v46 = vmul.f32 %v8920_v40, %v864_v28  ;;  %v894_v56 = vadd.f32 1e-05, %v846_v22  ;;  %v1219_v17 = vpack.c.bf16 %v1199_v43, %v1198_v52  ;;  %v1082_v4 = vmul.f32 %v1058_v51, %v10112_v14 }
 0x1cc   : > { %8931 = vrsqrt.f32 %v893_v45  ;;  %v847_v1 = vsub.f32 %v799_v47, %v823_v62  ;;  %v8922_v61 = vpop.eup %8921  ;;  %v869_v29 = vsub.f32 %v9919_v39, %v10208_v35  ;;  %v1083_v54 = vmul.f32 %v1059_v15, %v10148_v55 }
 0x1cd   : > { %v964_v2 = vmul.f32 %v9963_v63, %v936_v46  ;;  %8933 = vrsqrt.f32 %v894_v56  ;;  %v8924_v30 = vpop.eup %8923  ;;  %v1036_v31 = vmul.f32 0.044715, %v10224_v7  ;;  %v966_v59 = vmul.f32 %v9963_v63, %v938_v42 }
 0x1ce   : > { %v895_v28 = vadd.f32 1e-05, %v847_v1  ;;  %v937_v37 = vmul.f32 %v8924_v30, %v865_v34  ;;  %8446 = vmatmul.mubr.msk.bf16.gmra.mxu0 %vm582_vm1, %v1219_v17  ;;  %v1106_v49 = vadd.f32 %v1082_v4, %v10112_v14  ;;  %v1037_v53 = vmul.f32 0.044715, %v10239_v0 }
 0x1cf   : > { %v939_v39 = vmul.f32 %v8922_v61, %v867_v60  ;;  %8046 = vmatmul.mubr.msk.bf16.gmra.mxu1 %vm582_vm1, %v1219_v17  ;;  %v1107_v35 = vadd.f32 %v1083_v54, %v10148_v55  ;;  %v1060_v16 = vmul.f32 %v1036_v31, %v10224_v7  ;;  %v10272_v10 = vadd.f32 %v9973_v44, %v964_v2 }
 0x1d0   : > { %8935 = vrsqrt.f32 %v895_v28  ;;  %v965_v8 = vmul.f32 %v9963_v63, %v937_v37  ;;  %1356 = vmatprep.mubr.bf16.mxu1 %v9621_v50  ;;  %v1130_v34 = vmul.f32 0.7978846, %v1106_v49  ;;  %v1061_v58 = vmul.f32 %v1037_v53, %v10239_v0 }
 0x1d1   : > { %v1131_v36 = vmul.f32 0.7978846, %v1107_v35  ;;  %v1084_v6 = vmul.f32 %v1060_v16, %v10224_v7  ;;  %v1038_v3 = vmul.f32 0.044715, %v10197_v18  ;;  %v1039_v60 = vmul.f32 0.044715, %v10212_v12 }
 0x1d2   : > { %v10281_v21 = vadd.f32 %v9973_v44, %v966_v59  ;;  %v10284_v38 = vadd.f32 %v9973_v44, %v965_v8  ;;  %8937 = vtanh.f32 %v1130_v34  ;;  %v1085_v27 = vmul.f32 %v1061_v58, %v10239_v0 }
 0x1d3   : > { %v8926_v57 = vpop.eup %8925  ;;  %8939 = vtanh.f32 %v1131_v36  ;;  %v1108_v33 = vadd.f32 %v1084_v6, %v10224_v7  ;;  %v1062_v19 = vmul.f32 %v1038_v3, %v10197_v18  ;;  %v1063_v62 = vmul.f32 %v1039_v60, %v10212_v12 }
 0x1d4   : > { %v967_v25 = vmul.f32 %v9963_v63, %v939_v39  ;;  %v1176_v22 = vadd.f32 1.0, %v8926_v57  ;;  %v1109_v5 = vadd.f32 %v1085_v27, %v10239_v0  ;;  %v1040_v43 = vmul.f32 0.044715, %v10272_v10 }
 0x1d5   : > { %v1132_v42 = vmul.f32 0.7978846, %v1108_v33  ;;  %v1086_v45 = vmul.f32 %v1062_v19, %v10197_v18  ;;  %v1087_v47 = vmul.f32 %v1063_v62, %v10212_v12  ;;  %v1041_v51 = vmul.f32 0.044715, %v10284_v38 }
 0x1d6   : > { %v8928_v26 = vpop.eup %8927  ;;  %v1200_v56 = vmul.f32 %v1176_v22, %v10186_v41  ;;  %v1133_v52 = vmul.f32 0.7978846, %v1109_v5  ;;  %v1064_v17 = vmul.f32 %v1040_v43, %v10272_v10  ;;  %v10304_v41 = vadd.f32 %v9973_v44, %v967_v25 }
 0x1d7   : > { %v8930_v13 = vpop.eup %8929  ;;  %v940_v40 = vmul.f32 %v8928_v26, %v868_v24  ;;  %8941 = vtanh.f32 %v1132_v42  ;;  %v1110_v15 = vadd.f32 %v1086_v45, %v10197_v18  ;;  %v1111_v61 = vadd.f32 %v1087_v47, %v10212_v12 }
 0x1d8   : > { %v1177_v46 = vadd.f32 1.0, %v8930_v13  ;;  %8943 = vtanh.f32 %v1133_v52  ;;  %v1065_v4 = vmul.f32 %v1041_v51, %v10284_v38  ;;  %v1088_v49 = vmul.f32 %v1064_v17, %v10272_v10 }
 0x1d9   : > { %v968_v1 = vmul.f32 %v9963_v63, %v940_v40  ;;  %v8932_v2 = vpop.eup %8931  ;;  %v1134_v54 = vmul.f32 0.7978846, %v1110_v15  ;;  %v1135_v31 = vmul.f32 0.7978846, %v1111_v61  ;;  %v871_v53 = vsub.f32 %v9907_v32, %v10226_v9 }
 0x1da   : > { %v1201_v24 = vmul.f32 %v1177_v46, %v10189_v11  ;;  %v8934_v30 = vpop.eup %8933  ;;  %v941_v28 = vmul.f32 %v8932_v2, %v869_v29  ;;  %v1089_v11 = vmul.f32 %v1065_v4, %v10284_v38  ;;  %v1112_v23 = vadd.f32 %v1088_v49, %v10272_v10 }
 0x1db   : > { %v942_v59 = vmul.f32 %v8934_v30, %v870_v48  ;;  %v10314_v39 = vadd.f32 %v9973_v44, %v968_v1  ;;  %8945 = vtanh.f32 %v1134_v54  ;;  %v1042_v9 = vmul.f32 0.044715, %v10281_v21 }
 0x1dc   : > { %v1220_v37 = vpack.c.bf16 %v1201_v24, %v1200_v56  ;;  %v969_v35 = vmul.f32 %v9963_v63, %v941_v28  ;;  %8947 = vtanh.f32 %v1135_v31  ;;  %v1113_v20 = vadd.f32 %v1089_v11, %v10284_v38 }
 0x1dd   : > { %v8936_v29 = vpop.eup %8935  ;;  %v970_v16 = vmul.f32 %v9963_v63, %v942_v59  ;;  %v1043_v8 = vmul.f32 0.044715, %v10304_v41  ;;  %v1010_v34 = vmul.f32 0.5, %v10112_v14  ;;  %v1011_v58 = vmul.f32 0.5, %v10148_v55 }
 0x1de   : > { %8047 = vmatmul.mubr.msk.bf16.gmra.mxu1 %vm582_vm1, %v1220_v37  ;;  %8449 = vmatprep.mubr.msk.bf16.mxu0 %vm582_vm1, %v1220_v37  ;;  %v10323_v32 = vadd.f32 %v9973_v44, %v969_v35  ;;  %v943_v48 = vmul.f32 %v8936_v29, %v871_v53  ;;  %v1136_v36 = vmul.f32 0.7978846, %v1112_v23  ;;  %v1137_v6 = vmul.f32 0.7978846, %v1113_v20 }
 0x1df   : > { %1366 = vmatprep.mubr.bf16.mxu1 %v9621_v50  ;;  %v8938_v3 = vpop.eup %8937  ;;  %v10331_v60 = vadd.f32 %v9973_v44, %v970_v16  ;;  %v1066_v57 = vmul.f32 %v1042_v9, %v10281_v21  ;;  %v1067_v33 = vmul.f32 %v1043_v8, %v10304_v41  ;;  %v1044_v26 = vmul.f32 0.044715, %v10314_v39 }
 0x1e0   : > { %v971_v27 = vmul.f32 %v9963_v63, %v943_v48  ;;  %v8940_v19 = vpop.eup %8939  ;;  %v1178_v62 = vadd.f32 1.0, %v8938_v3  ;;  %8949 = vtanh.f32 %v1136_v36  ;;  %v1045_v14 = vmul.f32 0.044715, %v10323_v32 }
 0x1e1   : > { %v1179_v25 = vadd.f32 1.0, %v8940_v19  ;;  %8951 = vtanh.f32 %v1137_v6  ;;  %v1090_v22 = vmul.f32 %v1066_v57, %v10281_v21  ;;  %v1012_v63 = vmul.f32 0.5, %v10224_v7 }
 0x1e2   : > { %v10339_v55 = vadd.f32 %v9973_v44, %v971_v27  ;;  %v1091_v5 = vmul.f32 %v1067_v33, %v10304_v41  ;;  %v1068_v43 = vmul.f32 %v1044_v26, %v10314_v39  ;;  %v1069_v13 = vmul.f32 %v1045_v14, %v10323_v32 }
 0x1e3   : > { %v1202_v40 = vmul.f32 %v1178_v62, %v1010_v34  ;;  %v1203_v42 = vmul.f32 %v1179_v25, %v1011_v58  ;;  %v1013_v45 = vmul.f32 0.5, %v10239_v0  ;;  %v1114_v47 = vadd.f32 %v1090_v22, %v10281_v21 }
 0x1e4   : > { %v8942_v44 = vpop.eup %8941  ;;  %v1115_v46 = vadd.f32 %v1091_v5, %v10304_v41  ;;  %v1092_v56 = vmul.f32 %v1068_v43, %v10314_v39  ;;  %v1093_v52 = vmul.f32 %v1069_v13, %v10323_v32  ;;  %v1046_v7 = vmul.f32 0.044715, %v10331_v60 }
 0x1e5   : > { %v8944_v51 = vpop.eup %8943  ;;  %v1221_v1 = vpack.c.bf16 %v1203_v42, %v1202_v40  ;;  %v1180_v15 = vadd.f32 1.0, %v8942_v44  ;;  %v1138_v61 = vmul.f32 0.7978846, %v1114_v47  ;;  %v1047_v2 = vmul.f32 0.044715, %v10339_v55 }
 0x1e6   : > { %v1181_v24 = vadd.f32 1.0, %v8944_v51  ;;  %v1139_v17 = vmul.f32 0.7978846, %v1115_v46  ;;  %v1116_v0 = vadd.f32 %v1092_v56, %v10314_v39  ;;  %v1117_v4 = vadd.f32 %v1093_v52, %v10323_v32 }
 0x1e7   : > { %8450 = vmatmul.mubr.msk.bf16.gmra.mxu0 %vm582_vm1, %v1221_v1  ;;  %8048 = vmatmul.mubr.msk.bf16.gmra.mxu1 %vm582_vm1, %v1221_v1  ;;  %v1204_v30 = vmul.f32 %v1180_v15, %v1012_v63  ;;  %8953 = vtanh.f32 %v1138_v61  ;;  %v1070_v28 = vmul.f32 %v1046_v7, %v10331_v60  ;;  %v1071_v54 = vmul.f32 %v1047_v2, %v10339_v55 }
 0x1e8   : > { %v8946_v31 = vpop.eup %8945  ;;  %1376 = vmatprep.mubr.bf16.mxu1 %v9621_v50  ;;  %v1205_v59 = vmul.f32 %v1181_v24, %v1013_v45  ;;  %8955 = vtanh.f32 %v1139_v17  ;;  %v1140_v37 = vmul.f32 0.7978846, %v1116_v0  ;;  %v1141_v49 = vmul.f32 0.7978846, %v1117_v4 }
 0x1e9   : > { %v8948_v11 = vpop.eup %8947  ;;  %v1014_v53 = vmul.f32 0.5, %v10197_v18  ;;  %v1182_v35 = vadd.f32 1.0, %v8946_v31  ;;  %v1094_v29 = vmul.f32 %v1070_v28, %v10331_v60  ;;  %v1095_v16 = vmul.f32 %v1071_v54, %v10339_v55 }
 0x1ea   : > { %v1222_v23 = vpack.c.bf16 %v1205_v59, %v1204_v30  ;;  %v1015_v20 = vmul.f32 0.5, %v10212_v12  ;;  %v1183_v48 = vadd.f32 1.0, %v8948_v11  ;;  %8957 = vtanh.f32 %v1140_v37 }
 0x1eb   : > { %8959 = vtanh.f32 %v1141_v49  ;;  %v1118_v9 = vadd.f32 %v1094_v29, %v10331_v60  ;;  %v1119_v8 = vadd.f32 %v1095_v16, %v10339_v55  ;;  %v1206_v34 = vmul.f32 %v1182_v35, %v1014_v53 }
 0x1ec   : > { %8453 = vmatprep.mubr.msk.bf16.mxu0 %vm582_vm1, %v1222_v23  ;;  %v1207_v58 = vmul.f32 %v1183_v48, %v1015_v20  ;;  %v1016_v12 = vmul.f32 0.5, %v10272_v10  ;;  %v1017_v33 = vmul.f32 0.5, %v10284_v38  ;;  %v1018_v5 = vmul.f32 0.5, %v10281_v21 }
 0x1ed   : > { %v8950_v18 = vpop.eup %8949  ;;  %v1142_v36 = vmul.f32 0.7978846, %v1118_v9  ;;  %v1143_v6 = vmul.f32 0.7978846, %v1119_v8  ;;  %v1019_v10 = vmul.f32 0.5, %v10304_v41  ;;  %v1020_v47 = vmul.f32 0.5, %v10314_v39 }
 0x1ee   : > { %v8952_v3 = vpop.eup %8951  ;;  %v1223_v27 = vpack.c.bf16 %v1207_v58, %v1206_v34  ;;  %v1184_v57 = vadd.f32 1.0, %v8950_v18  ;;  %v1021_v44 = vmul.f32 0.5, %v10323_v32  ;;  %v1022_v15 = vmul.f32 0.5, %v10331_v60 }
 0x1ef   : > { %8049 = vmatmul.mubr.msk.bf16.gmra.mxu1 %vm582_vm1, %v1222_v23  ;;  %v1185_v19 = vadd.f32 1.0, %v8952_v3  ;;  %8961 = vtanh.f32 %v1142_v36  ;;  %v1023_v61 = vmul.f32 0.5, %v10339_v55 }
 0x1f0   : > { %8454 = vmatmul.mubr.msk.bf16.gmra.mxu0 %vm582_vm1, %v1223_v27  ;;  %1386 = vmatprep.mubr.bf16.mxu1 %v9621_v50  ;;  %8963 = vtanh.f32 %v1143_v6  ;;  %v1208_v62 = vmul.f32 %v1184_v57, %v1016_v12 }
 0x1f1   : > { %v1209_v26 = vmul.f32 %v1185_v19, %v1017_v33 }
 0x1f3   : > { %v1224_v14 = vpack.c.bf16 %v1209_v26, %v1208_v62 }
 0x1f4   : > { %v8954_v25 = vpop.eup %8953 }
 0x1f5   : > { %v8956_v22 = vpop.eup %8955  ;;  %8457 = vmatprep.mubr.msk.bf16.mxu0 %vm582_vm1, %v1224_v14  ;;  %v1186_v63 = vadd.f32 1.0, %v8954_v25 }
 0x1f6   : > { %v1187_v38 = vadd.f32 1.0, %v8956_v22 }
 0x1f7   : > { %v8958_v43 = vpop.eup %8957  ;;  %8050 = vmatmul.mubr.msk.bf16.gmra.mxu1 %vm582_vm1, %v1223_v27  ;;  %v1210_v40 = vmul.f32 %v1186_v63, %v1018_v5 }
 0x1f8   : > { %v8960_v13 = vpop.eup %8959  ;;  %1396 = vmatprep.mubr.bf16.mxu1 %v9621_v50  ;;  %v1211_v42 = vmul.f32 %v1187_v38, %v1019_v10  ;;  %v1188_v45 = vadd.f32 1.0, %v8958_v43 }
 0x1f9   : > { %v1189_v46 = vadd.f32 1.0, %v8960_v13 }
 0x1fa   : > { %v1225_v56 = vpack.c.bf16 %v1211_v42, %v1210_v40  ;;  %v1212_v52 = vmul.f32 %v1188_v45, %v1020_v47 }
 0x1fb   : > { %v1213_v21 = vmul.f32 %v1189_v46, %v1021_v44 }
 0x1fc   : > { %v8962_v7 = vpop.eup %8961  ;;  %8458 = vmatmul.mubr.msk.bf16.gmra.mxu0 %vm582_vm1, %v1225_v56 }
 0x1fd   : > { %v8964_v41 = vpop.eup %8963  ;;  %v1226_v51 = vpack.c.bf16 %v1213_v21, %v1212_v52  ;;  %v1190_v1 = vadd.f32 1.0, %v8962_v7 }
 0x1fe   : > { %v1191_v2 = vadd.f32 1.0, %v8964_v41 }
 0x1ff   : > { %8051 = vmatmul.mubr.msk.bf16.gmra.mxu1 %vm582_vm1, %v1224_v14  ;;  %8461 = vmatprep.mubr.msk.bf16.mxu0 %vm582_vm1, %v1226_v51  ;;  %v1214_v39 = vmul.f32 %v1190_v1, %v1022_v15 }
 0x200   : > { %1406 = vmatprep.mubr.bf16.mxu1 %v9621_v50  ;;  %v1215_v32 = vmul.f32 %v1191_v2, %v1023_v61 }
 0x202   : > { %v1227_v24 = vpack.c.bf16 %v1215_v32, %v1214_v39 }
 0x204   : > { %8462 = vmatmul.mubr.msk.bf16.gmra.mxu0 %vm582_vm1, %v1227_v24 }
 0x207   : > { %8052 = vmatmul.mubr.msk.bf16.gmra.mxu1 %vm582_vm1, %v1225_v56 }
 0x208   : > { %1416 = vmatprep.mubr.bf16.mxu1 %v9621_v50 }
 0x20f   : > { %8053 = vmatmul.mubr.msk.bf16.gmra.mxu1 %vm582_vm1, %v1226_v51 }
 0x210   : > { %1426 = vmatprep.mubr.bf16.mxu1 %v9621_v50  ;;  %v10410_v50 = vld [vmem:[%s14860_s5 + $0x3] ss:$0 sm:$0xff] }
 0x217   : > { %8054 = vmatmul.mubr.msk.bf16.gmra.mxu1 %vm582_vm1, %v1227_v24 }
 0x276   : > { %v10391_v60 = vpop.f32.mrf.mxu0 }
 0x278   : > { %v10393_v55 = vpop.f32.mrf.mxu0 }
 0x279   : > { %14864 = vst [vmem:[#allocation2_spill] sm:$0xff] %v10393_v55 }
 0x27a   : > { %v10395_v17 = vpop.f32.mrf.mxu0 }
 0x27b   : > { %14865 = vst [vmem:[#allocation3_spill] sm:$0xff] %v10395_v17 }
 0x27c   : > { %v10397_v0 = vpop.f32.mrf.mxu0 }
 0x27d   : > { %14866 = vst [vmem:[#allocation4_spill] sm:$0xff] %v10397_v0 }
 0x27e   : > { %v10399_v4 = vpop.f32.mrf.mxu0 }
 0x280   : > { %v10401_v30 = vpop.f32.mrf.mxu0 }
 0x281   : > { %14867 = vst [vmem:[#allocation5_spill] sm:$0xff] %v10401_v30 }
 0x282   : > { %v10403_v28 = vpop.f32.mrf.mxu0 }
 0x283   : > { %14868 = vst [vmem:[#allocation6_spill] sm:$0xff] %v10403_v28 }
 0x284   : > { %v10405_v54 = vpop.f32.mrf.mxu0 }
 0x285   : > { %14869 = vst [vmem:[#allocation7_spill] sm:$0xff] %v10405_v54 }
 0x286   : > { %v8443_v31 = vpop.f32.mrf.mxu0 }
 0x287   : > { %v10413_v59 = vadd.f32 %v8443_v31, %v10410_v50 }
 0x288   : > { %v1488_v37 = vpop.f32.mrf.mxu0 }
 0x289   : > { %v10416_v49 = vadd.f32 %v10410_v50, %v1488_v37  ;;  %v1591_v11 = vsel %vm582_vm1, %v10413_v59, 0.0  ;;  %v1683_v48 = vmul.f32 %v10413_v59, %v10413_v59 }
 0x28a   : > { %1592 = vadd.xlane.f32.xlu0 %v1591_v11  ;;  %v8444_v53 = vpop.f32.mrf.mxu0 }
 0x28b   : > { %v10421_v35 = vadd.f32 %v8444_v53, %v10410_v50  ;;  %v1585_v20 = vsel %vm582_vm1, %v10416_v49, 0.0  ;;  %v1711_v34 = vsel %vm582_vm1, %v1683_v48, 0.0  ;;  %v1681_v18 = vmul.f32 %v10416_v49, %v10416_v49 }
 0x28c   : > { %v1491_v29 = vpop.f32.mrf.mxu0 }
 0x28d   : > { %v10424_v16 = vadd.f32 %v10410_v50, %v1491_v29  ;;  %v1594_v23 = vsel %vm582_vm1, %v10421_v35, 0.0  ;;  %v1684_v58 = vmul.f32 %v10421_v35, %v10421_v35  ;;  %v1705_v27 = vsel %vm582_vm1, %v1681_v18, 0.0 }
 0x28e   : > { %1595 = vadd.xlane.f32.xlu1 %v1594_v23  ;;  %1586 = vadd.xlane.f32.xlu0 %v1585_v20  ;;  %v8447_v9 = vpop.f32.mrf.mxu0 }
 0x28f   : > { %v1588_v8 = vsel %vm582_vm1, %v10424_v16, 0.0  ;;  %v10440_v6 = vadd.f32 %v8447_v9, %v10410_v50  ;;  %v1714_v3 = vsel %vm582_vm1, %v1684_v58, 0.0  ;;  %v1682_v57 = vmul.f32 %v10424_v16, %v10424_v16 }
 0x290   : > { %v1504_v36 = vpop.f32.mrf.mxu0 }
 0x291   : > { %v10447_v33 = vadd.f32 %v10410_v50, %v1504_v36  ;;  %v1708_v62 = vsel %vm582_vm1, %v1682_v57, 0.0  ;;  %v1603_v26 = vsel %vm582_vm1, %v10440_v6, 0.0  ;;  %v1687_v5 = vmul.f32 %v10440_v6, %v10440_v6  ;;  %v8849_v36 = vld [vmem:[%s14859_s4 + $0x44] ss:$28 sps:$4 sm:$0xff]  }
 0x292   : > { %1589 = vadd.xlane.f32.xlu1 %v1588_v8  ;;  %1712 = vadd.xlane.f32.xlu0 %v1711_v34  ;;  %v8448_v12 = vpop.f32.mrf.mxu0 }
 0x293   : > { %v10450_v19 = vadd.f32 %v8448_v12, %v10410_v50  ;;  %v1597_v63 = vsel %vm582_vm1, %v10447_v33, 0.0  ;;  %v1723_v38 = vsel %vm582_vm1, %v1687_v5, 0.0  ;;  %v1685_v13 = vmul.f32 %v10447_v33, %v10447_v33  ;;  %8465 = vmatprep.subr.bf16.mxu1 %v8849_v36 }
 0x294   : > { %v1507_v14 = vpop.f32.mrf.mxu0  ;;  %8466 = vmatpush3.bf16.msra.mxu1 %v8849_v36 }
 0x295   : > { %v10456_v25 = vadd.f32 %v10410_v50, %v1507_v14  ;;  %v1606_v22 = vsel %vm582_vm1, %v10450_v19, 0.0  ;;  %v1688_v43 = vmul.f32 %v10450_v19, %v10450_v19  ;;  %v1717_v42 = vsel %vm582_vm1, %v1685_v13, 0.0 }
 0x296   : > { %1715 = vadd.xlane.f32.xlu1 %v1714_v3  ;;  %1706 = vadd.xlane.f32.xlu0 %v1705_v27 }
 0x297   : > { %v1600_v10 = vsel %vm582_vm1, %v10456_v25, 0.0  ;;  %v1726_v40 = vsel %vm582_vm1, %v1688_v43, 0.0  ;;  %v1686_v45 = vmul.f32 %v10456_v25, %v10456_v25 }
 0x299   : > { %v1720_v56 = vsel %vm582_vm1, %v1686_v45, 0.0 }
 0x29a   : > { %1709 = vadd.xlane.f32.xlu1 %v1708_v62  ;;  %1604 = vadd.xlane.f32.xlu0 %v1603_v26 }
 0x29e   : > { %1607 = vadd.xlane.f32.xlu1 %v1606_v22  ;;  %1598 = vadd.xlane.f32.xlu0 %v1597_v63 }
 0x2a2   : > { %1601 = vadd.xlane.f32.xlu1 %v1600_v10  ;;  %1724 = vadd.xlane.f32.xlu0 %v1723_v38 }
 0x2a6   : > { %1727 = vadd.xlane.f32.xlu1 %v1726_v40  ;;  %1718 = vadd.xlane.f32.xlu0 %v1717_v42 }
 0x2a7   : > { %v8451_v47 = vpop.f32.mrf.mxu0 }
 0x2a8   : > { %v10476_v44 = vadd.f32 %v8451_v47, %v10410_v50 }
 0x2a9   : > { %v1520_v46 = vpop.f32.mrf.mxu0 }
 0x2aa   : > { %v10480_v52 = vadd.f32 %v10410_v50, %v1520_v46  ;;  %1721 = vadd.xlane.f32.xlu1 %v1720_v56  ;;  %v1615_v21 = vsel %vm582_vm1, %v10476_v44, 0.0  ;;  %v1691_v2 = vmul.f32 %v10476_v44, %v10476_v44 }
 0x2ab   : > { %v8452_v7 = vpop.f32.mrf.mxu0  ;;  %1616 = vadd.xlane.f32.xlu0 %v1615_v21 }
 0x2ac   : > { %v10485_v41 = vadd.f32 %v8452_v7, %v10410_v50  ;;  %v1609_v61 = vsel %vm582_vm1, %v10480_v52, 0.0  ;;  %v1735_v24 = vsel %vm582_vm1, %v1691_v2, 0.0  ;;  %v1689_v37 = vmul.f32 %v10480_v52, %v10480_v52 }
 0x2ad   : > { %v1523_v51 = vpop.f32.mrf.mxu0 }
 0x2ae   : > { %v10488_v1 = vadd.f32 %v10410_v50, %v1523_v51  ;;  %v1618_v15 = vsel %vm582_vm1, %v10485_v41, 0.0  ;;  %v1692_v31 = vmul.f32 %v10485_v41, %v10485_v41  ;;  %v1729_v23 = vsel %vm582_vm1, %v1689_v37, 0.0 }
 0x2af   : > { %1619 = vadd.xlane.f32.xlu1 %v1618_v15  ;;  %1610 = vadd.xlane.f32.xlu0 %v1609_v61 }
 0x2b0   : > { %v8455_v39 = vpop.f32.mrf.mxu0  ;;  %v1612_v32 = vsel %vm582_vm1, %v10488_v1, 0.0  ;;  %v1738_v29 = vsel %vm582_vm1, %v1692_v31, 0.0  ;;  %v1690_v20 = vmul.f32 %v10488_v1, %v10488_v1 }
 0x2b1   : > { %v10504_v53 = vadd.f32 %v8455_v39, %v10410_v50 }
 0x2b2   : > { %v1536_v11 = vpop.f32.mrf.mxu0  ;;  %v1732_v34 = vsel %vm582_vm1, %v1690_v20, 0.0 }
 0x2b3   : > { %1613 = vadd.xlane.f32.xlu1 %v1612_v32  ;;  %1736 = vadd.xlane.f32.xlu0 %v1735_v24  ;;  %v10511_v9 = vadd.f32 %v10410_v50, %v1536_v11  ;;  %v1627_v58 = vsel %vm582_vm1, %v10504_v53, 0.0  ;;  %v1695_v12 = vmul.f32 %v10504_v53, %v10504_v53 }
 0x2b4   : > { %v8456_v48 = vpop.f32.mrf.mxu0 }
 0x2b5   : > { %v10514_v8 = vadd.f32 %v8456_v48, %v10410_v50  ;;  %v1621_v57 = vsel %vm582_vm1, %v10511_v9, 0.0  ;;  %v1747_v14 = vsel %vm582_vm1, %v1695_v12, 0.0  ;;  %v1693_v63 = vmul.f32 %v10511_v9, %v10511_v9 }
 0x2b6   : > { %v1539_v18 = vpop.f32.mrf.mxu0 }
 0x2b7   : > { %1739 = vadd.xlane.f32.xlu1 %v1738_v29  ;;  %1730 = vadd.xlane.f32.xlu0 %v1729_v23  ;;  %v10523_v3 = vadd.f32 %v10410_v50, %v1539_v18  ;;  %v1630_v27 = vsel %vm582_vm1, %v10514_v8, 0.0  ;;  %v1696_v22 = vmul.f32 %v10514_v8, %v10514_v8  ;;  %v1741_v43 = vsel %vm582_vm1, %v1693_v63, 0.0  ;;  %v8850_v63 = vld [vmem:[%s14859_s4 + $0xc] ss:$28 sps:$4 sm:$0xff]  }
 0x2b8   : > { %8467 = vmatprep.subr.bf16.mxu1 %v8850_v63 }
 0x2b9   : > { %v1624_v26 = vsel %vm582_vm1, %v10523_v3, 0.0  ;;  %v1750_v38 = vsel %vm582_vm1, %v1696_v22, 0.0  ;;  %v1694_v13 = vmul.f32 %v10523_v3, %v10523_v3  ;;  %8468 = vmatpush3.bf16.msra.mxu1 %v8850_v63 }
 0x2bb   : > { %1733 = vadd.xlane.f32.xlu1 %v1732_v34  ;;  %1628 = vadd.xlane.f32.xlu0 %v1627_v58  ;;  %v1744_v47 = vsel %vm582_vm1, %v1694_v13, 0.0 }
 0x2bc   : > { %v8459_v62 = vpop.f32.mrf.mxu0 }
 0x2bd   : > { %v10539_v10 = vadd.f32 %v8459_v62, %v10410_v50 }
 0x2be   : > { %v1552_v5 = vpop.f32.mrf.mxu0 }
 0x2bf   : > { %1631 = vadd.xlane.f32.xlu1 %v1630_v27  ;;  %1622 = vadd.xlane.f32.xlu0 %v1621_v57  ;;  %v10546_v42 = vadd.f32 %v10410_v50, %v1552_v5  ;;  %v1639_v46 = vsel %vm582_vm1, %v10539_v10, 0.0  ;;  %v1699_v15 = vmul.f32 %v10539_v10, %v10539_v10 }
 0x2c0   : > { %v8460_v40 = vpop.f32.mrf.mxu0 }
 0x2c1   : > { %v10549_v45 = vadd.f32 %v8460_v40, %v10410_v50  ;;  %v1633_v51 = vsel %vm582_vm1, %v10546_v42, 0.0  ;;  %v1759_v39 = vsel %vm582_vm1, %v1699_v15, 0.0  ;;  %v1697_v24 = vmul.f32 %v10546_v42, %v10546_v42 }
 0x2c2   : > { %v1555_v56 = vpop.f32.mrf.mxu0 }
 0x2c3   : > { %1625 = vadd.xlane.f32.xlu1 %v1624_v26  ;;  %1748 = vadd.xlane.f32.xlu0 %v1747_v14  ;;  %v10555_v21 = vadd.f32 %v10410_v50, %v1555_v56  ;;  %v1642_v7 = vsel %vm582_vm1, %v10549_v45, 0.0  ;;  %v1700_v32 = vmul.f32 %v10549_v45, %v10549_v45  ;;  %v1753_v29 = vsel %vm582_vm1, %v1697_v24, 0.0 }
 0x2c4   : > { %v8463_v61 = vpop.f32.mrf.mxu0 }
 0x2c5   : > { %v1636_v2 = vsel %vm582_vm1, %v10555_v21, 0.0  ;;  %v10571_v37 = vadd.f32 %v8463_v61, %v10410_v50  ;;  %v1762_v11 = vsel %vm582_vm1, %v1700_v32, 0.0  ;;  %v1698_v23 = vmul.f32 %v10555_v21, %v10555_v21 }
 0x2c6   : > { %v1568_v31 = vpop.f32.mrf.mxu0 }
 0x2c7   : > { %1751 = vadd.xlane.f32.xlu1 %v1750_v38  ;;  %1742 = vadd.xlane.f32.xlu0 %v1741_v43  ;;  %v10578_v48 = vadd.f32 %v10410_v50, %v1568_v31  ;;  %v1756_v58 = vsel %vm582_vm1, %v1698_v23, 0.0  ;;  %v1651_v18 = vsel %vm582_vm1, %v10571_v37, 0.0  ;;  %v1703_v22 = vmul.f32 %v10571_v37, %v10571_v37 }
 0x2c8   : > { %v8464_v20 = vpop.f32.mrf.mxu0 }
 0x2c9   : > { %v10581_v34 = vadd.f32 %v8464_v20, %v10410_v50  ;;  %v1645_v12 = vsel %vm582_vm1, %v10578_v48, 0.0  ;;  %v1701_v62 = vmul.f32 %v10578_v48, %v10578_v48  ;;  %v1771_v38 = vsel %vm582_vm1, %v1703_v22, 0.0 }
 0x2ca   : > { %v1571_v36 = vpop.f32.mrf.mxu0 }
 0x2cb   : > { %1745 = vadd.xlane.f32.xlu1 %v1744_v47  ;;  %1640 = vadd.xlane.f32.xlu0 %v1639_v46  ;;  %v10587_v27 = vadd.f32 %v10410_v50, %v1571_v36  ;;  %v1654_v57 = vsel %vm582_vm1, %v10581_v34, 0.0  ;;  %v1765_v14 = vsel %vm582_vm1, %v1701_v62, 0.0  ;;  %v1704_v43 = vmul.f32 %v10581_v34, %v10581_v34 }
 0x2cd   : > { %v1648_v26 = vsel %vm582_vm1, %v10587_v27, 0.0  ;;  %v1702_v50 = vmul.f32 %v10587_v27, %v10587_v27  ;;  %v1774_v13 = vsel %vm582_vm1, %v1704_v43, 0.0 }
 0x2cf   : > { %1643 = vadd.xlane.f32.xlu1 %v1642_v7  ;;  %1634 = vadd.xlane.f32.xlu0 %v1633_v51  ;;  %v1768_v5 = vsel %vm582_vm1, %v1702_v50, 0.0 }
 0x2d3   : > { %1637 = vadd.xlane.f32.xlu1 %v1636_v2  ;;  %1760 = vadd.xlane.f32.xlu0 %v1759_v39 }
 0x2d7   : > { %1763 = vadd.xlane.f32.xlu1 %v1762_v11  ;;  %1754 = vadd.xlane.f32.xlu0 %v1753_v29 }
 0x2db   : > { %1757 = vadd.xlane.f32.xlu1 %v1756_v58  ;;  %1652 = vadd.xlane.f32.xlu0 %v1651_v18 }
 0x2df   : > { %1655 = vadd.xlane.f32.xlu1 %v1654_v57  ;;  %1646 = vadd.xlane.f32.xlu0 %v1645_v12 }
 0x2e3   : > { %1649 = vadd.xlane.f32.xlu1 %v1648_v26  ;;  %1766 = vadd.xlane.f32.xlu0 %v1765_v14 }
 0x2e7   : > { %1769 = vadd.xlane.f32.xlu1 %v1768_v5  ;;  %1772 = vadd.xlane.f32.xlu0 %v1771_v38 }
 0x2eb   : > { %1775 = vadd.xlane.f32.xlu1 %v1774_v13 }
 0x313   : > { %v1593_v40 = vpop.xlane.xlu0 %1592 }
 0x314   : > { %v1659_v56 = vmul.f32 0.03125, %v1593_v40 }
 0x316   : > { %v1803_v2 = vmul.f32 %v1659_v56, %v1659_v56 }
 0x317   : > { %v1596_v47 = vpop.xlane.xlu1 %1595  ;;  %v1587_v46 = vpop.xlane.xlu0 %1586 }
 0x318   : > { %v10610_v7 = vmul.f32 0.03125, %v1596_v47  ;;  %v10612_v51 = vmul.f32 0.03125, %v1587_v46 }
 0x31a   : > { %v1804_v24 = vmul.f32 %v10610_v7, %v10610_v7  ;;  %v1801_v31 = vmul.f32 %v10612_v51, %v10612_v51 }
 0x31b   : > { %v1590_v15 = vpop.xlane.xlu1 %1589  ;;  %v1713_v61 = vpop.xlane.xlu0 %1712 }
 0x31c   : > { %v1779_v39 = vmul.f32 0.03125, %v1713_v61  ;;  %v10618_v23 = vmul.f32 0.03125, %v1590_v15 }
 0x31e   : > { %v1827_v32 = vsub.f32 %v1779_v39, %v1803_v2  ;;  %v1802_v26 = vmul.f32 %v10618_v23, %v10618_v23  ;;  %v1851_v39 = vsub.f32 %v10413_v59, %v1659_v56  ;;  %v1852_v59 = vsub.f32 %v10421_v35, %v10610_v7  ;;  %v10645_v56 = vld [vmem:[%s14860_s5 + $0x5] ss:$0 sm:$0xff] }
 0x31f   : > { %v1716_v11 = vpop.xlane.xlu1 %1715  ;;  %v1707_v29 = vpop.xlane.xlu0 %1706 }
 0x320   : > { %v1875_v20 = vadd.f32 1e-05, %v1827_v32  ;;  %v1780_v58 = vmul.f32 0.03125, %v1716_v11  ;;  %v1777_v18 = vmul.f32 0.03125, %v1707_v29 }
 0x322   : > { %8965 = vrsqrt.f32 %v1875_v20  ;;  %v1828_v36 = vsub.f32 %v1780_v58, %v1804_v24  ;;  %v1825_v57 = vsub.f32 %v1777_v18, %v1801_v31  ;;  %v10634_v31 = vld [vmem:[%s14860_s5 + $0x4] ss:$0 sm:$0xff] }
 0x323   : > { %v1710_v12 = vpop.xlane.xlu1 %1709  ;;  %v1605_v62 = vpop.xlane.xlu0 %1604 }
 0x324   : > { %v1876_v14 = vadd.f32 1e-05, %v1828_v36  ;;  %v1873_v50 = vadd.f32 1e-05, %v1825_v57  ;;  %v1778_v22 = vmul.f32 0.03125, %v1710_v12  ;;  %v10622_v13 = vmul.f32 0.03125, %v1605_v62 }
 0x326   : > { %8967 = vrsqrt.f32 %v1876_v14  ;;  %v1826_v63 = vsub.f32 %v1778_v22, %v1802_v26  ;;  %v1807_v61 = vmul.f32 %v10622_v13, %v10622_v13 }
 0x327   : > { %8969 = vrsqrt.f32 %v1873_v50  ;;  %v1608_v5 = vpop.xlane.xlu1 %1607  ;;  %v1599_v38 = vpop.xlane.xlu0 %1598 }
 0x328   : > { %v1874_v43 = vadd.f32 1e-05, %v1826_v63  ;;  %v10624_v40 = vmul.f32 0.03125, %v1608_v5  ;;  %v10626_v47 = vmul.f32 0.03125, %v1599_v38  ;;  %v1849_v63 = vsub.f32 %v10416_v49, %v10612_v51 }
 0x32a   : > { %8971 = vrsqrt.f32 %v1874_v43  ;;  %v1808_v11 = vmul.f32 %v10624_v40, %v10624_v40  ;;  %v1805_v29 = vmul.f32 %v10626_v47, %v10626_v47 }
 0x32b   : > { %v1602_v46 = vpop.xlane.xlu1 %1601  ;;  %v1725_v15 = vpop.xlane.xlu0 %1724 }
 0x32c   : > { %v1783_v2 = vmul.f32 0.03125, %v1725_v15  ;;  %v10647_v62 = vmul.f32 0.03125, %v1602_v46 }
 0x32e   : > { %v1831_v32 = vsub.f32 %v1783_v2, %v1807_v61  ;;  %v1806_v2 = vmul.f32 %v10647_v62, %v10647_v62 }
 0x32f   : > { %v8966_v24 = vpop.eup %8965  ;;  %v1728_v20 = vpop.xlane.xlu1 %1727 }
 0x330   : > { %v1719_v58 = vpop.xlane.xlu0 %1718  ;;  %v1923_v18 = vmul.f32 %v8966_v24, %v1851_v39  ;;  %v1879_v36 = vadd.f32 1e-05, %v1831_v32  ;;  %v1784_v57 = vmul.f32 0.03125, %v1728_v20  ;;  %v1850_v32 = vsub.f32 %v10424_v16, %v10618_v23 }
 0x331   : > { %v1781_v12 = vmul.f32 0.03125, %v1719_v58 }
 0x332   : > { %v1951_v26 = vmul.f32 %v10634_v31, %v1923_v18  ;;  %8973 = vrsqrt.f32 %v1879_v36  ;;  %v1832_v14 = vsub.f32 %v1784_v57, %v1808_v11 }
 0x333   : > { %v1829_v50 = vsub.f32 %v1781_v12, %v1805_v29  ;;  %v8968_v22 = vpop.eup %8967  ;;  %v1722_v5 = vpop.xlane.xlu1 %1721 }
 0x334   : > { %v8970_v38 = vpop.eup %8969  ;;  %v10653_v35 = vadd.f32 %v10645_v56, %v1951_v26  ;;  %v1924_v7 = vmul.f32 %v8968_v22, %v1852_v59  ;;  %v1880_v43 = vadd.f32 1e-05, %v1832_v14  ;;  %v1617_v61 = vpop.xlane.xlu0 %1616  ;;  %v1782_v39 = vmul.f32 0.03125, %v1722_v5 }
 0x335   : > { %v1877_v15 = vadd.f32 1e-05, %v1829_v50  ;;  %v1921_v46 = vmul.f32 %v8970_v38, %v1849_v63  ;;  %v10665_v18 = vmul.f32 0.03125, %v1617_v61 }
 0x336   : > { %v1952_v24 = vmul.f32 %v10634_v31, %v1924_v7  ;;  %8975 = vrsqrt.f32 %v1880_v43  ;;  %v2027_v49 = vmul.f32 0.044715, %v10653_v35  ;;  %v1830_v29 = vsub.f32 %v1782_v39, %v1806_v2 }
 0x337   : > { %v8972_v51 = vpop.eup %8971  ;;  %v1949_v11 = vmul.f32 %v10634_v31, %v1921_v46  ;;  %8977 = vrsqrt.f32 %v1877_v15  ;;  %v1811_v22 = vmul.f32 %v10665_v18, %v10665_v18  ;;  %v1855_v2 = vsub.f32 %v10440_v6, %v10622_v13 }
 0x338   : > { %v10663_v20 = vadd.f32 %v10645_v56, %v1952_v24  ;;  %v1922_v58 = vmul.f32 %v8972_v51, %v1850_v32  ;;  %v1620_v36 = vpop.xlane.xlu1 %1619  ;;  %v1611_v57 = vpop.xlane.xlu0 %1610  ;;  %v2051_v16 = vmul.f32 %v2027_v49, %v10653_v35  ;;  %v1878_v12 = vadd.f32 1e-05, %v1830_v29 }
 0x339   : > { %v10669_v23 = vadd.f32 %v10645_v56, %v1949_v11  ;;  %v10679_v63 = vmul.f32 0.03125, %v1620_v36  ;;  %v10682_v43 = vmul.f32 0.03125, %v1611_v57  ;;  %v1856_v51 = vsub.f32 %v10450_v19, %v10624_v40 }
 0x33a   : > { %v1950_v59 = vmul.f32 %v10634_v31, %v1922_v58  ;;  %v2028_v26 = vmul.f32 0.044715, %v10663_v20  ;;  %v2075_v14 = vmul.f32 %v2051_v16, %v10653_v35  ;;  %8979 = vrsqrt.f32 %v1878_v12 }
 0x33b   : > { %v2025_v7 = vmul.f32 0.044715, %v10669_v23  ;;  %v1853_v11 = vsub.f32 %v10447_v33, %v10626_v47  ;;  %v1812_v36 = vmul.f32 %v10679_v63, %v10679_v63 }
 0x33c   : > { %v10675_v50 = vadd.f32 %v10645_v56, %v1950_v59  ;;  %v1614_v5 = vpop.xlane.xlu1 %1613  ;;  %v1737_v38 = vpop.xlane.xlu0 %1736  ;;  %v2052_v61 = vmul.f32 %v2028_v26, %v10663_v20  ;;  %v2099_v46 = vadd.f32 %v2075_v14, %v10653_v35  ;;  %v1809_v59 = vmul.f32 %v10682_v43, %v10682_v43 }
 0x33d   : > { %v1787_v15 = vmul.f32 0.03125, %v1737_v38  ;;  %v10688_v39 = vmul.f32 0.03125, %v1614_v5  ;;  %v2049_v24 = vmul.f32 %v2025_v7, %v10669_v23 }
 0x33e   : > { %v2026_v32 = vmul.f32 0.044715, %v10675_v50  ;;  %v2076_v58 = vmul.f32 %v2052_v61, %v10663_v20  ;;  %v2123_v12 = vmul.f32 0.7978846, %v2099_v46 }
 0x33f   : > { %v8974_v49 = vpop.eup %8973  ;;  %v1835_v29 = vsub.f32 %v1787_v15, %v1811_v22  ;;  %v2073_v16 = vmul.f32 %v2049_v24, %v10669_v23  ;;  %v1810_v47 = vmul.f32 %v10688_v39, %v10688_v39 }
 0x340   : > { %v1740_v6 = vpop.xlane.xlu1 %1739  ;;  %v1731_v13 = vpop.xlane.xlu0 %1730  ;;  %v2050_v57 = vmul.f32 %v2026_v32, %v10675_v50  ;;  %v1927_v33 = vmul.f32 %v8974_v49, %v1855_v2  ;;  %v2100_v15 = vadd.f32 %v2076_v58, %v10663_v20  ;;  %8981 = vtanh.f32 %v2123_v12 }
 0x341   : > { %v1883_v19 = vadd.f32 1e-05, %v1835_v29  ;;  %v1788_v40 = vmul.f32 0.03125, %v1740_v6  ;;  %v1785_v26 = vmul.f32 0.03125, %v1731_v13  ;;  %v2097_v22 = vadd.f32 %v2073_v16, %v10669_v23 }
 0x342   : > { %v2074_v14 = vmul.f32 %v2050_v57, %v10675_v50  ;;  %v1854_v16 = vsub.f32 %v10456_v25, %v10647_v62  ;;  %v10713_v58 = vmul.f32 0.5, %v10653_v35 }
 0x343   : > { %v8976_v5 = vpop.eup %8975  ;;  %v1836_v38 = vsub.f32 %v1788_v40, %v1812_v36  ;;  %v1833_v7 = vsub.f32 %v1785_v26, %v1809_v59  ;;  %8983 = vrsqrt.f32 %v1883_v19  ;;  %v2121_v49 = vmul.f32 0.7978846, %v2097_v22 }
 0x344   : > { %v8978_v61 = vpop.eup %8977  ;;  %v1928_v46 = vmul.f32 %v8976_v5, %v1856_v51  ;;  %v1734_v32 = vpop.xlane.xlu1 %1733  ;;  %v2098_v2 = vadd.f32 %v2074_v14, %v10675_v50  ;;  %v1955_v36 = vmul.f32 %v10634_v31, %v1927_v33  ;;  %v2124_v33 = vmul.f32 0.7978846, %v2100_v15 }
 0x345   : > { %v1629_v24 = vpop.xlane.xlu0 %1628  ;;  %v1925_v29 = vmul.f32 %v8978_v61, %v1853_v11  ;;  %v1884_v6 = vadd.f32 1e-05, %v1836_v38  ;;  %v1881_v13 = vadd.f32 1e-05, %v1833_v7  ;;  %v1786_v57 = vmul.f32 0.03125, %v1734_v32 }
 0x346   : > { %v2122_v59 = vmul.f32 0.7978846, %v2098_v2  ;;  %v1956_v51 = vmul.f32 %v10634_v31, %v1928_v46  ;;  %8985 = vtanh.f32 %v2121_v49  ;;  %v10719_v26 = vmul.f32 0.03125, %v1629_v24 }
 0x347   : > { %v1953_v12 = vmul.f32 %v10634_v31, %v1925_v29  ;;  %v1834_v19 = vsub.f32 %v1786_v57, %v1810_v47  ;;  %v8980_v40 = vpop.eup %8979  ;;  %8987 = vrsqrt.f32 %v1881_v13  ;;  %v10725_v5 = vadd.f32 %v10645_v56, %v1955_v36 }
 0x348   : > { %v1632_v25 = vpop.xlane.xlu1 %1631  ;;  %v1926_v35 = vmul.f32 %v8980_v40, %v1854_v16  ;;  %8989 = vrsqrt.f32 %v1884_v6  ;;  %v10730_v38 = vmul.f32 0.5, %v10663_v20  ;;  %v10733_v7 = vadd.f32 %v10645_v56, %v1956_v51 }
 0x349   : > { %v1623_v62 = vpop.xlane.xlu0 %1622  ;;  %v10722_v14 = vadd.f32 %v10645_v56, %v1953_v12  ;;  %v1882_v22 = vadd.f32 1e-05, %v1834_v19  ;;  %8991 = vtanh.f32 %v2122_v59  ;;  %v10736_v61 = vmul.f32 0.03125, %v1632_v25 }
 0x34a   : > { %v1954_v15 = vmul.f32 %v10634_v31, %v1926_v35  ;;  %v1857_v46 = vsub.f32 %v10480_v52, %v10682_v43  ;;  %v10740_v32 = vmul.f32 0.03125, %v1623_v62  ;;  %v10743_v49 = vmul.f32 0.5, %v10669_v23 }
 0x34b   : > { %8993 = vrsqrt.f32 %v1882_v22  ;;  %v1815_v29 = vmul.f32 %v10719_v26, %v10719_v26  ;;  %v2029_v13 = vmul.f32 0.044715, %v10722_v14  ;;  %v1858_v52 = vsub.f32 %v10488_v1, %v10688_v39 }
 0x34c   : > { %v1626_v24 = vpop.xlane.xlu1 %1625  ;;  %8995 = vtanh.f32 %v2124_v33  ;;  %v10746_v20 = vadd.f32 %v10645_v56, %v1954_v15  ;;  %v10756_v57 = vmul.f32 0.5, %v10675_v50  ;;  %v10759_v23 = vmul.f32 0.5, %v10725_v5 }
 0x34d   : > { %v1749_v2 = vpop.xlane.xlu0 %1748  ;;  %v1816_v16 = vmul.f32 %v10736_v61, %v10736_v61  ;;  %v10764_v59 = vmul.f32 0.5, %v10733_v7  ;;  %v2031_v51 = vmul.f32 0.044715, %v10725_v5  ;;  %v8982_v12 = vpop.eup %8981  ;;  %v1813_v1 = vmul.f32 %v10740_v32, %v10740_v32 }
 0x34e   : > { %v1791_v6 = vmul.f32 0.03125, %v1749_v2  ;;  %v10769_v39 = vmul.f32 0.03125, %v1626_v24  ;;  %v2030_v40 = vmul.f32 0.044715, %v10746_v20  ;;  %v2053_v25 = vmul.f32 %v2029_v13, %v10722_v14 }
 0x34f   : > { %v2032_v15 = vmul.f32 0.044715, %v10733_v7  ;;  %v2171_v13 = vadd.f32 1.0, %v8982_v12  ;;  %v10785_v0 = vmul.f32 0.5, %v10722_v14  ;;  %v10796_v28 = vmul.f32 0.5, %v10746_v20 }
 0x350   : > { %v1839_v36 = vsub.f32 %v1791_v6, %v1815_v29  ;;  %v1752_v50 = vpop.xlane.xlu1 %1751  ;;  %v8984_v62 = vpop.eup %8983  ;;  %v2054_v24 = vmul.f32 %v2030_v40, %v10746_v20  ;;  %v2077_v6 = vmul.f32 %v2053_v25, %v10722_v14  ;;  %v2055_v40 = vmul.f32 %v2031_v51, %v10725_v5 }
 0x351   : > { %v1743_v19 = vpop.xlane.xlu0 %1742  ;;  %v1792_v35 = vmul.f32 0.03125, %v1752_v50  ;;  %v2195_v51 = vmul.f32 %v2171_v13, %v10713_v58 }
 0x352   : > { %v1887_v33 = vadd.f32 1e-05, %v1839_v36  ;;  %v1789_v22 = vmul.f32 0.03125, %v1743_v19  ;;  %v1814_v36 = vmul.f32 %v10769_v39, %v10769_v39  ;;  %v2078_v50 = vmul.f32 %v2054_v24, %v10746_v20 }
 0x353   : > { %v1840_v43 = vsub.f32 %v1792_v35, %v1816_v16  ;;  %v8986_v11 = vpop.eup %8985  ;;  %v14870_v16 = vsub.f32 %v10476_v44, %v10665_v18  ;;  %v2101_v55 = vadd.f32 %v2077_v6, %v10722_v14 }
 0x354   : > { %8997 = vrsqrt.f32 %v1887_v33  ;;  %v1837_v47 = vsub.f32 %v1789_v22, %v1813_v1  ;;  %v1746_v19 = vpop.xlane.xlu1 %1745  ;;  %v8988_v29 = vpop.eup %8987  ;;  %v2056_v33 = vmul.f32 %v2032_v15, %v10733_v7  ;;  %v2169_v17 = vadd.f32 1.0, %v8986_v11 }
 0x355   : > { %v1641_v2 = vpop.xlane.xlu0 %1640  ;;  %v1931_v1 = vmul.f32 %v8984_v62, %v14870_v16  ;;  %v1888_v12 = vadd.f32 1e-05, %v1840_v43  ;;  %v8990_v35 = vpop.eup %8989  ;;  %v1929_v22 = vmul.f32 %v8988_v29, %v1857_v46  ;;  %v1790_v54 = vmul.f32 0.03125, %v1746_v19 }
 0x356   : > { %v1885_v25 = vadd.f32 1e-05, %v1837_v47  ;;  %v8992_v30 = vpop.eup %8991  ;;  %v10798_v47 = vmul.f32 0.03125, %v1641_v2  ;;  %v2079_v62 = vmul.f32 %v2055_v40, %v10725_v5  ;;  %v2080_v58 = vmul.f32 %v2056_v33, %v10733_v7 }
 0x357   : > { %8999 = vrsqrt.f32 %v1888_v12  ;;  %v1838_v18 = vsub.f32 %v1790_v54, %v1814_v36  ;;  %v1959_v14 = vmul.f32 %v10634_v31, %v1931_v1  ;;  %v1957_v29 = vmul.f32 %v10634_v31, %v1929_v22 }
 0x358   : > { %v8994_v44 = vpop.eup %8993  ;;  %9001 = vrsqrt.f32 %v1885_v25  ;;  %v1644_v43 = vpop.xlane.xlu1 %1643  ;;  %v2170_v6 = vadd.f32 1.0, %v8992_v30  ;;  %v2102_v13 = vadd.f32 %v2078_v50, %v10746_v20  ;;  %v2125_v19 = vmul.f32 0.7978846, %v2101_v55 }
 0x359   : > { %v1635_v46 = vpop.xlane.xlu0 %1634  ;;  %v8996_v15 = vpop.eup %8995  ;;  %v1930_v11 = vmul.f32 %v8994_v44, %v1858_v52  ;;  %v1886_v24 = vadd.f32 1e-05, %v1838_v18  ;;  %v14871_v54 = vsub.f32 %v10485_v41, %v10679_v63  ;;  %v10808_v36 = vmul.f32 0.03125, %v1644_v43 }
 0x35a   : > { %v2193_v40 = vmul.f32 %v2169_v17, %v10743_v49  ;;  %v2172_v16 = vadd.f32 1.0, %v8996_v15  ;;  %v1819_v52 = vmul.f32 %v10798_v47, %v10798_v47  ;;  %v2194_v20 = vmul.f32 %v2170_v6, %v10756_v57 }
 0x35b   : > { %v1932_v2 = vmul.f32 %v8990_v35, %v14871_v54  ;;  %v1958_v1 = vmul.f32 %v10634_v31, %v1930_v11  ;;  %9003 = vrsqrt.f32 %v1886_v24  ;;  %v10816_v55 = vadd.f32 %v10645_v56, %v1957_v29 }
 0x35c   : > { %v1638_v12 = vpop.xlane.xlu1 %1637  ;;  %v10818_v41 = vmul.f32 0.03125, %v1635_v46  ;;  %v2196_v50 = vmul.f32 %v2172_v16, %v10730_v38  ;;  %v2217_v17 = vpack.c.bf16 %v2194_v20, %v2193_v40  ;;  %v2126_v49 = vmul.f32 0.7978846, %v2102_v13 }
 0x35d   : > { %v1761_v30 = vpop.xlane.xlu0 %1760  ;;  %9005 = vtanh.f32 %v2125_v19  ;;  %v2103_v25 = vadd.f32 %v2079_v62, %v10725_v5  ;;  %v1960_v33 = vmul.f32 %v10634_v31, %v1932_v2  ;;  %v1820_v35 = vmul.f32 %v10808_v36, %v10808_v36 }
 0x35e   : > { %v1795_v63 = vmul.f32 0.03125, %v1761_v30  ;;  %v2218_v57 = vpack.c.bf16 %v2196_v50, %v2195_v51  ;;  %v10826_v18 = vadd.f32 %v10645_v56, %v1958_v1  ;;  %8469 = vmatprep.mubr.msk.bf16.mxu1 %vm582_vm1, %v2217_v17  ;;  %9007 = vtanh.f32 %v2126_v49 }
 0x35f   : > { %v2104_v46 = vadd.f32 %v2080_v58, %v10733_v7  ;;  %v2127_v15 = vmul.f32 0.7978846, %v2103_v25  ;;  %v1817_v5 = vmul.f32 %v10818_v41, %v10818_v41  ;;  %v10833_v11 = vmul.f32 0.03125, %v1638_v12 }
 0x360   : > { %v1843_v22 = vsub.f32 %v1795_v63, %v1819_v52  ;;  %v1764_v43 = vpop.xlane.xlu1 %1763  ;;  %8470 = vmatmul.mubr.msk.bf16.vlgmr.msra.gmra.mxu1 %vm582_vm1, %v2218_v57  ;;  %v2033_v6 = vmul.f32 0.044715, %v10816_v55  ;;  %v10837_v13 = vadd.f32 %v10645_v56, %v1959_v14  ;;  %v14872_v7 = vsub.f32 %v10504_v53, %v10719_v26 }
 0x361   : > { %v8998_v44 = vpop.eup %8997  ;;  %v1755_v38 = vpop.xlane.xlu0 %1754  ;;  %v1796_v29 = vmul.f32 0.03125, %v1764_v43  ;;  %v2128_v24 = vmul.f32 0.7978846, %v2104_v46  ;;  %9009 = vtanh.f32 %v2127_v15  ;;  %v10843_v40 = vadd.f32 %v10645_v56, %v1960_v33 }
 0x362   : > { %v1891_v62 = vadd.f32 1e-05, %v1843_v22  ;;  %v1793_v51 = vmul.f32 0.03125, %v1755_v38  ;;  %v1935_v58 = vmul.f32 %v8998_v44, %v14872_v7  ;;  %v2034_v52 = vmul.f32 0.044715, %v10826_v18 }
 0x363   : > { %v1844_v19 = vsub.f32 %v1796_v29, %v1820_v35  ;;  %9011 = vtanh.f32 %v2128_v24  ;;  %v2057_v12 = vmul.f32 %v2033_v6, %v10816_v55  ;;  %v14873_v14 = vsub.f32 %v10514_v8, %v10736_v61 }
 0x364   : > { %v1841_v54 = vsub.f32 %v1793_v51, %v1817_v5  ;;  %v9000_v2 = vpop.eup %8999  ;;  %v1758_v16 = vpop.xlane.xlu1 %1757  ;;  %v1867_v53 = vsub.f32 %v10539_v10, %v10798_v47  ;;  %9013 = vrsqrt.f32 %v1891_v62  ;;  %v1868_v63 = vsub.f32 %v10549_v45, %v10808_v36 }
 0x365   : > { %v1653_v1 = vpop.xlane.xlu0 %1652  ;;  %v9002_v30 = vpop.eup %9001  ;;  %v1936_v20 = vmul.f32 %v9000_v2, %v14873_v14  ;;  %v1818_v50 = vmul.f32 %v10833_v11, %v10833_v11  ;;  %v1794_v17 = vmul.f32 0.03125, %v1758_v16  ;;  %v2058_v49 = vmul.f32 %v2034_v52, %v10826_v18 }
 0x366   : > { %v1889_v26 = vadd.f32 1e-05, %v1841_v54  ;;  %v1963_v25 = vmul.f32 %v10634_v31, %v1935_v58  ;;  %v14874_v8 = vsub.f32 %v10511_v9, %v10740_v32  ;;  %v1892_v33 = vadd.f32 1e-05, %v1844_v19 }
 0x367   : > { %v10861_v35 = vmul.f32 0.03125, %v1653_v1  ;;  %v1964_v22 = vmul.f32 %v10634_v31, %v1936_v20  ;;  %v1842_v57 = vsub.f32 %v1794_v17, %v1818_v50  ;;  %v2081_v38 = vmul.f32 %v2057_v12, %v10816_v55 }
 0x368   : > { %v1933_v61 = vmul.f32 %v9002_v30, %v14874_v8  ;;  %9015 = vrsqrt.f32 %v1889_v26  ;;  %v1656_v44 = vpop.xlane.xlu1 %1655  ;;  %v9004_v46 = vpop.eup %9003  ;;  %v1865_v15 = vsub.f32 %v10546_v42, %v10818_v41  ;;  %v1866_v5 = vsub.f32 %v10555_v21, %v10833_v11 }
 0x369   : > { %v1647_v43 = vpop.xlane.xlu0 %1646  ;;  %v10872_v32 = vmul.f32 0.5, %v10816_v55  ;;  %v14875_v62 = vsub.f32 %v10523_v3, %v10769_v39  ;;  %v1890_v51 = vadd.f32 1e-05, %v1842_v57  ;;  %v10878_v24 = vmul.f32 0.5, %v10826_v18 }
 0x36a   : > { %v10869_v9 = vmul.f32 0.03125, %v1647_v43  ;;  %v2082_v6 = vmul.f32 %v2058_v49, %v10826_v18  ;;  %v9006_v7 = vpop.eup %9005  ;;  %v10882_v58 = vadd.f32 %v10645_v56, %v1963_v25  ;;  %v1961_v19 = vmul.f32 %v10634_v31, %v1933_v61 }
 0x36b   : > { %v1934_v29 = vmul.f32 %v9004_v46, %v14875_v62  ;;  %9017 = vrsqrt.f32 %v1892_v33  ;;  %v1823_v54 = vmul.f32 %v10861_v35, %v10861_v35  ;;  %v10888_v2 = vadd.f32 %v10645_v56, %v1964_v22  ;;  %v9008_v52 = vpop.eup %9007 }
 0x36c   : > { %9019 = vrsqrt.f32 %v1890_v51  ;;  %v1650_v3 = vpop.xlane.xlu1 %1649  ;;  %v2173_v16 = vadd.f32 1.0, %v9006_v7  ;;  %v2105_v1 = vadd.f32 %v2081_v38, %v10816_v55  ;;  %v1821_v12 = vmul.f32 %v10869_v9, %v10869_v9 }
 0x36d   : > { %v1767_v39 = vpop.xlane.xlu0 %1766  ;;  %v10893_v30 = vmul.f32 0.03125, %v1650_v3  ;;  %v2106_v20 = vadd.f32 %v2082_v6, %v10826_v18  ;;  %v1962_v26 = vmul.f32 %v10634_v31, %v1934_v29  ;;  %v10897_v50 = vmul.f32 0.03125, %v1656_v44 }
 0x36e   : > { %v1797_v14 = vmul.f32 0.03125, %v1767_v39  ;;  %v2174_v17 = vadd.f32 1.0, %v9008_v52  ;;  %v2129_v49 = vmul.f32 0.7978846, %v2105_v1  ;;  %v9010_v25 = vpop.eup %9009  ;;  %v2197_v61 = vmul.f32 %v2173_v16, %v10785_v0 }
 0x36f   : > { %v2130_v55 = vmul.f32 0.7978846, %v2106_v20  ;;  %v2035_v33 = vmul.f32 0.044715, %v10837_v13  ;;  %v2175_v57 = vadd.f32 1.0, %v9010_v25  ;;  %v1822_v44 = vmul.f32 %v10893_v30, %v10893_v30 }
 0x370   : > { %v1845_v8 = vsub.f32 %v1797_v14, %v1821_v12  ;;  %v2198_v22 = vmul.f32 %v2174_v17, %v10796_v28  ;;  %v1770_v43 = vpop.xlane.xlu1 %1769  ;;  %9021 = vtanh.f32 %v2129_v49  ;;  %v2036_v18 = vmul.f32 0.044715, %v10843_v40  ;;  %v9012_v46 = vpop.eup %9011 }
 0x371   : > { %v1773_v38 = vpop.xlane.xlu0 %1772  ;;  %v1798_v29 = vmul.f32 0.03125, %v1770_v43  ;;  %v9014_v6 = vpop.eup %9013  ;;  %v10906_v0 = vadd.f32 %v10645_v56, %v1961_v19  ;;  %v2176_v3 = vadd.f32 1.0, %v9012_v46  ;;  %9023 = vtanh.f32 %v2130_v55 }
 0x372   : > { %v1893_v62 = vadd.f32 1e-05, %v1845_v8  ;;  %v1799_v51 = vmul.f32 0.03125, %v1773_v38  ;;  %v2219_v7 = vpack.c.bf16 %v2198_v22, %v2197_v61  ;;  %v1824_v28 = vmul.f32 %v10897_v50, %v10897_v50 }
 0x373   : > { %v1846_v39 = vsub.f32 %v1798_v29, %v1822_v44  ;;  %v2199_v1 = vmul.f32 %v2175_v57, %v10759_v23  ;;  %v2200_v52 = vmul.f32 %v2176_v3, %v10764_v59  ;;  %v2059_v14 = vmul.f32 %v2035_v33, %v10837_v13 }
 0x374   : > { %9025 = vrsqrt.f32 %v1893_v62  ;;  %v1847_v16 = vsub.f32 %v1799_v51, %v1823_v54  ;;  %8473 = vmatprep.mubr.msk.bf16.mxu1 %vm582_vm1, %v2219_v7  ;;  %v1776_v12 = vpop.xlane.xlu1 %1775  ;;  %v2060_v19 = vmul.f32 %v2036_v18, %v10843_v40  ;;  %v10916_v17 = vadd.f32 %v10645_v56, %v1962_v26 }
 0x375   : > { %v9016_v20 = vpop.eup %9015  ;;  %v1939_v49 = vmul.f32 %v9014_v6, %v1867_v53  ;;  %v1894_v54 = vadd.f32 1e-05, %v1846_v39  ;;  %v2220_v59 = vpack.c.bf16 %v2200_v52, %v2199_v1  ;;  %v1800_v8 = vmul.f32 0.03125, %v1776_v12 }
 0x376   : > { %v1895_v25 = vadd.f32 1e-05, %v1847_v16  ;;  %v1937_v23 = vmul.f32 %v9016_v20, %v1865_v15  ;;  %v2083_v61 = vmul.f32 %v2059_v14, %v10837_v13  ;;  %v1871_v55 = vsub.f32 %v10571_v37, %v10861_v35 }
 0x377   : > { %v1869_v26 = vsub.f32 %v10578_v48, %v10869_v9  ;;  %9027 = vrsqrt.f32 %v1894_v54  ;;  %v2084_v10 = vmul.f32 %v2060_v19, %v10843_v40  ;;  %8474 = vmatmul.mubr.msk.bf16.gmra.mxu1 %vm582_vm1, %v2220_v59  ;;  %v1848_v42 = vsub.f32 %v1800_v8, %v1824_v28 }
 0x378   : > { %v9018_v47 = vpop.eup %9017  ;;  %v1965_v53 = vmul.f32 %v10634_v31, %v1937_v23  ;;  %9029 = vrsqrt.f32 %v1895_v25  ;;  %v2107_v41 = vadd.f32 %v2083_v61, %v10837_v13  ;;  %v1870_v33 = vsub.f32 %v10587_v27, %v10893_v30 }
 0x379   : > { %v9020_v15 = vpop.eup %9019  ;;  %v2108_v22 = vadd.f32 %v2084_v10, %v10843_v40  ;;  %v2037_v48 = vmul.f32 0.044715, %v10906_v0  ;;  %v2038_v9 = vmul.f32 0.044715, %v10916_v17  ;;  %v1967_v57 = vmul.f32 %v10634_v31, %v1939_v49  ;;  %v10973_v10 = vpop.f32.mrf.mxu1 }
 0x37a   : > { %v1938_v43 = vmul.f32 %v9020_v15, %v1866_v5  ;;  %v1896_v38 = vadd.f32 1e-05, %v1848_v42  ;;  %v2131_v18 = vmul.f32 0.7978846, %v2107_v41  ;;  %v1940_v46 = vmul.f32 %v9018_v47, %v1868_v63 }
 0x37b   : > { %v2132_v44 = vmul.f32 0.7978846, %v2108_v22  ;;  %v2061_v27 = vmul.f32 %v2037_v48, %v10906_v0  ;;  %v2062_v30 = vmul.f32 %v2038_v9, %v10916_v17  ;;  %v10948_v62 = vadd.f32 %v10645_v56, %v1965_v53 }
 0x37c   : > { %v1966_v29 = vmul.f32 %v10634_v31, %v1938_v43  ;;  %9031 = vrsqrt.f32 %v1896_v38  ;;  %v2039_v21 = vmul.f32 0.044715, %v10882_v58  ;;  %v2040_v36 = vmul.f32 0.044715, %v10888_v2 }
 0x37d   : > { %v9022_v11 = vpop.eup %9021  ;;  %9033 = vtanh.f32 %v2131_v18  ;;  %v2085_v5 = vmul.f32 %v2061_v27, %v10906_v0  ;;  %v2086_v45 = vmul.f32 %v2062_v30, %v10916_v17  ;;  %v1968_v3 = vmul.f32 %v10634_v31, %v1940_v46  ;;  %v10991_v46 = vpop.f32.mrf.mxu1 }
 0x37e   : > { %v10956_v63 = vadd.f32 %v10645_v56, %v1966_v29  ;;  %v2177_v51 = vadd.f32 1.0, %v9022_v11  ;;  %9035 = vtanh.f32 %v2132_v44  ;;  %v2063_v6 = vmul.f32 %v2039_v21, %v10882_v58  ;;  %v9024_v7 = vpop.eup %9023 }
 0x37f   : > { %v2109_v28 = vadd.f32 %v2085_v5, %v10906_v0  ;;  %v2110_v39 = vadd.f32 %v2086_v45, %v10916_v17  ;;  %v2064_v16 = vmul.f32 %v2040_v36, %v10888_v2  ;;  %v10964_v52 = vadd.f32 %v10645_v56, %v1967_v57 }
 0x380   : > { %v2178_v12 = vadd.f32 1.0, %v9024_v7  ;;  %v2201_v14 = vmul.f32 %v2177_v51, %v10872_v32  ;;  %v2087_v19 = vmul.f32 %v2063_v6, %v10882_v58  ;;  %v2041_v8 = vmul.f32 0.044715, %v10948_v62  ;;  %v11009_v7 = vpop.f32.mrf.mxu1 }
 0x381   : > { %v9026_v1 = vpop.eup %9025  ;;  %v2133_v49 = vmul.f32 0.7978846, %v2109_v28  ;;  %v2134_v54 = vmul.f32 0.7978846, %v2110_v39  ;;  %v2088_v25 = vmul.f32 %v2064_v16, %v10888_v2  ;;  %v2042_v61 = vmul.f32 0.044715, %v10956_v63 }
 0x382   : > { %v1941_v20 = vmul.f32 %v9026_v1, %v1869_v26  ;;  %v2202_v23 = vmul.f32 %v2178_v12, %v10878_v24  ;;  %v2111_v59 = vadd.f32 %v2087_v19, %v10882_v58  ;;  %v10976_v47 = vadd.f32 %v10645_v56, %v1968_v3 }
 0x383   : > { %9037 = vtanh.f32 %v2133_v49  ;;  %v2112_v26 = vadd.f32 %v2088_v25, %v10888_v2  ;;  %v2065_v41 = vmul.f32 %v2041_v8, %v10948_v62  ;;  %v2011_v48 = vmul.f32 0.5, %v10837_v13 }
 0x384   : > { %v1969_v32 = vmul.f32 %v10634_v31, %v1941_v20  ;;  %v9028_v53 = vpop.eup %9027  ;;  %v2221_v42 = vpack.c.bf16 %v2202_v23, %v2201_v14  ;;  %9039 = vtanh.f32 %v2134_v54  ;;  %v2135_v24 = vmul.f32 0.7978846, %v2111_v59  ;;  %v11024_v59 = vpop.f32.mrf.mxu1 }
 0x385   : > { %v9030_v15 = vpop.eup %9029  ;;  %v1942_v22 = vmul.f32 %v9028_v53, %v1870_v33  ;;  %v2136_v9 = vmul.f32 0.7978846, %v2112_v26  ;;  %v2066_v57 = vmul.f32 %v2042_v61, %v10956_v63  ;;  %v2089_v18 = vmul.f32 %v2065_v41, %v10948_v62 }
 0x386   : > { %v10984_v43 = vadd.f32 %v10645_v56, %v1969_v32  ;;  %v1943_v38 = vmul.f32 %v9030_v15, %v1871_v55  ;;  %8477 = vmatprep.mubr.msk.bf16.mxu1 %vm582_vm1, %v2221_v42  ;;  %9041 = vtanh.f32 %v2135_v24  ;;  %v2043_v44 = vmul.f32 0.044715, %v10964_v52 }
 0x387   : > { %v1970_v33 = vmul.f32 %v10634_v31, %v1942_v22  ;;  %9043 = vtanh.f32 %v2136_v9  ;;  %v2090_v13 = vmul.f32 %v2066_v57, %v10956_v63  ;;  %v1872_v27 = vsub.f32 %v10581_v34, %v10897_v50 }
 0x388   : > { %v1971_v37 = vmul.f32 %v10634_v31, %v1943_v38  ;;  %v2113_v35 = vadd.f32 %v2089_v18, %v10948_v62  ;;  %v2044_v55 = vmul.f32 0.044715, %v10976_v47  ;;  %v2012_v21 = vmul.f32 0.5, %v10843_v40 }
 0x389   : > { %v9032_v30 = vpop.eup %9031  ;;  %v11002_v29 = vadd.f32 %v10645_v56, %v1970_v33  ;;  %v2114_v11 = vadd.f32 %v2090_v13, %v10956_v63  ;;  %v2067_v5 = vmul.f32 %v2043_v44, %v10964_v52  ;;  %v2045_v50 = vmul.f32 0.044715, %v10984_v43 }
 0x38a   : > { %v9034_v45 = vpop.eup %9033  ;;  %v1944_v36 = vmul.f32 %v9032_v30, %v1872_v27  ;;  %v2137_v51 = vmul.f32 0.7978846, %v2113_v35  ;;  %v2068_v34 = vmul.f32 %v2044_v55, %v10976_v47  ;;  %v11012_v3 = vadd.f32 %v10645_v56, %v1971_v37 }
 0x38b   : > { %v9036_v6 = vpop.eup %9035  ;;  %v2179_v28 = vadd.f32 1.0, %v9034_v45  ;;  %v2138_v39 = vmul.f32 0.7978846, %v2114_v11  ;;  %v2091_v40 = vmul.f32 %v2067_v5, %v10964_v52  ;;  %v2046_v20 = vmul.f32 0.044715, %v11002_v29 }
 0x38c   : > { %v1972_v16 = vmul.f32 %v10634_v31, %v1944_v36  ;;  %v2180_v1 = vadd.f32 1.0, %v9036_v6  ;;  %9045 = vtanh.f32 %v2137_v51  ;;  %v2092_v12 = vmul.f32 %v2068_v34, %v10976_v47 }
 0x38d   : > { %v2203_v14 = vmul.f32 %v2179_v28, %v2011_v48  ;;  %9047 = vtanh.f32 %v2138_v39  ;;  %v2115_v19 = vadd.f32 %v2091_v40, %v10964_v52  ;;  %v2069_v23 = vmul.f32 %v2045_v50, %v10984_v43 }
 0x38e   : > { %v11020_v49 = vadd.f32 %v10645_v56, %v1972_v16  ;;  %v2204_v54 = vmul.f32 %v2180_v1, %v2012_v21  ;;  %v2116_v25 = vadd.f32 %v2092_v12, %v10976_v47  ;;  %v2013_v31 = vmul.f32 0.5, %v10906_v0 }
 0x38f   : > { %v2139_v8 = vmul.f32 0.7978846, %v2115_v19  ;;  %v2070_v61 = vmul.f32 %v2046_v20, %v11002_v29  ;;  %v2047_v32 = vmul.f32 0.044715, %v11012_v3  ;;  %v2014_v42 = vmul.f32 0.5, %v10916_v17  ;;  %v11036_v17 = vpop.f32.mrf.mxu1 }
 0x390   : > { %v9038_v26 = vpop.eup %9037  ;;  %v2222_v53 = vpack.c.bf16 %v2204_v54, %v2203_v14  ;;  %v2140_v56 = vmul.f32 0.7978846, %v2116_v25  ;;  %v2093_v24 = vmul.f32 %v2069_v23, %v10984_v43  ;;  %v2048_v48 = vmul.f32 0.044715, %v11020_v49 }
 0x391   : > { %v9040_v41 = vpop.eup %9039  ;;  %v2181_v15 = vadd.f32 1.0, %v9038_v26  ;;  %9049 = vtanh.f32 %v2139_v8  ;;  %v2094_v22 = vmul.f32 %v2070_v61, %v11002_v29  ;;  %v2071_v57 = vmul.f32 %v2047_v32, %v11012_v3  ;;  %v11045_v51 = vpop.f32.mrf.mxu1 }
 0x392   : > { %8478 = vmatmul.mubr.msk.bf16.gmra.mxu1 %vm582_vm1, %v2222_v53  ;;  %v2182_v0 = vadd.f32 1.0, %v9040_v41  ;;  %9051 = vtanh.f32 %v2140_v56  ;;  %v2117_v9 = vadd.f32 %v2093_v24, %v10984_v43  ;;  %v2015_v33 = vmul.f32 0.5, %v10882_v58 }
 0x393   : > { %v9042_v38 = vpop.eup %9041  ;;  %v2205_v18 = vmul.f32 %v2181_v15, %v2013_v31  ;;  %v2118_v13 = vadd.f32 %v2094_v22, %v11002_v29  ;;  %v2072_v44 = vmul.f32 %v2048_v48, %v11020_v49  ;;  %v2095_v30 = vmul.f32 %v2071_v57, %v11012_v3  ;;  %v11049_v12 = vpop.f32.mrf.mxu1 }
 0x394   : > { %v9044_v27 = vpop.eup %9043  ;;  %v2206_v37 = vmul.f32 %v2182_v0, %v2014_v42  ;;  %v2183_v35 = vadd.f32 1.0, %v9042_v38  ;;  %v2141_v55 = vmul.f32 0.7978846, %v2117_v9  ;;  %v2016_v21 = vmul.f32 0.5, %v10888_v2 }
 0x395   : > { %v2184_v11 = vadd.f32 1.0, %v9044_v27  ;;  %v2142_v5 = vmul.f32 0.7978846, %v2118_v13  ;;  %v2096_v45 = vmul.f32 %v2072_v44, %v11020_v49  ;;  %v2119_v58 = vadd.f32 %v2095_v30, %v11012_v3  ;;  %v11054_v8 = vpop.f32.mrf.mxu1 }
 0x396   : > { %v2223_v36 = vpack.c.bf16 %v2206_v37, %v2205_v18  ;;  %9053 = vtanh.f32 %v2141_v55  ;;  %v2207_v34 = vmul.f32 %v2183_v35, %v2015_v33  ;;  %v2017_v14 = vmul.f32 0.5, %v10948_v62 }
 0x397   : > { %v2208_v50 = vmul.f32 %v2184_v11, %v2016_v21  ;;  %9055 = vtanh.f32 %v2142_v5  ;;  %v2120_v6 = vadd.f32 %v2096_v45, %v11020_v49  ;;  %v2143_v28 = vmul.f32 0.7978846, %v2119_v58  ;;  %v11059_v24 = vpop.f32.mrf.mxu1 }
 0x398   : > { %8481 = vmatprep.mubr.msk.bf16.mxu1 %vm582_vm1, %v2223_v36  ;;  %v2018_v19 = vmul.f32 0.5, %v10956_v63  ;;  %v2019_v26 = vmul.f32 0.5, %v10964_v52  ;;  %v2020_v53 = vmul.f32 0.5, %v10976_v47  ;;  %v2021_v48 = vmul.f32 0.5, %v10984_v43 }
 0x399   : > { %v9046_v39 = vpop.eup %9045  ;;  %v2224_v2 = vpack.c.bf16 %v2208_v50, %v2207_v34  ;;  %v2144_v40 = vmul.f32 0.7978846, %v2120_v6  ;;  %9057 = vtanh.f32 %v2143_v28  ;;  %v2022_v0 = vmul.f32 0.5, %v11002_v29  ;;  %v11064_v47 = vpop.f32.mrf.mxu1 }
 0x39a   : > { %v9048_v16 = vpop.eup %9047  ;;  %v2185_v1 = vadd.f32 1.0, %v9046_v39  ;;  %14876 = vst [vmem:[#allocation8_spill] sm:$0xff] %v11064_v47  ;;  %v2023_v44 = vmul.f32 0.5, %v11012_v3  ;;  %v2024_v27 = vmul.f32 0.5, %v11020_v49 }
 0x39b   : > { %8482 = vmatmul.mubr.msk.bf16.gmra.mxu1 %vm582_vm1, %v2224_v2  ;;  %v2186_v20 = vadd.f32 1.0, %v9048_v16  ;;  %9059 = vtanh.f32 %v2144_v40  ;;  %v11068_v35 = vpop.f32.mrf.mxu1 }
 0x39c   : > { %v2209_v54 = vmul.f32 %v2185_v1, %v2017_v14 }
 0x39d   : > { %v2210_v25 = vmul.f32 %v2186_v20, %v2018_v19  ;;  %v11071_v30 = vpop.f32.mrf.mxu1 }
 0x39e   : > { %v9050_v23 = vpop.eup %9049  ;;  %14877 = vst [vmem:[#allocation9_spill] sm:$0xff] %v11071_v30 }
 0x39f   : > { %v9052_v31 = vpop.eup %9051  ;;  %v2225_v61 = vpack.c.bf16 %v2210_v25, %v2209_v54  ;;  %v2187_v32 = vadd.f32 1.0, %v9050_v23  ;;  %v11074_v21 = vpop.f32.mrf.mxu1 }
 0x3a0   : > { %v2188_v42 = vadd.f32 1.0, %v9052_v31 }
 0x3a1   : > { %8485 = vmatprep.mubr.msk.bf16.mxu1 %vm582_vm1, %v2225_v61  ;;  %v2211_v62 = vmul.f32 %v2187_v32, %v2019_v26  ;;  %v11076_v11 = vpop.f32.mrf.mxu1 }
 0x3a2   : > { %v2212_v56 = vmul.f32 %v2188_v42, %v2020_v53 }
 0x3a3   : > { %v9054_v63 = vpop.eup %9053  ;;  %v11078_v5 = vpop.f32.mrf.mxu1 }
 0x3a4   : > { %v9056_v41 = vpop.eup %9055  ;;  %v2226_v15 = vpack.c.bf16 %v2212_v56, %v2211_v62  ;;  %v2189_v22 = vadd.f32 1.0, %v9054_v63  ;;  %v11133_v62 = vld [vmem:[%s14860_s5 + $0x6] ss:$0 sm:$0xff] }
 0x3a5   : > { %v2190_v9 = vadd.f32 1.0, %v9056_v41  ;;  %v11080_v3 = vpop.f32.mrf.mxu1 }
 0x3a6   : > { %8486 = vmatmul.mubr.msk.bf16.gmra.mxu1 %vm582_vm1, %v2226_v15  ;;  %v9058_v52 = vpop.eup %9057  ;;  %v2213_v57 = vmul.f32 %v2189_v22, %v2021_v48  ;;  %14878 = vst [vmem:[#allocation10_spill] sm:$0xff] %v11080_v3 }
 0x3a7   : > { %v2214_v38 = vmul.f32 %v2190_v9, %v2022_v0  ;;  %v2191_v33 = vadd.f32 1.0, %v9058_v52  ;;  %v11082_v49 = vpop.f32.mrf.mxu1  ;;  %v14891_v0 = vld [vmem:[#allocation6_spill] sm:$0xff] }
 0x3a8   : > { %v9060_v18 = vpop.eup %9059 }
 0x3a9   : > { %v2227_v13 = vpack.c.bf16 %v2214_v38, %v2213_v57  ;;  %v2192_v37 = vadd.f32 1.0, %v9060_v18  ;;  %v2215_v43 = vmul.f32 %v2191_v33, %v2023_v44  ;;  %v11084_v45 = vpop.f32.mrf.mxu1  ;;  %v14892_v18 = vld [vmem:[#allocation3_spill] sm:$0xff] }
 0x3aa   : > { %14879 = vst [vmem:[#allocation11_spill] sm:$0xff] %v11084_v45 }
 0x3ab   : > { %8489 = vmatprep.mubr.msk.bf16.mxu1 %vm582_vm1, %v2227_v13  ;;  %v2216_v29 = vmul.f32 %v2192_v37, %v2024_v27  ;;  %v11086_v36 = vpop.f32.mrf.mxu1 }
 0x3ad   : > { %v2228_v55 = vpack.c.bf16 %v2216_v29, %v2215_v43  ;;  %v11088_v58 = vpop.f32.mrf.mxu1 }
 0x3ae   : > { %14880 = vst [vmem:[#allocation12_spill] sm:$0xff] %v11088_v58 }
 0x3af   : > { %8490 = vmatmul.mubr.msk.bf16.gmra.mxu1 %vm582_vm1, %v2228_v55  ;;  %v11090_v34 = vpop.f32.mrf.mxu1 }
 0x3b1   : > { %v11092_v50 = vpop.f32.mrf.mxu1 }
 0x3b2   : > { %14881 = vst [vmem:[#allocation13_spill] sm:$0xff] %v11092_v50 }
 0x3b3   : > { %v11094_v6 = vpop.f32.mrf.mxu1 }
 0x3b5   : > { %v11096_v28 = vpop.f32.mrf.mxu1 }
 0x3b6   : > { %14882 = vst [vmem:[#allocation14_spill] sm:$0xff] %v11096_v28 }
 0x3b7   : > { %v11098_v39 = vpop.f32.mrf.mxu1 }
 0x3b9   : > { %v11100_v2 = vpop.f32.mrf.mxu1 }
 0x3ba   : > { %14883 = vst [vmem:[#allocation15_spill] sm:$0xff] %v11100_v2 }
 0x3bb   : > { %v11102_v40 = vpop.f32.mrf.mxu1 }
 0x3bd   : > { %v11104_v16 = vpop.f32.mrf.mxu1 }
 0x3be   : > { %14884 = vst [vmem:[#allocation16_spill] sm:$0xff] %v11104_v16 }
 0x3bf   : > { %v11106_v1 = vpop.f32.mrf.mxu1 }
 0x3c1   : > { %v11108_v14 = vpop.f32.mrf.mxu1 }
 0x3c2   : > { %14885 = vst [vmem:[#allocation17_spill] sm:$0xff] %v11108_v14 }
 0x3c3   : > { %v11110_v19 = vpop.f32.mrf.mxu1 }
 0x3c5   : > { %v11112_v20 = vpop.f32.mrf.mxu1 }
 0x3c6   : > { %14886 = vst [vmem:[#allocation18_spill] sm:$0xff] %v11112_v20 }
 0x3c7   : > { %v11114_v54 = vpop.f32.mrf.mxu1 }
 0x3c9   : > { %v11116_v25 = vpop.f32.mrf.mxu1 }
 0x3ca   : > { %14887 = vst [vmem:[#allocation19_spill] sm:$0xff] %v11116_v25 }
 0x3cb   : > { %v11118_v23 = vpop.f32.mrf.mxu1 }
 0x3cd   : > { %v11120_v31 = vpop.f32.mrf.mxu1 }
 0x3ce   : > { %14888 = vst [vmem:[#allocation20_spill] sm:$0xff] %v11120_v31 }
 0x3cf   : > { %v11122_v61 = vpop.f32.mrf.mxu1 }
 0x3d1   : > { %v11124_v32 = vpop.f32.mrf.mxu1 }
 0x3d2   : > { %14889 = vst [vmem:[#allocation21_spill] sm:$0xff] %v11124_v32 }
 0x3d3   : > { %v11126_v26 = vpop.f32.mrf.mxu1 }
 0x3d5   : > { %v11128_v53 = vpop.f32.mrf.mxu1 }
 0x3d6   : > { %14890 = vst [vmem:[#allocation22_spill] sm:$0xff] %v11128_v53 }
 0x420   : > { %v8471_v42 = vpop.f32.mrf.mxu1 }
 0x421   : > { %v2320_v56 = vadd.f32 %v8471_v42, %v10399_v4 }
 0x422   : > { %v2311_v63 = vpop.f32.mrf.mxu1 }
 0x423   : > { %v11137_v41 = vadd.f32 %v11133_v62, %v2320_v56  ;;  %v2312_v15 = vadd.f32 %v2311_v63, %v10391_v60 }
 0x424   : > { %v8472_v22 = vpop.f32.mrf.mxu1 }
 0x425   : > { %v11141_v48 = vadd.f32 %v11133_v62, %v2312_v15  ;;  %v2323_v9 = vadd.f32 %v8472_v22, %v14891_v0  ;;  %v2443_v52 = vsel %vm414_vm0, %v11137_v41, 0.0  ;;  %v2536_v37 = vmul.f32 %v11137_v41, %v11137_v41 }
 0x426   : > { %2444 = vadd.xlane.f32.xlu0 %v2443_v52  ;;  %v2314_v57 = vpop.f32.mrf.mxu1 }
 0x427   : > { %v11147_v38 = vadd.f32 %v11133_v62, %v2323_v9  ;;  %v2315_v33 = vadd.f32 %v2314_v57, %v14892_v18  ;;  %v2437_v27 = vsel %vm414_vm0, %v11141_v48, 0.0  ;;  %v2564_v29 = vsel %vm414_vm0, %v2536_v37, 0.0 }
 0x428   : > { %v2534_v42 = vmul.f32 %v11141_v48, %v11141_v48 }
 0x429   : > { %v11151_v13 = vadd.f32 %v11133_v62, %v2315_v33  ;;  %v2446_v44 = vsel %vm414_vm0, %v11147_v38, 0.0  ;;  %v2537_v55 = vmul.f32 %v11147_v38, %v11147_v38 }
 0x42a   : > { %2447 = vadd.xlane.f32.xlu1 %v2446_v44  ;;  %2438 = vadd.xlane.f32.xlu0 %v2437_v27  ;;  %v2558_v63 = vsel %vm414_vm0, %v2534_v42, 0.0 }
 0x42b   : > { %v2440_v43 = vsel %vm414_vm0, %v11151_v13, 0.0  ;;  %v2567_v56 = vsel %vm414_vm0, %v2537_v55, 0.0  ;;  %v2535_v15 = vmul.f32 %v11151_v13, %v11151_v13 }
 0x42d   : > { %v2561_v22 = vsel %vm414_vm0, %v2535_v15, 0.0 }
 0x42e   : > { %2441 = vadd.xlane.f32.xlu1 %v2440_v43  ;;  %2565 = vadd.xlane.f32.xlu0 %v2564_v29 }
 0x432   : > { %2568 = vadd.xlane.f32.xlu1 %v2567_v56  ;;  %2559 = vadd.xlane.f32.xlu0 %v2558_v63 }
 0x436   : > { %2562 = vadd.xlane.f32.xlu1 %v2561_v22 }
 0x437   : > { %v8475_v9 = vpop.f32.mrf.mxu1 }
 0x438   : > { %v2336_v52 = vadd.f32 %v8475_v9, %v11036_v17 }
 0x439   : > { %v2327_v57 = vpop.f32.mrf.mxu1 }
 0x43a   : > { %v11173_v33 = vadd.f32 %v11133_v62, %v2336_v52  ;;  %v2328_v44 = vadd.f32 %v2327_v57, %v10973_v10 }
 0x43b   : > { %v8476_v27 = vpop.f32.mrf.mxu1 }
 0x43c   : > { %v11177_v37 = vadd.f32 %v11133_v62, %v2328_v44  ;;  %v2339_v43 = vadd.f32 %v8476_v27, %v11049_v12  ;;  %v2455_v29 = vsel %vm414_vm0, %v11173_v33, 0.0  ;;  %v2540_v9 = vmul.f32 %v11173_v33, %v11173_v33 }
 0x43d   : > { %2456 = vadd.xlane.f32.xlu0 %v2455_v29  ;;  %v2330_v55 = vpop.f32.mrf.mxu1 }
 0x43e   : > { %v11183_v42 = vadd.f32 %v11133_v62, %v2339_v43  ;;  %v2331_v56 = vadd.f32 %v2330_v55, %v11009_v7  ;;  %v2449_v22 = vsel %vm414_vm0, %v11177_v37, 0.0  ;;  %v2576_v57 = vsel %vm414_vm0, %v2540_v9, 0.0 }
 0x43f   : > { %v2538_v27 = vmul.f32 %v11177_v37, %v11177_v37 }
 0x440   : > { %v11187_v63 = vadd.f32 %v11133_v62, %v2331_v56  ;;  %v2458_v15 = vsel %vm414_vm0, %v11183_v42, 0.0  ;;  %v2541_v44 = vmul.f32 %v11183_v42, %v11183_v42 }
 0x441   : > { %2459 = vadd.xlane.f32.xlu1 %v2458_v15  ;;  %2450 = vadd.xlane.f32.xlu0 %v2449_v22  ;;  %v2570_v29 = vsel %vm414_vm0, %v2538_v27, 0.0 }
 0x442   : > { %v2452_v52 = vsel %vm414_vm0, %v11187_v63, 0.0  ;;  %v2579_v43 = vsel %vm414_vm0, %v2541_v44, 0.0  ;;  %v2539_v55 = vmul.f32 %v11187_v63, %v11187_v63 }
 0x444   : > { %v2573_v56 = vsel %vm414_vm0, %v2539_v55, 0.0 }
 0x445   : > { %2453 = vadd.xlane.f32.xlu1 %v2452_v52  ;;  %2577 = vadd.xlane.f32.xlu0 %v2576_v57 }
 0x449   : > { %2580 = vadd.xlane.f32.xlu1 %v2579_v43  ;;  %2571 = vadd.xlane.f32.xlu0 %v2570_v29 }
 0x44d   : > { %2574 = vadd.xlane.f32.xlu1 %v2573_v56 }
 0x452   : > { %v8479_v15 = vpop.f32.mrf.mxu1 }
 0x453   : > { %v2352_v22 = vadd.f32 %v8479_v15, %v11074_v21 }
 0x454   : > { %v2343_v9 = vpop.f32.mrf.mxu1 }
 0x455   : > { %v11209_v31 = vadd.f32 %v11133_v62, %v2352_v22  ;;  %v2344_v52 = vadd.f32 %v2343_v9, %v11059_v24 }
 0x456   : > { %v8480_v57 = vpop.f32.mrf.mxu1 }
 0x457   : > { %v11213_v44 = vadd.f32 %v11133_v62, %v2344_v52  ;;  %v2355_v27 = vadd.f32 %v8480_v57, %v11078_v5  ;;  %v2467_v43 = vsel %vm414_vm0, %v11209_v31, 0.0  ;;  %v2544_v52 = vmul.f32 %v11209_v31, %v11209_v31 }
 0x458   : > { %2468 = vadd.xlane.f32.xlu0 %v2467_v43  ;;  %v2346_v29 = vpop.f32.mrf.mxu1 }
 0x459   : > { %v11219_v55 = vadd.f32 %v11133_v62, %v2355_v27  ;;  %v2347_v56 = vadd.f32 %v2346_v29, %v11068_v35  ;;  %v2461_v9 = vsel %vm414_vm0, %v11213_v44, 0.0  ;;  %v2542_v53 = vmul.f32 %v11213_v44, %v11213_v44 }
 0x45b   : > { %v11223_v15 = vadd.f32 %v11133_v62, %v2347_v56  ;;  %v2470_v22 = vsel %vm414_vm0, %v11219_v55, 0.0  ;;  %v8483_v57 = vpop.f32.mrf.mxu1  ;;  %v2588_v56 = vsel %vm414_vm0, %v2544_v52, 0.0  ;;  %v2545_v25 = vmul.f32 %v11219_v55, %v11219_v55 }
 0x45c   : > { %2471 = vadd.xlane.f32.xlu1 %v2470_v22  ;;  %2462 = vadd.xlane.f32.xlu0 %v2461_v9  ;;  %v2368_v27 = vadd.f32 %v8483_v57, %v11090_v34  ;;  %v2582_v16 = vsel %vm414_vm0, %v2542_v53, 0.0 }
 0x45d   : > { %v2359_v43 = vpop.f32.mrf.mxu1  ;;  %v2464_v29 = vsel %vm414_vm0, %v11223_v15, 0.0  ;;  %v2591_v57 = vsel %vm414_vm0, %v2545_v25, 0.0  ;;  %v2543_v2 = vmul.f32 %v11223_v15, %v11223_v15 }
 0x45e   : > { %v11240_v22 = vadd.f32 %v11133_v62, %v2368_v27  ;;  %v2360_v52 = vadd.f32 %v2359_v43, %v11082_v49 }
 0x45f   : > { %v8484_v32 = vpop.f32.mrf.mxu1  ;;  %v2585_v25 = vsel %vm414_vm0, %v2543_v2, 0.0 }
 0x460   : > { %2465 = vadd.xlane.f32.xlu1 %v2464_v29  ;;  %2589 = vadd.xlane.f32.xlu0 %v2588_v56  ;;  %v2371_v9 = vadd.f32 %v8484_v32, %v11094_v6  ;;  %v2479_v27 = vsel %vm414_vm0, %v11240_v22, 0.0  ;;  %v11254_v32 = vadd.f32 %v11133_v62, %v2360_v52  ;;  %v2548_v52 = vmul.f32 %v11240_v22, %v11240_v22 }
 0x461   : > { %v2362_v20 = vpop.f32.mrf.mxu1 }
 0x462   : > { %v11249_v29 = vadd.f32 %v11133_v62, %v2371_v9  ;;  %v2363_v53 = vadd.f32 %v2362_v20, %v11086_v36  ;;  %v2546_v14 = vmul.f32 %v11254_v32, %v11254_v32 }
 0x464   : > { %2592 = vadd.xlane.f32.xlu1 %v2591_v57  ;;  %2583 = vadd.xlane.f32.xlu0 %v2582_v16  ;;  %v2482_v16 = vsel %vm414_vm0, %v11249_v29, 0.0  ;;  %v11261_v9 = vadd.f32 %v11133_v62, %v2363_v53  ;;  %v2473_v57 = vsel %vm414_vm0, %v11254_v32, 0.0  ;;  %v2549_v53 = vmul.f32 %v11249_v29, %v11249_v29 }
 0x466   : > { %v8487_v56 = vpop.f32.mrf.mxu1 }
 0x467   : > { %v2384_v2 = vadd.f32 %v8487_v56, %v11106_v1  ;;  %v2603_v56 = vsel %vm414_vm0, %v2549_v53, 0.0 }
 0x468   : > { %2586 = vadd.xlane.f32.xlu1 %v2585_v25  ;;  %2480 = vadd.xlane.f32.xlu0 %v2479_v27  ;;  %v2375_v43 = vpop.f32.mrf.mxu1  ;;  %v2476_v27 = vsel %vm414_vm0, %v11261_v9, 0.0  ;;  %v2600_v25 = vsel %vm414_vm0, %v2548_v52, 0.0  ;;  %v2547_v52 = vmul.f32 %v11261_v9, %v11261_v9 }
 0x469   : > { %v11276_v58 = vadd.f32 %v11133_v62, %v2384_v2  ;;  %v2376_v28 = vadd.f32 %v2375_v43, %v11098_v39 }
 0x46a   : > { %v8488_v20 = vpop.f32.mrf.mxu1 }
 0x46b   : > { %v2491_v2 = vsel %vm414_vm0, %v11276_v58, 0.0 }
 0x46c   : > { %2483 = vadd.xlane.f32.xlu1 %v2482_v16  ;;  %2474 = vadd.xlane.f32.xlu0 %v2473_v57  ;;  %v2387_v16 = vadd.f32 %v8488_v20, %v11110_v19  ;;  %v2594_v57 = vsel %vm414_vm0, %v2546_v14, 0.0  ;;  %v2378_v45 = vpop.f32.mrf.mxu1  ;;  %v11290_v20 = vadd.f32 %v11133_v62, %v2376_v28  ;;  %v2597_v14 = vsel %vm414_vm0, %v2547_v52, 0.0 }
 0x46d   : > { %v2379_v43 = vadd.f32 %v2378_v45, %v11102_v40  ;;  %v2552_v28 = vmul.f32 %v11276_v58, %v11276_v58 }
 0x46e   : > { %v2550_v50 = vmul.f32 %v11290_v20, %v11290_v20 }
 0x470   : > { %2477 = vadd.xlane.f32.xlu1 %v2476_v27  ;;  %2601 = vadd.xlane.f32.xlu0 %v2600_v25  ;;  %v11285_v27 = vadd.f32 %v11133_v62, %v2387_v16  ;;  %v8491_v25 = vpop.f32.mrf.mxu1  ;;  %v11297_v16 = vadd.f32 %v11133_v62, %v2379_v43  ;;  %v2606_v3 = vsel %vm414_vm0, %v2550_v50, 0.0 }
 0x471   : > { %v2400_v52 = vadd.f32 %v8491_v25, %v11122_v61  ;;  %v8851_v25 = vld [vmem:[%s14858_s3 + $0x64] ss:$16 sps:$4 sm:$0xff]  }
 0x472   : > { %v2494_v53 = vsel %vm414_vm0, %v11285_v27, 0.0  ;;  %v2553_v43 = vmul.f32 %v11285_v27, %v11285_v27  ;;  %v2551_v47 = vmul.f32 %v11297_v16, %v11297_v16  ;;  %8493 = vmatprep.subr.bf16.mxu0 %v8851_v25 }
 0x473   : > { %v11312_v30 = vadd.f32 %v11133_v62, %v2400_v52  ;;  %8494 = vmatpush3.bf16.msra.mxu0 %v8851_v25 }
 0x474   : > { %2604 = vadd.xlane.f32.xlu1 %v2603_v56  ;;  %2595 = vadd.xlane.f32.xlu0 %v2594_v57  ;;  %v2391_v56 = vpop.f32.mrf.mxu1  ;;  %v2485_v57 = vsel %vm414_vm0, %v11290_v20, 0.0 }
 0x476   : > { %v8492_v45 = vpop.f32.mrf.mxu1 }
 0x478   : > { %2598 = vadd.xlane.f32.xlu1 %v2597_v14  ;;  %2492 = vadd.xlane.f32.xlu0 %v2491_v2  ;;  %v2488_v2 = vsel %vm414_vm0, %v11297_v16, 0.0  ;;  %v2612_v14 = vsel %vm414_vm0, %v2552_v28, 0.0  ;;  %v2615_v28 = vsel %vm414_vm0, %v2553_v43, 0.0  ;;  %v2394_v52 = vpop.f32.mrf.mxu1  ;;  %v2609_v43 = vsel %vm414_vm0, %v2551_v47, 0.0 }
 0x47c   : > { %2495 = vadd.xlane.f32.xlu1 %v2494_v53  ;;  %2486 = vadd.xlane.f32.xlu0 %v2485_v57  ;;  %v2403_v53 = vadd.f32 %v8492_v45, %v11126_v26  ;;  %v2392_v57 = vadd.f32 %v2391_v56, %v11114_v54  ;;  %v2503_v45 = vsel %vm414_vm0, %v11312_v30, 0.0  ;;  %v8852_v56 = vld [vmem:[%s14858_s3 + $0x44] ss:$16 sps:$4 sm:$0xff]  }
 0x47d   : > { %8495 = vmatprep.subr.bf16.mxu0 %v8852_v56 }
 0x47e   : > { %v11332_v50 = vadd.f32 %v11133_v62, %v2392_v57  ;;  %8496 = vmatpush3.bf16.msra.mxu0 %v8852_v56  ;;  %v2556_v56 = vmul.f32 %v11312_v30, %v11312_v30 }
 0x480   : > { %2489 = vadd.xlane.f32.xlu1 %v2488_v2  ;;  %2613 = vadd.xlane.f32.xlu0 %v2612_v14  ;;  %v11324_v2 = vadd.f32 %v11133_v62, %v2403_v53  ;;  %v2395_v14 = vadd.f32 %v2394_v52, %v11118_v23  ;;  %v8853_v53 = vld [vmem:[%s14858_s3 + $0x24] ss:$16 sps:$4 sm:$0xff]   ;;  %v2497_v57 = vsel %vm414_vm0, %v11332_v50, 0.0  ;;  %v2554_v47 = vmul.f32 %v11332_v50, %v11332_v50 }
 0x481   : > { %8497 = vmatprep.subr.bf16.mxu0 %v8853_v53 }
 0x482   : > { %v11342_v25 = vadd.f32 %v11133_v62, %v2395_v14  ;;  %8498 = vmatpush3.bf16.msra.mxu0 %v8853_v53  ;;  %v2618_v62 = vsel %vm414_vm0, %v2554_v47, 0.0 }
 0x484   : > { %2616 = vadd.xlane.f32.xlu1 %v2615_v28  ;;  %2607 = vadd.xlane.f32.xlu0 %v2606_v3  ;;  %v2506_v3 = vsel %vm414_vm0, %v11324_v2, 0.0  ;;  %v8854_v28 = vld [vmem:[%s14858_s3 + $0x4] ss:$16 sps:$4 sm:$0xff]   ;;  %v2500_v52 = vsel %vm414_vm0, %v11342_v25, 0.0 }
 0x485   : > { %8499 = vmatprep.subr.bf16.mxu0 %v8854_v28 }
 0x486   : > { %8500 = vmatpush3.bf16.msra.mxu0 %v8854_v28 }
 0x488   : > { %2610 = vadd.xlane.f32.xlu1 %v2609_v43  ;;  %2504 = vadd.xlane.f32.xlu0 %v2503_v45  ;;  %v2555_v45 = vmul.f32 %v11342_v25, %v11342_v25  ;;  %v2624_v43 = vsel %vm414_vm0, %v2556_v56, 0.0 }
 0x48a   : > { %v2621_v14 = vsel %vm414_vm0, %v2555_v45, 0.0 }
 0x48c   : > { %2507 = vadd.xlane.f32.xlu1 %v2506_v3  ;;  %2498 = vadd.xlane.f32.xlu0 %v2497_v57  ;;  %v2557_v3 = vmul.f32 %v11324_v2, %v11324_v2 }
 0x48e   : > { %v2627_v53 = vsel %vm414_vm0, %v2557_v3, 0.0 }
 0x490   : > { %2501 = vadd.xlane.f32.xlu1 %v2500_v52  ;;  %2619 = vadd.xlane.f32.xlu0 %v2618_v62 }
 0x494   : > { %2622 = vadd.xlane.f32.xlu1 %v2621_v14  ;;  %2625 = vadd.xlane.f32.xlu0 %v2624_v43 }
 0x498   : > { %2628 = vadd.xlane.f32.xlu1 %v2627_v53 }
 0x4a9   : > { %3132 = vrot.lane.b32.xlu1 %v14892_v18, %s9622_s12 }
 0x4aa   : > { %3130 = vrot.lane.b32.xlu0 %v10391_v60, %s9622_s12 }
 0x4ad   : > { %3134 = vrot.lane.b32.xlu1 %v10399_v4, %s9622_s12 }
 0x4ae   : > { %3138 = vrot.lane.b32.xlu0 %v10973_v10, %s9622_s12 }
 0x4af   : > { %v2445_v57 = vpop.xlane.xlu0 %2444 }
 0x4b0   : > { %v2512_v18 = vmul.f32 0.015625, %v2445_v57 }
 0x4b1   : > { %3136 = vrot.lane.b32.xlu1 %v14891_v0, %s9622_s12 }
 0x4b2   : > { %3142 = vrot.lane.b32.xlu0 %v11036_v17, %s9622_s12  ;;  %v2656_v0 = vmul.f32 %v2512_v18, %v2512_v18 }
 0x4b3   : > { %v2448_v47 = vpop.xlane.xlu1 %2447  ;;  %v2439_v28 = vpop.xlane.xlu0 %2438 }
 0x4b4   : > { %v2513_v60 = vmul.f32 0.015625, %v2448_v47  ;;  %v11379_v4 = vmul.f32 0.015625, %v2439_v28 }
 0x4b5   : > { %3140 = vrot.lane.b32.xlu1 %v11009_v7, %s9622_s12 }
 0x4b6   : > { %3146 = vrot.lane.b32.xlu0 %v11059_v24, %s9622_s12  ;;  %v2657_v45 = vmul.f32 %v2513_v60, %v2513_v60  ;;  %v2654_v7 = vmul.f32 %v11379_v4, %v11379_v4 }
 0x4b7   : > { %v2442_v10 = vpop.xlane.xlu1 %2441  ;;  %v2566_v52 = vpop.xlane.xlu0 %2565 }
 0x4b8   : > { %v2632_v62 = vmul.f32 0.015625, %v2566_v52  ;;  %v11389_v14 = vmul.f32 0.015625, %v2442_v10 }
 0x4b9   : > { %3144 = vrot.lane.b32.xlu1 %v11049_v12, %s9622_s12 }
 0x4ba   : > { %3150 = vrot.lane.b32.xlu0 %v11074_v21, %s9622_s12  ;;  %v2680_v17 = vsub.f32 %v2632_v62, %v2656_v0  ;;  %v2655_v47 = vmul.f32 %v11389_v14, %v11389_v14 }
 0x4bb   : > { %v2569_v56 = vpop.xlane.xlu1 %2568  ;;  %v2560_v24 = vpop.xlane.xlu0 %2559 }
 0x4bc   : > { %v2728_v43 = vadd.f32 1e-05, %v2680_v17  ;;  %v2633_v3 = vmul.f32 0.015625, %v2569_v56  ;;  %v2630_v12 = vmul.f32 0.015625, %v2560_v24 }
 0x4bd   : > { %3148 = vrot.lane.b32.xlu1 %v11068_v35, %s9622_s12 }
 0x4be   : > { %3154 = vrot.lane.b32.xlu0 %v11082_v49, %s9622_s12  ;;  %9061 = vrsqrt.f32 %v2728_v43  ;;  %v2681_v21 = vsub.f32 %v2633_v3, %v2657_v45  ;;  %v2678_v53 = vsub.f32 %v2630_v12, %v2654_v7 }
 0x4bf   : > { %v2563_v57 = vpop.xlane.xlu1 %2562 }
 0x4c0   : > { %v2729_v28 = vadd.f32 1e-05, %v2681_v21  ;;  %v2726_v35 = vadd.f32 1e-05, %v2678_v53  ;;  %v2631_v10 = vmul.f32 0.015625, %v2563_v57 }
 0x4c1   : > { %3152 = vrot.lane.b32.xlu1 %v11078_v5, %s9622_s12 }
 0x4c2   : > { %3158 = vrot.lane.b32.xlu0 %v11090_v34, %s9622_s12  ;;  %9063 = vrsqrt.f32 %v2729_v28  ;;  %v2679_v52 = vsub.f32 %v2631_v10, %v2655_v47  ;;  %v2704_v34 = vsub.f32 %v11137_v41, %v2512_v18  ;;  %v2705_v41 = vsub.f32 %v11147_v38, %v2513_v60 }
 0x4c3   : > { %9065 = vrsqrt.f32 %v2726_v35  ;;  %v2703_v38 = vsub.f32 %v11151_v13, %v11389_v14 }
 0x4c4   : > { %v2727_v49 = vadd.f32 1e-05, %v2679_v52 }
 0x4c5   : > { %3156 = vrot.lane.b32.xlu1 %v11086_v36, %s9622_s12  ;;  %v11411_v36 = vld [vmem:[%s14860_s5 + $0x7] ss:$0 sm:$0xff] }
 0x4c6   : > { %3162 = vrot.lane.b32.xlu0 %v11098_v39, %s9622_s12  ;;  %9067 = vrsqrt.f32 %v2727_v49  ;;  %v2457_v5 = vpop.xlane.xlu0 %2456 }
 0x4c7   : > { %v11413_v45 = vmul.f32 0.015625, %v2457_v5 }
 0x4c9   : > { %3160 = vrot.lane.b32.xlu1 %v11094_v6, %s9622_s12  ;;  %v11420_v6 = vld [vmem:[%s14860_s5 + $0x8] ss:$0 sm:$0xff]  ;;  %v2660_v3 = vmul.f32 %v11413_v45, %v11413_v45 }
 0x4ca   : > { %3166 = vrot.lane.b32.xlu0 %v11106_v1, %s9622_s12  ;;  %v2460_v0 = vpop.xlane.xlu1 %2459  ;;  %v2451_v62 = vpop.xlane.xlu0 %2450 }
 0x4cb   : > { %v9062_v17 = vpop.eup %9061  ;;  %v11424_v1 = vmul.f32 0.015625, %v2460_v0  ;;  %v11428_v7 = vmul.f32 0.015625, %v2451_v62 }
 0x4cc   : > { %v2776_v39 = vmul.f32 %v9062_v17, %v2704_v34 }
 0x4cd   : > { %3164 = vrot.lane.b32.xlu1 %v11102_v40, %s9622_s12  ;;  %v2702_v40 = vsub.f32 %v11141_v48, %v11379_v4  ;;  %v2661_v48 = vmul.f32 %v11424_v1, %v11424_v1  ;;  %v2658_v47 = vmul.f32 %v11428_v7, %v11428_v7 }
 0x4ce   : > { %3170 = vrot.lane.b32.xlu0 %v11114_v54, %s9622_s12  ;;  %v2804_v18 = vmul.f32 %v11411_v36, %v2776_v39  ;;  %v2454_v56 = vpop.xlane.xlu1 %2453  ;;  %v2578_v24 = vpop.xlane.xlu0 %2577 }
 0x4cf   : > { %v9064_v43 = vpop.eup %9063  ;;  %v2636_v12 = vmul.f32 0.015625, %v2578_v24  ;;  %v11448_v28 = vmul.f32 0.015625, %v2454_v56 }
 0x4d0   : > { %v9066_v21 = vpop.eup %9065  ;;  %v11435_v54 = vadd.f32 %v11420_v6, %v2804_v18  ;;  %v2777_v53 = vmul.f32 %v9064_v43, %v2705_v41 }
 0x4d1   : > { %3168 = vrot.lane.b32.xlu1 %v11110_v19, %s9622_s12  ;;  %v2774_v60 = vmul.f32 %v9066_v21, %v2702_v40  ;;  %v2684_v4 = vsub.f32 %v2636_v12, %v2660_v3  ;;  %v2659_v43 = vmul.f32 %v11448_v28, %v11448_v28 }
 0x4d2   : > { %3174 = vrot.lane.b32.xlu0 %v11122_v61, %s9622_s12  ;;  %v2805_v57 = vmul.f32 %v11411_v36, %v2777_v53  ;;  %v2581_v35 = vpop.xlane.xlu1 %2580  ;;  %v2572_v19 = vpop.xlane.xlu0 %2571  ;;  %v2880_v10 = vmul.f32 0.044715, %v11435_v54 }
 0x4d3   : > { %v9068_v13 = vpop.eup %9067  ;;  %v2802_v14 = vmul.f32 %v11411_v36, %v2774_v60  ;;  %v2732_v52 = vadd.f32 1e-05, %v2684_v4  ;;  %v2637_v61 = vmul.f32 0.015625, %v2581_v35  ;;  %v2634_v49 = vmul.f32 0.015625, %v2572_v19 }
 0x4d4   : > { %v11453_v5 = vadd.f32 %v11420_v6, %v2805_v57  ;;  %v2775_v34 = vmul.f32 %v9068_v13, %v2703_v38  ;;  %v2904_v0 = vmul.f32 %v2880_v10, %v11435_v54 }
 0x4d5   : > { %3172 = vrot.lane.b32.xlu1 %v11118_v23, %s9622_s12  ;;  %v11459_v62 = vadd.f32 %v11420_v6, %v2802_v14  ;;  %9069 = vrsqrt.f32 %v2732_v52  ;;  %v2685_v17 = vsub.f32 %v2637_v61, %v2661_v48  ;;  %v2682_v39 = vsub.f32 %v2634_v49, %v2658_v47 }
 0x4d6   : > { %v2803_v41 = vmul.f32 %v11411_v36, %v2775_v34  ;;  %v2575_v18 = vpop.xlane.xlu1 %2574  ;;  %v2881_v56 = vmul.f32 0.044715, %v11453_v5  ;;  %v2928_v24 = vmul.f32 %v2904_v0, %v11435_v54  ;;  %v2708_v0 = vsub.f32 %v11173_v33, %v11413_v45 }
 0x4d7   : > { %v2733_v40 = vadd.f32 1e-05, %v2685_v17  ;;  %v2730_v23 = vadd.f32 1e-05, %v2682_v39  ;;  %v2635_v3 = vmul.f32 0.015625, %v2575_v18 }
 0x4d8   : > { %v11467_v12 = vadd.f32 %v11420_v6, %v2803_v41  ;;  %v2878_v21 = vmul.f32 0.044715, %v11459_v62  ;;  %v2905_v53 = vmul.f32 %v2881_v56, %v11453_v5  ;;  %v2952_v38 = vadd.f32 %v2928_v24, %v11435_v54 }
 0x4d9   : > { %3176 = vrot.lane.b32.xlu1 %v11126_v26, %s9622_s12  ;;  %9071 = vrsqrt.f32 %v2733_v40  ;;  %v2683_v60 = vsub.f32 %v2635_v3, %v2659_v43  ;;  %v2709_v24 = vsub.f32 %v11183_v42, %v11424_v1  ;;  %v2706_v40 = vsub.f32 %v11177_v37, %v11428_v7 }
 0x4da   : > { %9073 = vrsqrt.f32 %v2730_v23  ;;  %v2879_v48 = vmul.f32 0.044715, %v11467_v12  ;;  %v2902_v4 = vmul.f32 %v2878_v21, %v11459_v62  ;;  %v2929_v47 = vmul.f32 %v2905_v53, %v11453_v5 }
 0x4db   : > { %v2731_v57 = vadd.f32 1e-05, %v2683_v60  ;;  %v2976_v19 = vmul.f32 0.7978846, %v2952_v38 }
 0x4dc   : > { %v2903_v35 = vmul.f32 %v2879_v48, %v11467_v12  ;;  %v2926_v26 = vmul.f32 %v2902_v4, %v11459_v62  ;;  %v2953_v10 = vadd.f32 %v2929_v47, %v11453_v5  ;;  %v2707_v48 = vsub.f32 %v11187_v63, %v11448_v28 }
 0x4dd   : > { %9075 = vrsqrt.f32 %v2731_v57 }
 0x4de   : > { %v2927_v13 = vmul.f32 %v2903_v35, %v11467_v12  ;;  %v2950_v14 = vadd.f32 %v2926_v26, %v11459_v62  ;;  %v2977_v52 = vmul.f32 0.7978846, %v2953_v10  ;;  %9077 = vtanh.f32 %v2976_v19 }
 0x4df   : > { %v2857_v19 = vmul.f32 0.5, %v11453_v5 }
 0x4e0   : > { %v2951_v49 = vadd.f32 %v2927_v13, %v11467_v12  ;;  %v2974_v34 = vmul.f32 0.7978846, %v2950_v14  ;;  %9079 = vtanh.f32 %v2977_v52  ;;  %v2854_v52 = vmul.f32 0.5, %v11459_v62 }
 0x4e1   : > { %v2469_v61 = vpop.xlane.xlu0 %2468 }
 0x4e2   : > { %v9070_v17 = vpop.eup %9069  ;;  %v2975_v39 = vmul.f32 0.7978846, %v2951_v49  ;;  %9081 = vtanh.f32 %v2974_v34  ;;  %v11490_v3 = vmul.f32 0.015625, %v2469_v61 }
 0x4e3   : > { %v2780_v41 = vmul.f32 %v9070_v17, %v2708_v0 }
 0x4e4   : > { %9083 = vtanh.f32 %v2975_v39  ;;  %v2664_v47 = vmul.f32 %v11490_v3, %v11490_v3 }
 0x4e5   : > { %v2472_v18 = vpop.xlane.xlu1 %2471  ;;  %v2463_v56 = vpop.xlane.xlu0 %2462  ;;  %v2808_v23 = vmul.f32 %v11411_v36, %v2780_v41 }
 0x4e6   : > { %v9072_v43 = vpop.eup %9071  ;;  %v11492_v53 = vmul.f32 0.015625, %v2472_v18  ;;  %v11496_v4 = vmul.f32 0.015625, %v2463_v56 }
 0x4e7   : > { %v9074_v33 = vpop.eup %9073  ;;  %v2781_v45 = vmul.f32 %v9072_v43, %v2709_v24  ;;  %v11499_v37 = vadd.f32 %v11420_v6, %v2808_v23 }
 0x4e8   : > { %v2778_v21 = vmul.f32 %v9074_v33, %v2706_v40  ;;  %v2665_v28 = vmul.f32 %v11492_v53, %v11492_v53  ;;  %v2662_v34 = vmul.f32 %v11496_v4, %v11496_v4 }
 0x4e9   : > { %v2466_v38 = vpop.xlane.xlu1 %2465  ;;  %v2590_v60 = vpop.xlane.xlu0 %2589  ;;  %v2809_v7 = vmul.f32 %v11411_v36, %v2781_v45  ;;  %v2884_v56 = vmul.f32 0.044715, %v11499_v37 }
 0x4ea   : > { %v2640_v42 = vmul.f32 0.015625, %v2590_v60  ;;  %v9076_v1 = vpop.eup %9075  ;;  %v2806_v57 = vmul.f32 %v11411_v36, %v2778_v21  ;;  %v11505_v26 = vmul.f32 0.015625, %v2466_v38 }
 0x4eb   : > { %v2779_v35 = vmul.f32 %v9076_v1, %v2707_v48  ;;  %v9078_v61 = vpop.eup %9077  ;;  %v11518_v39 = vadd.f32 %v11420_v6, %v2809_v7 }
 0x4ec   : > { %v11509_v63 = vadd.f32 %v11420_v6, %v2806_v57  ;;  %v2688_v10 = vsub.f32 %v2640_v42, %v2664_v47  ;;  %v2663_v62 = vmul.f32 %v11505_v26, %v11505_v26  ;;  %v3024_v60 = vadd.f32 1.0, %v9078_v61 }
 0x4ed   : > { %v2593_v13 = vpop.xlane.xlu1 %2592  ;;  %v2584_v14 = vpop.xlane.xlu0 %2583  ;;  %v2807_v49 = vmul.f32 %v11411_v36, %v2779_v35  ;;  %v2855_v47 = vmul.f32 0.5, %v11467_v12 }
 0x4ee   : > { %v2641_v0 = vmul.f32 0.015625, %v2593_v13  ;;  %v2638_v17 = vmul.f32 0.015625, %v2584_v14  ;;  %v9080_v5 = vpop.eup %9079  ;;  %v2736_v41 = vadd.f32 1e-05, %v2688_v10  ;;  %v2882_v18 = vmul.f32 0.044715, %v11509_v63 }
 0x4ef   : > { %v9082_v24 = vpop.eup %9081  ;;  %v3025_v23 = vadd.f32 1.0, %v9080_v5  ;;  %v11525_v33 = vadd.f32 %v11420_v6, %v2807_v49  ;;  %v2908_v10 = vmul.f32 %v2884_v56, %v11499_v37  ;;  %v2856_v14 = vmul.f32 0.5, %v11435_v54 }
 0x4f0   : > { %v2689_v43 = vsub.f32 %v2641_v0, %v2665_v28  ;;  %v2686_v40 = vsub.f32 %v2638_v17, %v2662_v34  ;;  %9085 = vrsqrt.f32 %v2736_v41  ;;  %v3022_v38 = vadd.f32 1.0, %v9082_v24 }
 0x4f1   : > { %v2587_v45 = vpop.xlane.xlu1 %2586  ;;  %v2481_v21 = vpop.xlane.xlu0 %2480  ;;  %v2906_v57 = vmul.f32 %v2882_v18, %v11509_v63  ;;  %v2885_v28 = vmul.f32 0.044715, %v11518_v39  ;;  %v3049_v49 = vmul.f32 %v3025_v23, %v2857_v19  ;;  %v2883_v5 = vmul.f32 0.044715, %v11525_v33 }
 0x4f2   : > { %v9084_v48 = vpop.eup %9083  ;;  %v2737_v42 = vadd.f32 1e-05, %v2689_v43  ;;  %v2734_v1 = vadd.f32 1e-05, %v2686_v40  ;;  %v2639_v7 = vmul.f32 0.015625, %v2587_v45  ;;  %v3046_v0 = vmul.f32 %v3022_v38, %v2854_v52 }
 0x4f3   : > { %v3023_v35 = vadd.f32 1.0, %v9084_v48  ;;  %v11533_v18 = vmul.f32 0.015625, %v2481_v21  ;;  %v3048_v12 = vmul.f32 %v3024_v60, %v2856_v14  ;;  %v2930_v24 = vmul.f32 %v2906_v57, %v11509_v63 }
 0x4f4   : > { %9087 = vrsqrt.f32 %v2737_v42  ;;  %v2687_v13 = vsub.f32 %v2639_v7, %v2663_v62  ;;  %v2907_v56 = vmul.f32 %v2883_v5, %v11525_v33  ;;  %v2909_v62 = vmul.f32 %v2885_v28, %v11518_v39 }
 0x4f5   : > { %9089 = vrsqrt.f32 %v2734_v1  ;;  %v2484_v61 = vpop.xlane.xlu1 %2483  ;;  %v2475_v34 = vpop.xlane.xlu0 %2474  ;;  %v3047_v17 = vmul.f32 %v3023_v35, %v2855_v47  ;;  %v2932_v54 = vmul.f32 %v2908_v10, %v11499_v37  ;;  %v3071_v40 = vpack.c.bf16 %v3049_v49, %v3048_v12 }
 0x4f6   : > { %v2735_v41 = vadd.f32 1e-05, %v2687_v13  ;;  %v11539_v19 = vmul.f32 0.015625, %v2484_v61  ;;  %v11541_v52 = vmul.f32 0.015625, %v2475_v34  ;;  %v2931_v21 = vmul.f32 %v2907_v56, %v11525_v33 }
 0x4f7   : > { %v3070_v43 = vpack.c.bf16 %v3047_v17, %v3046_v0  ;;  %v2954_v38 = vadd.f32 %v2930_v24, %v11509_v63  ;;  %v2933_v60 = vmul.f32 %v2909_v62, %v11518_v39  ;;  %v2668_v48 = vmul.f32 %v11533_v18, %v11533_v18 }
 0x4f8   : > { %9091 = vrsqrt.f32 %v2735_v41  ;;  %v2956_v1 = vadd.f32 %v2932_v54, %v11499_v37  ;;  %v2712_v7 = vsub.f32 %v11209_v31, %v11490_v3  ;;  %v2955_v57 = vadd.f32 %v2931_v21, %v11525_v33 }
 0x4f9   : > { %v2478_v23 = vpop.xlane.xlu1 %2477  ;;  %v2602_v45 = vpop.xlane.xlu0 %2601  ;;  %8501 = vmatprep.mubr.msk.bf16.mxu0 %vm414_vm0, %v3070_v43  ;;  %v2978_v47 = vmul.f32 0.7978846, %v2954_v38  ;;  %v2957_v35 = vadd.f32 %v2933_v60, %v11518_v39  ;;  %v2669_v28 = vmul.f32 %v11539_v19, %v11539_v19  ;;  %v2666_v10 = vmul.f32 %v11541_v52, %v11541_v52 }
 0x4fa   : > { %v2644_v42 = vmul.f32 0.015625, %v2602_v45  ;;  %8502 = vmatmul.mubr.msk.bf16.vlgmr.msra.gmra.mxu0 %vm414_vm0, %v3071_v40  ;;  %v2980_v14 = vmul.f32 0.7978846, %v2956_v1  ;;  %v11559_v49 = vmul.f32 0.015625, %v2478_v23  ;;  %v2979_v0 = vmul.f32 0.7978846, %v2955_v57 }
 0x4fb   : > { %9093 = vtanh.f32 %v2978_v47  ;;  %v2981_v31 = vmul.f32 0.7978846, %v2957_v35  ;;  %v2713_v24 = vsub.f32 %v11219_v55, %v11492_v53  ;;  %v2710_v54 = vsub.f32 %v11213_v44, %v11496_v4 }
 0x4fc   : > { %v2692_v13 = vsub.f32 %v2644_v42, %v2668_v48  ;;  %9095 = vtanh.f32 %v2980_v14  ;;  %v2667_v40 = vmul.f32 %v11559_v49, %v11559_v49  ;;  %v2711_v55 = vsub.f32 %v11223_v15, %v11505_v26 }
 0x4fd   : > { %v2605_v61 = vpop.xlane.xlu1 %2604  ;;  %v2596_v34 = vpop.xlane.xlu0 %2595  ;;  %9097 = vtanh.f32 %v2979_v0  ;;  %v2858_v4 = vmul.f32 0.5, %v11509_v63  ;;  %v2859_v57 = vmul.f32 0.5, %v11525_v33  ;;  %v11576_v47 = vmul.f32 0.5, %v11518_v39 }
 0x4fe   : > { %v9086_v3 = vpop.eup %9085  ;;  %v2740_v17 = vadd.f32 1e-05, %v2692_v13  ;;  %v2645_v5 = vmul.f32 0.015625, %v2605_v61  ;;  %v2642_v41 = vmul.f32 0.015625, %v2596_v34  ;;  %v2717_v61 = vsub.f32 %v11249_v29, %v11539_v19 }
 0x4ff   : > { %v2784_v12 = vmul.f32 %v9086_v3, %v2712_v7  ;;  %v11571_v7 = vmul.f32 0.5, %v11499_v37  ;;  %v2714_v34 = vsub.f32 %v11254_v32, %v11541_v52 }
 0x500   : > { %9099 = vrsqrt.f32 %v2740_v17  ;;  %v2693_v43 = vsub.f32 %v2645_v5, %v2669_v28  ;;  %v2690_v56 = vsub.f32 %v2642_v41, %v2666_v10  ;;  %v2716_v10 = vsub.f32 %v11240_v22, %v11533_v18 }
 0x501   : > { %v9088_v62 = vpop.eup %9087  ;;  %v2599_v23 = vpop.xlane.xlu1 %2598  ;;  %9101 = vtanh.f32 %v2981_v31  ;;  %v2812_v38 = vmul.f32 %v11411_v36, %v2784_v12  ;;  %v2715_v31 = vsub.f32 %v11261_v9, %v11559_v49 }
 0x502   : > { %v2493_v45 = vpop.xlane.xlu0 %2492  ;;  %v9090_v21 = vpop.eup %9089  ;;  %v2785_v60 = vmul.f32 %v9088_v62, %v2713_v24  ;;  %v2738_v48 = vadd.f32 1e-05, %v2690_v56  ;;  %v2643_v42 = vmul.f32 0.015625, %v2599_v23  ;;  %v2741_v1 = vadd.f32 1e-05, %v2693_v43 }
 0x503   : > { %v2782_v53 = vmul.f32 %v9090_v21, %v2710_v54  ;;  %v11581_v15 = vmul.f32 0.015625, %v2493_v45  ;;  %v11584_v13 = vadd.f32 %v11420_v6, %v2812_v38 }
 0x504   : > { %v2691_v44 = vsub.f32 %v2643_v42, %v2667_v40  ;;  %9103 = vrsqrt.f32 %v2738_v48  ;;  %v2813_v63 = vmul.f32 %v11411_v36, %v2785_v60 }
 0x505   : > { %v9092_v35 = vpop.eup %9091  ;;  %v2810_v28 = vmul.f32 %v11411_v36, %v2782_v53  ;;  %v2496_v26 = vpop.xlane.xlu1 %2495  ;;  %9105 = vrsqrt.f32 %v2741_v1  ;;  %v2672_v3 = vmul.f32 %v11581_v15, %v11581_v15  ;;  %v11613_v56 = vmul.f32 0.5, %v11584_v13 }
 0x506   : > { %v2487_v37 = vpop.xlane.xlu0 %2486  ;;  %v2783_v33 = vmul.f32 %v9092_v35, %v2711_v55  ;;  %v2739_v14 = vadd.f32 1e-05, %v2691_v44  ;;  %v11592_v22 = vmul.f32 0.015625, %v2496_v26  ;;  %v11607_v43 = vadd.f32 %v11420_v6, %v2813_v63 }
 0x507   : > { %v11588_v39 = vadd.f32 %v11420_v6, %v2810_v28  ;;  %v11597_v0 = vmul.f32 0.015625, %v2487_v37  ;;  %v2888_v45 = vmul.f32 0.044715, %v11584_v13 }
 0x508   : > { %v2811_v18 = vmul.f32 %v11411_v36, %v2783_v33  ;;  %9107 = vrsqrt.f32 %v2739_v14  ;;  %v9094_v24 = vpop.eup %9093  ;;  %v2673_v54 = vmul.f32 %v11592_v22, %v11592_v22 }
 0x509   : > { %v2490_v5 = vpop.xlane.xlu1 %2489  ;;  %v2886_v12 = vmul.f32 0.044715, %v11588_v39  ;;  %v9096_v62 = vpop.eup %9095  ;;  %v3026_v23 = vadd.f32 1.0, %v9094_v24  ;;  %v2670_v38 = vmul.f32 %v11597_v0, %v11597_v0 }
 0x50a   : > { %v2614_v41 = vpop.xlane.xlu0 %2613  ;;  %v11610_v32 = vadd.f32 %v11420_v6, %v2811_v18  ;;  %v9098_v21 = vpop.eup %9097  ;;  %v3028_v42 = vadd.f32 1.0, %v9096_v62  ;;  %v11624_v53 = vmul.f32 0.015625, %v2490_v5 }
 0x50b   : > { %v2648_v52 = vmul.f32 0.015625, %v2614_v41  ;;  %v3027_v35 = vadd.f32 1.0, %v9098_v21  ;;  %v2910_v26 = vmul.f32 %v2886_v12, %v11588_v39  ;;  %v3050_v18 = vmul.f32 %v3026_v23, %v2858_v4 }
 0x50c   : > { %v2887_v28 = vmul.f32 0.044715, %v11610_v32  ;;  %v3052_v62 = vmul.f32 %v3028_v42, %v11571_v7  ;;  %v11634_v23 = vmul.f32 0.5, %v11588_v39  ;;  %v2671_v7 = vmul.f32 %v11624_v53, %v11624_v53 }
 0x50d   : > { %v2696_v48 = vsub.f32 %v2648_v52, %v2672_v3  ;;  %v9100_v55 = vpop.eup %9099  ;;  %v2617_v1 = vpop.xlane.xlu1 %2616  ;;  %v3051_v24 = vmul.f32 %v3027_v35, %v2859_v57 }
 0x50e   : > { %v2608_v44 = vpop.xlane.xlu0 %2607  ;;  %v9102_v37 = vpop.eup %9101  ;;  %v2649_v33 = vmul.f32 0.015625, %v2617_v1  ;;  %v2788_v41 = vmul.f32 %v9100_v55, %v2716_v10  ;;  %v2911_v3 = vmul.f32 %v2887_v28, %v11610_v32 }
 0x50f   : > { %v2744_v63 = vadd.f32 1e-05, %v2696_v48  ;;  %v2646_v14 = vmul.f32 0.015625, %v2608_v44  ;;  %v3029_v60 = vadd.f32 1.0, %v9102_v37  ;;  %v3072_v17 = vpack.c.bf16 %v3051_v24, %v3050_v18 }
 0x510   : > { %v2697_v5 = vsub.f32 %v2649_v33, %v2673_v54  ;;  %v2934_v48 = vmul.f32 %v2910_v26, %v11588_v39  ;;  %v2935_v1 = vmul.f32 %v2911_v3, %v11610_v32  ;;  %v11637_v54 = vmul.f32 0.5, %v11607_v43 }
 0x511   : > { %9109 = vrsqrt.f32 %v2744_v63  ;;  %v2694_v52 = vsub.f32 %v2646_v14, %v2670_v38  ;;  %v2611_v21 = vpop.xlane.xlu1 %2610  ;;  %v3053_v12 = vmul.f32 %v3029_v60, %v11576_v47  ;;  %v9104_v4 = vpop.eup %9103  ;;  %8505 = vmatprep.mubr.msk.bf16.mxu0 %vm414_vm0, %v3072_v17  ;;  %v2816_v55 = vmul.f32 %v11411_v36, %v2788_v41 }
 0x512   : > { %v2505_v40 = vpop.xlane.xlu0 %2504  ;;  %v2745_v10 = vadd.f32 1e-05, %v2697_v5  ;;  %v2786_v38 = vmul.f32 %v9104_v4, %v2714_v34  ;;  %v2647_v42 = vmul.f32 0.015625, %v2611_v21  ;;  %v9106_v60 = vpop.eup %9105  ;;  %v2958_v44 = vadd.f32 %v2934_v48, %v11588_v39 }
 0x513   : > { %v2742_v57 = vadd.f32 1e-05, %v2694_v52  ;;  %v3073_v47 = vpack.c.bf16 %v3053_v12, %v3052_v62  ;;  %v2959_v35 = vadd.f32 %v2935_v1, %v11610_v32  ;;  %v2889_v17 = vmul.f32 0.044715, %v11607_v43 }
 0x514   : > { %9111 = vrsqrt.f32 %v2745_v10  ;;  %v2814_v26 = vmul.f32 %v11411_v36, %v2786_v38  ;;  %v2695_v34 = vsub.f32 %v2647_v42, %v2671_v7  ;;  %v2719_v39 = vsub.f32 %v11297_v16, %v11624_v53 }
 0x515   : > { %v9108_v28 = vpop.eup %9107  ;;  %9113 = vrsqrt.f32 %v2742_v57  ;;  %v2508_v37 = vpop.xlane.xlu1 %2507  ;;  %8506 = vmatmul.mubr.msk.bf16.gmra.mxu0 %vm414_vm0, %v3073_v47  ;;  %v11654_v14 = vmul.f32 0.5, %v11610_v32  ;;  %v2912_v18 = vmul.f32 %v2888_v45, %v11584_v13  ;;  %v2789_v41 = vmul.f32 %v9106_v60, %v2717_v61 }
 0x516   : > { %v2499_v63 = vpop.xlane.xlu0 %2498  ;;  %v2787_v33 = vmul.f32 %v9108_v28, %v2715_v31  ;;  %v2743_v24 = vadd.f32 1e-05, %v2695_v34  ;;  %v2982_v5 = vmul.f32 0.7978846, %v2958_v44  ;;  %v11663_v52 = vadd.f32 %v11420_v6, %v2816_v55 }
 0x517   : > { %v11660_v3 = vmul.f32 0.015625, %v2499_v63  ;;  %v11666_v49 = vmul.f32 0.015625, %v2505_v40  ;;  %v2983_v31 = vmul.f32 0.7978846, %v2959_v35  ;;  %v11669_v32 = vadd.f32 %v11420_v6, %v2814_v26 }
 0x518   : > { %v2815_v9 = vmul.f32 %v11411_v36, %v2787_v33  ;;  %9115 = vrsqrt.f32 %v2743_v24  ;;  %v2913_v45 = vmul.f32 %v2889_v17, %v11607_v43  ;;  %v2817_v40 = vmul.f32 %v11411_v36, %v2789_v41 }
 0x519   : > { %v2674_v29 = vmul.f32 %v11660_v3, %v11660_v3  ;;  %v2502_v19 = vpop.xlane.xlu1 %2501  ;;  %9117 = vtanh.f32 %v2982_v5  ;;  %v2936_v48 = vmul.f32 %v2912_v18, %v11584_v13  ;;  %v2676_v4 = vmul.f32 %v11666_v49, %v11666_v49 }
 0x51a   : > { %v2620_v61 = vpop.xlane.xlu0 %2619  ;;  %v11675_v62 = vadd.f32 %v11420_v6, %v2815_v9  ;;  %v11677_v21 = vmul.f32 0.015625, %v2502_v19  ;;  %9119 = vtanh.f32 %v2983_v31  ;;  %v2937_v1 = vmul.f32 %v2913_v45, %v11607_v43 }
 0x51b   : > { %v2650_v12 = vmul.f32 0.015625, %v2620_v61  ;;  %v11684_v10 = vmul.f32 0.015625, %v2508_v37  ;;  %v2960_v60 = vadd.f32 %v2936_v48, %v11584_v13  ;;  %v2890_v44 = vmul.f32 0.044715, %v11669_v32 }
 0x51c   : > { %v2675_v57 = vmul.f32 %v11677_v21, %v11677_v21  ;;  %v2961_v55 = vadd.f32 %v2937_v1, %v11607_v43  ;;  %v2891_v35 = vmul.f32 0.044715, %v11675_v62  ;;  %v14893_v28 = vsub.f32 %v11276_v58, %v11581_v15 }
 0x51d   : > { %v2698_v38 = vsub.f32 %v2650_v12, %v2674_v29  ;;  %v2623_v42 = vpop.xlane.xlu1 %2622  ;;  %v2984_v17 = vmul.f32 0.7978846, %v2960_v60  ;;  %v2914_v18 = vmul.f32 %v2890_v44, %v11669_v32  ;;  %v11698_v13 = vadd.f32 %v11420_v6, %v2817_v40 }
 0x51e   : > { %v9110_v7 = vpop.eup %9109  ;;  %v2626_v47 = vpop.xlane.xlu0 %2625  ;;  %v2651_v37 = vmul.f32 0.015625, %v2623_v42  ;;  %v2985_v33 = vmul.f32 0.7978846, %v2961_v55  ;;  %v2915_v41 = vmul.f32 %v2891_v35, %v11675_v62  ;;  %v2677_v58 = vmul.f32 %v11684_v10, %v11684_v10 }
 0x51f   : > { %v2792_v26 = vmul.f32 %v9110_v7, %v14893_v28  ;;  %v2746_v34 = vadd.f32 1e-05, %v2698_v38  ;;  %v2652_v63 = vmul.f32 0.015625, %v2626_v47  ;;  %v2938_v9 = vmul.f32 %v2914_v18, %v11669_v32 }
 0x520   : > { %v2699_v43 = vsub.f32 %v2651_v37, %v2675_v57  ;;  %v2939_v31 = vmul.f32 %v2915_v41, %v11675_v62  ;;  %v14894_v61 = vsub.f32 %v11285_v27, %v11592_v22  ;;  %v14895_v48 = vsub.f32 %v11290_v20, %v11597_v0 }
 0x521   : > { %9121 = vrsqrt.f32 %v2746_v34  ;;  %v2700_v24 = vsub.f32 %v2652_v63, %v2676_v4  ;;  %v9112_v5 = vpop.eup %9111  ;;  %v2629_v15 = vpop.xlane.xlu1 %2628  ;;  %v2820_v19 = vmul.f32 %v11411_v36, %v2792_v26  ;;  %v2962_v57 = vadd.f32 %v2938_v9, %v11669_v32 }
 0x522   : > { %9123 = vtanh.f32 %v2984_v17  ;;  %v9114_v29 = vpop.eup %9113  ;;  %v2793_v45 = vmul.f32 %v9112_v5, %v14894_v61  ;;  %v2747_v12 = vadd.f32 1e-05, %v2699_v43  ;;  %v2653_v4 = vmul.f32 0.015625, %v2629_v15 }
 0x523   : > { %v2748_v40 = vadd.f32 1e-05, %v2700_v24  ;;  %v2790_v1 = vmul.f32 %v9114_v29, %v14895_v48  ;;  %9125 = vtanh.f32 %v2985_v33  ;;  %v2724_v7 = vsub.f32 %v11312_v30, %v11666_v49 }
 0x524   : > { %v2821_v38 = vmul.f32 %v11411_v36, %v2793_v45  ;;  %9127 = vrsqrt.f32 %v2747_v12  ;;  %v2963_v42 = vadd.f32 %v2939_v31, %v11675_v62  ;;  %v2701_v22 = vsub.f32 %v2653_v4, %v2677_v58 }
 0x525   : > { %v2818_v27 = vmul.f32 %v11411_v36, %v2790_v1  ;;  %9129 = vrsqrt.f32 %v2748_v40  ;;  %v2986_v47 = vmul.f32 0.7978846, %v2962_v57  ;;  %v9116_v60 = vpop.eup %9115  ;;  %v11718_v20 = vadd.f32 %v11420_v6, %v2820_v19 }
 0x526   : > { %v2987_v0 = vmul.f32 0.7978846, %v2963_v42  ;;  %v2892_v55 = vmul.f32 0.044715, %v11663_v52  ;;  %v2893_v44 = vmul.f32 0.044715, %v11698_v13  ;;  %v9118_v35 = vpop.eup %9117  ;;  %v2791_v26 = vmul.f32 %v9116_v60, %v2719_v39 }
 0x527   : > { %v11723_v28 = vadd.f32 %v11420_v6, %v2818_v27  ;;  %v2749_v34 = vadd.f32 1e-05, %v2701_v22  ;;  %9131 = vtanh.f32 %v2986_v47  ;;  %v9120_v37 = vpop.eup %9119  ;;  %v3030_v63 = vadd.f32 1.0, %v9118_v35 }
 0x528   : > { %9133 = vtanh.f32 %v2987_v0  ;;  %v2916_v17 = vmul.f32 %v2892_v55, %v11663_v52  ;;  %v2917_v33 = vmul.f32 %v2893_v44, %v11698_v13  ;;  %v11731_v18 = vadd.f32 %v11420_v6, %v2821_v38 }
 0x529   : > { %v2819_v41 = vmul.f32 %v11411_v36, %v2791_v26  ;;  %9135 = vrsqrt.f32 %v2749_v34  ;;  %v3031_v43 = vadd.f32 1.0, %v9120_v37  ;;  %v2725_v16 = vsub.f32 %v11324_v2, %v11684_v10 }
 0x52a   : > { %v2940_v53 = vmul.f32 %v2916_v17, %v11663_v52  ;;  %v2941_v39 = vmul.f32 %v2917_v33, %v11698_v13  ;;  %v2894_v24 = vmul.f32 0.044715, %v11723_v28  ;;  %v2722_v58 = vsub.f32 %v11332_v50, %v11660_v3 }
 0x52b   : > { %v11740_v5 = vadd.f32 %v11420_v6, %v2819_v41  ;;  %v3054_v15 = vmul.f32 %v3030_v63, %v11634_v23  ;;  %v3055_v9 = vmul.f32 %v3031_v43, %v11654_v14  ;;  %v2896_v29 = vmul.f32 0.044715, %v11718_v20 }
 0x52c   : > { %v2964_v31 = vadd.f32 %v2940_v53, %v11663_v52  ;;  %v2965_v2 = vadd.f32 %v2941_v39, %v11698_v13  ;;  %v2918_v10 = vmul.f32 %v2894_v24, %v11723_v28  ;;  %v2866_v45 = vmul.f32 0.5, %v11669_v32 }
 0x52d   : > { %v3074_v61 = vpack.c.bf16 %v3055_v9, %v3054_v15  ;;  %v2895_v12 = vmul.f32 0.044715, %v11740_v5  ;;  %v2897_v50 = vmul.f32 0.044715, %v11731_v18  ;;  %v2920_v57 = vmul.f32 %v2896_v29, %v11718_v20 }
 0x52e   : > { %v9122_v19 = vpop.eup %9121  ;;  %v2988_v40 = vmul.f32 0.7978846, %v2964_v31  ;;  %v2989_v14 = vmul.f32 0.7978846, %v2965_v2  ;;  %v2942_v48 = vmul.f32 %v2918_v10, %v11723_v28  ;;  %v2723_v42 = vsub.f32 %v11342_v25, %v11677_v21 }
 0x52f   : > { %v9124_v3 = vpop.eup %9123  ;;  %v2794_v23 = vmul.f32 %v9122_v19, %v2722_v58  ;;  %8509 = vmatprep.mubr.msk.bf16.mxu0 %vm414_vm0, %v3074_v61  ;;  %v2919_v4 = vmul.f32 %v2895_v12, %v11740_v5  ;;  %v2921_v38 = vmul.f32 %v2897_v50, %v11731_v18  ;;  %v2867_v0 = vmul.f32 0.5, %v11675_v62 }
 0x530   : > { %v3032_v1 = vadd.f32 1.0, %v9124_v3  ;;  %v9126_v32 = vpop.eup %9125  ;;  %9137 = vtanh.f32 %v2988_v40  ;;  %v2966_v22 = vadd.f32 %v2942_v48, %v11723_v28  ;;  %v2944_v37 = vmul.f32 %v2920_v57, %v11718_v20 }
 0x531   : > { %v2822_v27 = vmul.f32 %v11411_v36, %v2794_v23  ;;  %v9128_v47 = vpop.eup %9127  ;;  %v3033_v60 = vadd.f32 1.0, %v9126_v32  ;;  %9139 = vtanh.f32 %v2989_v14  ;;  %v2943_v55 = vmul.f32 %v2919_v4, %v11740_v5 }
 0x532   : > { %v9130_v44 = vpop.eup %9129  ;;  %v2795_v35 = vmul.f32 %v9128_v47, %v2723_v42  ;;  %v3056_v26 = vmul.f32 %v3032_v1, %v11613_v56  ;;  %v2990_v34 = vmul.f32 0.7978846, %v2966_v22  ;;  %v2945_v62 = vmul.f32 %v2921_v38, %v11731_v18 }
 0x533   : > { %v2796_v25 = vmul.f32 %v9130_v44, %v2724_v7  ;;  %v3057_v21 = vmul.f32 %v3033_v60, %v11637_v54  ;;  %v2967_v63 = vadd.f32 %v2943_v55, %v11740_v5  ;;  %v11773_v33 = vadd.f32 %v11420_v6, %v2822_v27 }
 0x534   : > { %v9132_v17 = vpop.eup %9131  ;;  %v2823_v41 = vmul.f32 %v11411_v36, %v2795_v35  ;;  %9141 = vtanh.f32 %v2990_v34  ;;  %v2968_v56 = vadd.f32 %v2944_v37, %v11718_v20  ;;  %v2969_v58 = vadd.f32 %v2945_v62, %v11731_v18 }
 0x535   : > { %v9134_v43 = vpop.eup %9133  ;;  %v2824_v53 = vmul.f32 %v11411_v36, %v2796_v25  ;;  %v3075_v30 = vpack.c.bf16 %v3057_v21, %v3056_v26  ;;  %v3034_v49 = vadd.f32 1.0, %v9132_v17  ;;  %v2991_v7 = vmul.f32 0.7978846, %v2967_v63 }
 0x536   : > { %v9136_v54 = vpop.eup %9135  ;;  %v11779_v39 = vadd.f32 %v11420_v6, %v2823_v41  ;;  %v3035_v24 = vadd.f32 1.0, %v9134_v43  ;;  %v2992_v15 = vmul.f32 0.7978846, %v2968_v56  ;;  %v2993_v29 = vmul.f32 0.7978846, %v2969_v58 }
 0x537   : > { %v11783_v9 = vadd.f32 %v11420_v6, %v2824_v53  ;;  %v2797_v31 = vmul.f32 %v9136_v54, %v2725_v16  ;;  %8510 = vmatmul.mubr.msk.bf16.gmra.mxu0 %vm414_vm0, %v3075_v30  ;;  %9143 = vtanh.f32 %v2991_v7  ;;  %v3058_v2 = vmul.f32 %v3034_v49, %v2866_v45 }
 0x538   : > { %v3059_v10 = vmul.f32 %v3035_v24, %v2867_v0  ;;  %9145 = vtanh.f32 %v2992_v15  ;;  %v2898_v61 = vmul.f32 0.044715, %v11773_v33  ;;  %v2899_v12 = vmul.f32 0.044715, %v11779_v39 }
 0x539   : > { %v2825_v19 = vmul.f32 %v11411_v36, %v2797_v31  ;;  %9147 = vtanh.f32 %v2993_v29  ;;  %v2900_v3 = vmul.f32 0.044715, %v11783_v9  ;;  %v2868_v57 = vmul.f32 0.5, %v11663_v52 }
 0x53a   : > { %v3076_v50 = vpack.c.bf16 %v3059_v10, %v3058_v2  ;;  %v2922_v16 = vmul.f32 %v2898_v61, %v11773_v33  ;;  %v2923_v45 = vmul.f32 %v2899_v12, %v11779_v39  ;;  %v2870_v63 = vmul.f32 0.5, %v11723_v28 }
 0x53b   : > { %v11791_v23 = vadd.f32 %v11420_v6, %v2825_v19  ;;  %v2924_v40 = vmul.f32 %v2900_v3, %v11783_v9  ;;  %v2869_v6 = vmul.f32 0.5, %v11698_v13  ;;  %v2871_v17 = vmul.f32 0.5, %v11740_v5 }
 0x53c   : > { %8513 = vmatprep.mubr.msk.bf16.mxu0 %vm414_vm0, %v3076_v50  ;;  %v2946_v14 = vmul.f32 %v2922_v16, %v11773_v33  ;;  %v2947_v48 = vmul.f32 %v2923_v45, %v11779_v39  ;;  %v2872_v7 = vmul.f32 0.5, %v11718_v20  ;;  %v2873_v54 = vmul.f32 0.5, %v11731_v18 }
 0x53d   : > { %v9138_v36 = vpop.eup %9137  ;;  %v2901_v1 = vmul.f32 0.044715, %v11791_v23  ;;  %v2948_v32 = vmul.f32 %v2924_v40, %v11783_v9  ;;  %v2874_v19 = vmul.f32 0.5, %v11773_v33  ;;  %v2875_v61 = vmul.f32 0.5, %v11779_v39 }
 0x53e   : > { %v9140_v4 = vpop.eup %9139  ;;  %v3036_v38 = vadd.f32 1.0, %v9138_v36  ;;  %v2970_v27 = vadd.f32 %v2946_v14, %v11773_v33  ;;  %v2971_v22 = vadd.f32 %v2947_v48, %v11779_v39  ;;  %v2876_v16 = vmul.f32 0.5, %v11783_v9  ;;  %v3133_v33 = vpop.permute.xlu1 %3132 }
 0x53f   : > { %v3037_v42 = vadd.f32 1.0, %v9140_v4  ;;  %v2925_v47 = vmul.f32 %v2901_v1, %v11791_v23  ;;  %v2972_v0 = vadd.f32 %v2948_v32, %v11783_v9  ;;  %v2877_v45 = vmul.f32 0.5, %v11791_v23 }
 0x540   : > { %v3060_v60 = vmul.f32 %v3036_v38, %v2868_v57  ;;  %v2994_v35 = vmul.f32 0.7978846, %v2970_v27  ;;  %v2995_v26 = vmul.f32 0.7978846, %v2971_v22  ;;  %v11825_v57 = vld [vmem:[%s14860_s5 + $0x9] ss:$0 sm:$0xff] }
 0x541   : > { %v9142_v55 = vpop.eup %9141  ;;  %v3061_v44 = vmul.f32 %v3037_v42, %v2869_v6  ;;  %v2949_v52 = vmul.f32 %v2925_v47, %v11791_v23  ;;  %v2996_v13 = vmul.f32 0.7978846, %v2972_v0  ;;  %v3131_v6 = vpop.permute.xlu0 %3130 }
 0x542   : > { %v3038_v37 = vadd.f32 1.0, %v9142_v55  ;;  %9149 = vtanh.f32 %v2994_v35  ;;  %v3135_v39 = vpop.permute.xlu1 %3134 }
 0x543   : > { %v3077_v34 = vpack.c.bf16 %v3061_v44, %v3060_v60  ;;  %v2973_v25 = vadd.f32 %v2949_v52, %v11791_v23  ;;  %9151 = vtanh.f32 %v2995_v26 }
 0x544   : > { %v9144_v21 = vpop.eup %9143  ;;  %9153 = vtanh.f32 %v2996_v13  ;;  %v3062_v30 = vmul.f32 %v3038_v37, %v2870_v63 }
 0x545   : > { %v9146_v62 = vpop.eup %9145  ;;  %8514 = vmatmul.mubr.msk.bf16.gmra.mxu0 %vm414_vm0, %v3077_v34  ;;  %v3039_v41 = vadd.f32 1.0, %v9144_v21  ;;  %v2997_v56 = vmul.f32 0.7978846, %v2973_v25 }
 0x546   : > { %v3040_v43 = vadd.f32 1.0, %v9146_v62  ;;  %v9148_v53 = vpop.eup %9147  ;;  %v3137_v42 = vpop.permute.xlu1 %3136 }
 0x547   : > { %v3063_v49 = vmul.f32 %v3039_v41, %v2871_v17  ;;  %9155 = vtanh.f32 %v2997_v56  ;;  %v3041_v24 = vadd.f32 1.0, %v9148_v53  ;;  %v3139_v41 = vpop.permute.xlu0 %3138 }
 0x548   : > { %v3064_v58 = vmul.f32 %v3040_v43, %v2872_v7 }
 0x549   : > { %v3078_v28 = vpack.c.bf16 %v3063_v49, %v3062_v30  ;;  %v3065_v15 = vmul.f32 %v3041_v24, %v2873_v54 }
 0x54a   : > { %v3141_v43 = vpop.permute.xlu1 %3140 }
 0x54b   : > { %8517 = vmatprep.mubr.msk.bf16.mxu0 %vm414_vm0, %v3078_v28  ;;  %v3079_v31 = vpack.c.bf16 %v3065_v15, %v3064_v58  ;;  %v3143_v53 = vpop.permute.xlu0 %3142 }
 0x54d   : > { %8518 = vmatmul.mubr.msk.bf16.gmra.mxu0 %vm414_vm0, %v3079_v31 }
 0x54e   : > { %v3145_v28 = vpop.permute.xlu1 %3144 }
 0x54f   : > { %v9150_v5 = vpop.eup %9149 }
 0x550   : > { %v9152_v2 = vpop.eup %9151  ;;  %v3042_v10 = vadd.f32 1.0, %v9150_v5 }
 0x551   : > { %v9154_v29 = vpop.eup %9153  ;;  %v3043_v20 = vadd.f32 1.0, %v9152_v2 }
 0x552   : > { %v3044_v12 = vadd.f32 1.0, %v9154_v29  ;;  %v3066_v50 = vmul.f32 %v3042_v10, %v2874_v19 }
 0x553   : > { %v3067_v3 = vmul.f32 %v3043_v20, %v2875_v61 }
 0x554   : > { %v9156_v18 = vpop.eup %9155  ;;  %v3068_v14 = vmul.f32 %v3044_v12, %v2876_v16 }
 0x555   : > { %v3045_v40 = vadd.f32 1.0, %v9156_v18  ;;  %v3080_v36 = vpack.c.bf16 %v3067_v3, %v3066_v50 }
 0x557   : > { %v3069_v48 = vmul.f32 %v3045_v40, %v2877_v45  ;;  %8521 = vmatprep.mubr.msk.bf16.mxu0 %vm414_vm0, %v3080_v36 }
 0x559   : > { %v3081_v1 = vpack.c.bf16 %v3069_v48, %v3068_v14  ;;  %v3147_v48 = vpop.permute.xlu0 %3146 }
 0x55b   : > { %8522 = vmatmul.mubr.msk.bf16.gmra.mxu0 %vm414_vm0, %v3081_v1  ;;  %v3149_v1 = vpop.permute.xlu1 %3148 }
 0x5ba   : > { %v8503_v4 = vpop.f32.mrf.mxu0 }
 0x5bb   : > { %v3281_v9 = vadd.f32 %v8503_v4, %v3135_v39 }
 0x5bc   : > { %v3272_v23 = vpop.f32.mrf.mxu0 }
 0x5bd   : > { %v11828_v38 = vadd.f32 %v11825_v57, %v3281_v9  ;;  %v3273_v32 = vadd.f32 %v3272_v23, %v3131_v6 }
 0x5be   : > { %v8504_v27 = vpop.f32.mrf.mxu0 }
 0x5bf   : > { %v11831_v22 = vadd.f32 %v11825_v57, %v3273_v32  ;;  %v3284_v47 = vadd.f32 %v8504_v27, %v3137_v42  ;;  %v3404_v60 = vsel %vm414_vm0, %v11828_v38, 0.0  ;;  %v3496_v52 = vmul.f32 %v11828_v38, %v11828_v38  ;;  %v3153_v32 = vpop.permute.xlu1 %3152 }
 0x5c0   : > { %3405 = vadd.xlane.f32.xlu0 %v3404_v60  ;;  %v3275_v0 = vpop.f32.mrf.mxu0 }
 0x5c1   : > { %v11836_v55 = vadd.f32 %v11825_v57, %v3284_v47  ;;  %v3276_v44 = vadd.f32 %v3275_v0, %v3133_v33  ;;  %v3398_v26 = vsel %vm414_vm0, %v11831_v22, 0.0  ;;  %v3524_v37 = vsel %vm414_vm0, %v3496_v52, 0.0  ;;  %v3151_v33 = vpop.permute.xlu0 %3150 }
 0x5c2   : > { %v3494_v62 = vmul.f32 %v11831_v22, %v11831_v22 }
 0x5c3   : > { %v11839_v35 = vadd.f32 %v11825_v57, %v3276_v44  ;;  %v3497_v34 = vmul.f32 %v11836_v55, %v11836_v55  ;;  %v3407_v63 = vsel %vm414_vm0, %v11836_v55, 0.0 }
 0x5c4   : > { %3399 = vadd.xlane.f32.xlu0 %v3398_v26  ;;  %v3518_v56 = vsel %vm414_vm0, %v3494_v62, 0.0 }
 0x5c5   : > { %v3401_v13 = vsel %vm414_vm0, %v11839_v35, 0.0  ;;  %v3527_v25 = vsel %vm414_vm0, %v3497_v34, 0.0  ;;  %v3495_v21 = vmul.f32 %v11839_v35, %v11839_v35  ;;  %v3155_v52 = vpop.permute.xlu0 %3154 }
 0x5c6   : > { %3402 = vadd.xlane.f32.xlu1 %v3401_v13 }
 0x5c7   : > { %v3521_v17 = vsel %vm414_vm0, %v3495_v21, 0.0  ;;  %v3157_v21 = vpop.permute.xlu1 %3156 }
 0x5c8   : > { %3525 = vadd.xlane.f32.xlu0 %v3524_v37 }
 0x5ca   : > { %3528 = vadd.xlane.f32.xlu1 %v3527_v25 }
 0x5cc   : > { %3408 = vadd.xlane.f32.xlu0 %v3407_v63 }
 0x5ce   : > { %3522 = vadd.xlane.f32.xlu1 %v3521_v17 }
 0x5d0   : > { %3519 = vadd.xlane.f32.xlu0 %v3518_v56  ;;  %v3159_v56 = vpop.permute.xlu0 %3158 }
 0x5d5   : > { %v8507_v30 = vpop.f32.mrf.mxu0 }
 0x5d6   : > { %v3297_v49 = vadd.f32 %v8507_v30, %v3143_v53 }
 0x5d7   : > { %v3288_v7 = vpop.f32.mrf.mxu0 }
 0x5d8   : > { %v11860_v54 = vadd.f32 %v11825_v57, %v3297_v49  ;;  %v3289_v24 = vadd.f32 %v3288_v7, %v3139_v41 }
 0x5d9   : > { %v8508_v58 = vpop.f32.mrf.mxu0 }
 0x5da   : > { %v11863_v15 = vadd.f32 %v11825_v57, %v3289_v24  ;;  %v3300_v31 = vadd.f32 %v8508_v58, %v3145_v28  ;;  %v3416_v5 = vsel %vm414_vm0, %v11860_v54, 0.0  ;;  %v3500_v12 = vmul.f32 %v11860_v54, %v11860_v54 }
 0x5db   : > { %v3291_v2 = vpop.f32.mrf.mxu0  ;;  %3417 = vadd.xlane.f32.xlu0 %v3416_v5 }
 0x5dc   : > { %v11868_v10 = vadd.f32 %v11825_v57, %v3300_v31  ;;  %v3292_v29 = vadd.f32 %v3291_v2, %v3141_v43  ;;  %v3410_v20 = vsel %vm414_vm0, %v11863_v15, 0.0  ;;  %v3536_v3 = vsel %vm414_vm0, %v3500_v12, 0.0  ;;  %v3161_v31 = vpop.permute.xlu1 %3160 }
 0x5dd   : > { %v3498_v16 = vmul.f32 %v11863_v15, %v11863_v15 }
 0x5de   : > { %v11871_v19 = vadd.f32 %v11825_v57, %v3292_v29  ;;  %v3419_v61 = vsel %vm414_vm0, %v11868_v10, 0.0  ;;  %v3501_v50 = vmul.f32 %v11868_v10, %v11868_v10 }
 0x5df   : > { %3420 = vadd.xlane.f32.xlu1 %v3419_v61  ;;  %3411 = vadd.xlane.f32.xlu0 %v3410_v20  ;;  %v3530_v36 = vsel %vm414_vm0, %v3498_v16, 0.0 }
 0x5e0   : > { %v3413_v18 = vsel %vm414_vm0, %v11871_v19, 0.0  ;;  %v3539_v45 = vsel %vm414_vm0, %v3501_v50, 0.0  ;;  %v3499_v40 = vmul.f32 %v11871_v19, %v11871_v19 }
 0x5e2   : > { %v3533_v14 = vsel %vm414_vm0, %v3499_v40, 0.0  ;;  %v3165_v40 = vpop.permute.xlu1 %3164 }
 0x5e3   : > { %3414 = vadd.xlane.f32.xlu1 %v3413_v18  ;;  %3537 = vadd.xlane.f32.xlu0 %v3536_v3  ;;  %v3163_v3 = vpop.permute.xlu0 %3162 }
 0x5e7   : > { %3540 = vadd.xlane.f32.xlu1 %v3539_v45  ;;  %3531 = vadd.xlane.f32.xlu0 %v3530_v36 }
 0x5eb   : > { %3534 = vadd.xlane.f32.xlu1 %v3533_v14 }
 0x5f7   : > { %v8511_v39 = vpop.f32.mrf.mxu0 }
 0x5f8   : > { %v3313_v4 = vadd.f32 %v8511_v39, %v3151_v33  ;;  %v3167_v33 = vpop.permute.xlu0 %3166 }
 0x5f9   : > { %v3304_v9 = vpop.f32.mrf.mxu0 }
 0x5fa   : > { %v11892_v6 = vadd.f32 %v11825_v57, %v3313_v4  ;;  %v3305_v23 = vadd.f32 %v3304_v9, %v3147_v48 }
 0x5fb   : > { %v8512_v42 = vpop.f32.mrf.mxu0 }
 0x5fc   : > { %v11895_v27 = vadd.f32 %v11825_v57, %v3305_v23  ;;  %v3316_v47 = vadd.f32 %v8512_v42, %v3153_v32  ;;  %v3428_v60 = vsel %vm414_vm0, %v11892_v6, 0.0  ;;  %v3504_v25 = vmul.f32 %v11892_v6, %v11892_v6 }
 0x5fd   : > { %v3307_v0 = vpop.f32.mrf.mxu0  ;;  %3429 = vadd.xlane.f32.xlu0 %v3428_v60 }
 0x5fe   : > { %v11900_v44 = vadd.f32 %v11825_v57, %v3316_v47  ;;  %v3308_v26 = vadd.f32 %v3307_v0, %v3149_v1  ;;  %v3422_v37 = vsel %vm414_vm0, %v11895_v27, 0.0  ;;  %v3548_v17 = vsel %vm414_vm0, %v3504_v25, 0.0  ;;  %v3169_v47 = vpop.permute.xlu1 %3168 }
 0x5ff   : > { %v3502_v41 = vmul.f32 %v11895_v27, %v11895_v27 }
 0x600   : > { %v11903_v13 = vadd.f32 %v11825_v57, %v3308_v26  ;;  %v3431_v34 = vsel %vm414_vm0, %v11900_v44, 0.0  ;;  %v3505_v62 = vmul.f32 %v11900_v44, %v11900_v44 }
 0x601   : > { %3432 = vadd.xlane.f32.xlu1 %v3431_v34  ;;  %3423 = vadd.xlane.f32.xlu0 %v3422_v37  ;;  %v3542_v58 = vsel %vm414_vm0, %v3502_v41, 0.0 }
 0x602   : > { %v3425_v63 = vsel %vm414_vm0, %v11903_v13, 0.0  ;;  %v3503_v49 = vmul.f32 %v11903_v13, %v11903_v13  ;;  %v3551_v24 = vsel %vm414_vm0, %v3505_v62, 0.0 }
 0x604   : > { %v3545_v29 = vsel %vm414_vm0, %v3503_v49, 0.0 }
 0x605   : > { %3426 = vadd.xlane.f32.xlu1 %v3425_v63  ;;  %v8515_v43 = vpop.f32.mrf.mxu0  ;;  %3549 = vadd.xlane.f32.xlu0 %v3548_v17 }
 0x606   : > { %v3329_v53 = vadd.f32 %v8515_v43, %v3159_v56  ;;  %v3171_v43 = vpop.permute.xlu0 %3170 }
 0x607   : > { %v3320_v30 = vpop.f32.mrf.mxu0 }
 0x608   : > { %v11921_v7 = vadd.f32 %v11825_v57, %v3329_v53  ;;  %v3321_v28 = vadd.f32 %v3320_v30, %v3155_v52  ;;  %v3173_v30 = vpop.permute.xlu1 %3172 }
 0x609   : > { %3552 = vadd.xlane.f32.xlu1 %v3551_v24  ;;  %v8516_v5 = vpop.f32.mrf.mxu0  ;;  %3543 = vadd.xlane.f32.xlu0 %v3542_v58 }
 0x60a   : > { %v3332_v2 = vadd.f32 %v8516_v5, %v3161_v31  ;;  %v11927_v20 = vadd.f32 %v11825_v57, %v3321_v28  ;;  %v3440_v50 = vsel %vm414_vm0, %v11921_v7, 0.0  ;;  %v3508_v1 = vmul.f32 %v11921_v7, %v11921_v7  ;;  %v3175_v31 = vpop.permute.xlu0 %3174 }
 0x60b   : > { %v3323_v61 = vpop.f32.mrf.mxu0 }
 0x60c   : > { %v11930_v12 = vadd.f32 %v11825_v57, %v3332_v2  ;;  %v3324_v18 = vadd.f32 %v3323_v61, %v3157_v21  ;;  %v3434_v14 = vsel %vm414_vm0, %v11927_v20, 0.0  ;;  %v3506_v4 = vmul.f32 %v11927_v20, %v11927_v20 }
 0x60d   : > { %3546 = vadd.xlane.f32.xlu1 %v3545_v29  ;;  %3441 = vadd.xlane.f32.xlu0 %v3440_v50  ;;  %v8519_v45 = vpop.f32.mrf.mxu0  ;;  %v3560_v42 = vsel %vm414_vm0, %v3508_v1, 0.0 }
 0x60e   : > { %v3443_v16 = vsel %vm414_vm0, %v11930_v12, 0.0  ;;  %v11937_v36 = vadd.f32 %v11825_v57, %v3324_v18  ;;  %v3345_v23 = vadd.f32 %v8519_v45, %v3167_v33  ;;  %v3509_v32 = vmul.f32 %v11930_v12, %v11930_v12 }
 0x60f   : > { %v3336_v48 = vpop.f32.mrf.mxu0  ;;  %v3554_v0 = vsel %vm414_vm0, %v3506_v4, 0.0  ;;  %v8856_v4 = vld [vmem:[%s14858_s3 + $0x48] ss:$16 sps:$4 sm:$0xff]  }
 0x610   : > { %v3437_v9 = vsel %vm414_vm0, %v11937_v36, 0.0  ;;  %v11952_v26 = vadd.f32 %v11825_v57, %v3345_v23  ;;  %v3563_v52 = vsel %vm414_vm0, %v3509_v32, 0.0  ;;  %v3337_v34 = vadd.f32 %v3336_v48, %v3163_v3  ;;  %v3177_v3 = vpop.permute.xlu1 %3176 }
 0x611   : > { %3444 = vadd.xlane.f32.xlu1 %v3443_v16  ;;  %3435 = vadd.xlane.f32.xlu0 %v3434_v14  ;;  %v8520_v39 = vpop.f32.mrf.mxu0  ;;  %v3507_v37 = vmul.f32 %v11937_v36, %v11937_v36  ;;  %v8855_v16 = vld [vmem:[%s14858_s3 + $0x68] ss:$16 sps:$4 sm:$0xff]  }
 0x612   : > { %v3348_v60 = vadd.f32 %v8520_v39, %v3169_v47  ;;  %v11961_v62 = vadd.f32 %v11825_v57, %v3337_v34  ;;  %v3452_v56 = vsel %vm414_vm0, %v11952_v26, 0.0  ;;  %v3512_v58 = vmul.f32 %v11952_v26, %v11952_v26  ;;  %8525 = vmatprep.subr.bf16.mxu1 %v8855_v16 }
 0x613   : > { %v3339_v25 = vpop.f32.mrf.mxu0  ;;  %v3557_v17 = vsel %vm414_vm0, %v3507_v37, 0.0  ;;  %8526 = vmatpush3.bf16.msra.mxu1 %v8855_v16 }
 0x614   : > { %v11958_v21 = vadd.f32 %v11825_v57, %v3348_v60  ;;  %v3340_v41 = vadd.f32 %v3339_v25, %v3165_v40  ;;  %v3446_v28 = vsel %vm414_vm0, %v11961_v62, 0.0  ;;  %v3510_v2 = vmul.f32 %v11961_v62, %v11961_v62  ;;  %8527 = vmatprep.subr.bf16.mxu1 %v8856_v4  ;;  %v8857_v60 = vld [vmem:[%s14858_s3 + $0x28] ss:$16 sps:$4 sm:$0xff]  }
 0x615   : > { %3438 = vadd.xlane.f32.xlu1 %v3437_v9  ;;  %3561 = vadd.xlane.f32.xlu0 %v3560_v42  ;;  %v3572_v50 = vsel %vm414_vm0, %v3512_v58, 0.0  ;;  %v8858_v25 = vld [vmem:[%s14858_s3 + $0x8] ss:$16 sps:$4 sm:$0xff]  }
 0x616   : > { %v3455_v53 = vsel %vm414_vm0, %v11958_v21, 0.0  ;;  %v11969_v24 = vadd.f32 %v11825_v57, %v3340_v41  ;;  %v3513_v18 = vmul.f32 %v11958_v21, %v11958_v21  ;;  %v3566_v40 = vsel %vm414_vm0, %v3510_v2, 0.0 }
 0x617   : > { %8528 = vmatpush3.bf16.msra.mxu1 %v8856_v4 }
 0x618   : > { %v3449_v29 = vsel %vm414_vm0, %v11969_v24, 0.0  ;;  %v3575_v1 = vsel %vm414_vm0, %v3513_v18, 0.0  ;;  %v3511_v33 = vmul.f32 %v11969_v24, %v11969_v24  ;;  %8529 = vmatprep.subr.bf16.mxu1 %v8857_v60 }
 0x619   : > { %3564 = vadd.xlane.f32.xlu1 %v3563_v52  ;;  %3555 = vadd.xlane.f32.xlu0 %v3554_v0 }
 0x61a   : > { %v3569_v42 = vsel %vm414_vm0, %v3511_v33, 0.0 }
 0x61b   : > { %v8523_v63 = vpop.f32.mrf.mxu0  ;;  %8530 = vmatpush3.bf16.msra.mxu1 %v8857_v60 }
 0x61c   : > { %v3361_v61 = vadd.f32 %v8523_v63, %v3175_v31  ;;  %8531 = vmatprep.subr.bf16.mxu1 %v8858_v25 }
 0x61d   : > { %3558 = vadd.xlane.f32.xlu1 %v3557_v17  ;;  %3453 = vadd.xlane.f32.xlu0 %v3452_v56  ;;  %v3352_v49 = vpop.f32.mrf.mxu0 }
 0x61e   : > { %v11987_v14 = vadd.f32 %v11825_v57, %v3361_v61  ;;  %v3353_v48 = vadd.f32 %v3352_v49, %v3171_v43 }
 0x61f   : > { %v8524_v5 = vpop.f32.mrf.mxu0  ;;  %8532 = vmatpush3.bf16.msra.mxu1 %v8858_v25 }
 0x620   : > { %v3364_v45 = vadd.f32 %v8524_v5, %v3177_v3  ;;  %v11999_v23 = vadd.f32 %v11825_v57, %v3353_v48  ;;  %v3464_v47 = vsel %vm414_vm0, %v11987_v14, 0.0  ;;  %v3516_v41 = vmul.f32 %v11987_v14, %v11987_v14 }
 0x621   : > { %3456 = vadd.xlane.f32.xlu1 %v3455_v53  ;;  %3447 = vadd.xlane.f32.xlu0 %v3446_v28  ;;  %v3355_v39 = vpop.f32.mrf.mxu0 }
 0x622   : > { %v11996_v9 = vadd.f32 %v11825_v57, %v3364_v45  ;;  %v3356_v32 = vadd.f32 %v3355_v39, %v3173_v30  ;;  %v3458_v34 = vsel %vm414_vm0, %v11999_v23, 0.0  ;;  %v3514_v37 = vmul.f32 %v11999_v23, %v11999_v23 }
 0x623   : > { %v3584_v53 = vsel %vm414_vm0, %v3516_v41, 0.0 }
 0x624   : > { %v3467_v0 = vsel %vm414_vm0, %v11996_v9, 0.0  ;;  %v12010_v52 = vadd.f32 %v11825_v57, %v3356_v32  ;;  %v3578_v17 = vsel %vm414_vm0, %v3514_v37, 0.0  ;;  %v3517_v43 = vmul.f32 %v11996_v9, %v11996_v9 }
 0x625   : > { %3450 = vadd.xlane.f32.xlu1 %v3449_v29  ;;  %3573 = vadd.xlane.f32.xlu0 %v3572_v50 }
 0x626   : > { %v3461_v63 = vsel %vm414_vm0, %v12010_v52, 0.0  ;;  %v3515_v57 = vmul.f32 %v12010_v52, %v12010_v52  ;;  %v3587_v30 = vsel %vm414_vm0, %v3517_v43, 0.0 }
 0x628   : > { %v3581_v56 = vsel %vm414_vm0, %v3515_v57, 0.0 }
 0x629   : > { %3576 = vadd.xlane.f32.xlu1 %v3575_v1  ;;  %3567 = vadd.xlane.f32.xlu0 %v3566_v40 }
 0x62d   : > { %3570 = vadd.xlane.f32.xlu1 %v3569_v42  ;;  %3465 = vadd.xlane.f32.xlu0 %v3464_v47 }
 0x631   : > { %3468 = vadd.xlane.f32.xlu1 %v3467_v0  ;;  %3459 = vadd.xlane.f32.xlu0 %v3458_v34 }
 0x635   : > { %3462 = vadd.xlane.f32.xlu1 %v3461_v63  ;;  %3579 = vadd.xlane.f32.xlu0 %v3578_v17 }
 0x639   : > { %3582 = vadd.xlane.f32.xlu1 %v3581_v56  ;;  %3585 = vadd.xlane.f32.xlu0 %v3584_v53  ;;  %v12035_v56 = vld [vmem:[%s14860_s5 + $0xa] ss:$0 sm:$0xff]  ;;  %v12040_v53 = vld [vmem:[%s14860_s5 + $0xb] ss:$0 sm:$0xff] }
 0x63d   : > { %3588 = vadd.xlane.f32.xlu1 %v3587_v30 }
 0x649   : > { %v3406_v49 = vpop.xlane.xlu0 %3405 }
 0x64a   : > { %v3472_v58 = vmul.f32 0.015625, %v3406_v49 }
 0x64c   : > { %v3616_v2 = vmul.f32 %v3472_v58, %v3472_v58  ;;  %v3664_v57 = vsub.f32 %v11828_v38, %v3472_v58 }
 0x64d   : > { %v3400_v28 = vpop.xlane.xlu0 %3399 }
 0x64e   : > { %v3470_v16 = vmul.f32 0.015625, %v3400_v28 }
 0x64f   : > { %v3403_v31 = vpop.xlane.xlu1 %3402 }
 0x650   : > { %v3471_v61 = vmul.f32 0.015625, %v3403_v31  ;;  %v3614_v42 = vmul.f32 %v3470_v16, %v3470_v16 }
 0x651   : > { %v3526_v5 = vpop.xlane.xlu0 %3525 }
 0x652   : > { %v3592_v29 = vmul.f32 0.015625, %v3526_v5  ;;  %v3615_v48 = vmul.f32 %v3471_v61, %v3471_v61 }
 0x653   : > { %v3529_v18 = vpop.xlane.xlu1 %3528 }
 0x654   : > { %v3640_v50 = vsub.f32 %v3592_v29, %v3616_v2  ;;  %v3593_v33 = vmul.f32 0.015625, %v3529_v18  ;;  %v3663_v2 = vsub.f32 %v11839_v35, %v3471_v61 }
 0x655   : > { %v3409_v3 = vpop.xlane.xlu0 %3408 }
 0x656   : > { %v3688_v45 = vadd.f32 1e-05, %v3640_v50  ;;  %v3473_v40 = vmul.f32 0.015625, %v3409_v3  ;;  %v3662_v3 = vsub.f32 %v11831_v22, %v3470_v16 }
 0x657   : > { %v3523_v1 = vpop.xlane.xlu1 %3522 }
 0x658   : > { %9157 = vrsqrt.f32 %v3688_v45  ;;  %v3617_v39 = vmul.f32 %v3473_v40, %v3473_v40  ;;  %v3591_v4 = vmul.f32 0.015625, %v3523_v1  ;;  %v3665_v58 = vsub.f32 %v11836_v55, %v3473_v40 }
 0x659   : > { %v3520_v32 = vpop.xlane.xlu0 %3519 }
 0x65a   : > { %v3641_v47 = vsub.f32 %v3593_v33, %v3617_v39  ;;  %v3639_v60 = vsub.f32 %v3591_v4, %v3615_v48  ;;  %v3590_v0 = vmul.f32 0.015625, %v3520_v32 }
 0x65c   : > { %v3689_v34 = vadd.f32 1e-05, %v3641_v47  ;;  %v3687_v37 = vadd.f32 1e-05, %v3639_v60  ;;  %v3638_v25 = vsub.f32 %v3590_v0, %v3614_v42 }
 0x65e   : > { %9159 = vrsqrt.f32 %v3689_v34  ;;  %v3686_v63 = vadd.f32 1e-05, %v3638_v25 }
 0x65f   : > { %9161 = vrsqrt.f32 %v3687_v37 }
 0x660   : > { %9163 = vrsqrt.f32 %v3686_v63 }
 0x664   : > { %v3418_v17 = vpop.xlane.xlu0 %3417 }
 0x665   : > { %v9158_v41 = vpop.eup %9157  ;;  %v12043_v31 = vmul.f32 0.015625, %v3418_v17 }
 0x666   : > { %v3736_v43 = vmul.f32 %v9158_v41, %v3664_v57 }
 0x667   : > { %v3620_v55 = vmul.f32 %v12043_v31, %v12043_v31 }
 0x668   : > { %v3764_v30 = vmul.f32 %v12035_v56, %v3736_v43  ;;  %v3421_v49 = vpop.xlane.xlu1 %3420  ;;  %v3412_v28 = vpop.xlane.xlu0 %3411 }
 0x669   : > { %v12050_v29 = vmul.f32 0.015625, %v3421_v49  ;;  %v12052_v18 = vmul.f32 0.015625, %v3412_v28 }
 0x66a   : > { %v12046_v38 = vadd.f32 %v12040_v53, %v3764_v30 }
 0x66b   : > { %v9160_v5 = vpop.eup %9159  ;;  %v3621_v22 = vmul.f32 %v12050_v29, %v12050_v29  ;;  %v3618_v16 = vmul.f32 %v12052_v18, %v12052_v18 }
 0x66c   : > { %v9162_v50 = vpop.eup %9161  ;;  %v3737_v45 = vmul.f32 %v9160_v5, %v3665_v58  ;;  %v3415_v48 = vpop.xlane.xlu1 %3414  ;;  %v3840_v33 = vmul.f32 0.044715, %v12046_v38 }
 0x66d   : > { %v3538_v1 = vpop.xlane.xlu0 %3537  ;;  %v9164_v39 = vpop.eup %9163  ;;  %v3735_v4 = vmul.f32 %v9162_v50, %v3663_v2  ;;  %v12069_v34 = vmul.f32 0.015625, %v3415_v48 }
 0x66e   : > { %v3596_v40 = vmul.f32 0.015625, %v3538_v1  ;;  %v3765_v35 = vmul.f32 %v12035_v56, %v3737_v45  ;;  %v3734_v61 = vmul.f32 %v9164_v39, %v3662_v3  ;;  %v3864_v32 = vmul.f32 %v3840_v33, %v12046_v38 }
 0x66f   : > { %v3763_v42 = vmul.f32 %v12035_v56, %v3735_v4  ;;  %v3619_v48 = vmul.f32 %v12069_v34, %v12069_v34 }
 0x670   : > { %v3644_v47 = vsub.f32 %v3596_v40, %v3620_v55  ;;  %v12066_v60 = vadd.f32 %v12040_v53, %v3765_v35  ;;  %v3762_v0 = vmul.f32 %v12035_v56, %v3734_v61  ;;  %v3541_v37 = vpop.xlane.xlu1 %3540  ;;  %v3888_v63 = vmul.f32 %v3864_v32, %v12046_v38 }
 0x671   : > { %v3532_v25 = vpop.xlane.xlu0 %3531  ;;  %v12073_v57 = vadd.f32 %v12040_v53, %v3763_v42  ;;  %v3597_v17 = vmul.f32 0.015625, %v3541_v37 }
 0x672   : > { %v3692_v41 = vadd.f32 1e-05, %v3644_v47  ;;  %v3594_v43 = vmul.f32 0.015625, %v3532_v25  ;;  %v3841_v30 = vmul.f32 0.044715, %v12066_v60  ;;  %v12077_v49 = vadd.f32 %v12040_v53, %v3762_v0 }
 0x673   : > { %v3912_v28 = vadd.f32 %v3888_v63, %v12046_v38  ;;  %v3645_v58 = vsub.f32 %v3597_v17, %v3621_v22  ;;  %v3839_v45 = vmul.f32 0.044715, %v12073_v57  ;;  %v3668_v17 = vsub.f32 %v11860_v54, %v12043_v31 }
 0x674   : > { %9165 = vrsqrt.f32 %v3692_v41  ;;  %v3642_v5 = vsub.f32 %v3594_v43, %v3618_v16  ;;  %v3865_v2 = vmul.f32 %v3841_v30, %v12066_v60  ;;  %v3535_v50 = vpop.xlane.xlu1 %3534  ;;  %v3838_v3 = vmul.f32 0.044715, %v12077_v49 }
 0x675   : > { %v3693_v1 = vadd.f32 1e-05, %v3645_v58  ;;  %v3595_v33 = vmul.f32 0.015625, %v3535_v50  ;;  %v3863_v40 = vmul.f32 %v3839_v45, %v12073_v57  ;;  %v3936_v35 = vmul.f32 0.7978846, %v3912_v28 }
 0x676   : > { %v3690_v39 = vadd.f32 1e-05, %v3642_v5  ;;  %v3889_v4 = vmul.f32 %v3865_v2, %v12066_v60  ;;  %v3862_v55 = vmul.f32 %v3838_v3, %v12077_v49  ;;  %v3669_v30 = vsub.f32 %v11868_v10, %v12050_v29 }
 0x677   : > { %9167 = vrsqrt.f32 %v3693_v1  ;;  %v3643_v61 = vsub.f32 %v3595_v33, %v3619_v48  ;;  %v3887_v22 = vmul.f32 %v3863_v40, %v12073_v57  ;;  %v3666_v5 = vsub.f32 %v11863_v15, %v12052_v18 }
 0x678   : > { %v3913_v32 = vadd.f32 %v3889_v4, %v12066_v60  ;;  %9169 = vrsqrt.f32 %v3690_v39  ;;  %v3886_v42 = vmul.f32 %v3862_v55, %v12077_v49  ;;  %v3667_v31 = vsub.f32 %v11871_v19, %v12069_v34 }
 0x679   : > { %v3691_v16 = vadd.f32 1e-05, %v3643_v61  ;;  %v3911_v37 = vadd.f32 %v3887_v22, %v12073_v57  ;;  %9171 = vtanh.f32 %v3936_v35  ;;  %v3816_v18 = vmul.f32 0.5, %v12046_v38 }
 0x67a   : > { %v3937_v47 = vmul.f32 0.7978846, %v3913_v32  ;;  %v3910_v0 = vadd.f32 %v3886_v42, %v12077_v49  ;;  %v3817_v4 = vmul.f32 0.5, %v12066_v60  ;;  %v3814_v38 = vmul.f32 0.5, %v12077_v49 }
 0x67b   : > { %9173 = vrsqrt.f32 %v3691_v16  ;;  %v3935_v63 = vmul.f32 0.7978846, %v3911_v37 }
 0x67c   : > { %9175 = vtanh.f32 %v3937_v47  ;;  %v3934_v25 = vmul.f32 0.7978846, %v3910_v0 }
 0x67e   : > { %9177 = vtanh.f32 %v3934_v25 }
 0x67f   : > { %9179 = vtanh.f32 %v3935_v63 }
 0x681   : > { %v9166_v41 = vpop.eup %9165 }
 0x682   : > { %v3740_v43 = vmul.f32 %v9166_v41, %v3668_v17  ;;  %v3815_v17 = vmul.f32 0.5, %v12073_v57 }
 0x684   : > { %v3768_v28 = vmul.f32 %v12035_v56, %v3740_v43  ;;  %v9168_v58 = vpop.eup %9167 }
 0x685   : > { %v9170_v2 = vpop.eup %9169  ;;  %v3741_v50 = vmul.f32 %v9168_v58, %v3669_v30 }
 0x686   : > { %v12101_v3 = vadd.f32 %v12040_v53, %v3768_v28  ;;  %v3738_v45 = vmul.f32 %v9170_v2, %v3666_v5  ;;  %v3430_v48 = vpop.xlane.xlu0 %3429  ;;  %v9172_v54 = vpop.eup %9171 }
 0x687   : > { %v3769_v10 = vmul.f32 %v12035_v56, %v3741_v50  ;;  %v12113_v35 = vmul.f32 0.015625, %v3430_v48  ;;  %v3984_v34 = vadd.f32 1.0, %v9172_v54 }
 0x688   : > { %v9174_v1 = vpop.eup %9173  ;;  %v3766_v29 = vmul.f32 %v12035_v56, %v3738_v45  ;;  %v3844_v33 = vmul.f32 0.044715, %v12101_v3 }
 0x689   : > { %v9176_v39 = vpop.eup %9175  ;;  %v3739_v15 = vmul.f32 %v9174_v1, %v3667_v31  ;;  %v12122_v60 = vadd.f32 %v12040_v53, %v3769_v10  ;;  %v3624_v43 = vmul.f32 %v12113_v35, %v12113_v35  ;;  %v4008_v5 = vmul.f32 %v3984_v34, %v3816_v18 }
 0x68a   : > { %v12111_v55 = vadd.f32 %v12040_v53, %v3766_v29  ;;  %v3433_v40 = vpop.xlane.xlu1 %3432  ;;  %v3424_v19 = vpop.xlane.xlu0 %3423  ;;  %v3985_v61 = vadd.f32 1.0, %v9176_v39  ;;  %v3868_v25 = vmul.f32 %v3844_v33, %v12101_v3 }
 0x68b   : > { %v9178_v32 = vpop.eup %9177  ;;  %v3767_v42 = vmul.f32 %v12035_v56, %v3739_v15  ;;  %v12116_v22 = vmul.f32 0.015625, %v3433_v40  ;;  %v12118_v16 = vmul.f32 0.015625, %v3424_v19  ;;  %v3845_v31 = vmul.f32 0.044715, %v12122_v60 }
 0x68c   : > { %v9180_v47 = vpop.eup %9179  ;;  %v3982_v0 = vadd.f32 1.0, %v9178_v32  ;;  %v3842_v37 = vmul.f32 0.044715, %v12111_v55  ;;  %v4009_v41 = vmul.f32 %v3985_v61, %v3817_v4  ;;  %v3892_v1 = vmul.f32 %v3868_v25, %v12101_v3 }
 0x68d   : > { %v12127_v63 = vadd.f32 %v12040_v53, %v3767_v42  ;;  %v3983_v28 = vadd.f32 1.0, %v9180_v47  ;;  %v3625_v2 = vmul.f32 %v12116_v22, %v12116_v22  ;;  %v3622_v50 = vmul.f32 %v12118_v16, %v12118_v16 }
 0x68e   : > { %v3427_v30 = vpop.xlane.xlu1 %3426  ;;  %v3550_v49 = vpop.xlane.xlu0 %3549  ;;  %v4006_v58 = vmul.f32 %v3982_v0, %v3814_v38  ;;  %v3866_v57 = vmul.f32 %v3842_v37, %v12111_v55  ;;  %v4031_v33 = vpack.c.bf16 %v4009_v41, %v4008_v5  ;;  %v3869_v19 = vmul.f32 %v3845_v31, %v12122_v60 }
 0x68f   : > { %v3600_v45 = vmul.f32 0.015625, %v3550_v49  ;;  %v3843_v48 = vmul.f32 0.044715, %v12127_v63  ;;  %v4007_v54 = vmul.f32 %v3983_v28, %v3815_v17  ;;  %v12140_v10 = vmul.f32 0.015625, %v3427_v30 }
 0x690   : > { %v3890_v40 = vmul.f32 %v3866_v57, %v12111_v55  ;;  %v3916_v34 = vadd.f32 %v3892_v1, %v12101_v3  ;;  %v3893_v0 = vmul.f32 %v3869_v19, %v12122_v60 }
 0x691   : > { %v3648_v29 = vsub.f32 %v3600_v45, %v3624_v43  ;;  %v3867_v39 = vmul.f32 %v3843_v48, %v12127_v63  ;;  %v4030_v4 = vpack.c.bf16 %v4007_v54, %v4006_v58  ;;  %v3623_v43 = vmul.f32 %v12140_v10, %v12140_v10 }
 0x692   : > { %v3553_v15 = vpop.xlane.xlu1 %3552  ;;  %v3544_v18 = vpop.xlane.xlu0 %3543  ;;  %v3914_v47 = vadd.f32 %v3890_v40, %v12111_v55  ;;  %v3940_v37 = vmul.f32 0.7978846, %v3916_v34  ;;  %v3917_v58 = vadd.f32 %v3893_v0, %v12122_v60 }
 0x693   : > { %v3601_v61 = vmul.f32 0.015625, %v3553_v15  ;;  %v3696_v32 = vadd.f32 1e-05, %v3648_v29  ;;  %v3598_v42 = vmul.f32 0.015625, %v3544_v18  ;;  %v3891_v38 = vmul.f32 %v3867_v39, %v12127_v63  ;;  %8533 = vmatprep.mubr.msk.bf16.mxu1 %vm414_vm0, %v4030_v4 }
 0x694   : > { %8534 = vmatmul.mubr.msk.bf16.vlgmr.msra.gmra.mxu1 %vm414_vm0, %v4031_v33  ;;  %v3938_v28 = vmul.f32 0.7978846, %v3914_v47 }
 0x695   : > { %v3649_v25 = vsub.f32 %v3601_v61, %v3625_v2  ;;  %v3646_v17 = vsub.f32 %v3598_v42, %v3622_v50  ;;  %v3915_v41 = vadd.f32 %v3891_v38, %v12127_v63  ;;  %9181 = vrsqrt.f32 %v3696_v32 }
 0x696   : > { %v3547_v30 = vpop.xlane.xlu1 %3546  ;;  %v3442_v49 = vpop.xlane.xlu0 %3441  ;;  %9183 = vtanh.f32 %v3940_v37  ;;  %v3941_v2 = vmul.f32 0.7978846, %v3917_v58  ;;  %v3673_v58 = vsub.f32 %v11900_v44, %v12116_v22 }
 0x697   : > { %v3697_v5 = vadd.f32 1e-05, %v3649_v25  ;;  %v3599_v45 = vmul.f32 0.015625, %v3547_v30  ;;  %v3694_v48 = vadd.f32 1e-05, %v3646_v17  ;;  %9185 = vtanh.f32 %v3938_v28 }
 0x698   : > { %v3939_v54 = vmul.f32 0.7978846, %v3915_v41  ;;  %v12155_v29 = vmul.f32 0.015625, %v3442_v49  ;;  %v3672_v41 = vsub.f32 %v11892_v6, %v12113_v35  ;;  %v3820_v30 = vmul.f32 0.5, %v12101_v3 }
 0x699   : > { %9187 = vrsqrt.f32 %v3697_v5  ;;  %v3647_v50 = vsub.f32 %v3599_v45, %v3623_v43  ;;  %v3818_v43 = vmul.f32 0.5, %v12111_v55  ;;  %v3821_v49 = vmul.f32 0.5, %v12122_v60 }
 0x69a   : > { %9189 = vrsqrt.f32 %v3694_v48  ;;  %v3445_v57 = vpop.xlane.xlu1 %3444  ;;  %v3436_v31 = vpop.xlane.xlu0 %3435  ;;  %v3628_v4 = vmul.f32 %v12155_v29, %v12155_v29  ;;  %v3670_v5 = vsub.f32 %v11895_v27, %v12118_v16  ;;  %v3819_v55 = vmul.f32 0.5, %v12127_v63 }
 0x69b   : > { %v3695_v1 = vadd.f32 1e-05, %v3647_v50  ;;  %9191 = vtanh.f32 %v3939_v54  ;;  %v12157_v33 = vmul.f32 0.015625, %v3445_v57  ;;  %v12159_v15 = vmul.f32 0.015625, %v3436_v31 }
 0x69c   : > { %9193 = vtanh.f32 %v3941_v2  ;;  %v3671_v27 = vsub.f32 %v11903_v13, %v12140_v10 }
 0x69d   : > { %9195 = vrsqrt.f32 %v3695_v1  ;;  %v3629_v34 = vmul.f32 %v12157_v33, %v12157_v33  ;;  %v3626_v61 = vmul.f32 %v12159_v15, %v12159_v15 }
 0x69e   : > { %v3439_v39 = vpop.xlane.xlu1 %3438  ;;  %v3562_v18 = vpop.xlane.xlu0 %3561 }
 0x69f   : > { %v3604_v40 = vmul.f32 0.015625, %v3562_v18  ;;  %v12167_v47 = vmul.f32 0.015625, %v3439_v39 }
 0x6a1   : > { %v3652_v19 = vsub.f32 %v3604_v40, %v3628_v4  ;;  %v3627_v60 = vmul.f32 %v12167_v47, %v12167_v47  ;;  %v3676_v4 = vsub.f32 %v11921_v7, %v12155_v29 }
 0x6a2   : > { %v3565_v32 = vpop.xlane.xlu1 %3564  ;;  %v3556_v42 = vpop.xlane.xlu0 %3555 }
 0x6a3   : > { %v9182_v38 = vpop.eup %9181  ;;  %v3605_v0 = vmul.f32 0.015625, %v3565_v32  ;;  %v3700_v37 = vadd.f32 1e-05, %v3652_v19  ;;  %v3602_v25 = vmul.f32 0.015625, %v3556_v42 }
 0x6a4   : > { %v9184_v17 = vpop.eup %9183  ;;  %v3744_v2 = vmul.f32 %v9182_v38, %v3672_v41 }
 0x6a5   : > { %v9186_v28 = vpop.eup %9185  ;;  %v3653_v45 = vsub.f32 %v3605_v0, %v3629_v34  ;;  %v3650_v48 = vsub.f32 %v3602_v25, %v3626_v61  ;;  %9197 = vrsqrt.f32 %v3700_v37  ;;  %v3988_v39 = vadd.f32 1.0, %v9184_v17 }
 0x6a6   : > { %v9188_v54 = vpop.eup %9187  ;;  %v3559_v50 = vpop.xlane.xlu1 %3558  ;;  %v3986_v35 = vadd.f32 1.0, %v9186_v28  ;;  %v3772_v34 = vmul.f32 %v12035_v56, %v3744_v2 }
 0x6a7   : > { %v3454_v6 = vpop.xlane.xlu0 %3453  ;;  %v9190_v3 = vpop.eup %9189  ;;  %v3745_v57 = vmul.f32 %v9188_v54, %v3673_v58  ;;  %v3701_v31 = vadd.f32 1e-05, %v3653_v45  ;;  %v3603_v44 = vmul.f32 0.015625, %v3559_v50  ;;  %v3698_v1 = vadd.f32 1e-05, %v3650_v48 }
 0x6a8   : > { %v9192_v22 = vpop.eup %9191  ;;  %v3742_v16 = vmul.f32 %v9190_v3, %v3670_v5  ;;  %v4010_v38 = vmul.f32 %v3986_v35, %v3818_v43  ;;  %v12188_v37 = vmul.f32 0.015625, %v3454_v6  ;;  %v4012_v28 = vmul.f32 %v3988_v39, %v3820_v30 }
 0x6a9   : > { %v9194_v18 = vpop.eup %9193  ;;  %9199 = vrsqrt.f32 %v3701_v31  ;;  %v3651_v63 = vsub.f32 %v3603_v44, %v3627_v60  ;;  %v3987_v40 = vadd.f32 1.0, %v9192_v22  ;;  %v3773_v13 = vmul.f32 %v12035_v56, %v3745_v57 }
 0x6aa   : > { %v9196_v19 = vpop.eup %9195  ;;  %v3770_v61 = vmul.f32 %v12035_v56, %v3742_v16  ;;  %9201 = vrsqrt.f32 %v3698_v1  ;;  %v3457_v32 = vpop.xlane.xlu1 %3456  ;;  %v3989_v41 = vadd.f32 1.0, %v9194_v18  ;;  %v12197_v43 = vadd.f32 %v12040_v53, %v3772_v34 }
 0x6ab   : > { %v3448_v42 = vpop.xlane.xlu0 %3447  ;;  %v3743_v10 = vmul.f32 %v9196_v19, %v3671_v27  ;;  %v3699_v0 = vadd.f32 1e-05, %v3651_v63  ;;  %v4011_v17 = vmul.f32 %v3987_v40, %v3819_v55  ;;  %v12192_v5 = vmul.f32 0.015625, %v3457_v32 }
 0x6ac   : > { %v3798_v25 = vadd.f32 %v12040_v53, %v3770_v61  ;;  %v12194_v45 = vmul.f32 0.015625, %v3448_v42  ;;  %v3677_v48 = vsub.f32 %v11930_v12, %v12157_v33  ;;  %v4013_v6 = vmul.f32 %v3989_v41, %v3821_v49 }
 0x6ad   : > { %v3771_v58 = vmul.f32 %v12035_v56, %v3743_v10  ;;  %9203 = vrsqrt.f32 %v3699_v0  ;;  %v4032_v50 = vpack.c.bf16 %v4011_v17, %v4010_v38  ;;  %v12202_v55 = vadd.f32 %v12040_v53, %v3773_v13 }
 0x6ae   : > { %v3451_v54 = vpop.xlane.xlu1 %3450  ;;  %v3632_v35 = vmul.f32 %v12188_v37, %v12188_v37  ;;  %v3675_v57 = vsub.f32 %v11937_v36, %v12167_v47  ;;  %v3674_v12 = vsub.f32 %v11927_v20, %v12159_v15  ;;  %v4033_v33 = vpack.c.bf16 %v4013_v6, %v4012_v28 }
 0x6af   : > { %v3574_v2 = vpop.xlane.xlu0 %3573  ;;  %v12205_v30 = vadd.f32 %v12040_v53, %v3771_v58  ;;  %8537 = vmatprep.mubr.msk.bf16.mxu1 %vm414_vm0, %v4032_v50  ;;  %v3846_v49 = vmul.f32 0.044715, %v3798_v25  ;;  %v3633_v60 = vmul.f32 %v12192_v5, %v12192_v5  ;;  %v3680_v31 = vsub.f32 %v11952_v26, %v12188_v37 }
 0x6b0   : > { %v3608_v3 = vmul.f32 0.015625, %v3574_v2  ;;  %v3630_v44 = vmul.f32 %v12194_v45, %v12194_v45  ;;  %v12220_v27 = vmul.f32 0.015625, %v3451_v54  ;;  %8538 = vmatmul.mubr.msk.bf16.gmra.mxu1 %vm414_vm0, %v4033_v33  ;;  %v3848_v16 = vmul.f32 0.044715, %v12197_v43 }
 0x6b1   : > { %v3847_v20 = vmul.f32 0.044715, %v12205_v30  ;;  %v3870_v15 = vmul.f32 %v3846_v49, %v3798_v25  ;;  %v3849_v40 = vmul.f32 0.044715, %v12202_v55  ;;  %v3681_v19 = vsub.f32 %v11958_v21, %v12192_v5 }
 0x6b2   : > { %v3656_v22 = vsub.f32 %v3608_v3, %v3632_v35  ;;  %v3577_v36 = vpop.xlane.xlu1 %3576  ;;  %v9198_v1 = vpop.eup %9197  ;;  %v3678_v34 = vsub.f32 %v11961_v62, %v12194_v45  ;;  %v12231_v13 = vmul.f32 0.5, %v3798_v25  ;;  %v3872_v54 = vmul.f32 %v3848_v16, %v12197_v43 }
 0x6b3   : > { %v3568_v47 = vpop.xlane.xlu0 %3567  ;;  %v3609_v39 = vmul.f32 0.015625, %v3577_v36  ;;  %v3871_v61 = vmul.f32 %v3847_v20, %v12205_v30  ;;  %v3894_v32 = vmul.f32 %v3870_v15, %v3798_v25  ;;  %v3748_v0 = vmul.f32 %v9198_v1, %v3676_v4 }
 0x6b4   : > { %v3704_v18 = vadd.f32 1e-05, %v3656_v22  ;;  %v3606_v63 = vmul.f32 0.015625, %v3568_v47  ;;  %v3631_v50 = vmul.f32 %v12220_v27, %v12220_v27  ;;  %v3873_v3 = vmul.f32 %v3849_v40, %v12202_v55 }
 0x6b5   : > { %v3657_v42 = vsub.f32 %v3609_v39, %v3633_v60  ;;  %v3895_v28 = vmul.f32 %v3871_v61, %v12205_v30  ;;  %v3918_v58 = vadd.f32 %v3894_v32, %v3798_v25  ;;  %v12243_v29 = vmul.f32 0.5, %v12197_v43 }
 0x6b6   : > { %9205 = vrsqrt.f32 %v3704_v18  ;;  %v3654_v38 = vsub.f32 %v3606_v63, %v3630_v44  ;;  %v9200_v10 = vpop.eup %9199  ;;  %v3571_v17 = vpop.xlane.xlu1 %3570  ;;  %v3776_v22 = vmul.f32 %v12035_v56, %v3748_v0  ;;  %v3897_v39 = vmul.f32 %v3873_v3, %v12202_v55 }
 0x6b7   : > { %v3466_v41 = vpop.xlane.xlu0 %3465  ;;  %v9202_v2 = vpop.eup %9201  ;;  %v3705_v6 = vadd.f32 1e-05, %v3657_v42  ;;  %v3607_v35 = vmul.f32 0.015625, %v3571_v17  ;;  %v3919_v7 = vadd.f32 %v3895_v28, %v12205_v30  ;;  %v3749_v4 = vmul.f32 %v9200_v10, %v3677_v48 }
 0x6b8   : > { %v3746_v33 = vmul.f32 %v9202_v2, %v3674_v12  ;;  %v3702_v49 = vadd.f32 1e-05, %v3654_v38  ;;  %v3942_v60 = vmul.f32 0.7978846, %v3918_v58  ;;  %v3896_v12 = vmul.f32 %v3872_v54, %v12197_v43 }
 0x6b9   : > { %9207 = vrsqrt.f32 %v3705_v6  ;;  %v3655_v25 = vsub.f32 %v3607_v35, %v3631_v50  ;;  %v12248_v1 = vmul.f32 0.015625, %v3466_v41  ;;  %v3943_v63 = vmul.f32 0.7978846, %v3919_v7 }
 0x6ba   : > { %v9204_v44 = vpop.eup %9203  ;;  %v3774_v36 = vmul.f32 %v12035_v56, %v3746_v33  ;;  %9209 = vrsqrt.f32 %v3702_v49  ;;  %v3469_v47 = vpop.xlane.xlu1 %3468  ;;  %v3777_v40 = vmul.f32 %v12035_v56, %v3749_v4  ;;  %v12259_v32 = vmul.f32 0.5, %v12202_v55 }
 0x6bb   : > { %v3460_v20 = vpop.xlane.xlu0 %3459  ;;  %v3747_v15 = vmul.f32 %v9204_v44, %v3675_v57  ;;  %v3703_v16 = vadd.f32 1e-05, %v3655_v25  ;;  %9211 = vtanh.f32 %v3942_v60  ;;  %v3679_v57 = vsub.f32 %v11969_v24, %v12220_v27 }
 0x6bc   : > { %v12252_v48 = vadd.f32 %v12040_v53, %v3774_v36  ;;  %v12254_v18 = vmul.f32 0.015625, %v3460_v20  ;;  %v3920_v0 = vadd.f32 %v3896_v12, %v12197_v43  ;;  %v3921_v58 = vadd.f32 %v3897_v39, %v12202_v55 }
 0x6bd   : > { %v3775_v61 = vmul.f32 %v12035_v56, %v3747_v15  ;;  %9213 = vrsqrt.f32 %v3703_v16  ;;  %v12273_v54 = vadd.f32 %v12040_v53, %v3776_v22  ;;  %v3636_v2 = vmul.f32 %v12248_v1, %v12248_v1 }
 0x6be   : > { %v3463_v42 = vpop.xlane.xlu1 %3462  ;;  %v3634_v38 = vmul.f32 %v12254_v18, %v12254_v18  ;;  %9215 = vtanh.f32 %v3943_v63  ;;  %v3944_v50 = vmul.f32 0.7978846, %v3920_v0  ;;  %v3850_v6 = vmul.f32 0.044715, %v12252_v48 }
 0x6bf   : > { %v3580_v10 = vpop.xlane.xlu0 %3579  ;;  %v12267_v17 = vadd.f32 %v12040_v53, %v3775_v61  ;;  %v12269_v41 = vmul.f32 0.015625, %v3463_v42  ;;  %v12279_v35 = vadd.f32 %v12040_v53, %v3777_v40  ;;  %v12281_v43 = vmul.f32 0.015625, %v3469_v47 }
 0x6c0   : > { %v3610_v28 = vmul.f32 0.015625, %v3580_v10  ;;  %v3945_v33 = vmul.f32 0.7978846, %v3921_v58  ;;  %9217 = vtanh.f32 %v3944_v50  ;;  %v3874_v60 = vmul.f32 %v3850_v6, %v12252_v48 }
 0x6c1   : > { %v3635_v55 = vmul.f32 %v12269_v41, %v12269_v41  ;;  %v3851_v25 = vmul.f32 0.044715, %v12267_v17  ;;  %v3823_v20 = vmul.f32 0.5, %v12205_v30  ;;  %v3637_v16 = vmul.f32 %v12281_v43, %v12281_v43 }
 0x6c2   : > { %v3658_v3 = vsub.f32 %v3610_v28, %v3634_v38  ;;  %v3583_v7 = vpop.xlane.xlu1 %3582  ;;  %9219 = vtanh.f32 %v3945_v33  ;;  %v3898_v15 = vmul.f32 %v3874_v60, %v12252_v48  ;;  %v3852_v30 = vmul.f32 0.044715, %v12273_v54 }
 0x6c3   : > { %v9206_v49 = vpop.eup %9205  ;;  %v3586_v4 = vpop.xlane.xlu0 %3585  ;;  %v3611_v22 = vmul.f32 0.015625, %v3583_v7  ;;  %v3875_v12 = vmul.f32 %v3851_v25, %v12267_v17  ;;  %v3853_v28 = vmul.f32 0.044715, %v12279_v35  ;;  %v3684_v24 = vsub.f32 %v11987_v14, %v12248_v1 }
 0x6c4   : > { %v3752_v44 = vmul.f32 %v9206_v49, %v3680_v31  ;;  %v3706_v36 = vadd.f32 1e-05, %v3658_v3  ;;  %v3612_v47 = vmul.f32 0.015625, %v3586_v4  ;;  %v3922_v61 = vadd.f32 %v3898_v15, %v12252_v48 }
 0x6c5   : > { %v3659_v39 = vsub.f32 %v3611_v22, %v3635_v55  ;;  %v3899_v31 = vmul.f32 %v3875_v12, %v12267_v17  ;;  %v3876_v21 = vmul.f32 %v3852_v30, %v12273_v54 }
 0x6c6   : > { %9221 = vrsqrt.f32 %v3706_v36  ;;  %v3660_v63 = vsub.f32 %v3612_v47, %v3636_v2  ;;  %v9208_v40 = vpop.eup %9207  ;;  %v3780_v26 = vmul.f32 %v12035_v56, %v3752_v44  ;;  %v3589_v37 = vpop.xlane.xlu1 %3588  ;;  %v3946_v6 = vmul.f32 0.7978846, %v3922_v61 }
 0x6c7   : > { %v9210_v42 = vpop.eup %9209  ;;  %v3753_v38 = vmul.f32 %v9208_v40, %v3681_v19  ;;  %v3707_v10 = vadd.f32 1e-05, %v3659_v39  ;;  %v3613_v0 = vmul.f32 0.015625, %v3589_v37  ;;  %v3923_v50 = vadd.f32 %v3899_v31, %v12267_v17 }
 0x6c8   : > { %v3750_v58 = vmul.f32 %v9210_v42, %v3678_v34  ;;  %v3708_v2 = vadd.f32 1e-05, %v3660_v63  ;;  %v9212_v3 = vpop.eup %9211  ;;  %v12311_v62 = vadd.f32 %v12040_v53, %v3780_v26  ;;  %v3877_v36 = vmul.f32 %v3853_v28, %v12279_v35 }
 0x6c9   : > { %v3781_v33 = vmul.f32 %v12035_v56, %v3753_v38  ;;  %9223 = vrsqrt.f32 %v3707_v10  ;;  %v3661_v49 = vsub.f32 %v3613_v0, %v3637_v16  ;;  %v3990_v55 = vadd.f32 1.0, %v9212_v3 }
 0x6ca   : > { %v9214_v5 = vpop.eup %9213  ;;  %v3778_v19 = vmul.f32 %v12035_v56, %v3750_v58  ;;  %9225 = vrsqrt.f32 %v3708_v2  ;;  %v3947_v7 = vmul.f32 0.7978846, %v3923_v50  ;;  %v3900_v47 = vmul.f32 %v3876_v21, %v12273_v54 }
 0x6cb   : > { %v9216_v4 = vpop.eup %9215  ;;  %v3751_v45 = vmul.f32 %v9214_v5, %v3679_v57  ;;  %v3709_v34 = vadd.f32 1e-05, %v3661_v49  ;;  %9227 = vtanh.f32 %v3946_v6  ;;  %v4014_v44 = vmul.f32 %v3990_v55, %v12231_v13 }
 0x6cc   : > { %v12317_v25 = vadd.f32 %v12040_v53, %v3778_v19  ;;  %v3991_v60 = vadd.f32 1.0, %v9216_v4  ;;  %9229 = vtanh.f32 %v3947_v7  ;;  %v12324_v12 = vadd.f32 %v12040_v53, %v3781_v33 }
 0x6cd   : > { %v3779_v22 = vmul.f32 %v12035_v56, %v3751_v45  ;;  %9231 = vrsqrt.f32 %v3709_v34  ;;  %v9218_v15 = vpop.eup %9217  ;;  %v3685_v16 = vsub.f32 %v11996_v9, %v12281_v43  ;;  %v3901_v39 = vmul.f32 %v3877_v36, %v12279_v35 }
 0x6ce   : > { %v4015_v27 = vmul.f32 %v3991_v60, %v3823_v20  ;;  %v3854_v57 = vmul.f32 0.044715, %v12317_v25  ;;  %v3924_v63 = vadd.f32 %v3900_v47, %v12273_v54  ;;  %v3992_v26 = vadd.f32 1.0, %v9218_v15 }
 0x6cf   : > { %v12330_v13 = vadd.f32 %v12040_v53, %v3779_v22  ;;  %v3856_v14 = vmul.f32 0.044715, %v12311_v62  ;;  %v9220_v1 = vpop.eup %9219  ;;  %v3682_v20 = vsub.f32 %v11999_v23, %v12254_v18  ;;  %v3925_v31 = vadd.f32 %v3901_v39, %v12279_v35 }
 0x6d0   : > { %v4034_v40 = vpack.c.bf16 %v4015_v27, %v4014_v44  ;;  %v3878_v37 = vmul.f32 %v3854_v57, %v12317_v25  ;;  %v3948_v61 = vmul.f32 0.7978846, %v3924_v63  ;;  %v3993_v43 = vadd.f32 1.0, %v9220_v1 }
 0x6d1   : > { %v3855_v30 = vmul.f32 0.044715, %v12330_v13  ;;  %v4016_v42 = vmul.f32 %v3992_v26, %v12243_v29  ;;  %v3857_v10 = vmul.f32 0.044715, %v12324_v12  ;;  %v3949_v28 = vmul.f32 0.7978846, %v3925_v31 }
 0x6d2   : > { %8541 = vmatprep.mubr.msk.bf16.mxu1 %vm414_vm0, %v4034_v40  ;;  %v3902_v38 = vmul.f32 %v3878_v37, %v12317_v25  ;;  %9233 = vtanh.f32 %v3948_v61  ;;  %v4017_v18 = vmul.f32 %v3993_v43, %v12259_v32  ;;  %v3880_v2 = vmul.f32 %v3856_v14, %v12311_v62 }
 0x6d3   : > { %v9222_v9 = vpop.eup %9221  ;;  %v3879_v23 = vmul.f32 %v3855_v30, %v12330_v13  ;;  %v3881_v50 = vmul.f32 %v3857_v10, %v12324_v12  ;;  %v3683_v29 = vsub.f32 %v12010_v52, %v12269_v41  ;;  %9235 = vtanh.f32 %v3949_v28 }
 0x6d4   : > { %v3754_v0 = vmul.f32 %v9222_v9, %v3682_v20  ;;  %v3926_v58 = vadd.f32 %v3902_v38, %v12317_v25  ;;  %v4035_v49 = vpack.c.bf16 %v4017_v18, %v4016_v42  ;;  %v3904_v5 = vmul.f32 %v3880_v2, %v12311_v62 }
 0x6d5   : > { %v3903_v3 = vmul.f32 %v3879_v23, %v12330_v13  ;;  %v3905_v32 = vmul.f32 %v3881_v50, %v12324_v12  ;;  %v3826_v4 = vmul.f32 0.5, %v12252_v48  ;;  %v3827_v36 = vmul.f32 0.5, %v12267_v17 }
 0x6d6   : > { %v3782_v6 = vmul.f32 %v12035_v56, %v3754_v0  ;;  %v9224_v33 = vpop.eup %9223  ;;  %v3950_v21 = vmul.f32 0.7978846, %v3926_v58  ;;  %8542 = vmatmul.mubr.msk.bf16.gmra.mxu1 %vm414_vm0, %v4035_v49  ;;  %v3928_v34 = vadd.f32 %v3904_v5, %v12311_v62  ;;  %v3828_v38 = vmul.f32 0.5, %v12273_v54 }
 0x6d7   : > { %v9226_v19 = vpop.eup %9225  ;;  %v3755_v55 = vmul.f32 %v9224_v33, %v3683_v29  ;;  %v3927_v52 = vadd.f32 %v3903_v3, %v12330_v13  ;;  %v3929_v60 = vadd.f32 %v3905_v32, %v12324_v12 }
 0x6d8   : > { %v12358_v7 = vadd.f32 %v12040_v53, %v3782_v6  ;;  %v9228_v41 = vpop.eup %9227  ;;  %v3756_v45 = vmul.f32 %v9226_v19, %v3684_v24  ;;  %9237 = vtanh.f32 %v3950_v21  ;;  %v3952_v39 = vmul.f32 0.7978846, %v3928_v34 }
 0x6d9   : > { %v9230_v44 = vpop.eup %9229  ;;  %v3783_v22 = vmul.f32 %v12035_v56, %v3755_v55  ;;  %v3994_v47 = vadd.f32 1.0, %v9228_v41  ;;  %v3951_v27 = vmul.f32 0.7978846, %v3927_v52  ;;  %v3953_v24 = vmul.f32 0.7978846, %v3929_v60 }
 0x6da   : > { %v9232_v57 = vpop.eup %9231  ;;  %v3784_v48 = vmul.f32 %v12035_v56, %v3756_v45  ;;  %v3995_v15 = vadd.f32 1.0, %v9230_v44  ;;  %v3858_v17 = vmul.f32 0.044715, %v12358_v7  ;;  %v3830_v55 = vmul.f32 0.5, %v12317_v25 }
 0x6db   : > { %v12369_v63 = vadd.f32 %v12040_v53, %v3783_v22  ;;  %v3757_v40 = vmul.f32 %v9232_v57, %v3685_v16  ;;  %v4018_v26 = vmul.f32 %v3994_v47, %v3826_v4  ;;  %9239 = vtanh.f32 %v3951_v27 }
 0x6dc   : > { %v12372_v37 = vadd.f32 %v12040_v53, %v3784_v48  ;;  %v4019_v14 = vmul.f32 %v3995_v15, %v3827_v36  ;;  %9241 = vtanh.f32 %v3952_v39  ;;  %v3882_v61 = vmul.f32 %v3858_v17, %v12358_v7 }
 0x6dd   : > { %v3785_v1 = vmul.f32 %v12035_v56, %v3757_v40  ;;  %9243 = vtanh.f32 %v3953_v24  ;;  %v3859_v20 = vmul.f32 0.044715, %v12369_v63  ;;  %v3831_v45 = vmul.f32 0.5, %v12330_v13 }
 0x6de   : > { %v4036_v31 = vpack.c.bf16 %v4019_v14, %v4018_v26  ;;  %v3860_v30 = vmul.f32 0.044715, %v12372_v37  ;;  %v3906_v42 = vmul.f32 %v3882_v61, %v12358_v7  ;;  %v3832_v36 = vmul.f32 0.5, %v12311_v62 }
 0x6df   : > { %v12380_v16 = vadd.f32 %v12040_v53, %v3785_v1  ;;  %v3883_v9 = vmul.f32 %v3859_v20, %v12369_v63  ;;  %v9234_v43 = vpop.eup %9233  ;;  %v3829_v53 = vmul.f32 0.5, %v12279_v35  ;;  %v3833_v25 = vmul.f32 0.5, %v12324_v12 }
 0x6e0   : > { %8545 = vmatprep.mubr.msk.bf16.mxu1 %vm414_vm0, %v4036_v31  ;;  %v3884_v56 = vmul.f32 %v3860_v30, %v12372_v37  ;;  %v3996_v10 = vadd.f32 1.0, %v9234_v43  ;;  %v9236_v23 = vpop.eup %9235  ;;  %v3930_v18 = vadd.f32 %v3906_v42, %v12358_v7  ;;  %v3834_v26 = vmul.f32 0.5, %v12358_v7 }
 0x6e1   : > { %v3907_v0 = vmul.f32 %v3883_v9, %v12369_v63  ;;  %v3861_v28 = vmul.f32 0.044715, %v12380_v16  ;;  %v3997_v2 = vadd.f32 1.0, %v9236_v23  ;;  %v3835_v17 = vmul.f32 0.5, %v12369_v63 }
 0x6e2   : > { %v3908_v58 = vmul.f32 %v3884_v56, %v12372_v37  ;;  %v4020_v50 = vmul.f32 %v3996_v10, %v3828_v38  ;;  %v3954_v3 = vmul.f32 0.7978846, %v3930_v18  ;;  %v3836_v61 = vmul.f32 0.5, %v12372_v37 }
 0x6e3   : > { %v3931_v29 = vadd.f32 %v3907_v0, %v12369_v63  ;;  %v3885_v6 = vmul.f32 %v3861_v28, %v12380_v16  ;;  %v4021_v49 = vmul.f32 %v3997_v2, %v3829_v53  ;;  %v3837_v43 = vmul.f32 0.5, %v12380_v16  ;;  %v12413_v63 = vld [vmem:[%s14860_s5 + $0xc] ss:$0 sm:$0xff]  ;;  %v14896_v0 = vld [vmem:[#allocation5_spill] sm:$0xff] }
 0x6e4   : > { %v3932_v54 = vadd.f32 %v3908_v58, %v12372_v37  ;;  %9245 = vtanh.f32 %v3954_v3  ;;  %v14898_v2 = vld [vmem:[#allocation7_spill] sm:$0xff] }
 0x6e5   : > { %v9238_v33 = vpop.eup %9237  ;;  %v3955_v21 = vmul.f32 0.7978846, %v3931_v29  ;;  %v3909_v5 = vmul.f32 %v3885_v6, %v12380_v16  ;;  %v4037_v19 = vpack.c.bf16 %v4021_v49, %v4020_v50 }
 0x6e6   : > { %v3998_v32 = vadd.f32 1.0, %v9238_v33  ;;  %v3956_v35 = vmul.f32 0.7978846, %v3932_v54  ;;  %v14899_v54 = vld [vmem:[#allocation4_spill] sm:$0xff] }
 0x6e7   : > { %9247 = vtanh.f32 %v3955_v21  ;;  %v3933_v4 = vadd.f32 %v3909_v5, %v12380_v16  ;;  %8546 = vmatmul.mubr.msk.bf16.gmra.mxu1 %vm414_vm0, %v4037_v19  ;;  %v14897_v16 = vld [vmem:[#allocation2_spill] sm:$0xff] }
 0x6e8   : > { %v9240_v52 = vpop.eup %9239  ;;  %9249 = vtanh.f32 %v3956_v35  ;;  %v4022_v60 = vmul.f32 %v3998_v32, %v3830_v55 }
 0x6e9   : > { %v9242_v41 = vpop.eup %9241  ;;  %v3999_v34 = vadd.f32 1.0, %v9240_v52  ;;  %v3957_v44 = vmul.f32 0.7978846, %v3933_v4 }
 0x6ea   : > { %v9244_v22 = vpop.eup %9243  ;;  %v4000_v47 = vadd.f32 1.0, %v9242_v41 }
 0x6eb   : > { %v4023_v27 = vmul.f32 %v3999_v34, %v3831_v45  ;;  %v4001_v57 = vadd.f32 1.0, %v9244_v22  ;;  %9251 = vtanh.f32 %v3957_v44 }
 0x6ec   : > { %v4024_v48 = vmul.f32 %v4000_v47, %v3832_v36 }
 0x6ed   : > { %v4038_v15 = vpack.c.bf16 %v4023_v27, %v4022_v60  ;;  %v4025_v39 = vmul.f32 %v4001_v57, %v3833_v25 }
 0x6ef   : > { %8549 = vmatprep.mubr.msk.bf16.mxu1 %vm414_vm0, %v4038_v15  ;;  %v4039_v24 = vpack.c.bf16 %v4025_v39, %v4024_v48 }
 0x6f1   : > { %8550 = vmatmul.mubr.msk.bf16.gmra.mxu1 %vm414_vm0, %v4039_v24  ;;  %v9246_v13 = vpop.eup %9245 }
 0x6f2   : > { %v4002_v14 = vadd.f32 1.0, %v9246_v13 }
 0x6f4   : > { %v9248_v40 = vpop.eup %9247  ;;  %v4026_v12 = vmul.f32 %v4002_v14, %v3834_v26 }
 0x6f5   : > { %v9250_v62 = vpop.eup %9249  ;;  %v4003_v1 = vadd.f32 1.0, %v9248_v40 }
 0x6f6   : > { %v4004_v20 = vadd.f32 1.0, %v9250_v62 }
 0x6f7   : > { %v4027_v31 = vmul.f32 %v4003_v1, %v3835_v17 }
 0x6f8   : > { %v9252_v30 = vpop.eup %9251  ;;  %v4028_v56 = vmul.f32 %v4004_v20, %v3836_v61 }
 0x6f9   : > { %v4040_v9 = vpack.c.bf16 %v4027_v31, %v4026_v12  ;;  %v4005_v42 = vadd.f32 1.0, %v9252_v30 }
 0x6fb   : > { %8553 = vmatprep.mubr.msk.bf16.mxu1 %vm414_vm0, %v4040_v9  ;;  %v4029_v38 = vmul.f32 %v4005_v42, %v3837_v43  ;;  %v14900_v9 = vld [vmem:[#allocation8_spill] sm:$0xff] }
 0x6fd   : > { %v4041_v7 = vpack.c.bf16 %v4029_v38, %v4028_v56  ;;  %v14901_v38 = vld [vmem:[#allocation10_spill] sm:$0xff] }
 0x6ff   : > { %8554 = vmatmul.mubr.msk.bf16.gmra.mxu1 %vm414_vm0, %v4041_v7 }
 0x754   : > { %v8535_v10 = vpop.f32.mrf.mxu1 }
 0x755   : > { %v4145_v37 = vadd.f32 %v8535_v10, %v14896_v0 }
 0x756   : > { %v4136_v28 = vpop.f32.mrf.mxu1 }
 0x757   : > { %v12417_v23 = vadd.f32 %v12413_v63, %v4145_v37  ;;  %v4137_v53 = vadd.f32 %v4136_v28, %v14897_v16 }
 0x758   : > { %v8536_v18 = vpop.f32.mrf.mxu1 }
 0x759   : > { %v12421_v58 = vadd.f32 %v12413_v63, %v4137_v53  ;;  %v4148_v50 = vadd.f32 %v8536_v18, %v14898_v2  ;;  %v4268_v29 = vsel %vm582_vm1, %v12417_v23, 0.0  ;;  %v4360_v32 = vmul.f32 %v12417_v23, %v12417_v23 }
 0x75a   : > { %4269 = vadd.xlane.f32.xlu0 %v4268_v29  ;;  %v4139_v6 = vpop.f32.mrf.mxu1 }
 0x75b   : > { %v12427_v3 = vadd.f32 %v12413_v63, %v4148_v50  ;;  %v4140_v33 = vadd.f32 %v4139_v6, %v14899_v54  ;;  %v4262_v5 = vsel %vm582_vm1, %v12421_v58, 0.0  ;;  %v4388_v19 = vsel %vm582_vm1, %v4360_v32, 0.0 }
 0x75c   : > { %v4358_v4 = vmul.f32 %v12421_v58, %v12421_v58 }
 0x75d   : > { %v12431_v49 = vadd.f32 %v12413_v63, %v4140_v33  ;;  %v4271_v21 = vsel %vm582_vm1, %v12427_v3, 0.0  ;;  %v4361_v55 = vmul.f32 %v12427_v3, %v12427_v3 }
 0x75e   : > { %4272 = vadd.xlane.f32.xlu1 %v4271_v21  ;;  %4263 = vadd.xlane.f32.xlu0 %v4262_v5  ;;  %v4382_v41 = vsel %vm582_vm1, %v4358_v4, 0.0 }
 0x75f   : > { %v4265_v35 = vsel %vm582_vm1, %v12431_v49, 0.0  ;;  %v4391_v52 = vsel %vm582_vm1, %v4361_v55, 0.0  ;;  %v4359_v45 = vmul.f32 %v12431_v49, %v12431_v49 }
 0x761   : > { %v4385_v34 = vsel %vm582_vm1, %v4359_v45, 0.0 }
 0x762   : > { %4266 = vadd.xlane.f32.xlu1 %v4265_v35  ;;  %4389 = vadd.xlane.f32.xlu0 %v4388_v19  ;;  %v14903_v35 = vld [vmem:[#allocation13_spill] sm:$0xff] }
 0x766   : > { %4392 = vadd.xlane.f32.xlu1 %v4391_v52  ;;  %4383 = vadd.xlane.f32.xlu0 %v4382_v41  ;;  %v14904_v52 = vld [vmem:[#allocation11_spill] sm:$0xff] }
 0x76a   : > { %4386 = vadd.xlane.f32.xlu1 %v4385_v34 }
 0x770   : > { %v8539_v60 = vpop.f32.mrf.mxu1 }
 0x771   : > { %v4161_v44 = vadd.f32 %v8539_v60, %v11045_v51 }
 0x772   : > { %v4152_v22 = vpop.f32.mrf.mxu1 }
 0x773   : > { %v12453_v36 = vadd.f32 %v12413_v63, %v4161_v44  ;;  %v4153_v47 = vadd.f32 %v4152_v22, %v10991_v46  ;;  %v14905_v44 = vld [vmem:[#allocation14_spill] sm:$0xff] }
 0x774   : > { %v8540_v27 = vpop.f32.mrf.mxu1 }
 0x775   : > { %v12457_v25 = vadd.f32 %v12413_v63, %v4153_v47  ;;  %v4164_v57 = vadd.f32 %v8540_v27, %v11054_v8  ;;  %v4280_v48 = vsel %vm582_vm1, %v12453_v36, 0.0  ;;  %v4364_v8 = vmul.f32 %v12453_v36, %v12453_v36 }
 0x776   : > { %4281 = vadd.xlane.f32.xlu0 %v4280_v48  ;;  %v4155_v15 = vpop.f32.mrf.mxu1  ;;  %v14906_v48 = vld [vmem:[#allocation12_spill] sm:$0xff] }
 0x777   : > { %v12463_v39 = vadd.f32 %v12413_v63, %v4164_v57  ;;  %v4156_v51 = vadd.f32 %v4155_v15, %v11024_v59  ;;  %v4274_v13 = vsel %vm582_vm1, %v12457_v25, 0.0  ;;  %v4400_v26 = vsel %vm582_vm1, %v4364_v8, 0.0 }
 0x778   : > { %v4362_v14 = vmul.f32 %v12457_v25, %v12457_v25 }
 0x779   : > { %v12467_v24 = vadd.f32 %v12413_v63, %v4156_v51  ;;  %v4283_v46 = vsel %vm582_vm1, %v12463_v39, 0.0  ;;  %v4365_v59 = vmul.f32 %v12463_v39, %v12463_v39 }
 0x77a   : > { %4284 = vadd.xlane.f32.xlu1 %v4283_v46  ;;  %4275 = vadd.xlane.f32.xlu0 %v4274_v13  ;;  %v4394_v17 = vsel %vm582_vm1, %v4362_v14, 0.0 }
 0x77b   : > { %v4277_v40 = vsel %vm582_vm1, %v12467_v24, 0.0  ;;  %v4403_v62 = vsel %vm582_vm1, %v4365_v59, 0.0  ;;  %v4363_v1 = vmul.f32 %v12467_v24, %v12467_v24  ;;  %v14907_v59 = vld [vmem:[#allocation17_spill] sm:$0xff] }
 0x77d   : > { %v4397_v12 = vsel %vm582_vm1, %v4363_v1, 0.0 }
 0x77e   : > { %4278 = vadd.xlane.f32.xlu1 %v4277_v40  ;;  %4401 = vadd.xlane.f32.xlu0 %v4400_v26 }
 0x782   : > { %4404 = vadd.xlane.f32.xlu1 %v4403_v62  ;;  %4395 = vadd.xlane.f32.xlu0 %v4394_v17 }
 0x786   : > { %4398 = vadd.xlane.f32.xlu1 %v4397_v12 }
 0x796   : > { %v8543_v20 = vpop.f32.mrf.mxu1 }
 0x797   : > { %v4177_v31 = vadd.f32 %v8543_v20, %v11076_v11  ;;  %v14902_v11 = vld [vmem:[#allocation9_spill] sm:$0xff] }
 0x798   : > { %v4168_v61 = vpop.f32.mrf.mxu1 }
 0x799   : > { %v12489_v30 = vadd.f32 %v12413_v63, %v4177_v31  ;;  %v4169_v43 = vadd.f32 %v4168_v61, %v14900_v9  ;;  %v14908_v61 = vld [vmem:[#allocation18_spill] sm:$0xff] }
 0x79a   : > { %v8544_v42 = vpop.f32.mrf.mxu1 }
 0x79b   : > { %v12493_v56 = vadd.f32 %v12413_v63, %v4169_v43  ;;  %v4180_v7 = vadd.f32 %v8544_v42, %v14901_v38  ;;  %v4292_v10 = vsel %vm582_vm1, %v12489_v30, 0.0  ;;  %v4368_v2 = vmul.f32 %v12489_v30, %v12489_v30  ;;  %v14909_v38 = vld [vmem:[#allocation15_spill] sm:$0xff] }
 0x79c   : > { %4293 = vadd.xlane.f32.xlu0 %v4292_v10  ;;  %v4171_v0 = vpop.f32.mrf.mxu1 }
 0x79d   : > { %v12499_v37 = vadd.f32 %v12413_v63, %v4180_v7  ;;  %v4172_v28 = vadd.f32 %v4171_v0, %v14902_v11  ;;  %v4286_v18 = vsel %vm582_vm1, %v12493_v56, 0.0  ;;  %v4412_v29 = vsel %vm582_vm1, %v4368_v2, 0.0  ;;  %v14910_v2 = vld [vmem:[#allocation16_spill] sm:$0xff] }
 0x79e   : > { %v4366_v54 = vmul.f32 %v12493_v56, %v12493_v56 }
 0x79f   : > { %v12503_v16 = vadd.f32 %v12413_v63, %v4172_v28  ;;  %v4295_v53 = vsel %vm582_vm1, %v12499_v37, 0.0  ;;  %v4369_v6 = vmul.f32 %v12499_v37, %v12499_v37 }
 0x7a0   : > { %4296 = vadd.xlane.f32.xlu1 %v4295_v53  ;;  %4287 = vadd.xlane.f32.xlu0 %v4286_v18  ;;  %v4406_v5 = vsel %vm582_vm1, %v4366_v54, 0.0 }
 0x7a1   : > { %v4289_v50 = vsel %vm582_vm1, %v12503_v16, 0.0  ;;  %v4415_v21 = vsel %vm582_vm1, %v4369_v6, 0.0  ;;  %v4367_v32 = vmul.f32 %v12503_v16, %v12503_v16 }
 0x7a3   : > { %v4409_v34 = vsel %vm582_vm1, %v4367_v32, 0.0  ;;  %v14911_v32 = vld [vmem:[#allocation21_spill] sm:$0xff] }
 0x7a4   : > { %4290 = vadd.xlane.f32.xlu1 %v4289_v50  ;;  %4413 = vadd.xlane.f32.xlu0 %v4412_v29 }
 0x7a7   : > { %v8547_v33 = vpop.f32.mrf.mxu1 }
 0x7a8   : > { %v4193_v19 = vadd.f32 %v8547_v33, %v14903_v35  ;;  %4416 = vadd.xlane.f32.xlu1 %v4415_v21  ;;  %4407 = vadd.xlane.f32.xlu0 %v4406_v5 }
 0x7a9   : > { %v4184_v55 = vpop.f32.mrf.mxu1 }
 0x7aa   : > { %v12524_v4 = vadd.f32 %v12413_v63, %v4193_v19  ;;  %v4185_v41 = vadd.f32 %v4184_v55, %v14904_v52 }
 0x7ab   : > { %v8548_v45 = vpop.f32.mrf.mxu1 }
 0x7ac   : > { %v12529_v60 = vadd.f32 %v12413_v63, %v4185_v41  ;;  %v4196_v22 = vadd.f32 %v8548_v45, %v14905_v44  ;;  %4410 = vadd.xlane.f32.xlu1 %v4409_v34  ;;  %v4304_v47 = vsel %vm582_vm1, %v12524_v4, 0.0  ;;  %v4372_v40 = vmul.f32 %v12524_v4, %v12524_v4  ;;  %v14912_v44 = vld [vmem:[#allocation22_spill] sm:$0xff] }
 0x7ad   : > { %4305 = vadd.xlane.f32.xlu0 %v4304_v47  ;;  %v4187_v27 = vpop.f32.mrf.mxu1  ;;  %v14913_v47 = vld [vmem:[#allocation19_spill] sm:$0xff] }
 0x7ae   : > { %v12535_v57 = vadd.f32 %v12413_v63, %v4196_v22  ;;  %v4188_v15 = vadd.f32 %v4187_v27, %v14906_v48  ;;  %v4298_v8 = vsel %vm582_vm1, %v12529_v60, 0.0  ;;  %v4424_v1 = vsel %vm582_vm1, %v4372_v40, 0.0 }
 0x7af   : > { %v4370_v20 = vmul.f32 %v12529_v60, %v12529_v60 }
 0x7b0   : > { %v12539_v46 = vadd.f32 %v12413_v63, %v4188_v15  ;;  %v4307_v13 = vsel %vm582_vm1, %v12535_v57, 0.0  ;;  %v4373_v12 = vmul.f32 %v12535_v57, %v12535_v57 }
 0x7b1   : > { %v8551_v51 = vpop.f32.mrf.mxu1  ;;  %4308 = vadd.xlane.f32.xlu1 %v4307_v13  ;;  %4299 = vadd.xlane.f32.xlu0 %v4298_v8  ;;  %v4418_v42 = vsel %vm582_vm1, %v4370_v20, 0.0 }
 0x7b2   : > { %v4209_v14 = vadd.f32 %v8551_v51, %v14907_v59  ;;  %v4301_v17 = vsel %vm582_vm1, %v12539_v46, 0.0  ;;  %v4427_v43 = vsel %vm582_vm1, %v4373_v12, 0.0  ;;  %v4371_v10 = vmul.f32 %v12539_v46, %v12539_v46  ;;  %v8860_v12 = vld [vmem:[%s14859_s4 + $0x10] ss:$28 sps:$4 sm:$0xff]  }
 0x7b3   : > { %v4200_v26 = vpop.f32.mrf.mxu1 }
 0x7b4   : > { %v12556_v31 = vadd.f32 %v12413_v63, %v4209_v14  ;;  %v4201_v7 = vadd.f32 %v4200_v26, %v14909_v38  ;;  %v4421_v18 = vsel %vm582_vm1, %v4371_v10, 0.0  ;;  %v8859_v26 = vld [vmem:[%s14859_s4 + $0x48] ss:$28 sps:$4 sm:$0xff]   ;;  %v14914_v14 = vld [vmem:[#allocation20_spill] sm:$0xff] }
 0x7b5   : > { %v8552_v62 = vpop.f32.mrf.mxu1  ;;  %4302 = vadd.xlane.f32.xlu1 %v4301_v17  ;;  %4425 = vadd.xlane.f32.xlu0 %v4424_v1 }
 0x7b6   : > { %v4212_v9 = vadd.f32 %v8552_v62, %v14908_v61  ;;  %v4316_v28 = vsel %vm582_vm1, %v12556_v31, 0.0  ;;  %v12570_v53 = vadd.f32 %v12413_v63, %v4201_v7  ;;  %v4376_v5 = vmul.f32 %v12556_v31, %v12556_v31  ;;  %8557 = vmatprep.subr.bf16.mxu0 %v8859_v26 }
 0x7b7   : > { %v4203_v0 = vpop.f32.mrf.mxu1  ;;  %8558 = vmatpush3.bf16.msra.mxu0 %v8859_v26 }
 0x7b8   : > { %v12565_v11 = vadd.f32 %v12413_v63, %v4212_v9  ;;  %v4204_v50 = vadd.f32 %v4203_v0, %v14910_v2  ;;  %v4310_v21 = vsel %vm582_vm1, %v12570_v53, 0.0  ;;  %v4436_v52 = vsel %vm582_vm1, %v4376_v5, 0.0  ;;  %8559 = vmatprep.subr.bf16.mxu0 %v8860_v12 }
 0x7b9   : > { %4428 = vadd.xlane.f32.xlu1 %v4427_v43  ;;  %4419 = vadd.xlane.f32.xlu0 %v4418_v42  ;;  %v4374_v45 = vmul.f32 %v12570_v53, %v12570_v53 }
 0x7ba   : > { %v4319_v6 = vsel %vm582_vm1, %v12565_v11, 0.0  ;;  %v12577_v33 = vadd.f32 %v12413_v63, %v4204_v50  ;;  %v4377_v41 = vmul.f32 %v12565_v11, %v12565_v11 }
 0x7bb   : > { %v4430_v15 = vsel %vm582_vm1, %v4374_v45, 0.0  ;;  %8560 = vmatpush3.bf16.msra.mxu0 %v8860_v12 }
 0x7bc   : > { %v4313_v55 = vsel %vm582_vm1, %v12577_v33, 0.0  ;;  %v4439_v48 = vsel %vm582_vm1, %v4377_v41, 0.0  ;;  %v4375_v51 = vmul.f32 %v12577_v33, %v12577_v33 }
 0x7bd   : > { %4422 = vadd.xlane.f32.xlu1 %v4421_v18  ;;  %4317 = vadd.xlane.f32.xlu0 %v4316_v28 }
 0x7be   : > { %v4433_v17 = vsel %vm582_vm1, %v4375_v51, 0.0 }
 0x7bf   : > { %v8555_v29 = vpop.f32.mrf.mxu1 }
 0x7c0   : > { %v4225_v35 = vadd.f32 %v8555_v29, %v14911_v32 }
 0x7c1   : > { %v4216_v54 = vpop.f32.mrf.mxu1  ;;  %4320 = vadd.xlane.f32.xlu1 %v4319_v6  ;;  %4311 = vadd.xlane.f32.xlu0 %v4310_v21 }
 0x7c2   : > { %v12592_v34 = vadd.f32 %v12413_v63, %v4225_v35  ;;  %v4217_v27 = vadd.f32 %v4216_v54, %v14913_v47 }
 0x7c3   : > { %v8556_v19 = vpop.f32.mrf.mxu1 }
 0x7c4   : > { %v4228_v22 = vadd.f32 %v8556_v19, %v14912_v44  ;;  %v4328_v40 = vsel %vm582_vm1, %v12592_v34, 0.0  ;;  %v12609_v59 = vadd.f32 %v12413_v63, %v4217_v27 }
 0x7c5   : > { %4314 = vadd.xlane.f32.xlu1 %v4313_v55  ;;  %4437 = vadd.xlane.f32.xlu0 %v4436_v52  ;;  %v4219_v13 = vpop.f32.mrf.mxu1 }
 0x7c6   : > { %v12601_v8 = vadd.f32 %v12413_v63, %v4228_v22  ;;  %v4220_v62 = vadd.f32 %v4219_v13, %v14914_v14  ;;  %v4322_v61 = vsel %vm582_vm1, %v12609_v59, 0.0  ;;  %v4378_v9 = vmul.f32 %v12609_v59, %v12609_v59 }
 0x7c8   : > { %v4331_v1 = vsel %vm582_vm1, %v12601_v8, 0.0  ;;  %v12619_v20 = vadd.f32 %v12413_v63, %v4220_v62  ;;  %v4442_v42 = vsel %vm582_vm1, %v4378_v9, 0.0  ;;  %v4380_v63 = vmul.f32 %v12592_v34, %v12592_v34 }
 0x7c9   : > { %4440 = vadd.xlane.f32.xlu1 %v4439_v48  ;;  %4431 = vadd.xlane.f32.xlu0 %v4430_v15  ;;  %v4381_v0 = vmul.f32 %v12601_v8, %v12601_v8 }
 0x7ca   : > { %v4325_v43 = vsel %vm582_vm1, %v12619_v20, 0.0  ;;  %v4379_v38 = vmul.f32 %v12619_v20, %v12619_v20  ;;  %v4448_v10 = vsel %vm582_vm1, %v4380_v63, 0.0 }
 0x7cb   : > { %v4451_v28 = vsel %vm582_vm1, %v4381_v0, 0.0 }
 0x7cc   : > { %v4445_v7 = vsel %vm582_vm1, %v4379_v38, 0.0 }
 0x7cd   : > { %4434 = vadd.xlane.f32.xlu1 %v4433_v17  ;;  %4329 = vadd.xlane.f32.xlu0 %v4328_v40 }
 0x7d1   : > { %4332 = vadd.xlane.f32.xlu1 %v4331_v1  ;;  %4323 = vadd.xlane.f32.xlu0 %v4322_v61  ;;  %v12641_v61 = vld [vmem:[%s14860_s5 + $0xd] ss:$0 sm:$0xff] }
 0x7d5   : > { %4326 = vadd.xlane.f32.xlu1 %v4325_v43  ;;  %4443 = vadd.xlane.f32.xlu0 %v4442_v42  ;;  %v12646_v42 = vld [vmem:[%s14860_s5 + $0xe] ss:$0 sm:$0xff] }
 0x7d9   : > { %4446 = vadd.xlane.f32.xlu1 %v4445_v7  ;;  %4449 = vadd.xlane.f32.xlu0 %v4448_v10 }
 0x7dd   : > { %4452 = vadd.xlane.f32.xlu1 %v4451_v28 }
 0x7e3   : > { %v4270_v18 = vpop.xlane.xlu0 %4269 }
 0x7e4   : > { %v4336_v29 = vmul.f32 0.03125, %v4270_v18 }
 0x7e6   : > { %v4480_v32 = vmul.f32 %v4336_v29, %v4336_v29  ;;  %v4528_v1 = vsub.f32 %v12417_v23, %v4336_v29 }
 0x7e7   : > { %v4273_v2 = vpop.xlane.xlu1 %4272  ;;  %v4264_v50 = vpop.xlane.xlu0 %4263 }
 0x7e8   : > { %v4337_v6 = vmul.f32 0.03125, %v4273_v2  ;;  %v4334_v54 = vmul.f32 0.03125, %v4264_v50 }
 0x7ea   : > { %v4481_v55 = vmul.f32 %v4337_v6, %v4337_v6  ;;  %v4478_v52 = vmul.f32 %v4334_v54, %v4334_v54  ;;  %v4529_v38 = vsub.f32 %v12427_v3, %v4337_v6  ;;  %v4526_v23 = vsub.f32 %v12421_v58, %v4334_v54 }
 0x7eb   : > { %v4267_v21 = vpop.xlane.xlu1 %4266  ;;  %v4390_v5 = vpop.xlane.xlu0 %4389 }
 0x7ec   : > { %v4456_v35 = vmul.f32 0.03125, %v4390_v5  ;;  %v4335_v44 = vmul.f32 0.03125, %v4267_v21 }
 0x7ee   : > { %v4504_v19 = vsub.f32 %v4456_v35, %v4480_v32  ;;  %v4479_v13 = vmul.f32 %v4335_v44, %v4335_v44  ;;  %v4527_v21 = vsub.f32 %v12431_v49, %v4335_v44 }
 0x7ef   : > { %v4393_v41 = vpop.xlane.xlu1 %4392  ;;  %v4384_v45 = vpop.xlane.xlu0 %4383 }
 0x7f0   : > { %v4552_v22 = vadd.f32 1e-05, %v4504_v19  ;;  %v4457_v47 = vmul.f32 0.03125, %v4393_v41  ;;  %v4454_v27 = vmul.f32 0.03125, %v4384_v45 }
 0x7f2   : > { %9253 = vrsqrt.f32 %v4552_v22  ;;  %v4505_v48 = vsub.f32 %v4457_v47, %v4481_v55  ;;  %v4502_v15 = vsub.f32 %v4454_v27, %v4478_v52 }
 0x7f3   : > { %v4387_v51 = vpop.xlane.xlu1 %4386 }
 0x7f4   : > { %v4553_v40 = vadd.f32 1e-05, %v4505_v48  ;;  %v4550_v26 = vadd.f32 1e-05, %v4502_v15  ;;  %v4455_v14 = vmul.f32 0.03125, %v4387_v51 }
 0x7f6   : > { %9255 = vrsqrt.f32 %v4553_v40  ;;  %v4503_v62 = vsub.f32 %v4455_v14, %v4479_v13 }
 0x7f7   : > { %9257 = vrsqrt.f32 %v4550_v26 }
 0x7f8   : > { %v4551_v17 = vadd.f32 1e-05, %v4503_v62 }
 0x7fa   : > { %9259 = vrsqrt.f32 %v4551_v17 }
 0x7ff   : > { %v9254_v12 = vpop.eup %9253  ;;  %v4282_v43 = vpop.xlane.xlu0 %4281 }
 0x800   : > { %v4600_v9 = vmul.f32 %v9254_v12, %v4528_v1  ;;  %v12654_v29 = vmul.f32 0.03125, %v4282_v43 }
 0x802   : > { %v4628_v63 = vmul.f32 %v12641_v61, %v4600_v9  ;;  %v4484_v45 = vmul.f32 %v12654_v29, %v12654_v29 }
 0x803   : > { %v9256_v7 = vpop.eup %9255  ;;  %v4285_v18 = vpop.xlane.xlu1 %4284 }
 0x804   : > { %v9258_v10 = vpop.eup %9257  ;;  %v12652_v0 = vadd.f32 %v12646_v42, %v4628_v63  ;;  %v4601_v28 = vmul.f32 %v9256_v7, %v4529_v38  ;;  %v4276_v2 = vpop.xlane.xlu0 %4275  ;;  %v12660_v58 = vmul.f32 0.03125, %v4285_v18 }
 0x805   : > { %v4598_v50 = vmul.f32 %v9258_v10, %v4526_v23  ;;  %v12662_v54 = vmul.f32 0.03125, %v4276_v2 }
 0x806   : > { %v4629_v5 = vmul.f32 %v12641_v61, %v4601_v28  ;;  %v4704_v3 = vmul.f32 0.044715, %v12652_v0  ;;  %v4485_v48 = vmul.f32 %v12660_v58, %v12660_v58 }
 0x807   : > { %v9260_v6 = vpop.eup %9259  ;;  %v4626_v32 = vmul.f32 %v12641_v61, %v4598_v50  ;;  %v4279_v55 = vpop.xlane.xlu1 %4278  ;;  %v4482_v15 = vmul.f32 %v12662_v54, %v12662_v54 }
 0x808   : > { %v12665_v35 = vadd.f32 %v12646_v42, %v4629_v5  ;;  %v4599_v19 = vmul.f32 %v9260_v6, %v4527_v21  ;;  %v4402_v52 = vpop.xlane.xlu0 %4401  ;;  %v4728_v41 = vmul.f32 %v4704_v3, %v12652_v0  ;;  %v4339_v1 = vmul.f32 0.03125, %v4279_v55 }
 0x809   : > { %v12669_v49 = vadd.f32 %v12646_v42, %v4626_v32  ;;  %v4460_v44 = vmul.f32 0.03125, %v4402_v52 }
 0x80a   : > { %v4627_v22 = vmul.f32 %v12641_v61, %v4599_v19  ;;  %v4705_v47 = vmul.f32 0.044715, %v12665_v35  ;;  %v4752_v27 = vmul.f32 %v4728_v41, %v12652_v0  ;;  %v4483_v5 = vmul.f32 %v4339_v1, %v4339_v1 }
 0x80b   : > { %v4508_v51 = vsub.f32 %v4460_v44, %v4484_v45  ;;  %v4405_v40 = vpop.xlane.xlu1 %4404  ;;  %v4702_v14 = vmul.f32 0.044715, %v12669_v49 }
 0x80c   : > { %v12681_v13 = vadd.f32 %v12646_v42, %v4627_v22  ;;  %v4396_v26 = vpop.xlane.xlu0 %4395  ;;  %v4729_v62 = vmul.f32 %v4705_v47, %v12665_v35  ;;  %v4776_v17 = vadd.f32 %v4752_v27, %v12652_v0  ;;  %v4461_v9 = vmul.f32 0.03125, %v4405_v40 }
 0x80d   : > { %v4556_v12 = vadd.f32 1e-05, %v4508_v51  ;;  %v4458_v43 = vmul.f32 0.03125, %v4396_v26  ;;  %v4726_v63 = vmul.f32 %v4702_v14, %v12669_v49  ;;  %v4532_v27 = vsub.f32 %v12453_v36, %v12654_v29 }
 0x80e   : > { %v4703_v38 = vmul.f32 0.044715, %v12681_v13  ;;  %v4753_v7 = vmul.f32 %v4729_v62, %v12665_v35  ;;  %v4509_v23 = vsub.f32 %v4461_v9, %v4485_v48  ;;  %v4800_v28 = vmul.f32 0.7978846, %v4776_v17 }
 0x80f   : > { %9261 = vrsqrt.f32 %v4556_v12  ;;  %v4506_v10 = vsub.f32 %v4458_v43, %v4482_v15  ;;  %v4399_v18 = vpop.xlane.xlu1 %4398  ;;  %v4750_v50 = vmul.f32 %v4726_v63, %v12669_v49  ;;  %v4533_v40 = vsub.f32 %v12463_v39, %v12660_v58 }
 0x810   : > { %v4727_v2 = vmul.f32 %v4703_v38, %v12681_v13  ;;  %v4777_v21 = vadd.f32 %v4753_v7, %v12665_v35  ;;  %v4557_v3 = vadd.f32 1e-05, %v4509_v23  ;;  %v4459_v32 = vmul.f32 0.03125, %v4399_v18 }
 0x811   : > { %v4554_v6 = vadd.f32 1e-05, %v4506_v10  ;;  %v4774_v55 = vadd.f32 %v4750_v50, %v12669_v49  ;;  %9263 = vtanh.f32 %v4800_v28  ;;  %v4530_v62 = vsub.f32 %v12457_v25, %v12662_v54 }
 0x812   : > { %v4751_v19 = vmul.f32 %v4727_v2, %v12681_v13  ;;  %v4801_v52 = vmul.f32 0.7978846, %v4777_v21  ;;  %9265 = vrsqrt.f32 %v4557_v3  ;;  %v4507_v41 = vsub.f32 %v4459_v32, %v4483_v5 }
 0x813   : > { %9267 = vrsqrt.f32 %v4554_v6  ;;  %v4798_v44 = vmul.f32 0.7978846, %v4774_v55  ;;  %v4531_v29 = vsub.f32 %v12467_v24, %v4339_v1  ;;  %v4681_v25 = vmul.f32 0.5, %v12665_v35 }
 0x814   : > { %v4775_v45 = vadd.f32 %v4751_v19, %v12681_v13  ;;  %v4555_v22 = vadd.f32 1e-05, %v4507_v41  ;;  %9269 = vtanh.f32 %v4801_v52  ;;  %v4678_v21 = vmul.f32 0.5, %v12669_v49 }
 0x815   : > { %9271 = vtanh.f32 %v4798_v44  ;;  %v4679_v5 = vmul.f32 0.5, %v12681_v13  ;;  %v4680_v35 = vmul.f32 0.5, %v12652_v0 }
 0x816   : > { %v4799_v47 = vmul.f32 0.7978846, %v4775_v45  ;;  %9273 = vrsqrt.f32 %v4555_v22 }
 0x818   : > { %9275 = vtanh.f32 %v4799_v47 }
 0x81c   : > { %v9262_v48 = vpop.eup %9261 }
 0x81d   : > { %v4604_v15 = vmul.f32 %v9262_v48, %v4532_v27 }
 0x81e   : > { %v9264_v51 = vpop.eup %9263 }
 0x81f   : > { %v4632_v26 = vmul.f32 %v12641_v61, %v4604_v15  ;;  %v9266_v14 = vpop.eup %9265  ;;  %v4848_v2 = vadd.f32 1.0, %v9264_v51 }
 0x820   : > { %v9268_v17 = vpop.eup %9267  ;;  %v4605_v9 = vmul.f32 %v9266_v14, %v4533_v40 }
 0x821   : > { %v12703_v12 = vadd.f32 %v12646_v42, %v4632_v26  ;;  %v9270_v43 = vpop.eup %9269  ;;  %v4602_v38 = vmul.f32 %v9268_v17, %v4530_v62  ;;  %v4872_v44 = vmul.f32 %v4848_v2, %v4680_v35 }
 0x822   : > { %v9272_v36 = vpop.eup %9271  ;;  %v4633_v63 = vmul.f32 %v12641_v61, %v4605_v9  ;;  %v4849_v7 = vadd.f32 1.0, %v9270_v43 }
 0x823   : > { %v4708_v39 = vmul.f32 0.044715, %v12703_v12  ;;  %v9274_v58 = vpop.eup %9273  ;;  %v4630_v23 = vmul.f32 %v12641_v61, %v4602_v38  ;;  %v4846_v10 = vadd.f32 1.0, %v9272_v36 }
 0x824   : > { %v12711_v28 = vadd.f32 %v12646_v42, %v4633_v63  ;;  %v4603_v18 = vmul.f32 %v9274_v58, %v4531_v29  ;;  %v4873_v32 = vmul.f32 %v4849_v7, %v4681_v25 }
 0x825   : > { %v9276_v54 = vpop.eup %9275  ;;  %v4732_v50 = vmul.f32 %v4708_v39, %v12703_v12  ;;  %v12715_v24 = vadd.f32 %v12646_v42, %v4630_v23  ;;  %v4294_v1 = vpop.xlane.xlu0 %4293  ;;  %v4870_v19 = vmul.f32 %v4846_v10, %v4678_v21 }
 0x826   : > { %v4847_v3 = vadd.f32 1.0, %v9276_v54  ;;  %v4631_v6 = vmul.f32 %v12641_v61, %v4603_v18  ;;  %v4709_v41 = vmul.f32 0.044715, %v12711_v28  ;;  %v12729_v48 = vmul.f32 0.03125, %v4294_v1 }
 0x827   : > { %v4706_v52 = vmul.f32 0.044715, %v12715_v24  ;;  %v4756_v49 = vmul.f32 %v4732_v50, %v12703_v12  ;;  %v4895_v15 = vpack.c.bf16 %v4873_v32, %v4872_v44 }
 0x828   : > { %v4871_v55 = vmul.f32 %v4847_v3, %v4679_v5  ;;  %v12724_v45 = vadd.f32 %v12646_v42, %v4631_v6  ;;  %v4733_v0 = vmul.f32 %v4709_v41, %v12711_v28  ;;  %v4488_v7 = vmul.f32 %v12729_v48, %v12729_v48 }
 0x829   : > { %v4297_v22 = vpop.xlane.xlu1 %4296  ;;  %v4288_v13 = vpop.xlane.xlu0 %4287  ;;  %v4730_v27 = vmul.f32 %v4706_v52, %v12715_v24  ;;  %v4780_v14 = vadd.f32 %v4756_v49, %v12703_v12 }
 0x82a   : > { %v4894_v47 = vpack.c.bf16 %v4871_v55, %v4870_v19  ;;  %v4707_v51 = vmul.f32 0.044715, %v12724_v45  ;;  %v4757_v26 = vmul.f32 %v4733_v0, %v12711_v28  ;;  %v12736_v62 = vmul.f32 0.03125, %v4297_v22 }
 0x82b   : > { %v4754_v40 = vmul.f32 %v4730_v27, %v12715_v24  ;;  %v12738_v17 = vmul.f32 0.03125, %v4288_v13  ;;  %v4804_v63 = vmul.f32 0.7978846, %v4780_v14 }
 0x82c   : > { %8561 = vmatprep.mubr.msk.bf16.mxu0 %vm582_vm1, %v4894_v47  ;;  %v4731_v38 = vmul.f32 %v4707_v51, %v12724_v45  ;;  %v4781_v29 = vadd.f32 %v4757_v26, %v12711_v28  ;;  %v4489_v25 = vmul.f32 %v12736_v62, %v12736_v62 }
 0x82d   : > { %8562 = vmatmul.mubr.msk.bf16.vlgmr.msra.gmra.mxu0 %vm582_vm1, %v4895_v15  ;;  %v4291_v9 = vpop.xlane.xlu1 %4290  ;;  %v4414_v43 = vpop.xlane.xlu0 %4413  ;;  %v4778_v36 = vadd.f32 %v4754_v40, %v12715_v24  ;;  %9277 = vtanh.f32 %v4804_v63  ;;  %v4486_v18 = vmul.f32 %v12738_v17, %v12738_v17  ;;  %v4684_v63 = vmul.f32 0.5, %v12703_v12 }
 0x82e   : > { %v4464_v39 = vmul.f32 0.03125, %v4414_v43  ;;  %v4755_v58 = vmul.f32 %v4731_v38, %v12724_v45  ;;  %v4805_v10 = vmul.f32 0.7978846, %v4781_v29  ;;  %v12751_v2 = vmul.f32 0.03125, %v4291_v9 }
 0x82f   : > { %v4802_v23 = vmul.f32 0.7978846, %v4778_v36 }
 0x830   : > { %v4512_v54 = vsub.f32 %v4464_v39, %v4488_v7  ;;  %v4779_v21 = vadd.f32 %v4755_v58, %v12724_v45  ;;  %v4487_v52 = vmul.f32 %v12751_v2, %v12751_v2  ;;  %v4685_v7 = vmul.f32 0.5, %v12711_v28 }
 0x831   : > { %v4417_v50 = vpop.xlane.xlu1 %4416  ;;  %v4408_v1 = vpop.xlane.xlu0 %4407  ;;  %9279 = vtanh.f32 %v4802_v23  ;;  %v4536_v39 = vsub.f32 %v12489_v30, %v12729_v48  ;;  %v4682_v58 = vmul.f32 0.5, %v12715_v24 }
 0x832   : > { %v4560_v5 = vadd.f32 1e-05, %v4512_v54  ;;  %v4465_v3 = vmul.f32 0.03125, %v4417_v50  ;;  %v4462_v6 = vmul.f32 0.03125, %v4408_v1  ;;  %9281 = vtanh.f32 %v4805_v10 }
 0x833   : > { %v4803_v35 = vmul.f32 0.7978846, %v4779_v21  ;;  %v4537_v54 = vsub.f32 %v12499_v37, %v12736_v62  ;;  %v4683_v1 = vmul.f32 0.5, %v12724_v45  ;;  %v4534_v62 = vsub.f32 %v12493_v56, %v12738_v17 }
 0x834   : > { %9283 = vrsqrt.f32 %v4560_v5  ;;  %v4513_v32 = vsub.f32 %v4465_v3, %v4489_v25  ;;  %v4510_v19 = vsub.f32 %v4462_v6, %v4486_v18 }
 0x835   : > { %v4411_v55 = vpop.xlane.xlu1 %4410  ;;  %9285 = vtanh.f32 %v4803_v35 }
 0x836   : > { %v4561_v41 = vadd.f32 1e-05, %v4513_v32  ;;  %v4558_v44 = vadd.f32 1e-05, %v4510_v19  ;;  %v4463_v49 = vmul.f32 0.03125, %v4411_v55  ;;  %v4306_v22 = vpop.xlane.xlu0 %4305 }
 0x837   : > { %v12756_v15 = vmul.f32 0.03125, %v4306_v22 }
 0x838   : > { %9287 = vrsqrt.f32 %v4561_v41  ;;  %v4511_v13 = vsub.f32 %v4463_v49, %v4487_v52 }
 0x839   : > { %9289 = vrsqrt.f32 %v4558_v44  ;;  %v4492_v36 = vmul.f32 %v12756_v15, %v12756_v15 }
 0x83a   : > { %v4559_v47 = vadd.f32 1e-05, %v4511_v13  ;;  %v4309_v27 = vpop.xlane.xlu1 %4308  ;;  %v4300_v0 = vpop.xlane.xlu0 %4299 }
 0x83b   : > { %v9278_v51 = vpop.eup %9277  ;;  %v12758_v40 = vmul.f32 0.03125, %v4309_v27  ;;  %v12760_v14 = vmul.f32 0.03125, %v4300_v0 }
 0x83c   : > { %9291 = vrsqrt.f32 %v4559_v47  ;;  %v4852_v23 = vadd.f32 1.0, %v9278_v51 }
 0x83d   : > { %v4493_v18 = vmul.f32 %v12758_v40, %v12758_v40  ;;  %v4490_v28 = vmul.f32 %v12760_v14, %v12760_v14 }
 0x83e   : > { %v9280_v26 = vpop.eup %9279  ;;  %v4303_v9 = vpop.xlane.xlu1 %4302  ;;  %v4876_v45 = vmul.f32 %v4852_v23, %v4684_v63 }
 0x83f   : > { %v4426_v43 = vpop.xlane.xlu0 %4425  ;;  %v9282_v38 = vpop.eup %9281  ;;  %v12776_v30 = vmul.f32 0.03125, %v4303_v9  ;;  %v4850_v5 = vadd.f32 1.0, %v9280_v26 }
 0x840   : > { %v4468_v29 = vmul.f32 0.03125, %v4426_v43  ;;  %v4853_v10 = vadd.f32 1.0, %v9282_v38  ;;  %v4535_v43 = vsub.f32 %v12503_v16, %v12751_v2 }
 0x841   : > { %v9284_v25 = vpop.eup %9283  ;;  %v4491_v47 = vmul.f32 %v12776_v30, %v12776_v30  ;;  %v4874_v56 = vmul.f32 %v4850_v5, %v4682_v58 }
 0x842   : > { %v4516_v50 = vsub.f32 %v4468_v29, %v4492_v36  ;;  %v9286_v12 = vpop.eup %9285  ;;  %v4608_v21 = vmul.f32 %v9284_v25, %v4536_v39  ;;  %v4429_v24 = vpop.xlane.xlu1 %4428  ;;  %v4877_v19 = vmul.f32 %v4853_v10, %v4685_v7 }
 0x843   : > { %v4420_v48 = vpop.xlane.xlu0 %4419  ;;  %v4469_v6 = vmul.f32 0.03125, %v4429_v24  ;;  %v4851_v37 = vadd.f32 1.0, %v9286_v12  ;;  %v4540_v24 = vsub.f32 %v12524_v4, %v12756_v15 }
 0x844   : > { %v4564_v3 = vadd.f32 1e-05, %v4516_v50  ;;  %v4466_v35 = vmul.f32 0.03125, %v4420_v48  ;;  %v4636_v32 = vmul.f32 %v12641_v61, %v4608_v21  ;;  %v4897_v39 = vpack.c.bf16 %v4877_v19, %v4876_v45 }
 0x845   : > { %v9288_v55 = vpop.eup %9287  ;;  %v4517_v52 = vsub.f32 %v4469_v6, %v4493_v18  ;;  %v4875_v44 = vmul.f32 %v4851_v37, %v4683_v1  ;;  %v4538_v45 = vsub.f32 %v12529_v60, %v12760_v14  ;;  %v4539_v19 = vsub.f32 %v12539_v46, %v12776_v30 }
 0x846   : > { %9293 = vrsqrt.f32 %v4564_v3  ;;  %v4514_v41 = vsub.f32 %v4466_v35, %v4490_v28  ;;  %v9290_v49 = vpop.eup %9289  ;;  %v12782_v22 = vadd.f32 %v12646_v42, %v4636_v32  ;;  %v4609_v13 = vmul.f32 %v9288_v55, %v4537_v54  ;;  %v4423_v27 = vpop.xlane.xlu1 %4422 }
 0x847   : > { %v4318_v0 = vpop.xlane.xlu0 %4317  ;;  %v4606_v17 = vmul.f32 %v9290_v49, %v4534_v62  ;;  %v4565_v51 = vadd.f32 1e-05, %v4517_v52  ;;  %v4467_v9 = vmul.f32 0.03125, %v4423_v27  ;;  %v4896_v36 = vpack.c.bf16 %v4875_v44, %v4874_v56 }
 0x848   : > { %v4562_v26 = vadd.f32 1e-05, %v4514_v41  ;;  %v4637_v38 = vmul.f32 %v12641_v61, %v4609_v13  ;;  %v12797_v54 = vmul.f32 0.03125, %v4318_v0  ;;  %v4712_v18 = vmul.f32 0.044715, %v12782_v22 }
 0x849   : > { %v9292_v29 = vpop.eup %9291  ;;  %v4634_v63 = vmul.f32 %v12641_v61, %v4606_v17  ;;  %9295 = vrsqrt.f32 %v4565_v51  ;;  %v4515_v7 = vsub.f32 %v4467_v9, %v4491_v47  ;;  %8565 = vmatprep.mubr.msk.bf16.mxu0 %vm582_vm1, %v4896_v36  ;;  %v4541_v32 = vsub.f32 %v12535_v57, %v12758_v40 }
 0x84a   : > { %v12791_v23 = vadd.f32 %v12646_v42, %v4637_v38  ;;  %v4607_v58 = vmul.f32 %v9292_v29, %v4535_v43  ;;  %9297 = vrsqrt.f32 %v4562_v26  ;;  %v4321_v10 = vpop.xlane.xlu1 %4320  ;;  %8566 = vmatmul.mubr.msk.bf16.gmra.mxu0 %vm582_vm1, %v4897_v39  ;;  %v4496_v6 = vmul.f32 %v12797_v54, %v12797_v54 }
 0x84b   : > { %v4312_v25 = vpop.xlane.xlu0 %4311  ;;  %v12795_v16 = vadd.f32 %v12646_v42, %v4634_v63  ;;  %v4563_v2 = vadd.f32 1e-05, %v4515_v7  ;;  %v12803_v12 = vmul.f32 0.03125, %v4321_v10  ;;  %v4736_v37 = vmul.f32 %v4712_v18, %v12782_v22 }
 0x84c   : > { %v4635_v50 = vmul.f32 %v12641_v61, %v4607_v58  ;;  %v4713_v1 = vmul.f32 0.044715, %v12791_v23  ;;  %v12805_v21 = vmul.f32 0.03125, %v4312_v25  ;;  %v12838_v51 = vmul.f32 0.5, %v12782_v22 }
 0x84d   : > { %9299 = vrsqrt.f32 %v4563_v2  ;;  %v4710_v3 = vmul.f32 0.044715, %v12795_v16  ;;  %v4497_v55 = vmul.f32 %v12803_v12, %v12803_v12  ;;  %v4760_v14 = vmul.f32 %v4736_v37, %v12782_v22 }
 0x84e   : > { %v12808_v28 = vadd.f32 %v12646_v42, %v4635_v50  ;;  %v4315_v48 = vpop.xlane.xlu1 %4314  ;;  %v4737_v62 = vmul.f32 %v4713_v1, %v12791_v23  ;;  %v4494_v52 = vmul.f32 %v12805_v21, %v12805_v21  ;;  %v4544_v26 = vsub.f32 %v12556_v31, %v12797_v54 }
 0x84f   : > { %v4438_v5 = vpop.xlane.xlu0 %4437  ;;  %v4734_v15 = vmul.f32 %v4710_v3, %v12795_v16  ;;  %v12833_v0 = vmul.f32 0.03125, %v4315_v48  ;;  %v4545_v29 = vsub.f32 %v12565_v11, %v12803_v12  ;;  %v4784_v58 = vadd.f32 %v4760_v14, %v12782_v22 }
 0x850   : > { %v4472_v35 = vmul.f32 0.03125, %v4438_v5  ;;  %v4711_v4 = vmul.f32 0.044715, %v12808_v28  ;;  %v4761_v13 = vmul.f32 %v4737_v62, %v12791_v23 }
 0x851   : > { %v4758_v60 = vmul.f32 %v4734_v15, %v12795_v16 }
 0x852   : > { %v4520_v41 = vsub.f32 %v4472_v35, %v4496_v6  ;;  %v4441_v49 = vpop.xlane.xlu1 %4440  ;;  %v4735_v40 = vmul.f32 %v4711_v4, %v12808_v28  ;;  %v4785_v50 = vadd.f32 %v4761_v13, %v12791_v23  ;;  %v12852_v6 = vmul.f32 0.5, %v12795_v16 }
 0x853   : > { %v9294_v44 = vpop.eup %9293  ;;  %v4432_v57 = vpop.xlane.xlu0 %4431  ;;  %v4473_v30 = vmul.f32 0.03125, %v4441_v49  ;;  %v4782_v17 = vadd.f32 %v4758_v60, %v12795_v16 }
 0x854   : > { %v4612_v47 = vmul.f32 %v9294_v44, %v4540_v24  ;;  %v4568_v46 = vadd.f32 1e-05, %v4520_v41  ;;  %v4470_v27 = vmul.f32 0.03125, %v4432_v57  ;;  %v4759_v56 = vmul.f32 %v4735_v40, %v12808_v28 }
 0x855   : > { %v4521_v9 = vsub.f32 %v4473_v30, %v4497_v55  ;;  %v4495_v24 = vmul.f32 %v12833_v0, %v12833_v0  ;;  %v4806_v5 = vmul.f32 0.7978846, %v4782_v17  ;;  %v4809_v41 = vmul.f32 0.7978846, %v4785_v50 }
 0x856   : > { %9301 = vrsqrt.f32 %v4568_v46  ;;  %v4518_v43 = vsub.f32 %v4470_v27, %v4494_v52  ;;  %v9296_v38 = vpop.eup %9295  ;;  %v4640_v36 = vmul.f32 %v12641_v61, %v4612_v47  ;;  %v4435_v63 = vpop.xlane.xlu1 %4434  ;;  %v4783_v39 = vadd.f32 %v4759_v56, %v12808_v28 }
 0x857   : > { %v4330_v7 = vpop.xlane.xlu0 %4329  ;;  %v9298_v10 = vpop.eup %9297  ;;  %v4613_v25 = vmul.f32 %v9296_v38, %v4541_v32  ;;  %v4569_v2 = vadd.f32 1e-05, %v4521_v9  ;;  %v4471_v48 = vmul.f32 0.03125, %v4435_v63  ;;  %v4808_v52 = vmul.f32 0.7978846, %v4784_v58 }
 0x858   : > { %v4566_v18 = vadd.f32 1e-05, %v4518_v43  ;;  %v4610_v1 = vmul.f32 %v9298_v10, %v4538_v45  ;;  %v4807_v35 = vmul.f32 0.7978846, %v4783_v39  ;;  %v12855_v37 = vadd.f32 %v12646_v42, %v4640_v36 }
 0x859   : > { %v4641_v3 = vmul.f32 %v12641_v61, %v4613_v25  ;;  %9303 = vrsqrt.f32 %v4569_v2  ;;  %v4519_v32 = vsub.f32 %v4471_v48, %v4495_v24  ;;  %v4542_v40 = vsub.f32 %v12570_v53, %v12805_v21 }
 0x85a   : > { %v9300_v22 = vpop.eup %9299  ;;  %v4638_v62 = vmul.f32 %v12641_v61, %v4610_v1  ;;  %9305 = vrsqrt.f32 %v4566_v18  ;;  %v4333_v45 = vpop.xlane.xlu1 %4332  ;;  %v12869_v60 = vmul.f32 0.03125, %v4330_v7  ;;  %v12874_v47 = vmul.f32 0.5, %v12808_v28 }
 0x85b   : > { %v4324_v4 = vpop.xlane.xlu0 %4323  ;;  %v12859_v15 = vadd.f32 %v12646_v42, %v4641_v3  ;;  %v4611_v55 = vmul.f32 %v9300_v22, %v4539_v19  ;;  %v4567_v44 = vadd.f32 1e-05, %v4519_v32  ;;  %9307 = vtanh.f32 %v4806_v5 }
 0x85c   : > { %v12862_v16 = vadd.f32 %v12646_v42, %v4638_v62  ;;  %v12864_v49 = vmul.f32 0.03125, %v4324_v4  ;;  %9309 = vtanh.f32 %v4807_v35  ;;  %v4716_v46 = vmul.f32 0.044715, %v12855_v37 }
 0x85d   : > { %v4639_v57 = vmul.f32 %v12641_v61, %v4611_v55  ;;  %9311 = vrsqrt.f32 %v4567_v44  ;;  %v4543_v21 = vsub.f32 %v12577_v33, %v12833_v0  ;;  %v4717_v17 = vmul.f32 0.044715, %v12859_v15 }
 0x85e   : > { %v4498_v19 = vmul.f32 %v12864_v49, %v12864_v49  ;;  %v4327_v14 = vpop.xlane.xlu1 %4326  ;;  %9313 = vtanh.f32 %v4808_v52  ;;  %v4714_v56 = vmul.f32 0.044715, %v12862_v16  ;;  %v4500_v28 = vmul.f32 %v12869_v60, %v12869_v60 }
 0x85f   : > { %v4444_v13 = vpop.xlane.xlu0 %4443  ;;  %v12878_v30 = vadd.f32 %v12646_v42, %v4639_v57  ;;  %v12880_v27 = vmul.f32 0.03125, %v4327_v14  ;;  %9315 = vtanh.f32 %v4809_v41  ;;  %v12888_v9 = vmul.f32 0.03125, %v4333_v45 }
 0x860   : > { %v4474_v53 = vmul.f32 0.03125, %v4444_v13  ;;  %v4738_v33 = vmul.f32 %v4714_v56, %v12862_v16  ;;  %v4740_v0 = vmul.f32 %v4716_v46, %v12855_v37  ;;  %v4741_v58 = vmul.f32 %v4717_v17, %v12859_v15 }
 0x861   : > { %v4499_v43 = vmul.f32 %v12880_v27, %v12880_v27  ;;  %v4715_v39 = vmul.f32 0.044715, %v12878_v30  ;;  %v4501_v31 = vmul.f32 %v12888_v9, %v12888_v9 }
 0x862   : > { %v4522_v38 = vsub.f32 %v4474_v53, %v4498_v19  ;;  %v4447_v63 = vpop.xlane.xlu1 %4446  ;;  %v4762_v1 = vmul.f32 %v4738_v33, %v12862_v16  ;;  %v4764_v24 = vmul.f32 %v4740_v0, %v12855_v37  ;;  %v4765_v48 = vmul.f32 %v4741_v58, %v12859_v15 }
 0x863   : > { %v9302_v36 = vpop.eup %9301  ;;  %v4450_v7 = vpop.xlane.xlu0 %4449  ;;  %v4475_v2 = vmul.f32 0.03125, %v4447_v63  ;;  %v4739_v50 = vmul.f32 %v4715_v39, %v12878_v30 }
 0x864   : > { %v4616_v10 = vmul.f32 %v9302_v36, %v4544_v26  ;;  %v4570_v25 = vadd.f32 1e-05, %v4522_v38  ;;  %v4476_v18 = vmul.f32 0.03125, %v4450_v7  ;;  %v4786_v62 = vadd.f32 %v4762_v1, %v12862_v16 }
 0x865   : > { %v4523_v3 = vsub.f32 %v4475_v2, %v4499_v43  ;;  %v4763_v26 = vmul.f32 %v4739_v50, %v12878_v30  ;;  %v4788_v32 = vadd.f32 %v4764_v24, %v12855_v37  ;;  %v4789_v41 = vadd.f32 %v4765_v48, %v12859_v15 }
 0x866   : > { %v4644_v5 = vmul.f32 %v12641_v61, %v4616_v10  ;;  %9317 = vrsqrt.f32 %v4570_v25  ;;  %v4524_v35 = vsub.f32 %v4476_v18, %v4500_v28  ;;  %v9304_v22 = vpop.eup %9303  ;;  %v4453_v54 = vpop.xlane.xlu1 %4452  ;;  %v4810_v14 = vmul.f32 0.7978846, %v4786_v62 }
 0x867   : > { %v9306_v45 = vpop.eup %9305  ;;  %v4617_v4 = vmul.f32 %v9304_v22, %v4545_v29  ;;  %v4571_v55 = vadd.f32 1e-05, %v4523_v3  ;;  %v4477_v57 = vmul.f32 0.03125, %v4453_v54  ;;  %v4787_v19 = vadd.f32 %v4763_v26, %v12878_v30 }
 0x868   : > { %v4572_v52 = vadd.f32 1e-05, %v4524_v35  ;;  %v4614_v44 = vmul.f32 %v9306_v45, %v4542_v40  ;;  %v9308_v13 = vpop.eup %9307  ;;  %v12915_v46 = vadd.f32 %v12646_v42, %v4644_v5  ;;  %v4812_v56 = vmul.f32 0.7978846, %v4788_v32 }
 0x869   : > { %v4645_v53 = vmul.f32 %v12641_v61, %v4617_v4  ;;  %9319 = vrsqrt.f32 %v4571_v55  ;;  %v9310_v17 = vpop.eup %9309  ;;  %v4525_v12 = vsub.f32 %v4477_v57, %v4501_v31  ;;  %v4854_v29 = vadd.f32 1.0, %v9308_v13 }
 0x86a   : > { %v4642_v11 = vmul.f32 %v12641_v61, %v4614_v44  ;;  %9321 = vrsqrt.f32 %v4572_v52  ;;  %v9312_v28 = vpop.eup %9311  ;;  %v4855_v40 = vadd.f32 1.0, %v9310_v17  ;;  %v4811_v43 = vmul.f32 0.7978846, %v4787_v19 }
 0x86b   : > { %9323 = vtanh.f32 %v4810_v14  ;;  %v4813_v38 = vmul.f32 0.7978846, %v4789_v41  ;;  %v9314_v36 = vpop.eup %9313  ;;  %v12920_v63 = vadd.f32 %v12646_v42, %v4645_v53  ;;  %v4615_v39 = vmul.f32 %v9312_v28, %v4543_v21 }
 0x86c   : > { %v12923_v7 = vadd.f32 %v12646_v42, %v4642_v11  ;;  %v4573_v33 = vadd.f32 1e-05, %v4525_v12  ;;  %v9316_v0 = vpop.eup %9315  ;;  %v4878_v58 = vmul.f32 %v4854_v29, %v12852_v6  ;;  %v4879_v10 = vmul.f32 %v4855_v40, %v12874_v47 }
 0x86d   : > { %v4856_v25 = vadd.f32 1.0, %v9314_v36  ;;  %9325 = vtanh.f32 %v4811_v43  ;;  %v4643_v2 = vmul.f32 %v12641_v61, %v4615_v39  ;;  %v4689_v18 = vmul.f32 0.5, %v12791_v23 }
 0x86e   : > { %9327 = vrsqrt.f32 %v4573_v33  ;;  %v4857_v50 = vadd.f32 1.0, %v9316_v0  ;;  %v4898_v1 = vpack.c.bf16 %v4879_v10, %v4878_v58  ;;  %v4718_v24 = vmul.f32 0.044715, %v12923_v7 }
 0x86f   : > { %9329 = vtanh.f32 %v4812_v56  ;;  %v12931_v21 = vadd.f32 %v12646_v42, %v4643_v2  ;;  %v4880_v48 = vmul.f32 %v4856_v25, %v12838_v51  ;;  %v4546_v47 = vsub.f32 %v12609_v59, %v12864_v49 }
 0x870   : > { %v4881_v6 = vmul.f32 %v4857_v50, %v4689_v18  ;;  %9331 = vtanh.f32 %v4813_v38  ;;  %8569 = vmatprep.mubr.msk.bf16.mxu0 %vm582_vm1, %v4898_v1  ;;  %v4742_v5 = vmul.f32 %v4718_v24, %v12923_v7  ;;  %v4720_v23 = vmul.f32 0.044715, %v12915_v46 }
 0x871   : > { %v4721_v3 = vmul.f32 0.044715, %v12920_v63  ;;  %v4719_v31 = vmul.f32 0.044715, %v12931_v21  ;;  %v4547_v59 = vsub.f32 %v12619_v20, %v12880_v27  ;;  %v4548_v41 = vsub.f32 %v12592_v34, %v12869_v60 }
 0x872   : > { %v4899_v22 = vpack.c.bf16 %v4881_v6, %v4880_v48  ;;  %v4766_v51 = vmul.f32 %v4742_v5, %v12923_v7  ;;  %v4744_v26 = vmul.f32 %v4720_v23, %v12915_v46  ;;  %v4549_v44 = vsub.f32 %v12601_v8, %v12888_v9 }
 0x873   : > { %v9318_v35 = vpop.eup %9317  ;;  %v4745_v62 = vmul.f32 %v4721_v3, %v12920_v63  ;;  %v4743_v49 = vmul.f32 %v4719_v31, %v12931_v21  ;;  %v4692_v20 = vmul.f32 0.5, %v12855_v37  ;;  %v4690_v14 = vmul.f32 0.5, %v12862_v16 }
 0x874   : > { %v4618_v54 = vmul.f32 %v9318_v35, %v4546_v47  ;;  %8570 = vmatmul.mubr.msk.bf16.gmra.mxu0 %vm582_vm1, %v4899_v22  ;;  %v4790_v45 = vadd.f32 %v4766_v51, %v12923_v7  ;;  %v4768_v4 = vmul.f32 %v4744_v26, %v12915_v46  ;;  %v4693_v29 = vmul.f32 0.5, %v12859_v15 }
 0x875   : > { %v4769_v55 = vmul.f32 %v4745_v62, %v12920_v63  ;;  %v4767_v27 = vmul.f32 %v4743_v49, %v12931_v21  ;;  %v4691_v36 = vmul.f32 0.5, %v12878_v30 }
 0x876   : > { %v4646_v32 = vmul.f32 %v12641_v61, %v4618_v54  ;;  %v9320_v52 = vpop.eup %9319  ;;  %v4814_v13 = vmul.f32 0.7978846, %v4790_v45  ;;  %v4792_v53 = vadd.f32 %v4768_v4, %v12915_v46 }
 0x877   : > { %v9322_v57 = vpop.eup %9321  ;;  %v4619_v19 = vmul.f32 %v9320_v52, %v4547_v59  ;;  %v4791_v34 = vadd.f32 %v4767_v27, %v12931_v21  ;;  %v4793_v8 = vadd.f32 %v4769_v55, %v12920_v63 }
 0x878   : > { %v9324_v56 = vpop.eup %9323  ;;  %v12961_v17 = vadd.f32 %v12646_v42, %v4646_v32  ;;  %v4620_v11 = vmul.f32 %v9322_v57, %v4548_v41  ;;  %9333 = vtanh.f32 %v4814_v13  ;;  %v4816_v9 = vmul.f32 0.7978846, %v4792_v53 }
 0x879   : > { %v4647_v37 = vmul.f32 %v12641_v61, %v4619_v19  ;;  %v4858_v60 = vadd.f32 1.0, %v9324_v56  ;;  %v4815_v28 = vmul.f32 0.7978846, %v4791_v34  ;;  %v4817_v40 = vmul.f32 0.7978846, %v4793_v8 }
 0x87a   : > { %v9326_v12 = vpop.eup %9325  ;;  %v4648_v16 = vmul.f32 %v12641_v61, %v4620_v11  ;;  %9335 = vtanh.f32 %v4816_v9  ;;  %v4722_v10 = vmul.f32 0.044715, %v12961_v17  ;;  %v4694_v19 = vmul.f32 0.5, %v12923_v7 }
 0x87b   : > { %v9328_v43 = vpop.eup %9327  ;;  %v12969_v38 = vadd.f32 %v12646_v42, %v4647_v37  ;;  %v4859_v39 = vadd.f32 1.0, %v9326_v12  ;;  %9337 = vtanh.f32 %v4815_v28  ;;  %v4882_v15 = vmul.f32 %v4858_v60, %v4690_v14 }
 0x87c   : > { %v9330_v33 = vpop.eup %9329  ;;  %v12973_v0 = vadd.f32 %v12646_v42, %v4648_v16  ;;  %v4621_v58 = vmul.f32 %v9328_v43, %v4549_v44  ;;  %9339 = vtanh.f32 %v4817_v40  ;;  %v4746_v24 = vmul.f32 %v4722_v10, %v12961_v17 }
 0x87d   : > { %v9332_v25 = vpop.eup %9331  ;;  %v4883_v2 = vmul.f32 %v4859_v39, %v4691_v36  ;;  %v4860_v18 = vadd.f32 1.0, %v9330_v33  ;;  %v4723_v30 = vmul.f32 0.044715, %v12969_v38  ;;  %v4695_v14 = vmul.f32 0.5, %v12931_v21 }
 0x87e   : > { %v4649_v50 = vmul.f32 %v12641_v61, %v4621_v58  ;;  %v4861_v1 = vadd.f32 1.0, %v9332_v25  ;;  %v4724_v47 = vmul.f32 0.044715, %v12973_v0  ;;  %v4770_v35 = vmul.f32 %v4746_v24, %v12961_v17 }
 0x87f   : > { %v4900_v48 = vpack.c.bf16 %v4883_v2, %v4882_v15  ;;  %v4884_v6 = vmul.f32 %v4860_v18, %v4692_v20  ;;  %v4747_v3 = vmul.f32 %v4723_v30, %v12969_v38  ;;  %v4696_v53 = vmul.f32 0.5, %v12915_v46 }
 0x880   : > { %v4677_v5 = vadd.f32 %v12646_v42, %v4649_v50  ;;  %v4885_v23 = vmul.f32 %v4861_v1, %v4693_v29  ;;  %v4748_v61 = vmul.f32 %v4724_v47, %v12973_v0  ;;  %v4794_v54 = vadd.f32 %v4770_v35, %v12961_v17 }
 0x881   : > { %8573 = vmatprep.mubr.msk.bf16.mxu0 %vm582_vm1, %v4900_v48  ;;  %v4771_v31 = vmul.f32 %v4747_v3, %v12969_v38  ;;  %v4697_v56 = vmul.f32 0.5, %v12920_v63  ;;  %v4698_v46 = vmul.f32 0.5, %v12961_v17  ;;  %v4699_v63 = vmul.f32 0.5, %v12969_v38 }
 0x882   : > { %v4901_v22 = vpack.c.bf16 %v4885_v23, %v4884_v6  ;;  %v4725_v51 = vmul.f32 0.044715, %v4677_v5  ;;  %v4772_v26 = vmul.f32 %v4748_v61, %v12973_v0  ;;  %v4818_v62 = vmul.f32 0.7978846, %v4794_v54 }
 0x883   : > { %v4795_v42 = vadd.f32 %v4771_v31, %v12969_v38  ;;  %v4700_v10 = vmul.f32 0.5, %v12973_v0  ;;  %v4701_v25 = vmul.f32 0.5, %v4677_v5  ;;  %v13005_v38 = vld [vmem:[%s14860_s5 + $0xf] ss:$0 sm:$0xff] }
 0x884   : > { %8574 = vmatmul.mubr.msk.bf16.gmra.mxu0 %vm582_vm1, %v4901_v22  ;;  %v4749_v59 = vmul.f32 %v4725_v51, %v4677_v5  ;;  %v4796_v49 = vadd.f32 %v4772_v26, %v12973_v0  ;;  %9341 = vtanh.f32 %v4818_v62 }
 0x885   : > { %v9334_v32 = vpop.eup %9333  ;;  %v4819_v45 = vmul.f32 0.7978846, %v4795_v42 }
 0x886   : > { %v4773_v4 = vmul.f32 %v4749_v59, %v4677_v5  ;;  %v4820_v55 = vmul.f32 0.7978846, %v4796_v49  ;;  %v4862_v41 = vadd.f32 1.0, %v9334_v32 }
 0x887   : > { %v9336_v52 = vpop.eup %9335  ;;  %9343 = vtanh.f32 %v4819_v45 }
 0x888   : > { %v9338_v44 = vpop.eup %9337  ;;  %v4864_v20 = vadd.f32 1.0, %v9336_v52  ;;  %v4797_v27 = vadd.f32 %v4773_v4, %v4677_v5  ;;  %9345 = vtanh.f32 %v4820_v55  ;;  %v4886_v8 = vmul.f32 %v4862_v41, %v4694_v19 }
 0x889   : > { %v9340_v57 = vpop.eup %9339  ;;  %v4863_v13 = vadd.f32 1.0, %v9338_v44 }
 0x88a   : > { %v4865_v11 = vadd.f32 1.0, %v9340_v57  ;;  %v4821_v34 = vmul.f32 0.7978846, %v4797_v27  ;;  %v4888_v60 = vmul.f32 %v4864_v20, %v4696_v53  ;;  %v9624_v27 = vmov 0.0  }
 0x88b   : > { %v4887_v37 = vmul.f32 %v4863_v13, %v4695_v14  ;;  %8585 = vmatprep.subr.bf16.mxu1 %v9624_v27  ;;  %8603 = vmatprep.subr.bf16.mxu0 %v9624_v27 }
 0x88c   : > { %v4889_v9 = vmul.f32 %v4865_v11, %v4697_v56  ;;  %9347 = vtanh.f32 %v4821_v34  ;;  %8591 = vmatprep.mubr.msk.bf16.mxu1 %vm9625_vm2, %v9624_v27 }
 0x88d   : > { %v4902_v12 = vpack.c.bf16 %v4887_v37, %v4886_v8 }
 0x88e   : > { %v4903_v16 = vpack.c.bf16 %v4889_v9, %v4888_v60 }
 0x88f   : > { %8577 = vmatprep.mubr.msk.bf16.mxu0 %vm582_vm1, %v4902_v12 }
 0x890   : > { %8578 = vmatmul.mubr.msk.bf16.gmra.mxu0 %vm582_vm1, %v4903_v16 }
 0x891   : > { %v9342_v7 = vpop.eup %9341 }
 0x892   : > { %v4866_v21 = vadd.f32 1.0, %v9342_v7 }
 0x894   : > { %v9344_v29 = vpop.eup %9343  ;;  %v4890_v43 = vmul.f32 %v4866_v21, %v4698_v46 }
 0x895   : > { %v9346_v28 = vpop.eup %9345  ;;  %v4867_v40 = vadd.f32 1.0, %v9344_v29 }
 0x896   : > { %v4868_v39 = vadd.f32 1.0, %v9346_v28 }
 0x897   : > { %v4891_v36 = vmul.f32 %v4867_v40, %v4699_v63 }
 0x898   : > { %v4892_v2 = vmul.f32 %v4868_v39, %v4700_v10 }
 0x899   : > { %v9348_v33 = vpop.eup %9347  ;;  %v4904_v58 = vpack.c.bf16 %v4891_v36, %v4890_v43 }
 0x89a   : > { %v4869_v15 = vadd.f32 1.0, %v9348_v33 }
 0x89b   : > { %8581 = vmatprep.mubr.msk.bf16.mxu0 %vm582_vm1, %v4904_v58 }
 0x89c   : > { %v4893_v18 = vmul.f32 %v4869_v15, %v4701_v25 }
 0x89e   : > { %v4905_v50 = vpack.c.bf16 %v4893_v18, %v4892_v2 }
 0x8a0   : > { %8582 = vmatmul.mubr.msk.bf16.gmra.mxu0 %vm582_vm1, %v4905_v50 }
 0x8a1   : > { %8609 = vmatprep.mubr.msk.bf16.mxu0 %vm9625_vm2, %v9624_v27 }
 0x8ed   : > { %v8563_v17 = vpop.f32.mrf.mxu0 }
 0x8ee   : > { %v5002_v30 = vadd.f32 %v8563_v17, %v13005_v38 }
 0x8ef   : > { %v4993_v1 = vpop.f32.mrf.mxu0 }
 0x8f0   : > { %v4994_v0 = vadd.f32 %v13005_v38, %v4993_v1  ;;  %v13010_v47 = vmul.f32 0.17677669, %v5002_v30 }
 0x8f1   : > { %v8564_v24 = vpop.f32.mrf.mxu0 }
 0x8f2   : > { %v5005_v48 = vadd.f32 %v8564_v24, %v13005_v38  ;;  %v13017_v35 = vmul.f32 0.17677669, %v4994_v0 }
 0x8f3   : > { %v4996_v6 = vpop.f32.mrf.mxu0 }
 0x8f4   : > { %v13012_v5 = vmul.f32 0.17677669, %v5005_v48  ;;  %v13014_v23 = vpack.c.bf16 %v5005_v48, %v5002_v30  ;;  %v4997_v3 = vadd.f32 %v13005_v38, %v4996_v6 }
 0x8f6   : > { %v5113_v61 = vpack.c.bf16 %v13012_v5, %v13010_v47  ;;  %v13021_v22 = vmul.f32 0.17677669, %v4997_v3  ;;  %5141 = vrot.lane.b32.xlu1 %v13014_v23, %s9623_s27  ;;  %v13073_v21 = vpack.c.bf16 %v4997_v3, %v4994_v0 }
 0x8f8   : > { %v5112_v31 = vpack.c.bf16 %v13021_v22, %v13017_v35 }
 0x90a   : > { %v8567_v54 = vpop.f32.mrf.mxu0 }
 0x90b   : > { %v5018_v26 = vadd.f32 %v8567_v54, %v13005_v38 }
 0x90c   : > { %v5009_v51 = vpop.f32.mrf.mxu0 }
 0x90d   : > { %v5010_v62 = vadd.f32 %v13005_v38, %v5009_v51  ;;  %v13030_v32 = vmul.f32 0.17677669, %v5018_v26 }
 0x90e   : > { %v8568_v42 = vpop.f32.mrf.mxu0 }
 0x90f   : > { %v5021_v59 = vadd.f32 %v8568_v42, %v13005_v38  ;;  %v13035_v55 = vmul.f32 0.17677669, %v5010_v62 }
 0x910   : > { %v5012_v49 = vpop.f32.mrf.mxu0 }
 0x911   : > { %v13032_v45 = vmul.f32 0.17677669, %v5021_v59  ;;  %v5013_v4 = vadd.f32 %v13005_v38, %v5012_v49  ;;  %v13079_v28 = vpack.c.bf16 %v5021_v59, %v5018_v26 }
 0x913   : > { %v5115_v52 = vpack.c.bf16 %v13032_v45, %v13030_v32  ;;  %v13039_v41 = vmul.f32 0.17677669, %v5013_v4  ;;  %v13041_v44 = vpack.c.bf16 %v5013_v4, %v5010_v62 }
 0x915   : > { %v5114_v20 = vpack.c.bf16 %v13039_v41, %v13035_v55  ;;  %5143 = vrot.lane.b32.xlu0 %v13041_v44, %s9623_s27 }
 0x934   : > { %v8571_v57 = vpop.f32.mrf.mxu0 }
 0x935   : > { %v5034_v14 = vadd.f32 %v8571_v57, %v13005_v38 }
 0x936   : > { %v5025_v19 = vpop.f32.mrf.mxu0 }
 0x937   : > { %v5026_v53 = vadd.f32 %v13005_v38, %v5025_v19  ;;  %v13056_v34 = vmul.f32 0.17677669, %v5034_v14 }
 0x938   : > { %v8572_v13 = vpop.f32.mrf.mxu0 }
 0x939   : > { %v5037_v56 = vadd.f32 %v8572_v13, %v13005_v38  ;;  %v13063_v9 = vmul.f32 0.17677669, %v5026_v53 }
 0x93a   : > { %v5028_v11 = vpop.f32.mrf.mxu0 }
 0x93b   : > { %v13058_v8 = vmul.f32 0.17677669, %v5037_v56  ;;  %v13060_v37 = vpack.c.bf16 %v5037_v56, %v5034_v14  ;;  %v5029_v60 = vadd.f32 %v13005_v38, %v5028_v11 }
 0x93d   : > { %v5117_v12 = vpack.c.bf16 %v13058_v8, %v13056_v34  ;;  %v13067_v16 = vmul.f32 0.17677669, %v5029_v60  ;;  %v13069_v7 = vpack.c.bf16 %v5029_v60, %v5026_v53  ;;  %5227 = vrot.lane.b32.xlu1 %v13060_v37, %s9623_s27 }
 0x93f   : > { %v5116_v29 = vpack.c.bf16 %v13067_v16, %v13063_v9  ;;  %5225 = vrot.lane.b32.xlu0 %v13069_v7, %s9623_s27 }
 0x941   : > { %5139 = vrot.lane.b32.xlu1 %v13073_v21, %s9623_s27 }
 0x943   : > { %5223 = vrot.lane.b32.xlu0 %v13079_v28, %s9623_s27 }
 0x944   : > { %v8575_v46 = vpop.f32.mrf.mxu0 }
 0x945   : > { %v5050_v40 = vadd.f32 %v8575_v46, %v13005_v38 }
 0x946   : > { %v5041_v63 = vpop.f32.mrf.mxu0 }
 0x947   : > { %v5042_v36 = vadd.f32 %v13005_v38, %v5041_v63  ;;  %v13088_v58 = vmul.f32 0.17677669, %v5050_v40 }
 0x948   : > { %v8576_v43 = vpop.f32.mrf.mxu0 }
 0x949   : > { %v5053_v39 = vadd.f32 %v8576_v43, %v13005_v38  ;;  %v13093_v15 = vmul.f32 0.17677669, %v5042_v36 }
 0x94a   : > { %v5044_v33 = vpop.f32.mrf.mxu0 }
 0x94b   : > { %v13090_v10 = vmul.f32 0.17677669, %v5053_v39  ;;  %v5045_v25 = vadd.f32 %v13005_v38, %v5044_v33  ;;  %v13122_v4 = vpack.c.bf16 %v5053_v39, %v5050_v40  ;;  %v5473_v39 = vld [vmem:[%s13142_s9 + $0x8] sm:$0xff] }
 0x94d   : > { %v5119_v2 = vpack.c.bf16 %v13090_v10, %v13088_v58  ;;  %v13097_v18 = vmul.f32 0.17677669, %v5045_v25  ;;  %v13129_v19 = vpack.c.bf16 %v5045_v25, %v5042_v36 }
 0x94f   : > { %v5118_v50 = vpack.c.bf16 %v13097_v18, %v13093_v15 }
 0x950   : > { %v8579_v17 = vpop.f32.mrf.mxu0 }
 0x951   : > { %v5066_v30 = vadd.f32 %v8579_v17, %v13005_v38 }
 0x952   : > { %v5057_v1 = vpop.f32.mrf.mxu0 }
 0x953   : > { %v5058_v0 = vadd.f32 %v13005_v38, %v5057_v1  ;;  %v13104_v3 = vmul.f32 0.17677669, %v5066_v30 }
 0x954   : > { %v8580_v24 = vpop.f32.mrf.mxu0 }
 0x955   : > { %v5069_v48 = vadd.f32 %v8580_v24, %v13005_v38  ;;  %v13109_v26 = vmul.f32 0.17677669, %v5058_v0  ;;  %v5472_v24 = vld [vmem:[%s13142_s9] sm:$0xff] }
 0x956   : > { %v5060_v6 = vpop.f32.mrf.mxu0 }
 0x957   : > { %v13106_v54 = vmul.f32 0.17677669, %v5069_v48  ;;  %v5061_v51 = vadd.f32 %v13005_v38, %v5060_v6  ;;  %v13135_v56 = vpack.c.bf16 %v5069_v48, %v5066_v30  ;;  %v5474_v30 = vld [vmem:[%s13142_s9 + $0x10] sm:$0xff]  ;;  %v5475_v48 = vld [vmem:[%s13142_s9 + $0x18] sm:$0xff]  ;;  %v5476_v6 = vld [vmem:[%s13142_s9 + $0x20] sm:$0xff] }
 0x959   : > { %v5121_v42 = vpack.c.bf16 %v13106_v54, %v13104_v3  ;;  %v13113_v62 = vmul.f32 0.17677669, %v5061_v51  ;;  %v13115_v59 = vpack.c.bf16 %v5061_v51, %v5058_v0  ;;  %v5478_v0 = vld [vmem:[%s13142_s9 + $0x30] sm:$0xff]  ;;  %v5479_v51 = vld [vmem:[%s13142_s9 + $0x38] sm:$0xff] }
 0x95b   : > { %v5120_v49 = vpack.c.bf16 %v13113_v62, %v13109_v26  ;;  %5311 = vrot.lane.b32.xlu1 %v13115_v59, %s9623_s27 }
 0x95f   : > { %5309 = vrot.lane.b32.xlu1 %v13122_v4, %s9623_s27 }
 0x960   : > { %v8583_v57 = vpop.f32.mrf.mxu0 }
 0x961   : > { %v5082_v13 = vadd.f32 %v8583_v57, %v13005_v38  ;;  %v5480_v57 = vld [vmem:[%s13142_s9 + $0x40] sm:$0xff] }
 0x962   : > { %v5073_v14 = vpop.f32.mrf.mxu0 }
 0x963   : > { %5307 = vrot.lane.b32.xlu1 %v13129_v19, %s9623_s27  ;;  %v5074_v11 = vadd.f32 %v13005_v38, %v5073_v14  ;;  %v13144_v63 = vmul.f32 0.17677669, %v5082_v13  ;;  %v5477_v14 = vld [vmem:[%s13142_s9 + $0x28] sm:$0xff] }
 0x964   : > { %v8584_v53 = vpop.f32.mrf.mxu0 }
 0x965   : > { %v5085_v60 = vadd.f32 %v8584_v53, %v13005_v38  ;;  %v13154_v33 = vmul.f32 0.17677669, %v5074_v11  ;;  %v5481_v53 = vld [vmem:[%s13142_s9 + $0x48] sm:$0xff] }
 0x966   : > { %v5076_v46 = vpop.f32.mrf.mxu0 }
 0x967   : > { %v13146_v40 = vmul.f32 0.17677669, %v5085_v60  ;;  %v13148_v43 = vpack.c.bf16 %v5085_v60, %v5082_v13  ;;  %v5077_v36 = vadd.f32 %v13005_v38, %v5076_v46  ;;  %5391 = vrot.lane.b32.xlu1 %v13135_v56, %s9623_s27  ;;  %v5484_v13 = vld [vmem:[%s13142_s9 + $0x60] sm:$0xff]  ;;  %v5485_v60 = vld [vmem:[%s13142_s9 + $0x68] sm:$0xff]  ;;  %v5486_v46 = vld [vmem:[%s13142_s9 + $0x70] sm:$0xff] }
 0x969   : > { %v5123_v25 = vpack.c.bf16 %v13146_v40, %v13144_v63  ;;  %v13158_v17 = vmul.f32 0.17677669, %v5077_v36  ;;  %5395 = vrot.lane.b32.xlu0 %v13148_v43, %s9623_s27  ;;  %v13164_v1 = vpack.c.bf16 %v5077_v36, %v5074_v11  ;;  %v5482_v11 = vld [vmem:[%s13142_s9 + $0x50] sm:$0xff]  ;;  %v5483_v36 = vld [vmem:[%s13142_s9 + $0x58] sm:$0xff] }
 0x96b   : > { %v5122_v38 = vpack.c.bf16 %v13158_v17, %v13154_v33  ;;  %5504 = vperm.xlu1 %8836, %v5473_v39  }
 0x96d   : > { %5393 = vrot.lane.b32.xlu0 %v13164_v1, %s9623_s27  ;;  %s14655_s27 = scalar_lea.vmem %s14861_s6, %s8016_s8 }
 0x96f   : > { %5507 = vperm.xlu1 %8836, %v5474_v30   ;;  %v5490_v30 = vld [vmem:[%s13142_s9 + $0x90] sm:$0xff] }
 0x971   : > { %5501 = vperm.xlu0 %8835, %v5472_v24  }
 0x973   : > { %5519 = vperm.xlu1 %8836, %v5478_v0   ;;  %v5487_v0 = vld [vmem:[%s13142_s9 + $0x78] sm:$0xff] }
 0x975   : > { %5510 = vperm.xlu0 %8835, %v5475_v48   ;;  %v5488_v48 = vld [vmem:[%s13142_s9 + $0x80] sm:$0xff] }
 0x977   : > { %5513 = vperm.xlu1 %8836, %v5476_v6   ;;  %v5142_v6 = vpop.permute.xlu1 %5141 }
 0x979   : > { %5522 = vperm.xlu0 %8835, %v5479_v51   ;;  %v5491_v51 = vld [vmem:[%s13142_s9 + $0x98] sm:$0xff] }
 0x97b   : > { %5525 = vperm.xlu1 %8836, %v5480_v57   ;;  %v5158_v57 = vsel %vm582_vm1, %v5142_v6, 0  ;;  %v8154_v6 = vld [vmem:[%s13357_s15] ss:$0 sm:$0xff] }
 0x97d   : > { %5516 = vperm.xlu0 %8835, %v5477_v14   ;;  %v5492_v14 = vld [vmem:[%s13142_s9 + $0xa0] sm:$0xff] }
 0x97f   : > { %5537 = vperm.xlu1 %8836, %v5484_v13   ;;  %v5489_v13 = vld [vmem:[%s13142_s9 + $0x88] sm:$0xff] }
 0x981   : > { %5528 = vperm.xlu0 %8835, %v5481_v53   ;;  %v5494_v53 = vld [vmem:[%s13142_s9 + $0xb0] sm:$0xff] }
 0x983   : > { %5531 = vperm.xlu1 %8836, %v5482_v11   ;;  %v5493_v11 = vld [vmem:[%s13142_s9 + $0xa8] sm:$0xff] }
 0x985   : > { %5540 = vperm.xlu0 %8835, %v5485_v60   ;;  %v5495_v60 = vld [vmem:[%s13142_s9 + $0xb8] sm:$0xff] }
 0x987   : > { %5543 = vperm.xlu1 %8836, %v5486_v46   ;;  %v5144_v39 = vpop.permute.xlu0 %5143 }
 0x988   : > { %v5161_v24 = vsel %vm582_vm1, %v5144_v39, 0 }
 0x989   : > { %5534 = vperm.xlu0 %8835, %v5483_v36   ;;  %8586 = vmatpush3.bf16.xpose.msra.mxu1 %v5161_v24 }
 0x98a   : > { %8587 = vmatprep.subr.bf16.mxu1 %v9624_v27 }
 0x98b   : > { %5555 = vperm.xlu1 %8836, %v5490_v30  }
 0x98d   : > { %5546 = vperm.xlu0 %8835, %v5487_v0  }
 0x98f   : > { %5549 = vperm.xlu1 %8836, %v5488_v48  }
 0x991   : > { %5558 = vperm.xlu0 %8835, %v5491_v51   ;;  %8588 = vmatpush3.bf16.xpose.msra.mxu1 %v5158_v57 }
 0x992   : > { %8589 = vmatprep.subr.bf16.mxu1 %v9624_v27 }
 0x993   : > { %5561 = vperm.xlu1 %8836, %v5492_v14  }
 0x995   : > { %5552 = vperm.xlu0 %8835, %v5489_v13  }
 0x997   : > { %5567 = vperm.xlu1 %8836, %v5494_v53  }
 0x999   : > { %5564 = vperm.xlu0 %8835, %v5493_v11  }
 0x99b   : > { %5917 = vrot.lane.b32.xlu1 %v13041_v44, %s9622_s12 }
 0x99d   : > { %5570 = vperm.xlu0 %8835, %v5495_v60  }
 0x99f   : > { %5913 = vrot.lane.b32.xlu1 %v13073_v21, %s9622_s12 }
 0x9a1   : > { %5915 = vrot.lane.b32.xlu0 %v13014_v23, %s9622_s12 }
 0x9a3   : > { %5990 = vrot.lane.b32.xlu1 %v13069_v7, %s9622_s12 }
 0x9a5   : > { %5992 = vrot.lane.b32.xlu0 %v13060_v37, %s9622_s12 }
 0x9a7   : > { %6067 = vrot.lane.b32.xlu1 %v13115_v59, %s9622_s12 }
 0x9a9   : > { %5988 = vrot.lane.b32.xlu0 %v13079_v28, %s9622_s12 }
 0x9af   : > { %v5228_v44 = vpop.permute.xlu1 %5227 }
 0x9b0   : > { %v5245_v46 = vsel %vm582_vm1, %v5228_v44, 0 }
 0x9b1   : > { %8604 = vmatpush3.bf16.xpose.msra.mxu0 %v5245_v46  ;;  %v5226_v36 = vpop.permute.xlu0 %5225 }
 0x9b2   : > { %8605 = vmatprep.subr.bf16.mxu0 %v9624_v27  ;;  %v5242_v37 = vsel %vm582_vm1, %v5226_v36, 0 }
 0x9b3   : > { %v5140_v21 = vpop.permute.xlu1 %5139 }
 0x9b4   : > { %v5155_v23 = vsel %vm582_vm1, %v5140_v21, 0 }
 0x9b5   : > { %8590 = vmatpush3.bf16.xpose.msra.mxu1 %v5155_v23  ;;  %v5224_v7 = vpop.permute.xlu0 %5223  ;;  %v8155_v23 = vld [vmem:[%s13357_s15 + $0x1] ss:$0 sm:$0xff] }
 0x9b6   : > { %8621 = vmatprep.subr.bf16.mxu1 %v9624_v27  ;;  %v5239_v28 = vsel %vm582_vm1, %v5224_v7, 0 }
 0x9b9   : > { %8606 = vmatpush3.bf16.xpose.msra.mxu0 %v5242_v37 }
 0x9ba   : > { %8607 = vmatprep.subr.bf16.mxu0 %v9624_v27 }
 0x9bc   : > { %8592 = vmatmul.mubr.msk.bf16.vlgmr.msra.gmra.mxu1 %vm582_vm1, %v5112_v31 }
 0x9bd   : > { %8595 = vmatprep.mubr.msk.bf16.mxu1 %vm9625_vm2, %v9624_v27 }
 0x9c1   : > { %8608 = vmatpush3.bf16.xpose.msra.mxu0 %v5239_v28 }
 0x9c2   : > { %8639 = vmatprep.subr.bf16.mxu0 %v9624_v27 }
 0x9c4   : > { %8596 = vmatmul.mubr.msk.bf16.gmra.mxu1 %vm582_vm1, %v5113_v61 }
 0x9c5   : > { %8599 = vmatprep.mubr.msk.bf16.mxu1 %vm9625_vm2, %v9624_v27 }
 0x9c8   : > { %8610 = vmatmul.mubr.msk.bf16.vlgmr.msra.gmra.mxu0 %vm582_vm1, %v5115_v52 }
 0x9c9   : > { %8613 = vmatprep.mubr.msk.bf16.mxu0 %vm9625_vm2, %v9624_v27 }
 0x9cc   : > { %8600 = vmatmul.mubr.msk.bf16.gmra.mxu1 %vm582_vm1, %v5114_v20 }
 0x9cd   : > { %8627 = vmatprep.mubr.msk.bf16.mxu1 %vm9625_vm2, %v9624_v27  ;;  %v5312_v47 = vpop.permute.xlu1 %5311 }
 0x9ce   : > { %v5329_v5 = vsel %vm582_vm1, %v5312_v47, 0 }
 0x9cf   : > { %8622 = vmatpush3.bf16.xpose.msra.mxu1 %v5329_v5 }
 0x9d0   : > { %8614 = vmatmul.mubr.msk.bf16.gmra.mxu0 %vm582_vm1, %v5116_v29  ;;  %8623 = vmatprep.subr.bf16.mxu1 %v9624_v27 }
 0x9d1   : > { %8617 = vmatprep.mubr.msk.bf16.mxu0 %vm9625_vm2, %v9624_v27  ;;  %v5310_v35 = vpop.permute.xlu1 %5309 }
 0x9d2   : > { %v5326_v61 = vsel %vm582_vm1, %v5310_v35, 0 }
 0x9d5   : > { %v5308_v22 = vpop.permute.xlu1 %5307 }
 0x9d6   : > { %v5323_v45 = vsel %vm582_vm1, %v5308_v22, 0 }
 0x9d7   : > { %8624 = vmatpush3.bf16.xpose.msra.mxu1 %v5326_v61 }
 0x9d8   : > { %8618 = vmatmul.mubr.msk.bf16.gmra.mxu0 %vm582_vm1, %v5117_v12  ;;  %8625 = vmatprep.subr.bf16.mxu1 %v9624_v27 }
 0x9d9   : > { %8645 = vmatprep.mubr.msk.bf16.mxu0 %vm9625_vm2, %v9624_v27  ;;  %v5392_v52 = vpop.permute.xlu1 %5391 }
 0x9da   : > { %v5407_v8 = vsel %vm582_vm1, %v5392_v52, 0 }
 0x9db   : > { %v5396_v31 = vpop.permute.xlu0 %5395 }
 0x9dc   : > { %v5413_v32 = vsel %vm582_vm1, %v5396_v31, 0 }
 0x9dd   : > { %8640 = vmatpush3.bf16.xpose.msra.mxu0 %v5413_v32 }
 0x9de   : > { %8641 = vmatprep.subr.bf16.mxu0 %v9624_v27 }
 0x9df   : > { %8626 = vmatpush3.bf16.xpose.msra.mxu1 %v5323_v45  ;;  %v5394_v55 = vpop.permute.xlu0 %5393 }
 0x9e0   : > { %8657 = vmatprep.subr.bf16.mxu1 %v9624_v27  ;;  %v5410_v41 = vsel %vm582_vm1, %v5394_v55, 0 }
 0x9e5   : > { %8642 = vmatpush3.bf16.xpose.msra.mxu0 %v5410_v41 }
 0x9e6   : > { %v13262_v20 = vpop.permute.xlu1 %5504  ;;  %8628 = vmatmul.mubr.msk.bf16.vlgmr.msra.gmra.mxu1 %vm582_vm1, %v5118_v50  ;;  %8643 = vmatprep.subr.bf16.mxu0 %v9624_v27 }
 0x9e7   : > { %8631 = vmatprep.mubr.msk.bf16.mxu1 %vm9625_vm2, %v9624_v27  ;;  %vm5589_vm5 = vcmp.eq.s32.totalorder %v13262_v20, %v8154_v6 }
 0x9ea   : > { %v13271_v34 = vpop.permute.xlu1 %5507 }
 0x9eb   : > { %vm5590_vm6 = vcmp.eq.s32.totalorder %v13271_v34, %v8154_v6 }
 0x9ec   : > { %v5502_v9 = vpop.permute.xlu0 %5501 }
 0x9ed   : > { %8644 = vmatpush3.bf16.xpose.msra.mxu0 %v5407_v8  ;;  %vm5588_vm3 = vcmp.eq.s32.totalorder %v5502_v9, %v8154_v6 }
 0x9ee   : > { %v13274_v12 = vpop.permute.xlu1 %5519  ;;  %8632 = vmatmul.mubr.msk.bf16.gmra.mxu1 %vm582_vm1, %v5119_v2  ;;  %8675 = vmatprep.subr.bf16.mxu0 %v9624_v27 }
 0x9ef   : > { %8635 = vmatprep.mubr.msk.bf16.mxu1 %vm9625_vm2, %v9624_v27  ;;  %vm5594_vm7 = vcmp.eq.s32.totalorder %v13274_v12, %v8155_v23 }
 0x9f0   : > { %v13283_v16 = vpop.permute.xlu0 %5510 }
 0x9f1   : > { %vm5591_vm9 = vcmp.eq.s32.totalorder %v13283_v16, %v8154_v6 }
 0x9f2   : > { %v13285_v29 = vpop.permute.xlu1 %5513 }
 0x9f3   : > { %vm5592_vm11 = vcmp.eq.s32.totalorder %v13285_v29, %v8154_v6 }
 0x9f4   : > { %8646 = vmatmul.mubr.msk.bf16.vlgmr.msra.gmra.mxu0 %vm582_vm1, %v5121_v42  ;;  %v13291_v15 = vpop.permute.xlu0 %5522 }
 0x9f5   : > { %8649 = vmatprep.mubr.msk.bf16.mxu0 %vm9625_vm2, %v9624_v27  ;;  %vm5595_vm8 = vcmp.eq.s32.totalorder %v13291_v15, %v8155_v23 }
 0x9f6   : > { %v13295_v58 = vpop.permute.xlu1 %5525  ;;  %8636 = vmatmul.mubr.msk.bf16.gmra.mxu1 %vm582_vm1, %v5120_v49 }
 0x9f7   : > { %8663 = vmatprep.mubr.msk.bf16.mxu1 %vm9625_vm2, %v9624_v27  ;;  %vm5596_vm10 = vcmp.eq.s32.totalorder %v13295_v58, %v8155_v23 }
 0x9f8   : > { %v13303_v10 = vpop.permute.xlu0 %5516 }
 0x9f9   : > { %vm5593_vm13 = vcmp.eq.s32.totalorder %v13303_v10, %v8154_v6 }
 0x9fa   : > { %v13305_v2 = vpop.permute.xlu1 %5537 }
 0x9fc   : > { %8650 = vmatmul.mubr.msk.bf16.gmra.mxu0 %vm582_vm1, %v5122_v38  ;;  %v13311_v18 = vpop.permute.xlu0 %5528 }
 0x9fd   : > { %8653 = vmatprep.mubr.msk.bf16.mxu0 %vm9625_vm2, %v9624_v27  ;;  %vm5597_vm12 = vcmp.eq.s32.totalorder %v13311_v18, %v8155_v23 }
 0x9fe   : > { %v13315_v50 = vpop.permute.xlu1 %5531 }
 0x9ff   : > { %vm5598_vm14 = vcmp.eq.s32.totalorder %v13315_v50, %v8155_v23 }
 0xa00   : > { %v13317_v3 = vpop.permute.xlu0 %5540 }
 0xa02   : > { %v13319_v54 = vpop.permute.xlu1 %5543 }
 0xa04   : > { %8654 = vmatmul.mubr.msk.bf16.gmra.mxu0 %vm582_vm1, %v5123_v25  ;;  %v13325_v26 = vpop.permute.xlu0 %5534 }
 0xa05   : > { %8681 = vmatprep.mubr.msk.bf16.mxu0 %vm9625_vm2, %v9624_v27  ;;  %vm5599_vm15 = vcmp.eq.s32.totalorder %v13325_v26, %v8155_v23 }
 0xa06   : > { %v13329_v42 = vpop.permute.xlu1 %5555 }
 0xa08   : > { %v13331_v62 = vpop.permute.xlu0 %5546 }
 0xa0a   : > { %v13333_v59 = vpop.permute.xlu1 %5549 }
 0xa0c   : > { %v13335_v49 = vpop.permute.xlu0 %5558 }
 0xa0e   : > { %v13337_v33 = vpop.permute.xlu1 %5561 }
 0xa10   : > { %v13339_v17 = vpop.permute.xlu0 %5552 }
 0xa12   : > { %v13341_v63 = vpop.permute.xlu1 %5567 }
 0xa14   : > { %v13343_v40 = vpop.permute.xlu0 %5564 }
 0xa16   : > { %v5918_v25 = vpop.permute.xlu1 %5917 }
 0xa17   : > { %8658 = vmatpush3.bf16.msra.mxu1 %v5918_v25 }
 0xa18   : > { %v13345_v38 = vpop.permute.xlu0 %5570  ;;  %8659 = vmatprep.subr.bf16.mxu1 %v9624_v27 }
 0xa1a   : > { %v5914_v30 = vpop.permute.xlu1 %5913 }
 0xa1c   : > { %v5916_v39 = vpop.permute.xlu0 %5915 }
 0xa1d   : > { %8660 = vmatpush3.bf16.msra.mxu1 %v5916_v39 }
 0xa1e   : > { %8661 = vmatprep.subr.bf16.mxu1 %v9624_v27  ;;  %v5991_v0 = vpop.permute.xlu1 %5990 }
 0xa20   : > { %v5993_v24 = vpop.permute.xlu0 %5992 }
 0xa21   : > { %8662 = vmatpush3.bf16.msra.mxu1 %v5914_v30  ;;  %8676 = vmatpush3.bf16.msra.mxu0 %v5993_v24 }
 0xa22   : > { %8677 = vmatprep.subr.bf16.mxu0 %v9624_v27  ;;  %8693 = vmatprep.subr.bf16.mxu1 %v9624_v27 }
 0xa24   : > { %v5989_v48 = vpop.permute.xlu0 %5988 }
 0xa25   : > { %8678 = vmatpush3.bf16.msra.mxu0 %v5991_v0 }
 0xa26   : > { %8679 = vmatprep.subr.bf16.mxu0 %v9624_v27 }
 0xa29   : > { %8680 = vmatpush3.bf16.msra.mxu0 %v5989_v48 }
 0xa2a   : > { %8711 = vmatprep.subr.bf16.mxu0 %v9624_v27 }
 0xa7c   : > { %v5197_v51 = vpop.f32.mrf.mxu1 }
 0xa7d   : > { %v13360_v57 = vsel %vm5588_vm3, %v5197_v51, -1e+30 }
 0xa7e   : > { %v5637_v14 = vsel %vm5636_vm4, %v13360_v57, -inf  ;;  %v8593_v13 = vpop.f32.mrf.mxu1 }
 0xa7f   : > { %5638 = vmax.xlane.f32.xlu1 %v5637_v14 }
 0xa80   : > { %v5200_v53 = vpop.f32.mrf.mxu1 }
 0xa81   : > { %v13365_v11 = vsel %vm5589_vm5, %v5200_v53, -1e+30 }
 0xa82   : > { %v5640_v60 = vsel %vm5636_vm4, %v13365_v11, -inf  ;;  %v8594_v44 = vpop.f32.mrf.mxu1 }
 0xa83   : > { %5641 = vmax.xlane.f32.xlu0 %v5640_v60  ;;  %v8156_v60 = vld [vmem:[%s13357_s15 + $0x2] ss:$0 sm:$0xff] }
 0xa84   : > { %v5205_v46 = vpop.f32.mrf.mxu1  ;;  %vm5600_vm3 = vcmp.eq.s32.totalorder %v13305_v2, %v8156_v60  ;;  %vm5601_vm5 = vcmp.eq.s32.totalorder %v13317_v3, %v8156_v60  ;;  %v8157_v2 = vld [vmem:[%s13357_s15 + $0x3] ss:$0 sm:$0xff] }
 0xa85   : > { %v13370_v21 = vsel %vm5590_vm6, %v5205_v46, -1e+30  ;;  %vm5606_vm6 = vcmp.eq.s32.totalorder %v13329_v42, %v8157_v2 }
 0xa86   : > { %v5643_v36 = vsel %vm5636_vm4, %v13370_v21, -inf  ;;  %v8597_v37 = vpop.f32.mrf.mxu1 }
 0xa87   : > { %5644 = vmax.xlane.f32.xlu0 %v5643_v36 }
 0xa88   : > { %v5208_v7 = vpop.f32.mrf.mxu1  ;;  %v5281_v28 = vpop.f32.mrf.mxu0 }
 0xa89   : > { %v13376_v47 = vsel %vm5594_vm7, %v5281_v28, -1e+30  ;;  %v13386_v41 = vsel %vm5591_vm9, %v5208_v7, -1e+30  ;;  %vm5602_vm7 = vcmp.eq.s32.totalorder %v13319_v54, %v8156_v60  ;;  %vm5603_vm9 = vcmp.eq.s32.totalorder %v13331_v62, %v8156_v60 }
 0xa8a   : > { %v5655_v5 = vsel %vm5636_vm4, %v13376_v47, -inf  ;;  %v8598_v35 = vpop.f32.mrf.mxu1  ;;  %v8611_v61 = vpop.f32.mrf.mxu0  ;;  %v5646_v9 = vsel %vm5636_vm4, %v13386_v41, -inf }
 0xa8b   : > { %5656 = vmax.xlane.f32.xlu1 %v5655_v5 }
 0xa8c   : > { %v5213_v22 = vpop.f32.mrf.mxu1  ;;  %v5284_v31 = vpop.f32.mrf.mxu0 }
 0xa8d   : > { %v13381_v32 = vsel %vm5595_vm8, %v5284_v31, -1e+30  ;;  %v13396_v25 = vsel %vm5592_vm11, %v5213_v22, -1e+30  ;;  %vm5607_vm8 = vcmp.eq.s32.totalorder %v13335_v49, %v8157_v2  ;;  %vm5604_vm11 = vcmp.eq.s32.totalorder %v13333_v59, %v8156_v60 }
 0xa8e   : > { %v5658_v45 = vsel %vm5636_vm4, %v13381_v32, -inf  ;;  %v8601_v55 = vpop.f32.mrf.mxu1  ;;  %v8612_v52 = vpop.f32.mrf.mxu0  ;;  %v5649_v30 = vsel %vm5636_vm4, %v13396_v25, -inf }
 0xa8f   : > { %5659 = vmax.xlane.f32.xlu0 %v5658_v45 }
 0xa90   : > { %v5216_v20 = vpop.f32.mrf.mxu1  ;;  %v5289_v34 = vpop.f32.mrf.mxu0 }
 0xa91   : > { %v13389_v8 = vsel %vm5596_vm10, %v5289_v34, -1e+30  ;;  %v13406_v0 = vsel %vm5593_vm13, %v5216_v20, -1e+30  ;;  %vm5608_vm10 = vcmp.eq.s32.totalorder %v13337_v33, %v8157_v2  ;;  %vm5605_vm13 = vcmp.eq.s32.totalorder %v13339_v17, %v8156_v60 }
 0xa92   : > { %v5661_v12 = vsel %vm5636_vm4, %v13389_v8, -inf  ;;  %v8602_v16 = vpop.f32.mrf.mxu1  ;;  %v8615_v15 = vpop.f32.mrf.mxu0  ;;  %v5652_v51 = vsel %vm5636_vm4, %v13406_v0, -inf }
 0xa93   : > { %5662 = vmax.xlane.f32.xlu1 %v5661_v12  ;;  %5647 = vmax.xlane.f32.xlu0 %v5646_v9 }
 0xa94   : > { %v5292_v39 = vpop.f32.mrf.mxu0 }
 0xa95   : > { %v13399_v58 = vsel %vm5597_vm12, %v5292_v39, -1e+30  ;;  %vm5609_vm12 = vcmp.eq.s32.totalorder %v13343_v40, %v8157_v2 }
 0xa96   : > { %v5664_v29 = vsel %vm5636_vm4, %v13399_v58, -inf  ;;  %v8616_v24 = vpop.f32.mrf.mxu0 }
 0xa97   : > { %5650 = vmax.xlane.f32.xlu1 %v5649_v30  ;;  %5665 = vmax.xlane.f32.xlu0 %v5664_v29 }
 0xa98   : > { %v5297_v48 = vpop.f32.mrf.mxu0 }
 0xa99   : > { %v13409_v18 = vsel %vm5598_vm14, %v5297_v48, -1e+30  ;;  %vm5610_vm14 = vcmp.eq.s32.totalorder %v13341_v63, %v8157_v2 }
 0xa9a   : > { %v5667_v10 = vsel %vm5636_vm4, %v13409_v18, -inf  ;;  %v8619_v6 = vpop.f32.mrf.mxu0 }
 0xa9b   : > { %5668 = vmax.xlane.f32.xlu1 %v5667_v10  ;;  %5653 = vmax.xlane.f32.xlu0 %v5652_v51 }
 0xa9c   : > { %v5300_v14 = vpop.f32.mrf.mxu0 }
 0xa9d   : > { %v13416_v13 = vsel %vm5599_vm15, %v5300_v14, -1e+30  ;;  %vm5611_vm15 = vcmp.eq.s32.totalorder %v13345_v38, %v8157_v2 }
 0xa9e   : > { %v5670_v53 = vsel %vm5636_vm4, %v13416_v13, -inf  ;;  %v8620_v50 = vpop.f32.mrf.mxu0 }
 0xa9f   : > { %5671 = vmax.xlane.f32.xlu0 %v5670_v53 }
 0xaa6   : > { %v5365_v44 = vpop.f32.mrf.mxu1 }
 0xaa7   : > { %v13422_v46 = vsel %vm5600_vm3, %v5365_v44, -1e+30 }
 0xaa8   : > { %v5673_v36 = vsel %vm5636_vm4, %v13422_v46, -inf  ;;  %v8629_v37 = vpop.f32.mrf.mxu1 }
 0xaa9   : > { %5674 = vmax.xlane.f32.xlu1 %v5673_v36 }
 0xaaa   : > { %v5368_v26 = vpop.f32.mrf.mxu1 }
 0xaab   : > { %v13427_v23 = vsel %vm5601_vm5, %v5368_v26, -1e+30 }
 0xaac   : > { %v5676_v7 = vsel %vm5636_vm4, %v13427_v23, -inf  ;;  %v8630_v28 = vpop.f32.mrf.mxu1 }
 0xaad   : > { %5677 = vmax.xlane.f32.xlu0 %v5676_v7  ;;  %v13486_v7 = vpop.permute.xlu1 %6067 }
 0xaae   : > { %v5373_v5 = vpop.f32.mrf.mxu1 }
 0xaaf   : > { %v13438_v20 = vsel %vm5602_vm7, %v5373_v5, -1e+30 }
 0xab0   : > { %v8633_v35 = vpop.f32.mrf.mxu1  ;;  %v5679_v42 = vsel %vm5636_vm4, %v13438_v20, -inf }
 0xab2   : > { %v5376_v61 = vpop.f32.mrf.mxu1 }
 0xab3   : > { %v13448_v39 = vsel %vm5603_vm9, %v5376_v61, -1e+30 }
 0xab4   : > { %v5449_v22 = vpop.f32.mrf.mxu0  ;;  %v8634_v31 = vpop.f32.mrf.mxu1  ;;  %v5682_v24 = vsel %vm5636_vm4, %v13448_v39, -inf }
 0xab5   : > { %v13433_v45 = vsel %vm5606_vm6, %v5449_v22, -1e+30 }
 0xab6   : > { %v5691_v3 = vsel %vm5636_vm4, %v13433_v45, -inf  ;;  %v8647_v55 = vpop.f32.mrf.mxu0  ;;  %v5381_v52 = vpop.f32.mrf.mxu1 }
 0xab7   : > { %5692 = vmax.xlane.f32.xlu1 %v5691_v3  ;;  %v13458_v51 = vsel %vm5604_vm11, %v5381_v52, -1e+30 }
 0xab8   : > { %v5452_v34 = vpop.f32.mrf.mxu0  ;;  %v8637_v9 = vpop.f32.mrf.mxu1  ;;  %v5685_v6 = vsel %vm5636_vm4, %v13458_v51, -inf }
 0xab9   : > { %v13441_v12 = vsel %vm5607_vm8, %v5452_v34, -1e+30 }
 0xaba   : > { %v5694_v54 = vsel %vm5636_vm4, %v13441_v12, -inf  ;;  %v8648_v16 = vpop.f32.mrf.mxu0  ;;  %v5384_v15 = vpop.f32.mrf.mxu1 }
 0xabb   : > { %5680 = vmax.xlane.f32.xlu1 %v5679_v42  ;;  %5695 = vmax.xlane.f32.xlu0 %v5694_v54  ;;  %v13468_v53 = vsel %vm5605_vm13, %v5384_v15, -1e+30 }
 0xabc   : > { %v5457_v30 = vpop.f32.mrf.mxu0  ;;  %v8638_v49 = vpop.f32.mrf.mxu1  ;;  %v5688_v40 = vsel %vm5636_vm4, %v13468_v53, -inf }
 0xabd   : > { %v13451_v29 = vsel %vm5608_vm10, %v5457_v30, -1e+30 }
 0xabe   : > { %v5697_v62 = vsel %vm5636_vm4, %v13451_v29, -inf  ;;  %v8651_v48 = vpop.f32.mrf.mxu0 }
 0xabf   : > { %5698 = vmax.xlane.f32.xlu1 %v5697_v62  ;;  %5683 = vmax.xlane.f32.xlu0 %v5682_v24 }
 0xac0   : > { %v5460_v10 = vpop.f32.mrf.mxu0 }
 0xac1   : > { %v13461_v33 = vsel %vm5609_vm12, %v5460_v10, -1e+30 }
 0xac2   : > { %v5700_v59 = vsel %vm5636_vm4, %v13461_v33, -inf  ;;  %v8652_v14 = vpop.f32.mrf.mxu0 }
 0xac3   : > { %5686 = vmax.xlane.f32.xlu1 %v5685_v6  ;;  %5701 = vmax.xlane.f32.xlu0 %v5700_v59 }
 0xac4   : > { %v5465_v50 = vpop.f32.mrf.mxu0 }
 0xac5   : > { %v13471_v44 = vsel %vm5610_vm14, %v5465_v50, -1e+30 }
 0xac6   : > { %v5703_v36 = vsel %vm5636_vm4, %v13471_v44, -inf  ;;  %v8655_v17 = vpop.f32.mrf.mxu0 }
 0xac7   : > { %5704 = vmax.xlane.f32.xlu1 %v5703_v36  ;;  %5689 = vmax.xlane.f32.xlu0 %v5688_v40 }
 0xac8   : > { %v5468_v60 = vpop.f32.mrf.mxu0 }
 0xac9   : > { %v13478_v37 = vsel %vm5611_vm15, %v5468_v60, -1e+30 }
 0xaca   : > { %v5706_v26 = vsel %vm5636_vm4, %v13478_v37, -inf  ;;  %v8656_v63 = vpop.f32.mrf.mxu0 }
 0xacb   : > { %5707 = vmax.xlane.f32.xlu0 %v5706_v26 }
 0xad8   : > { %6063 = vrot.lane.b32.xlu1 %v13129_v19, %s9622_s12 }
 0xae1   : > { %6065 = vrot.lane.b32.xlu0 %v13122_v4, %s9622_s12 }
 0xb08   : > { %v5639_v28 = vpop.xlane.xlu1 %5638 }
 0xb09   : > { %v5709_v5 = vsub.f32 %v13360_v57, %v5639_v28 }
 0xb0b   : > { %v5733_v35 = vmul.f32 1.442695, %v5709_v5 }
 0xb0c   : > { %v5642_v38 = vpop.xlane.xlu0 %5641 }
 0xb0d   : > { %9349 = vpow2.f32 %v5733_v35  ;;  %v5710_v2 = vsub.f32 %v13365_v11, %v5642_v38 }
 0xb0f   : > { %v5735_v61 = vmul.f32 1.442695, %v5710_v2 }
 0xb10   : > { %v5645_v22 = vpop.xlane.xlu0 %5644 }
 0xb11   : > { %9351 = vpow2.f32 %v5735_v61  ;;  %v5711_v31 = vsub.f32 %v13370_v21, %v5645_v22 }
 0xb13   : > { %v5737_v55 = vmul.f32 1.442695, %v5711_v31 }
 0xb14   : > { %v5657_v3 = vpop.xlane.xlu1 %5656 }
 0xb15   : > { %v5715_v19 = vsub.f32 %v13376_v47, %v5657_v3 }
 0xb17   : > { %v5745_v4 = vmul.f32 1.442695, %v5715_v19 }
 0xb18   : > { %v5660_v52 = vpop.xlane.xlu0 %5659 }
 0xb19   : > { %9353 = vpow2.f32 %v5745_v4  ;;  %v5716_v34 = vsub.f32 %v13381_v32, %v5660_v52 }
 0xb1a   : > { %v13493_v57 = vpop.eup %9349  ;;  %9355 = vpow2.f32 %v5737_v55 }
 0xb1b   : > { %v5747_v9 = vmul.f32 1.442695, %v5716_v34  ;;  %v5781_v11 = vsel %vm5636_vm4, %v13493_v57, 0.0 }
 0xb1c   : > { %5782 = vadd.xlane.f32.xlu1 %v5781_v11  ;;  %v5663_v42 = vpop.xlane.xlu1 %5662  ;;  %v5648_v54 = vpop.xlane.xlu0 %5647 }
 0xb1d   : > { %9357 = vpow2.f32 %v5747_v9  ;;  %v5717_v21 = vsub.f32 %v13389_v8, %v5663_v42  ;;  %v5712_v47 = vsub.f32 %v13386_v41, %v5648_v54 }
 0xb1e   : > { %v13499_v16 = vpop.eup %9351 }
 0xb1f   : > { %v5749_v15 = vmul.f32 1.442695, %v5717_v21  ;;  %v5739_v30 = vmul.f32 1.442695, %v5712_v47  ;;  %v5784_v32 = vsel %vm5636_vm4, %v13499_v16, 0.0 }
 0xb20   : > { %v5651_v49 = vpop.xlane.xlu1 %5650  ;;  %5785 = vadd.xlane.f32.xlu0 %v5784_v32  ;;  %v5666_v24 = vpop.xlane.xlu0 %5665 }
 0xb21   : > { %9359 = vpow2.f32 %v5749_v15  ;;  %v5713_v62 = vsub.f32 %v13396_v25, %v5651_v49  ;;  %v5718_v48 = vsub.f32 %v13399_v58, %v5666_v24 }
 0xb22   : > { %9361 = vpow2.f32 %v5739_v30 }
 0xb23   : > { %v5741_v10 = vmul.f32 1.442695, %v5713_v62  ;;  %v5751_v8 = vmul.f32 1.442695, %v5718_v48 }
 0xb24   : > { %v5669_v6 = vpop.xlane.xlu1 %5668  ;;  %v5654_v41 = vpop.xlane.xlu0 %5653 }
 0xb25   : > { %9363 = vpow2.f32 %v5741_v10  ;;  %v5719_v59 = vsub.f32 %v13409_v18, %v5669_v6  ;;  %v5714_v14 = vsub.f32 %v13406_v0, %v5654_v41 }
 0xb26   : > { %v13507_v50 = vpop.eup %9353  ;;  %9365 = vpow2.f32 %v5751_v8 }
 0xb27   : > { %v5753_v40 = vmul.f32 1.442695, %v5719_v59  ;;  %v5743_v36 = vmul.f32 1.442695, %v5714_v14  ;;  %v5799_v25 = vsel %vm5636_vm4, %v13507_v50, 0.0  ;;  %v13511_v17 = vpop.eup %9355 }
 0xb28   : > { %5800 = vadd.xlane.f32.xlu1 %v5799_v25  ;;  %v5672_v58 = vpop.xlane.xlu0 %5671  ;;  %v5787_v0 = vsel %vm5636_vm4, %v13511_v17, 0.0 }
 0xb29   : > { %9367 = vpow2.f32 %v5753_v40  ;;  %v5720_v60 = vsub.f32 %v13416_v13, %v5672_v58 }
 0xb2a   : > { %v13514_v26 = vpop.eup %9357  ;;  %9369 = vpow2.f32 %v5743_v36 }
 0xb2b   : > { %v5755_v18 = vmul.f32 1.442695, %v5720_v60  ;;  %v5802_v63 = vsel %vm5636_vm4, %v13514_v26, 0.0 }
 0xb2c   : > { %5788 = vadd.xlane.f32.xlu1 %v5787_v0  ;;  %5803 = vadd.xlane.f32.xlu0 %v5802_v63 }
 0xb2d   : > { %9371 = vpow2.f32 %v5755_v18 }
 0xb2e   : > { %v13520_v28 = vpop.eup %9359 }
 0xb2f   : > { %v13522_v5 = vpop.eup %9361  ;;  %v5805_v13 = vsel %vm5636_vm4, %v13520_v28, 0.0 }
 0xb30   : > { %5806 = vadd.xlane.f32.xlu1 %v5805_v13  ;;  %v5790_v35 = vsel %vm5636_vm4, %v13522_v5, 0.0 }
 0xb31   : > { %5791 = vadd.xlane.f32.xlu0 %v5790_v35 }
 0xb32   : > { %v13528_v38 = vpop.eup %9363  ;;  %v5675_v22 = vpop.xlane.xlu1 %5674 }
 0xb33   : > { %v13530_v2 = vpop.eup %9365  ;;  %v5793_v61 = vsel %vm5636_vm4, %v13528_v38, 0.0  ;;  %v5721_v3 = vsub.f32 %v13422_v46, %v5675_v22 }
 0xb34   : > { %5794 = vadd.xlane.f32.xlu1 %v5793_v61  ;;  %v5808_v31 = vsel %vm5636_vm4, %v13530_v2, 0.0 }
 0xb35   : > { %5809 = vadd.xlane.f32.xlu0 %v5808_v31  ;;  %v5757_v55 = vmul.f32 1.442695, %v5721_v3 }
 0xb36   : > { %v13537_v19 = vpop.eup %9367  ;;  %v5678_v34 = vpop.xlane.xlu0 %5677 }
 0xb37   : > { %v13539_v4 = vpop.eup %9369  ;;  %v5811_v52 = vsel %vm5636_vm4, %v13537_v19, 0.0  ;;  %9373 = vpow2.f32 %v5757_v55  ;;  %v5722_v11 = vsub.f32 %v13427_v23, %v5678_v34 }
 0xb38   : > { %5812 = vadd.xlane.f32.xlu1 %v5811_v52  ;;  %v5796_v9 = vsel %vm5636_vm4, %v13539_v4, 0.0 }
 0xb39   : > { %5797 = vadd.xlane.f32.xlu0 %v5796_v9  ;;  %v5759_v46 = vmul.f32 1.442695, %v5722_v11 }
 0xb3a   : > { %v13546_v42 = vpop.eup %9371 }
 0xb3b   : > { %v5814_v54 = vsel %vm5636_vm4, %v13546_v42, 0.0  ;;  %9375 = vpow2.f32 %v5759_v46 }
 0xb3d   : > { %5815 = vadd.xlane.f32.xlu0 %v5814_v54 }
 0xb40   : > { %v5693_v21 = vpop.xlane.xlu1 %5692 }
 0xb41   : > { %v5727_v47 = vsub.f32 %v13433_v45, %v5693_v21 }
 0xb43   : > { %v5769_v15 = vmul.f32 1.442695, %v5727_v47 }
 0xb44   : > { %v13551_v30 = vpop.eup %9373  ;;  %v5681_v32 = vpop.xlane.xlu1 %5680 }
 0xb45   : > { %v5696_v49 = vpop.xlane.xlu0 %5695  ;;  %9377 = vpow2.f32 %v5769_v15  ;;  %v5723_v23 = vsub.f32 %v13438_v20, %v5681_v32  ;;  %v5817_v62 = vsel %vm5636_vm4, %v13551_v30, 0.0 }
 0xb46   : > { %v5728_v24 = vsub.f32 %v13441_v12, %v5696_v49  ;;  %5818 = vadd.xlane.f32.xlu1 %v5817_v62 }
 0xb47   : > { %v5761_v48 = vmul.f32 1.442695, %v5723_v23 }
 0xb48   : > { %v5771_v10 = vmul.f32 1.442695, %v5728_v24  ;;  %v13557_v8 = vpop.eup %9375  ;;  %v5699_v6 = vpop.xlane.xlu1 %5698 }
 0xb49   : > { %v5684_v45 = vpop.xlane.xlu0 %5683  ;;  %9379 = vpow2.f32 %v5761_v48  ;;  %v5729_v41 = vsub.f32 %v13451_v29, %v5699_v6  ;;  %v5820_v20 = vsel %vm5636_vm4, %v13557_v8, 0.0 }
 0xb4a   : > { %v5724_v59 = vsub.f32 %v13448_v39, %v5684_v45  ;;  %9381 = vpow2.f32 %v5771_v10  ;;  %5821 = vadd.xlane.f32.xlu0 %v5820_v20 }
 0xb4b   : > { %v5773_v12 = vmul.f32 1.442695, %v5729_v41 }
 0xb4c   : > { %v5763_v14 = vmul.f32 1.442695, %v5724_v59  ;;  %v5687_v40 = vpop.xlane.xlu1 %5686 }
 0xb4d   : > { %v5702_v36 = vpop.xlane.xlu0 %5701  ;;  %9383 = vpow2.f32 %v5773_v12  ;;  %v5725_v25 = vsub.f32 %v13458_v51, %v5687_v40 }
 0xb4e   : > { %v5730_v58 = vsub.f32 %v13461_v33, %v5702_v36  ;;  %9385 = vpow2.f32 %v5763_v14 }
 0xb4f   : > { %v5765_v60 = vmul.f32 1.442695, %v5725_v25 }
 0xb50   : > { %v5775_v18 = vmul.f32 1.442695, %v5730_v58  ;;  %v5705_v29 = vpop.xlane.xlu1 %5704 }
 0xb51   : > { %v5690_v0 = vpop.xlane.xlu0 %5689  ;;  %9387 = vpow2.f32 %v5765_v60  ;;  %v5731_v39 = vsub.f32 %v13471_v44, %v5705_v29 }
 0xb52   : > { %v5726_v63 = vsub.f32 %v13468_v53, %v5690_v0  ;;  %v13567_v13 = vpop.eup %9377  ;;  %9389 = vpow2.f32 %v5775_v18 }
 0xb53   : > { %v5777_v35 = vmul.f32 1.442695, %v5731_v39  ;;  %v5835_v51 = vsel %vm5636_vm4, %v13567_v13, 0.0 }
 0xb54   : > { %v5767_v61 = vmul.f32 1.442695, %v5726_v63  ;;  %5836 = vadd.xlane.f32.xlu0 %v5835_v51  ;;  %v6064_v62 = vpop.permute.xlu1 %6063 }
 0xb55   : > { %v5708_v33 = vpop.xlane.xlu0 %5707 }
 0xb56   : > { %v5732_v22 = vsub.f32 %v13478_v37, %v5708_v33  ;;  %v13572_v31 = vpop.eup %9379  ;;  %9391 = vpow2.f32 %v5767_v61 }
 0xb57   : > { %v13574_v3 = vpop.eup %9381  ;;  %9393 = vpow2.f32 %v5777_v35  ;;  %v5823_v53 = vsel %vm5636_vm4, %v13572_v31, 0.0 }
 0xb58   : > { %v5779_v44 = vmul.f32 1.442695, %v5732_v22  ;;  %5824 = vadd.xlane.f32.xlu1 %v5823_v53  ;;  %v5838_v55 = vsel %vm5636_vm4, %v13574_v3, 0.0 }
 0xb59   : > { %5839 = vadd.xlane.f32.xlu0 %v5838_v55  ;;  %v6066_v48 = vpop.permute.xlu0 %6065 }
 0xb5a   : > { %9395 = vpow2.f32 %v5779_v44  ;;  %v13580_v52 = vpop.eup %9383 }
 0xb5b   : > { %v13582_v34 = vpop.eup %9385  ;;  %v5841_v37 = vsel %vm5636_vm4, %v13580_v52, 0.0 }
 0xb5c   : > { %5842 = vadd.xlane.f32.xlu1 %v5841_v37  ;;  %v5826_v9 = vsel %vm5636_vm4, %v13582_v34, 0.0 }
 0xb5d   : > { %5827 = vadd.xlane.f32.xlu0 %v5826_v9 }
 0xb5e   : > { %v13588_v11 = vpop.eup %9387 }
 0xb5f   : > { %v5829_v46 = vsel %vm5636_vm4, %v13588_v11, 0.0  ;;  %v13592_v54 = vpop.eup %9389 }
 0xb60   : > { %5830 = vadd.xlane.f32.xlu1 %v5829_v46  ;;  %v5844_v47 = vsel %vm5636_vm4, %v13592_v54, 0.0 }
 0xb63   : > { %v13594_v21 = vpop.eup %9391 }
 0xb64   : > { %v13598_v15 = vpop.eup %9393  ;;  %5845 = vadd.xlane.f32.xlu1 %v5844_v47  ;;  %v5832_v32 = vsel %vm5636_vm4, %v13594_v21, 0.0 }
 0xb65   : > { %5833 = vadd.xlane.f32.xlu0 %v5832_v32  ;;  %v5847_v23 = vsel %vm5636_vm4, %v13598_v15, 0.0 }
 0xb67   : > { %v13602_v49 = vpop.eup %9395 }
 0xb68   : > { %v5850_v24 = vsel %vm5636_vm4, %v13602_v49, 0.0  ;;  %5848 = vadd.xlane.f32.xlu1 %v5847_v23 }
 0xb69   : > { %5851 = vadd.xlane.f32.xlu0 %v5850_v24 }
 0xb79   : > { %6140 = vrot.lane.b32.xlu1 %v13164_v1, %s9622_s12 }
 0xb7d   : > { %6138 = vrot.lane.b32.xlu1 %v13135_v56, %s9622_s12 }
 0xb7f   : > { %6142 = vrot.lane.b32.xlu0 %v13148_v43, %s9622_s12 }
 0xba5   : > { %v5783_v10 = vpop.xlane.xlu1 %5782 }
 0xba6   : > { %9397 = vrcp.f32 %v5783_v10 }
 0xba9   : > { %v5786_v6 = vpop.xlane.xlu0 %5785 }
 0xbaa   : > { %9399 = vrcp.f32 %v5786_v6 }
 0xbb1   : > { %v5801_v45 = vpop.xlane.xlu1 %5800 }
 0xbb2   : > { %9401 = vrcp.f32 %v5801_v45 }
 0xbb3   : > { %v9398_v41 = vpop.eup %9397 }
 0xbb4   : > { %v5877_v1 = vmul.f32 %v9398_v41, %v13493_v57 }
 0xbb5   : > { %v5789_v59 = vpop.xlane.xlu1 %5788  ;;  %v5804_v20 = vpop.xlane.xlu0 %5803 }
 0xbb6   : > { %9403 = vrcp.f32 %v5804_v20 }
 0xbb7   : > { %v9400_v12 = vpop.eup %9399  ;;  %9405 = vrcp.f32 %v5789_v59 }
 0xbb8   : > { %v5878_v56 = vmul.f32 %v9400_v12, %v13499_v16 }
 0xbb9   : > { %v5807_v14 = vpop.xlane.xlu1 %5806 }
 0xbba   : > { %v5901_v43 = vpack.c.bf16 %v5878_v56, %v5877_v1  ;;  %v5792_v40 = vpop.xlane.xlu0 %5791 }
 0xbbb   : > { %9407 = vrcp.f32 %v5792_v40 }
 0xbbc   : > { %8664 = vmatmul.mubr.msk.bf16.vlgmr.msra.gmra.mxu1 %vm5636_vm4, %v5901_v43  ;;  %9409 = vrcp.f32 %v5807_v14 }
 0xbbd   : > { %8694 = vmatpush3.bf16.msra.mxu1 %v13486_v7  ;;  %v5795_v36 = vpop.xlane.xlu1 %5794  ;;  %8667 = vmatprep.mubr.msk.bf16.mxu1 %vm9625_vm2, %v9624_v27 }
 0xbbe   : > { %v5810_v25 = vpop.xlane.xlu0 %5809  ;;  %8695 = vmatprep.subr.bf16.mxu1 %v9624_v27 }
 0xbbf   : > { %9411 = vrcp.f32 %v5810_v25  ;;  %v9402_v57 = vpop.eup %9401 }
 0xbc0   : > { %9413 = vrcp.f32 %v5795_v36  ;;  %v5883_v18 = vmul.f32 %v9402_v57, %v13507_v50 }
 0xbc1   : > { %8696 = vmatpush3.bf16.msra.mxu1 %v6066_v48  ;;  %v5813_v16 = vpop.xlane.xlu1 %5812 }
 0xbc2   : > { %v5798_v58 = vpop.xlane.xlu0 %5797  ;;  %8697 = vmatprep.subr.bf16.mxu1 %v9624_v27 }
 0xbc3   : > { %9415 = vrcp.f32 %v5798_v58  ;;  %v9404_v60 = vpop.eup %9403 }
 0xbc4   : > { %v5884_v7 = vmul.f32 %v9404_v60, %v13514_v26  ;;  %9417 = vrcp.f32 %v5813_v16  ;;  %v9406_v29 = vpop.eup %9405 }
 0xbc5   : > { %8698 = vmatpush3.bf16.msra.mxu1 %v6064_v62  ;;  %v5879_v35 = vmul.f32 %v9406_v29, %v13511_v17 }
 0xbc6   : > { %v5816_v0 = vpop.xlane.xlu0 %5815  ;;  %v5904_v39 = vpack.c.bf16 %v5884_v7, %v5883_v18 }
 0xbc7   : > { %9419 = vrcp.f32 %v5816_v0 }
 0xbc8   : > { %v9408_v63 = vpop.eup %9407  ;;  %8682 = vmatmul.mubr.msk.bf16.vlgmr.msra.gmra.mxu0 %vm5636_vm4, %v5904_v39 }
 0xbc9   : > { %v5880_v61 = vmul.f32 %v9408_v63, %v13522_v5  ;;  %v9410_v51 = vpop.eup %9409  ;;  %8685 = vmatprep.mubr.msk.bf16.mxu0 %vm9625_vm2, %v9624_v27 }
 0xbca   : > { %v5885_v26 = vmul.f32 %v9410_v51, %v13520_v28 }
 0xbcb   : > { %v5902_v50 = vpack.c.bf16 %v5880_v61, %v5879_v35  ;;  %v8861_v61 = vld [vmem:[%s14859_s4 + $0x4c] ss:$28 sps:$4 sm:$0xff]  }
 0xbcc   : > { %v9412_v33 = vpop.eup %9411  ;;  %8729 = vmatprep.subr.bf16.mxu1 %v8861_v61 }
 0xbcd   : > { %8668 = vmatmul.mubr.msk.bf16.gmra.mxu1 %vm5636_vm4, %v5902_v50  ;;  %v5886_v22 = vmul.f32 %v9412_v33, %v13530_v2  ;;  %v9414_v44 = vpop.eup %9413 }
 0xbce   : > { %8671 = vmatprep.mubr.msk.bf16.mxu1 %vm9625_vm2, %v9624_v27  ;;  %v5881_v5 = vmul.f32 %v9414_v44, %v13528_v38 }
 0xbcf   : > { %v5905_v53 = vpack.c.bf16 %v5886_v22, %v5885_v26  ;;  %v5819_v55 = vpop.xlane.xlu1 %5818 }
 0xbd0   : > { %v9416_v17 = vpop.eup %9415  ;;  %9421 = vrcp.f32 %v5819_v55 }
 0xbd1   : > { %8686 = vmatmul.mubr.msk.bf16.gmra.mxu0 %vm5636_vm4, %v5905_v53  ;;  %v5882_v37 = vmul.f32 %v9416_v17, %v13539_v4  ;;  %v9418_v9 = vpop.eup %9417 }
 0xbd2   : > { %8689 = vmatprep.mubr.msk.bf16.mxu0 %vm9625_vm2, %v9624_v27  ;;  %v5887_v47 = vmul.f32 %v9418_v9, %v13537_v19 }
 0xbd3   : > { %v5903_v28 = vpack.c.bf16 %v5882_v37, %v5881_v5  ;;  %v5822_v46 = vpop.xlane.xlu0 %5821 }
 0xbd4   : > { %v9420_v2 = vpop.eup %9419  ;;  %9423 = vrcp.f32 %v5822_v46 }
 0xbd5   : > { %8672 = vmatmul.mubr.msk.bf16.gmra.mxu1 %vm5636_vm4, %v5903_v28  ;;  %v5888_v32 = vmul.f32 %v9420_v2, %v13546_v42 }
 0xbd6   : > { %8699 = vmatprep.mubr.msk.bf16.mxu1 %vm9625_vm2, %v9624_v27 }
 0xbd7   : > { %v5906_v38 = vpack.c.bf16 %v5888_v32, %v5887_v47 }
 0xbd9   : > { %8690 = vmatmul.mubr.msk.bf16.gmra.mxu0 %vm5636_vm4, %v5906_v38 }
 0xbda   : > { %8717 = vmatprep.mubr.msk.bf16.mxu0 %vm9625_vm2, %v9624_v27 }
 0xbdd   : > { %v5837_v4 = vpop.xlane.xlu0 %5836  ;;  %v9422_v23 = vpop.eup %9421 }
 0xbde   : > { %v5889_v48 = vmul.f32 %v9422_v23, %v13551_v30 }
 0xbe1   : > { %v9424_v24 = vpop.eup %9423  ;;  %v5825_v62 = vpop.xlane.xlu1 %5824 }
 0xbe2   : > { %v5890_v10 = vmul.f32 %v9424_v24, %v13557_v8  ;;  %v5840_v19 = vpop.xlane.xlu0 %5839  ;;  %9425 = vrcp.f32 %v5825_v62 }
 0xbe4   : > { %v5907_v6 = vpack.c.bf16 %v5890_v10, %v5889_v48 }
 0xbe5   : > { %v5843_v42 = vpop.xlane.xlu1 %5842 }
 0xbe6   : > { %v5828_v45 = vpop.xlane.xlu0 %5827  ;;  %8700 = vmatmul.mubr.msk.bf16.vlgmr.msra.gmra.mxu1 %vm5636_vm4, %v5907_v6 }
 0xbe7   : > { %9427 = vrcp.f32 %v5828_v45  ;;  %8703 = vmatprep.mubr.msk.bf16.mxu1 %vm9625_vm2, %v9624_v27  ;;  %8730 = vmatpush3.bf16.msra.mxu1 %v8861_v61 }
 0xbe8   : > { %9429 = vrcp.f32 %v5840_v19 }
 0xbe9   : > { %v5831_v41 = vpop.xlane.xlu1 %5830 }
 0xbea   : > { %9431 = vrcp.f32 %v5831_v41 }
 0xbeb   : > { %9433 = vrcp.f32 %v5837_v4 }
 0xbed   : > { %v5846_v59 = vpop.xlane.xlu1 %5845 }
 0xbee   : > { %v5834_v20 = vpop.xlane.xlu0 %5833 }
 0xbef   : > { %9435 = vrcp.f32 %v5834_v20  ;;  %v9426_v30 = vpop.eup %9425 }
 0xbf0   : > { %9437 = vrcp.f32 %v5846_v59  ;;  %v5891_v56 = vmul.f32 %v9426_v30, %v13572_v31 }
 0xbf1   : > { %v5849_v8 = vpop.xlane.xlu1 %5848  ;;  %9439 = vrcp.f32 %v5843_v42 }
 0xbf2   : > { %v5852_v12 = vpop.xlane.xlu0 %5851  ;;  %9441 = vrcp.f32 %v5849_v8 }
 0xbf3   : > { %9443 = vrcp.f32 %v5852_v12 }
 0xbf4   : > { %v9428_v1 = vpop.eup %9427 }
 0xbf5   : > { %v5892_v14 = vmul.f32 %v9428_v1, %v13582_v34  ;;  %v6141_v36 = vpop.permute.xlu1 %6140  ;;  %v9430_v25 = vpop.eup %9429 }
 0xbf6   : > { %v6143_v43 = vpop.permute.xlu0 %6142  ;;  %v5896_v34 = vmul.f32 %v9430_v25, %v13574_v3 }
 0xbf7   : > { %8712 = vmatpush3.bf16.msra.mxu0 %v6143_v43  ;;  %v5908_v40 = vpack.c.bf16 %v5892_v14, %v5891_v56  ;;  %v9432_v57 = vpop.eup %9431 }
 0xbf8   : > { %8713 = vmatprep.subr.bf16.mxu0 %v9624_v27  ;;  %v9434_v16 = vpop.eup %9433  ;;  %v5893_v58 = vmul.f32 %v9432_v57, %v13588_v11 }
 0xbf9   : > { %8704 = vmatmul.mubr.msk.bf16.gmra.mxu1 %vm5636_vm4, %v5908_v40  ;;  %v5895_v18 = vmul.f32 %v9434_v16, %v13567_v13  ;;  %v6139_v7 = vpop.permute.xlu1 %6138 }
 0xbfa   : > { %8707 = vmatprep.mubr.msk.bf16.mxu1 %vm9625_vm2, %v9624_v27 }
 0xbfb   : > { %8714 = vmatpush3.bf16.msra.mxu0 %v6141_v36  ;;  %v5910_v0 = vpack.c.bf16 %v5896_v34, %v5895_v18 }
 0xbfc   : > { %v9436_v31 = vpop.eup %9435  ;;  %8715 = vmatprep.subr.bf16.mxu0 %v9624_v27 }
 0xbfd   : > { %v5894_v60 = vmul.f32 %v9436_v31, %v13594_v21  ;;  %v9438_v39 = vpop.eup %9437 }
 0xbfe   : > { %v9440_v63 = vpop.eup %9439  ;;  %v5898_v3 = vmul.f32 %v9438_v39, %v13592_v54 }
 0xbff   : > { %8716 = vmatpush3.bf16.msra.mxu0 %v6139_v7  ;;  %v5909_v29 = vpack.c.bf16 %v5894_v60, %v5893_v58  ;;  %v5897_v11 = vmul.f32 %v9440_v63, %v13580_v52  ;;  %v9442_v21 = vpop.eup %9441  ;;  %v8862_v52 = vld [vmem:[%s14859_s4 + $0x14] ss:$28 sps:$4 sm:$0xff]  }
 0xc00   : > { %v9444_v13 = vpop.eup %9443  ;;  %v5899_v51 = vmul.f32 %v9442_v21, %v13598_v15  ;;  %8731 = vmatprep.subr.bf16.mxu1 %v8862_v52 }
 0xc01   : > { %8708 = vmatmul.mubr.msk.bf16.gmra.mxu1 %vm5636_vm4, %v5909_v29  ;;  %v5911_v35 = vpack.c.bf16 %v5898_v3, %v5897_v11  ;;  %v5900_v50 = vmul.f32 %v9444_v13, %v13602_v49 }
 0xc02   : > { %8718 = vmatmul.mubr.msk.bf16.vlgmr.msra.gmra.mxu0 %vm5636_vm4, %v5910_v0  ;;  %8732 = vmatpush3.bf16.msra.mxu1 %v8862_v52 }
 0xc03   : > { %8721 = vmatprep.mubr.msk.bf16.mxu0 %vm9625_vm2, %v9624_v27  ;;  %v5912_v54 = vpack.c.bf16 %v5900_v50, %v5899_v51  ;;  %v13696_v51 = vld [vmem:[%s14860_s5 + $0x10] ss:$0 sm:$0xff] }
 0xc0a   : > { %8722 = vmatmul.mubr.msk.bf16.gmra.mxu0 %vm5636_vm4, %v5911_v35 }
 0xc0b   : > { %8725 = vmatprep.mubr.msk.bf16.mxu0 %vm9625_vm2, %v9624_v27 }
 0xc12   : > { %8726 = vmatmul.mubr.msk.bf16.gmra.mxu0 %vm5636_vm4, %v5912_v54 }
 0xc7c   : > { %v5965_v33 = vpop.f32.mrf.mxu1 }
 0xc7e   : > { %v8665_v26 = vpop.f32.mrf.mxu1 }
 0xc80   : > { %v5968_v22 = vpop.f32.mrf.mxu1 }
 0xc81   : > { %v6213_v44 = vpack.c.bf16 %v5968_v22, %v5965_v33  ;;  %v9589_v33 = vld [vmem:[%s9692_s11 + $0x10] sm:$0xff] }
 0xc82   : > { %v8666_v27 = vpop.f32.mrf.mxu1 }
 0xc83   : > { %8733 = vmatprep.mubr.msk.bf16.mxu1 %vm582_vm1, %v6213_v44  ;;  %v9590_v27 = vld [vmem:[%s9692_s11] sm:$0xff] }
 0xc88   : > { %v6040_v15 = vpop.f32.mrf.mxu0 }
 0xc8a   : > { %v8683_v49 = vpop.f32.mrf.mxu0 }
 0xc8c   : > { %v6043_v17 = vpop.f32.mrf.mxu0 }
 0xc8d   : > { %v5973_v53 = vpop.f32.mrf.mxu1  ;;  %v6216_v48 = vpack.c.bf16 %v6043_v17, %v6040_v15 }
 0xc8e   : > { %v8684_v5 = vpop.f32.mrf.mxu0 }
 0xc8f   : > { %v8669_v55 = vpop.f32.mrf.mxu1 }
 0xc90   : > { %v9591_v55 = vld [vmem:[%s9692_s11 + $0x18] sm:$0xff] }
 0xc91   : > { %v5976_v37 = vpop.f32.mrf.mxu1  ;;  %v6048_v9 = vpop.f32.mrf.mxu0 }
 0xc92   : > { %v6214_v28 = vpack.c.bf16 %v5976_v37, %v5973_v53 }
 0xc93   : > { %v8670_v2 = vpop.f32.mrf.mxu1  ;;  %v8687_v46 = vpop.f32.mrf.mxu0 }
 0xc94   : > { %8734 = vmatmul.mubr.msk.bf16.vlgmr.msra.gmra.mxu1 %vm582_vm1, %v6214_v28  ;;  %v9592_v2 = vld [vmem:[%s9692_s11 + $0x8] sm:$0xff] }
 0xc95   : > { %v5981_v47 = vpop.f32.mrf.mxu1  ;;  %v6051_v32 = vpop.f32.mrf.mxu0 }
 0xc96   : > { %v6217_v6 = vpack.c.bf16 %v6051_v32, %v6048_v9 }
 0xc97   : > { %v8673_v38 = vpop.f32.mrf.mxu1  ;;  %v8688_v4 = vpop.f32.mrf.mxu0 }
 0xc99   : > { %v5984_v23 = vpop.f32.mrf.mxu1  ;;  %v6056_v24 = vpop.f32.mrf.mxu0 }
 0xc9a   : > { %v6215_v62 = vpack.c.bf16 %v5984_v23, %v5981_v47 }
 0xc9b   : > { %v8674_v10 = vpop.f32.mrf.mxu1  ;;  %v8691_v19 = vpop.f32.mrf.mxu0 }
 0xc9c   : > { %8737 = vmatprep.mubr.msk.bf16.mxu1 %vm582_vm1, %v6215_v62  ;;  %v9593_v19 = vld [vmem:[%s9692_s11 + $0x30] sm:$0xff] }
 0xc9d   : > { %v6059_v42 = vpop.f32.mrf.mxu0  ;;  %8738 = vmatmul.mubr.msk.bf16.gmra.mxu1 %vm582_vm1, %v6216_v48 }
 0xc9e   : > { %8741 = vmatprep.mubr.msk.bf16.mxu1 %vm582_vm1, %v6217_v6  ;;  %v6218_v41 = vpack.c.bf16 %v6059_v42, %v6056_v24 }
 0xc9f   : > { %v8692_v45 = vpop.f32.mrf.mxu0 }
 0xca5   : > { %8742 = vmatmul.mubr.msk.bf16.gmra.mxu1 %vm582_vm1, %v6218_v41 }
 0xca6   : > { %v6115_v59 = vpop.f32.mrf.mxu1 }
 0xca8   : > { %v8701_v20 = vpop.f32.mrf.mxu1 }
 0xcaa   : > { %v6118_v30 = vpop.f32.mrf.mxu1 }
 0xcab   : > { %v6219_v8 = vpack.c.bf16 %v6118_v30, %v6115_v59 }
 0xcac   : > { %v8702_v12 = vpop.f32.mrf.mxu1 }
 0xcad   : > { %8745 = vmatprep.mubr.msk.bf16.mxu1 %vm582_vm1, %v6219_v8  ;;  %v9594_v8 = vld [vmem:[%s9692_s11 + $0x20] sm:$0xff] }
 0xcb9   : > { %v6123_v1 = vpop.f32.mrf.mxu1 }
 0xcbb   : > { %v8705_v56 = vpop.f32.mrf.mxu1 }
 0xcbc   : > { %v9595_v56 = vld [vmem:[%s9692_s11 + $0x38] sm:$0xff] }
 0xcbd   : > { %v6126_v14 = vpop.f32.mrf.mxu1 }
 0xcbe   : > { %v6220_v43 = vpack.c.bf16 %v6126_v14, %v6123_v1 }
 0xcbf   : > { %v8706_v40 = vpop.f32.mrf.mxu1 }
 0xcc0   : > { %8746 = vmatmul.mubr.msk.bf16.gmra.mxu1 %vm582_vm1, %v6220_v43 }
 0xcc1   : > { %v6131_v36 = vpop.f32.mrf.mxu1 }
 0xcc2   : > { %v6190_v25 = vpop.f32.mrf.mxu0 }
 0xcc3   : > { %v8709_v57 = vpop.f32.mrf.mxu1 }
 0xcc4   : > { %v8719_v16 = vpop.f32.mrf.mxu0 }
 0xcc5   : > { %v6134_v31 = vpop.f32.mrf.mxu1  ;;  %v9596_v16 = vld [vmem:[%s9692_s11 + $0x28] sm:$0xff] }
 0xcc6   : > { %v6221_v34 = vpack.c.bf16 %v6134_v31, %v6131_v36  ;;  %v6193_v58 = vpop.f32.mrf.mxu0 }
 0xcc7   : > { %v6222_v60 = vpack.c.bf16 %v6193_v58, %v6190_v25  ;;  %v8710_v18 = vpop.f32.mrf.mxu1 }
 0xcc8   : > { %v8720_v7 = vpop.f32.mrf.mxu0  ;;  %8749 = vmatprep.mubr.msk.bf16.mxu1 %vm582_vm1, %v6221_v34 }
 0xcc9   : > { %8750 = vmatmul.mubr.msk.bf16.gmra.mxu1 %vm582_vm1, %v6222_v60 }
 0xcca   : > { %v6198_v29 = vpop.f32.mrf.mxu0 }
 0xccc   : > { %v8723_v0 = vpop.f32.mrf.mxu0 }
 0xcce   : > { %v6201_v39 = vpop.f32.mrf.mxu0 }
 0xccf   : > { %v6223_v63 = vpack.c.bf16 %v6201_v39, %v6198_v29 }
 0xcd0   : > { %v8724_v3 = vpop.f32.mrf.mxu0 }
 0xcd1   : > { %8753 = vmatprep.mubr.msk.bf16.mxu1 %vm582_vm1, %v6223_v63  ;;  %v9597_v63 = vld [vmem:[%s9692_s11 + $0x50] sm:$0xff] }
 0xcd2   : > { %v6206_v11 = vpop.f32.mrf.mxu0 }
 0xcd4   : > { %v8727_v21 = vpop.f32.mrf.mxu0 }
 0xcd6   : > { %v6209_v35 = vpop.f32.mrf.mxu0 }
 0xcd7   : > { %v6224_v13 = vpack.c.bf16 %v6209_v35, %v6206_v11 }
 0xcd8   : > { %v8728_v61 = vpop.f32.mrf.mxu0 }
 0xcd9   : > { %8754 = vmatmul.mubr.msk.bf16.gmra.mxu1 %vm582_vm1, %v6224_v13 }
 0xd54   : > { %v8735_v50 = vpop.f32.mrf.mxu1 }
 0xd55   : > { %v6321_v52 = vadd.f32 %v8735_v50, %v13696_v51 }
 0xd56   : > { %v6312_v54 = vpop.f32.mrf.mxu1 }
 0xd57   : > { %v13700_v26 = vadd.f32 %v9589_v33, %v6321_v52  ;;  %v6313_v22 = vadd.f32 %v13696_v51, %v6312_v54  ;;  %v9598_v52 = vld [vmem:[%s9692_s11 + $0x40] sm:$0xff] }
 0xd58   : > { %v8736_v44 = vpop.f32.mrf.mxu1 }
 0xd59   : > { %v13704_v15 = vadd.f32 %v9590_v27, %v6313_v22  ;;  %v6324_v49 = vadd.f32 %v8736_v44, %v13696_v51  ;;  %v6439_v53 = vsel %vm414_vm0, %v13700_v26, 0.0  ;;  %v6531_v28 = vmul.f32 %v13700_v26, %v13700_v26  ;;  %v9599_v22 = vld [vmem:[%s9692_s11 + $0x58] sm:$0xff] }
 0xd5a   : > { %6440 = vadd.xlane.f32.xlu0 %v6439_v53  ;;  %v6315_v17 = vpop.f32.mrf.mxu1 }
 0xd5b   : > { %v13710_v5 = vadd.f32 %v9591_v55, %v6324_v49  ;;  %v6316_v37 = vadd.f32 %v13696_v51, %v6315_v17  ;;  %v6433_v9 = vsel %vm414_vm0, %v13704_v15, 0.0  ;;  %v6559_v23 = vsel %vm414_vm0, %v6531_v28, 0.0  ;;  %v9600_v55 = vld [vmem:[%s9692_s11 + $0x48] sm:$0xff] }
 0xd5c   : > { %6434 = vadd.xlane.f32.xlu1 %v6433_v9  ;;  %v6529_v24 = vmul.f32 %v13704_v15, %v13704_v15 }
 0xd5d   : > { %v13718_v46 = vadd.f32 %v9592_v2, %v6316_v37  ;;  %v8739_v47 = vpop.f32.mrf.mxu1  ;;  %v6442_v32 = vsel %vm414_vm0, %v13710_v5, 0.0  ;;  %v6532_v48 = vmul.f32 %v13710_v5, %v13710_v5 }
 0xd5e   : > { %6443 = vadd.xlane.f32.xlu0 %v6442_v32  ;;  %v6337_v38 = vadd.f32 %v8739_v47, %v13696_v51  ;;  %v6553_v45 = vsel %vm414_vm0, %v6529_v24, 0.0 }
 0xd5f   : > { %v6328_v4 = vpop.f32.mrf.mxu1  ;;  %v6436_v62 = vsel %vm414_vm0, %v13718_v46, 0.0  ;;  %v6562_v59 = vsel %vm414_vm0, %v6532_v48, 0.0  ;;  %v6530_v20 = vmul.f32 %v13718_v46, %v13718_v46 }
 0xd60   : > { %6560 = vadd.xlane.f32.xlu1 %v6559_v23  ;;  %v13731_v6 = vadd.f32 %v9593_v19, %v6337_v38  ;;  %v6329_v42 = vadd.f32 %v13696_v51, %v6328_v4 }
 0xd61   : > { %v8740_v10 = vpop.f32.mrf.mxu1  ;;  %v6556_v40 = vsel %vm414_vm0, %v6530_v20, 0.0  ;;  %v8863_v20 = vld [vmem:[%s14858_s3 + $0x6c] ss:$16 sps:$4 sm:$0xff]  }
 0xd62   : > { %6437 = vadd.xlane.f32.xlu0 %v6436_v62  ;;  %v6340_v41 = vadd.f32 %v8740_v10, %v13696_v51  ;;  %v13740_v12 = vadd.f32 %v9594_v8, %v6329_v42  ;;  %v6451_v1 = vsel %vm414_vm0, %v13731_v6, 0.0  ;;  %v6535_v57 = vmul.f32 %v13731_v6, %v13731_v6  ;;  %v9601_v62 = vld [vmem:[%s9692_s11 + $0x70] sm:$0xff]  ;;  %8757 = vmatprep.subr.bf16.mxu0 %v8863_v20 }
 0xd63   : > { %v6331_v30 = vpop.f32.mrf.mxu1  ;;  %8758 = vmatpush3.bf16.msra.mxu0 %v8863_v20 }
 0xd64   : > { %6554 = vadd.xlane.f32.xlu1 %v6553_v45  ;;  %v13745_v14 = vadd.f32 %v9595_v56, %v6340_v41  ;;  %v6332_v43 = vadd.f32 %v13696_v51, %v6331_v30  ;;  %v6445_v25 = vsel %vm414_vm0, %v13740_v12, 0.0  ;;  %v6571_v18 = vsel %vm414_vm0, %v6535_v57, 0.0  ;;  %v9602_v30 = vld [vmem:[%s9692_s11 + $0x60] sm:$0xff]  ;;  %v9603_v56 = vld [vmem:[%s9692_s11 + $0x78] sm:$0xff] }
 0xd65   : > { %v8743_v36 = vpop.f32.mrf.mxu1  ;;  %v6533_v7 = vmul.f32 %v13740_v12, %v13740_v12  ;;  %v8864_v57 = vld [vmem:[%s14858_s3 + $0x4c] ss:$16 sps:$4 sm:$0xff]  }
 0xd66   : > { %6563 = vadd.xlane.f32.xlu0 %v6562_v59  ;;  %v13754_v31 = vadd.f32 %v9596_v16, %v6332_v43  ;;  %v6454_v34 = vsel %vm414_vm0, %v13745_v14, 0.0  ;;  %v6353_v60 = vadd.f32 %v8743_v36, %v13696_v51  ;;  %v6536_v0 = vmul.f32 %v13745_v14, %v13745_v14  ;;  %8759 = vmatprep.subr.bf16.mxu0 %v8864_v57 }
 0xd67   : > { %v6344_v58 = vpop.f32.mrf.mxu1  ;;  %v6565_v21 = vsel %vm414_vm0, %v6533_v7, 0.0  ;;  %8760 = vmatpush3.bf16.msra.mxu0 %v8864_v57 }
 0xd68   : > { %6452 = vadd.xlane.f32.xlu1 %v6451_v1  ;;  %v6448_v29 = vsel %vm414_vm0, %v13754_v31, 0.0  ;;  %v13767_v3 = vadd.f32 %v9597_v63, %v6353_v60  ;;  %v6345_v11 = vadd.f32 %v13696_v51, %v6344_v58  ;;  %v6574_v13 = vsel %vm414_vm0, %v6536_v0, 0.0  ;;  %v9604_v60 = vld [vmem:[%s9692_s11 + $0x68] sm:$0xff] }
 0xd69   : > { %v8744_v39 = vpop.f32.mrf.mxu1  ;;  %v6534_v61 = vmul.f32 %v13754_v31, %v13754_v31 }
 0xd6a   : > { %6557 = vadd.xlane.f32.xlu0 %v6556_v40  ;;  %v6356_v35 = vadd.f32 %v8744_v39, %v13696_v51  ;;  %v13776_v54 = vadd.f32 %v9598_v52, %v6345_v11  ;;  %v6463_v33 = vsel %vm414_vm0, %v13767_v3, 0.0  ;;  %v6539_v17 = vmul.f32 %v13767_v3, %v13767_v3 }
 0xd6b   : > { %v6347_v50 = vpop.f32.mrf.mxu1  ;;  %v6568_v49 = vsel %vm414_vm0, %v6534_v61, 0.0  ;;  %v9605_v61 = vld [vmem:[%s9692_s11 + $0x90] sm:$0xff] }
 0xd6c   : > { %6446 = vadd.xlane.f32.xlu1 %v6445_v25  ;;  %v13781_v44 = vadd.f32 %v9599_v22, %v6356_v35  ;;  %v6348_v27 = vadd.f32 %v13696_v51, %v6347_v50  ;;  %v6457_v53 = vsel %vm414_vm0, %v13776_v54, 0.0  ;;  %v6583_v28 = vsel %vm414_vm0, %v6539_v17, 0.0  ;;  %v9606_v17 = vld [vmem:[%s9692_s11 + $0x80] sm:$0xff] }
 0xd6d   : > { %v6537_v2 = vmul.f32 %v13776_v54, %v13776_v54 }
 0xd6e   : > { %6455 = vadd.xlane.f32.xlu0 %v6454_v34  ;;  %v13790_v37 = vadd.f32 %v9600_v55, %v6348_v27  ;;  %v6466_v9 = vsel %vm414_vm0, %v13781_v44, 0.0  ;;  %v6540_v38 = vmul.f32 %v13781_v44, %v13781_v44 }
 0xd6f   : > { %v6577_v23 = vsel %vm414_vm0, %v6537_v2, 0.0 }
 0xd70   : > { %6572 = vadd.xlane.f32.xlu1 %v6571_v18  ;;  %v6460_v47 = vsel %vm414_vm0, %v13790_v37, 0.0  ;;  %v6586_v19 = vsel %vm414_vm0, %v6540_v38, 0.0  ;;  %v6538_v45 = vmul.f32 %v13790_v37, %v13790_v37 }
 0xd72   : > { %6449 = vadd.xlane.f32.xlu0 %v6448_v29  ;;  %v6580_v36 = vsel %vm414_vm0, %v6538_v45, 0.0  ;;  %v8865_v29 = vld [vmem:[%s14858_s3 + $0x2c] ss:$16 sps:$4 sm:$0xff]  }
 0xd73   : > { %8761 = vmatprep.subr.bf16.mxu0 %v8865_v29 }
 0xd74   : > { %6566 = vadd.xlane.f32.xlu1 %v6565_v21  ;;  %8762 = vmatpush3.bf16.msra.mxu0 %v8865_v29  ;;  %v9611_v29 = vld [vmem:[%s9692_s11 + $0xb8] sm:$0xff] }
 0xd76   : > { %6575 = vadd.xlane.f32.xlu0 %v6574_v13  ;;  %v8866_v13 = vld [vmem:[%s14858_s3 + $0xc] ss:$16 sps:$4 sm:$0xff]  }
 0xd77   : > { %8763 = vmatprep.subr.bf16.mxu0 %v8866_v13 }
 0xd78   : > { %6464 = vadd.xlane.f32.xlu1 %v6463_v33  ;;  %8764 = vmatpush3.bf16.msra.mxu0 %v8866_v13 }
 0xd7a   : > { %6569 = vadd.xlane.f32.xlu0 %v6568_v49 }
 0xd7c   : > { %6458 = vadd.xlane.f32.xlu1 %v6457_v53 }
 0xd7e   : > { %6467 = vadd.xlane.f32.xlu0 %v6466_v9 }
 0xd80   : > { %6584 = vadd.xlane.f32.xlu1 %v6583_v28  ;;  %v8747_v32 = vpop.f32.mrf.mxu1  ;;  %v9607_v28 = vld [vmem:[%s9692_s11 + $0x98] sm:$0xff] }
 0xd81   : > { %v6369_v4 = vadd.f32 %v8747_v32, %v13696_v51 }
 0xd82   : > { %6461 = vadd.xlane.f32.xlu0 %v6460_v47  ;;  %v6360_v24 = vpop.f32.mrf.mxu1 }
 0xd83   : > { %v13804_v48 = vadd.f32 %v9601_v62, %v6369_v4  ;;  %v6361_v10 = vadd.f32 %v13696_v51, %v6360_v24  ;;  %v9608_v24 = vld [vmem:[%s9692_s11 + $0x88] sm:$0xff] }
 0xd84   : > { %6578 = vadd.xlane.f32.xlu1 %v6577_v23  ;;  %v8748_v42 = vpop.f32.mrf.mxu1 }
 0xd85   : > { %v6372_v41 = vadd.f32 %v8748_v42, %v13696_v51  ;;  %v6475_v59 = vsel %vm414_vm0, %v13804_v48, 0.0  ;;  %v13817_v8 = vadd.f32 %v9602_v30, %v6361_v10  ;;  %v6543_v58 = vmul.f32 %v13804_v48, %v13804_v48 }
 0xd86   : > { %6587 = vadd.xlane.f32.xlu0 %v6586_v19  ;;  %v6363_v1 = vpop.f32.mrf.mxu1 }
 0xd87   : > { %v13820_v43 = vadd.f32 %v9603_v56, %v6372_v41  ;;  %v6364_v40 = vadd.f32 %v13696_v51, %v6363_v1  ;;  %v6469_v16 = vsel %vm414_vm0, %v13817_v8, 0.0  ;;  %v6595_v39 = vsel %vm414_vm0, %v6543_v58, 0.0  ;;  %v9609_v1 = vld [vmem:[%s9692_s11 + $0xb0] sm:$0xff]  ;;  %v9610_v58 = vld [vmem:[%s9692_s11 + $0xa0] sm:$0xff] }
 0xd88   : > { %6476 = vadd.xlane.f32.xlu1 %v6475_v59  ;;  %v6541_v63 = vmul.f32 %v13817_v8, %v13817_v8 }
 0xd89   : > { %v8751_v25 = vpop.f32.mrf.mxu1  ;;  %v6478_v34 = vsel %vm414_vm0, %v13820_v43, 0.0  ;;  %v13834_v18 = vadd.f32 %v9604_v60, %v6364_v40  ;;  %v6544_v21 = vmul.f32 %v13820_v43, %v13820_v43 }
 0xd8a   : > { %6581 = vadd.xlane.f32.xlu0 %v6580_v36  ;;  %v6385_v0 = vadd.f32 %v8751_v25, %v13696_v51  ;;  %v6589_v33 = vsel %vm414_vm0, %v6541_v63, 0.0 }
 0xd8b   : > { %v6376_v7 = vpop.f32.mrf.mxu1  ;;  %v6472_v11 = vsel %vm414_vm0, %v13834_v18, 0.0  ;;  %v6598_v27 = vsel %vm414_vm0, %v6544_v21, 0.0  ;;  %v6542_v49 = vmul.f32 %v13834_v18, %v13834_v18 }
 0xd8c   : > { %6470 = vadd.xlane.f32.xlu1 %v6469_v16  ;;  %v13851_v50 = vadd.f32 %v9605_v61, %v6385_v0  ;;  %v6377_v52 = vadd.f32 %v13696_v51, %v6376_v7 }
 0xd8d   : > { %v8752_v35 = vpop.f32.mrf.mxu1  ;;  %v6592_v32 = vsel %vm414_vm0, %v6542_v49, 0.0 }
 0xd8e   : > { %6479 = vadd.xlane.f32.xlu0 %v6478_v34  ;;  %v6388_v22 = vadd.f32 %v8752_v35, %v13696_v51  ;;  %v13860_v55 = vadd.f32 %v9606_v17, %v6377_v52  ;;  %v6487_v9 = vsel %vm414_vm0, %v13851_v50, 0.0  ;;  %v6547_v23 = vmul.f32 %v13851_v50, %v13851_v50  ;;  %v9612_v35 = vld [vmem:[%s9692_s11 + $0xa8] sm:$0xff] }
 0xd8f   : > { %v6379_v53 = vpop.f32.mrf.mxu1 }
 0xd90   : > { %6596 = vadd.xlane.f32.xlu1 %v6595_v39  ;;  %v13865_v2 = vadd.f32 %v9607_v28, %v6388_v22  ;;  %v6380_v47 = vadd.f32 %v13696_v51, %v6379_v53  ;;  %v6481_v4 = vsel %vm414_vm0, %v13860_v55, 0.0  ;;  %v6607_v45 = vsel %vm414_vm0, %v6547_v23, 0.0 }
 0xd91   : > { %v6545_v41 = vmul.f32 %v13860_v55, %v13860_v55 }
 0xd92   : > { %6473 = vadd.xlane.f32.xlu0 %v6472_v11  ;;  %v13874_v62 = vadd.f32 %v9608_v24, %v6380_v47  ;;  %v6490_v10 = vsel %vm414_vm0, %v13865_v2, 0.0  ;;  %v6548_v20 = vmul.f32 %v13865_v2, %v13865_v2 }
 0xd93   : > { %v6601_v36 = vsel %vm414_vm0, %v6545_v41, 0.0 }
 0xd94   : > { %6590 = vadd.xlane.f32.xlu1 %v6589_v33  ;;  %v6484_v59 = vsel %vm414_vm0, %v13874_v62, 0.0  ;;  %v6610_v57 = vsel %vm414_vm0, %v6548_v20, 0.0  ;;  %v6546_v16 = vmul.f32 %v13874_v62, %v13874_v62 }
 0xd96   : > { %6599 = vadd.xlane.f32.xlu0 %v6598_v27  ;;  %v6604_v63 = vsel %vm414_vm0, %v6546_v16, 0.0 }
 0xd98   : > { %6488 = vadd.xlane.f32.xlu1 %v6487_v9 }
 0xd99   : > { %v8755_v38 = vpop.f32.mrf.mxu1 }
 0xd9a   : > { %6593 = vadd.xlane.f32.xlu0 %v6592_v32  ;;  %v6401_v42 = vadd.f32 %v8755_v38, %v13696_v51 }
 0xd9b   : > { %v6392_v19 = vpop.f32.mrf.mxu1 }
 0xd9c   : > { %6482 = vadd.xlane.f32.xlu1 %v6481_v4  ;;  %v13887_v56 = vadd.f32 %v9609_v1, %v6401_v42  ;;  %v6393_v40 = vadd.f32 %v13696_v51, %v6392_v19 }
 0xd9d   : > { %v8756_v30 = vpop.f32.mrf.mxu1 }
 0xd9e   : > { %6491 = vadd.xlane.f32.xlu0 %v6490_v10  ;;  %v6404_v25 = vadd.f32 %v8756_v30, %v13696_v51  ;;  %v13896_v60 = vadd.f32 %v9610_v58, %v6393_v40  ;;  %v6499_v7 = vsel %vm414_vm0, %v13887_v56, 0.0 }
 0xd9f   : > { %v6395_v34 = vpop.f32.mrf.mxu1 }
 0xda0   : > { %6608 = vadd.xlane.f32.xlu1 %v6607_v45  ;;  %v13901_v0 = vadd.f32 %v9611_v29, %v6404_v25  ;;  %v6396_v39 = vadd.f32 %v13696_v51, %v6395_v34  ;;  %v6493_v11 = vsel %vm414_vm0, %v13896_v60, 0.0  ;;  %v6549_v21 = vmul.f32 %v13896_v60, %v13896_v60 }
 0xda1   : > { %v6551_v51 = vmul.f32 %v13887_v56, %v13887_v56 }
 0xda2   : > { %6485 = vadd.xlane.f32.xlu0 %v6484_v59  ;;  %v13910_v13 = vadd.f32 %v9612_v35, %v6396_v39  ;;  %v6502_v61 = vsel %vm414_vm0, %v13901_v0, 0.0  ;;  %v6613_v52 = vsel %vm414_vm0, %v6549_v21, 0.0  ;;  %v6552_v53 = vmul.f32 %v13901_v0, %v13901_v0 }
 0xda3   : > { %v6619_v27 = vsel %vm414_vm0, %v6551_v51, 0.0 }
 0xda4   : > { %6602 = vadd.xlane.f32.xlu1 %v6601_v36  ;;  %v6496_v33 = vsel %vm414_vm0, %v13910_v13, 0.0  ;;  %v6550_v22 = vmul.f32 %v13910_v13, %v13910_v13  ;;  %v6622_v17 = vsel %vm414_vm0, %v6552_v53, 0.0 }
 0xda6   : > { %6611 = vadd.xlane.f32.xlu0 %v6610_v57  ;;  %v6616_v49 = vsel %vm414_vm0, %v6550_v22, 0.0 }
 0xda8   : > { %6500 = vadd.xlane.f32.xlu1 %v6499_v7 }
 0xdaa   : > { %6605 = vadd.xlane.f32.xlu0 %v6604_v63 }
 0xdac   : > { %6494 = vadd.xlane.f32.xlu1 %v6493_v11 }
 0xdae   : > { %6503 = vadd.xlane.f32.xlu0 %v6502_v61 }
 0xdb0   : > { %6614 = vadd.xlane.f32.xlu1 %v6613_v52 }
 0xdb2   : > { %6497 = vadd.xlane.f32.xlu0 %v6496_v33 }
 0xdb4   : > { %6620 = vadd.xlane.f32.xlu1 %v6619_v27 }
 0xdb6   : > { %6617 = vadd.xlane.f32.xlu0 %v6616_v49 }
 0xdba   : > { %6623 = vadd.xlane.f32.xlu0 %v6622_v17 }
 0xde3   : > { %v6441_v9 = vpop.xlane.xlu0 %6440 }
 0xde4   : > { %v13926_v47 = vmul.f32 0.015625, %v6441_v9 }
 0xde5   : > { %v6435_v28 = vpop.xlane.xlu1 %6434 }
 0xde6   : > { %v6651_v4 = vmul.f32 %v13926_v47, %v13926_v47  ;;  %v13930_v23 = vmul.f32 0.015625, %v6435_v28 }
 0xde7   : > { %v6444_v32 = vpop.xlane.xlu0 %6443 }
 0xde8   : > { %v6508_v19 = vmul.f32 0.015625, %v6444_v32  ;;  %v6649_v41 = vmul.f32 %v13930_v23, %v13930_v23 }
 0xde9   : > { %v6561_v38 = vpop.xlane.xlu1 %6560 }
 0xdea   : > { %v6627_v24 = vmul.f32 0.015625, %v6561_v38  ;;  %v6652_v30 = vmul.f32 %v6508_v19, %v6508_v19 }
 0xdeb   : > { %v6438_v10 = vpop.xlane.xlu0 %6437 }
 0xdec   : > { %v6675_v42 = vsub.f32 %v6627_v24, %v6651_v4  ;;  %v13934_v25 = vmul.f32 0.015625, %v6438_v10 }
 0xded   : > { %v6555_v45 = vpop.xlane.xlu1 %6554 }
 0xdee   : > { %v6625_v59 = vmul.f32 0.015625, %v6555_v45  ;;  %v6723_v1 = vadd.f32 1e-05, %v6675_v42  ;;  %v6650_v29 = vmul.f32 %v13934_v25, %v13934_v25 }
 0xdef   : > { %v6564_v20 = vpop.xlane.xlu0 %6563 }
 0xdf0   : > { %v6673_v40 = vsub.f32 %v6625_v59, %v6649_v41  ;;  %v6628_v36 = vmul.f32 0.015625, %v6564_v20  ;;  %9445 = vrsqrt.f32 %v6723_v1  ;;  %v6700_v20 = vsub.f32 %v13710_v5, %v6508_v19 }
 0xdf1   : > { %v6453_v57 = vpop.xlane.xlu1 %6452 }
 0xdf2   : > { %v6721_v16 = vadd.f32 1e-05, %v6673_v40  ;;  %v6676_v34 = vsub.f32 %v6628_v36, %v6652_v30  ;;  %v13938_v11 = vmul.f32 0.015625, %v6453_v57  ;;  %v6697_v40 = vsub.f32 %v13704_v15, %v13930_v23  ;;  %v13964_v15 = vld [vmem:[%s14860_s5 + $0x11] ss:$0 sm:$0xff] }
 0xdf3   : > { %v6558_v58 = vpop.xlane.xlu0 %6557 }
 0xdf4   : > { %v6724_v7 = vadd.f32 1e-05, %v6676_v34  ;;  %9447 = vrsqrt.f32 %v6721_v16  ;;  %v6626_v39 = vmul.f32 0.015625, %v6558_v58  ;;  %v6655_v51 = vmul.f32 %v13938_v11, %v13938_v11 }
 0xdf5   : > { %v6447_v63 = vpop.xlane.xlu1 %6446  ;;  %v6699_v16 = vsub.f32 %v13700_v26, %v13926_v47  ;;  %v6698_v26 = vsub.f32 %v13718_v46, %v13934_v25  ;;  %v13976_v46 = vld [vmem:[%s14860_s5 + $0x12] ss:$0 sm:$0xff] }
 0xdf6   : > { %9449 = vrsqrt.f32 %v6724_v7  ;;  %v6674_v21 = vsub.f32 %v6626_v39, %v6650_v29  ;;  %v13942_v22 = vmul.f32 0.015625, %v6447_v63 }
 0xdf7   : > { %v6456_v35 = vpop.xlane.xlu0 %6455 }
 0xdf8   : > { %v6722_v61 = vadd.f32 1e-05, %v6674_v21  ;;  %v13944_v49 = vmul.f32 0.015625, %v6456_v35  ;;  %v6653_v9 = vmul.f32 %v13942_v22, %v13942_v22 }
 0xdf9   : > { %v6573_v52 = vpop.xlane.xlu1 %6572 }
 0xdfa   : > { %v6631_v33 = vmul.f32 0.015625, %v6573_v52  ;;  %9451 = vrsqrt.f32 %v6722_v61  ;;  %v6656_v38 = vmul.f32 %v13944_v49, %v13944_v49 }
 0xdfb   : > { %v6450_v27 = vpop.xlane.xlu0 %6449 }
 0xdfc   : > { %v6679_v53 = vsub.f32 %v6631_v33, %v6655_v51  ;;  %v13950_v42 = vmul.f32 0.015625, %v6450_v27 }
 0xdfd   : > { %v6567_v17 = vpop.xlane.xlu1 %6566  ;;  %v9446_v10 = vpop.eup %9445 }
 0xdfe   : > { %v6629_v28 = vmul.f32 0.015625, %v6567_v17  ;;  %v6727_v4 = vadd.f32 1e-05, %v6679_v53  ;;  %v6654_v7 = vmul.f32 %v13950_v42, %v13950_v42  ;;  %v6771_v19 = vmul.f32 %v9446_v10, %v6699_v16 }
 0xdff   : > { %v6576_v32 = vpop.xlane.xlu0 %6575 }
 0xe00   : > { %v6632_v24 = vmul.f32 0.015625, %v6576_v32  ;;  %v6677_v45 = vsub.f32 %v6629_v28, %v6653_v9  ;;  %9453 = vrsqrt.f32 %v6727_v4  ;;  %v6799_v27 = vmul.f32 %v13964_v15, %v6771_v19 }
 0xe01   : > { %v6465_v41 = vpop.xlane.xlu1 %6464  ;;  %v9448_v59 = vpop.eup %9447 }
 0xe02   : > { %v6680_v30 = vsub.f32 %v6632_v24, %v6656_v38  ;;  %v6725_v36 = vadd.f32 1e-05, %v6677_v45  ;;  %v6769_v5 = vmul.f32 %v9448_v59, %v6697_v40  ;;  %v13959_v63 = vmul.f32 0.015625, %v6465_v41 }
 0xe03   : > { %v9450_v1 = vpop.eup %9449  ;;  %v6570_v57 = vpop.xlane.xlu0 %6569  ;;  %v13993_v41 = vadd.f32 %v13976_v46, %v6799_v27 }
 0xe04   : > { %v6772_v34 = vmul.f32 %v9450_v1, %v6700_v20  ;;  %v6728_v58 = vadd.f32 1e-05, %v6680_v30  ;;  %9455 = vrsqrt.f32 %v6725_v36  ;;  %v6630_v29 = vmul.f32 0.015625, %v6570_v57 }
 0xe05   : > { %v6459_v39 = vpop.xlane.xlu1 %6458  ;;  %v6797_v33 = vmul.f32 %v13964_v15, %v6769_v5  ;;  %v6659_v53 = vmul.f32 %v13959_v63, %v13959_v63  ;;  %v6704_v5 = vsub.f32 %v13745_v14, %v13944_v49 }
 0xe06   : > { %9457 = vrsqrt.f32 %v6728_v58  ;;  %v6678_v47 = vsub.f32 %v6630_v29, %v6654_v7  ;;  %v6800_v35 = vmul.f32 %v13964_v15, %v6772_v34  ;;  %v13978_v25 = vmul.f32 0.015625, %v6459_v39 }
 0xe07   : > { %v6468_v23 = vpop.xlane.xlu0 %6467  ;;  %v9452_v21 = vpop.eup %9451  ;;  %v13987_v10 = vadd.f32 %v13976_v46, %v6797_v33 }
 0xe08   : > { %v6726_v61 = vadd.f32 1e-05, %v6678_v47  ;;  %v6770_v51 = vmul.f32 %v9452_v21, %v6698_v26  ;;  %v13982_v32 = vadd.f32 %v13976_v46, %v6800_v35  ;;  %v13984_v38 = vmul.f32 0.015625, %v6468_v23 }
 0xe09   : > { %v6585_v52 = vpop.xlane.xlu1 %6584  ;;  %v6657_v59 = vmul.f32 %v13978_v25, %v13978_v25  ;;  %v6701_v47 = vsub.f32 %v13740_v12, %v13942_v22  ;;  %v6703_v35 = vsub.f32 %v13731_v6, %v13938_v11  ;;  %v6702_v12 = vsub.f32 %v13754_v31, %v13950_v42 }
 0xe0a   : > { %v6635_v17 = vmul.f32 0.015625, %v6585_v52  ;;  %9459 = vrsqrt.f32 %v6726_v61  ;;  %v6798_v28 = vmul.f32 %v13964_v15, %v6770_v51  ;;  %v6850_v40 = vpack.c.bf16 %v13982_v32, %v13993_v41 }
 0xe0b   : > { %v6462_v9 = vpop.xlane.xlu0 %6461  ;;  %v6660_v36 = vmul.f32 %v13984_v38, %v13984_v38 }
 0xe0c   : > { %v6683_v4 = vsub.f32 %v6635_v17, %v6659_v53  ;;  %v13990_v45 = vadd.f32 %v13976_v46, %v6798_v28  ;;  %v14003_v58 = vmul.f32 0.015625, %v6462_v9 }
 0xe0d   : > { %v6579_v24 = vpop.xlane.xlu1 %6578  ;;  %v9454_v34 = vpop.eup %9453 }
 0xe0e   : > { %v6633_v20 = vmul.f32 0.015625, %v6579_v24  ;;  %v6849_v1 = vpack.c.bf16 %v13990_v45, %v13987_v10  ;;  %v6731_v57 = vadd.f32 1e-05, %v6683_v4  ;;  %v6658_v51 = vmul.f32 %v14003_v58, %v14003_v58 }
 0xe0f   : > { %v6588_v30 = vpop.xlane.xlu0 %6587  ;;  %v6775_v27 = vmul.f32 %v9454_v34, %v6703_v35 }
 0xe10   : > { %v6636_v16 = vmul.f32 0.015625, %v6588_v30  ;;  %v6681_v7 = vsub.f32 %v6633_v20, %v6657_v59  ;;  %8765 = vmatprep.mubr.msk.bf16.mxu0 %vm414_vm0, %v6849_v1  ;;  %9461 = vrsqrt.f32 %v6731_v57 }
 0xe11   : > { %v6477_v29 = vpop.xlane.xlu1 %6476  ;;  %v9456_v39 = vpop.eup %9455  ;;  %8766 = vmatmul.mubr.msk.bf16.vlgmr.msra.gmra.mxu0 %vm414_vm0, %v6850_v40  ;;  %v6803_v30 = vmul.f32 %v13964_v15, %v6775_v27 }
 0xe12   : > { %v6684_v19 = vsub.f32 %v6636_v16, %v6660_v36  ;;  %v6729_v23 = vadd.f32 1e-05, %v6681_v7  ;;  %v6773_v33 = vmul.f32 %v9456_v39, %v6701_v47  ;;  %v14015_v53 = vmul.f32 0.015625, %v6477_v29 }
 0xe13   : > { %v9458_v26 = vpop.eup %9457  ;;  %v6582_v21 = vpop.xlane.xlu0 %6581  ;;  %v14039_v29 = vadd.f32 %v13976_v46, %v6803_v30 }
 0xe14   : > { %v6776_v61 = vmul.f32 %v9458_v26, %v6704_v5  ;;  %v6732_v52 = vadd.f32 1e-05, %v6684_v19  ;;  %9463 = vrsqrt.f32 %v6729_v23  ;;  %v6634_v14 = vmul.f32 0.015625, %v6582_v21 }
 0xe15   : > { %v6471_v49 = vpop.xlane.xlu1 %6470  ;;  %v6801_v24 = vmul.f32 %v13964_v15, %v6773_v33  ;;  %v6663_v59 = vmul.f32 %v14015_v53, %v14015_v53  ;;  %v6708_v33 = vsub.f32 %v13781_v44, %v13984_v38 }
 0xe16   : > { %9465 = vrsqrt.f32 %v6732_v52  ;;  %v6682_v22 = vsub.f32 %v6634_v14, %v6658_v51  ;;  %v6804_v11 = vmul.f32 %v13964_v15, %v6776_v61  ;;  %v14024_v1 = vmul.f32 0.015625, %v6471_v49 }
 0xe17   : > { %v6480_v17 = vpop.xlane.xlu0 %6479  ;;  %v9460_v6 = vpop.eup %9459  ;;  %v14033_v34 = vadd.f32 %v13976_v46, %v6801_v24 }
 0xe18   : > { %v6730_v9 = vadd.f32 1e-05, %v6682_v22  ;;  %v6774_v4 = vmul.f32 %v9460_v6, %v6702_v12  ;;  %v14027_v40 = vmul.f32 0.015625, %v6480_v17  ;;  %v14030_v57 = vadd.f32 %v13976_v46, %v6804_v11 }
 0xe19   : > { %v6597_v28 = vpop.xlane.xlu1 %6596  ;;  %v6661_v39 = vmul.f32 %v14024_v1, %v14024_v1  ;;  %v6705_v22 = vsub.f32 %v13776_v54, %v13978_v25  ;;  %v6707_v11 = vsub.f32 %v13767_v3, %v13959_v63  ;;  %v6706_v54 = vsub.f32 %v13790_v37, %v14003_v58 }
 0xe1a   : > { %v6639_v20 = vmul.f32 0.015625, %v6597_v28  ;;  %9467 = vrsqrt.f32 %v6730_v9  ;;  %v6802_v42 = vmul.f32 %v13964_v15, %v6774_v4  ;;  %v6664_v47 = vmul.f32 %v14027_v40, %v14027_v40 }
 0xe1b   : > { %v6474_v31 = vpop.xlane.xlu0 %6473  ;;  %v6852_v35 = vpack.c.bf16 %v14030_v57, %v14039_v29 }
 0xe1c   : > { %v6687_v36 = vsub.f32 %v6639_v20, %v6663_v59  ;;  %v14036_v7 = vadd.f32 %v13976_v46, %v6802_v42  ;;  %v14049_v52 = vmul.f32 0.015625, %v6474_v31 }
 0xe1d   : > { %v6591_v16 = vpop.xlane.xlu1 %6590  ;;  %v9462_v61 = vpop.eup %9461 }
 0xe1e   : > { %v6637_v5 = vmul.f32 0.015625, %v6591_v16  ;;  %v6851_v26 = vpack.c.bf16 %v14036_v7, %v14033_v34  ;;  %v6735_v23 = vadd.f32 1e-05, %v6687_v36  ;;  %v6662_v4 = vmul.f32 %v14049_v52, %v14049_v52 }
 0xe1f   : > { %v6600_v19 = vpop.xlane.xlu0 %6599  ;;  %v6779_v59 = vmul.f32 %v9462_v61, %v6707_v11 }
 0xe20   : > { %v6640_v21 = vmul.f32 0.015625, %v6600_v19  ;;  %v6685_v51 = vsub.f32 %v6637_v5, %v6661_v39  ;;  %8769 = vmatprep.mubr.msk.bf16.mxu0 %vm414_vm0, %v6851_v26  ;;  %9469 = vrsqrt.f32 %v6735_v23 }
 0xe21   : > { %v6489_v14 = vpop.xlane.xlu1 %6488  ;;  %v9464_v49 = vpop.eup %9463  ;;  %8770 = vmatmul.mubr.msk.bf16.gmra.mxu0 %vm414_vm0, %v6852_v35  ;;  %v6807_v19 = vmul.f32 %v13964_v15, %v6779_v59 }
 0xe22   : > { %v6688_v27 = vsub.f32 %v6640_v21, %v6664_v47  ;;  %v6733_v17 = vadd.f32 1e-05, %v6685_v51  ;;  %v6777_v24 = vmul.f32 %v9464_v49, %v6705_v22  ;;  %v14061_v20 = vmul.f32 0.015625, %v6489_v14 }
 0xe23   : > { %v9466_v12 = vpop.eup %9465  ;;  %v6594_v6 = vpop.xlane.xlu0 %6593  ;;  %v14085_v14 = vadd.f32 %v13976_v46, %v6807_v19 }
 0xe24   : > { %v6780_v9 = vmul.f32 %v9466_v12, %v6708_v33  ;;  %v6736_v28 = vadd.f32 1e-05, %v6688_v27  ;;  %9471 = vrsqrt.f32 %v6733_v17  ;;  %v6638_v44 = vmul.f32 0.015625, %v6594_v6 }
 0xe25   : > { %v6483_v38 = vpop.xlane.xlu1 %6482  ;;  %v6805_v16 = vmul.f32 %v13964_v15, %v6777_v24  ;;  %v6667_v39 = vmul.f32 %v14061_v20, %v14061_v20  ;;  %v6712_v24 = vsub.f32 %v13820_v43, %v14027_v40 }
 0xe26   : > { %9473 = vrsqrt.f32 %v6736_v28  ;;  %v6686_v25 = vsub.f32 %v6638_v44, %v6662_v4  ;;  %v6808_v63 = vmul.f32 %v13964_v15, %v6780_v9  ;;  %v14070_v26 = vmul.f32 0.015625, %v6483_v38 }
 0xe27   : > { %v6492_v30 = vpop.xlane.xlu0 %6491  ;;  %v9468_v3 = vpop.eup %9467  ;;  %v14079_v61 = vadd.f32 %v13976_v46, %v6805_v16 }
 0xe28   : > { %v6734_v31 = vadd.f32 1e-05, %v6686_v25  ;;  %v6778_v36 = vmul.f32 %v9468_v3, %v6706_v54  ;;  %v14073_v47 = vmul.f32 0.015625, %v6492_v30  ;;  %v14076_v21 = vadd.f32 %v13976_v46, %v6808_v63 }
 0xe29   : > { %v6609_v42 = vpop.xlane.xlu1 %6608  ;;  %v6665_v49 = vmul.f32 %v14070_v26, %v14070_v26  ;;  %v6709_v25 = vsub.f32 %v13817_v8, %v14024_v1  ;;  %v6711_v63 = vsub.f32 %v13804_v48, %v14015_v53  ;;  %v6710_v8 = vsub.f32 %v13834_v18, %v14049_v52 }
 0xe2a   : > { %v6643_v5 = vmul.f32 0.015625, %v6609_v42  ;;  %9475 = vrsqrt.f32 %v6734_v31  ;;  %v6806_v58 = vmul.f32 %v13964_v15, %v6778_v36  ;;  %v6668_v22 = vmul.f32 %v14073_v47, %v14073_v47 }
 0xe2b   : > { %v6486_v37 = vpop.xlane.xlu0 %6485  ;;  %v6854_v11 = vpack.c.bf16 %v14076_v21, %v14085_v14 }
 0xe2c   : > { %v6691_v23 = vsub.f32 %v6643_v5, %v6667_v39  ;;  %v14082_v51 = vadd.f32 %v13976_v46, %v6806_v58  ;;  %v14095_v28 = vmul.f32 0.015625, %v6486_v37 }
 0xe2d   : > { %v6603_v35 = vpop.xlane.xlu1 %6602  ;;  %v9470_v9 = vpop.eup %9469 }
 0xe2e   : > { %v6641_v33 = vmul.f32 0.015625, %v6603_v35  ;;  %v6853_v12 = vpack.c.bf16 %v14082_v51, %v14079_v61  ;;  %v6739_v17 = vadd.f32 1e-05, %v6691_v23  ;;  %v6666_v36 = vmul.f32 %v14095_v28, %v14095_v28 }
 0xe2f   : > { %v6612_v27 = vpop.xlane.xlu0 %6611  ;;  %v6783_v39 = vmul.f32 %v9470_v9, %v6711_v63 }
 0xe30   : > { %v6644_v6 = vmul.f32 0.015625, %v6612_v27  ;;  %v6689_v4 = vsub.f32 %v6641_v33, %v6665_v49  ;;  %8773 = vmatprep.mubr.msk.bf16.mxu0 %vm414_vm0, %v6853_v12  ;;  %9477 = vrsqrt.f32 %v6739_v17 }
 0xe31   : > { %v6501_v44 = vpop.xlane.xlu1 %6500  ;;  %v9472_v38 = vpop.eup %9471  ;;  %8774 = vmatmul.mubr.msk.bf16.gmra.mxu0 %vm414_vm0, %v6854_v11  ;;  %v6811_v27 = vmul.f32 %v13964_v15, %v6783_v39 }
 0xe32   : > { %v6692_v59 = vsub.f32 %v6644_v6, %v6668_v22  ;;  %v6737_v30 = vadd.f32 1e-05, %v6689_v4  ;;  %v6781_v16 = vmul.f32 %v9472_v38, %v6709_v25  ;;  %v14116_v12 = vmul.f32 0.015625, %v6501_v44 }
 0xe33   : > { %v9474_v54 = vpop.eup %9473  ;;  %v6606_v3 = vpop.xlane.xlu0 %6605  ;;  %v14131_v44 = vadd.f32 %v13976_v46, %v6811_v27 }
 0xe34   : > { %v6784_v31 = vmul.f32 %v9474_v54, %v6712_v24  ;;  %v6740_v42 = vadd.f32 1e-05, %v6692_v59  ;;  %9479 = vrsqrt.f32 %v6737_v30  ;;  %v6642_v43 = vmul.f32 0.015625, %v6606_v3 }
 0xe35   : > { %v6495_v40 = vpop.xlane.xlu1 %6494  ;;  %v6809_v35 = vmul.f32 %v13964_v15, %v6781_v16  ;;  %v6671_v24 = vmul.f32 %v14116_v12, %v14116_v12 }
 0xe36   : > { %9481 = vrsqrt.f32 %v6740_v42  ;;  %v14107_v5 = vmul.f32 0.015625, %v6495_v40  ;;  %v6690_v1 = vsub.f32 %v6642_v43, %v6666_v36  ;;  %v6812_v53 = vmul.f32 %v13964_v15, %v6784_v31 }
 0xe37   : > { %v6504_v19 = vpop.xlane.xlu0 %6503  ;;  %v9476_v48 = vpop.eup %9475  ;;  %v14125_v9 = vadd.f32 %v13976_v46, %v6809_v35  ;;  %v6716_v40 = vsub.f32 %v13865_v2, %v14073_v47  ;;  %v6714_v47 = vsub.f32 %v13874_v62, %v14095_v28 }
 0xe38   : > { %v6738_v37 = vadd.f32 1e-05, %v6690_v1  ;;  %v6782_v23 = vmul.f32 %v9476_v48, %v6710_v8  ;;  %v6669_v49 = vmul.f32 %v14107_v5, %v14107_v5  ;;  %v14122_v6 = vadd.f32 %v13976_v46, %v6812_v53 }
 0xe39   : > { %v6615_v58 = vpop.xlane.xlu1 %6614  ;;  %v6528_v59 = vmul.f32 0.015625, %v6504_v19  ;;  %v6715_v8 = vsub.f32 %v13851_v50, %v14061_v20  ;;  %v6713_v1 = vsub.f32 %v13860_v55, %v14070_v26  ;;  %v6717_v28 = vsub.f32 %v13896_v60, %v14107_v5 }
 0xe3a   : > { %v6645_v33 = vmul.f32 0.015625, %v6615_v58  ;;  %9483 = vrsqrt.f32 %v6738_v37  ;;  %v6810_v52 = vmul.f32 %v13964_v15, %v6782_v23  ;;  %v6856_v31 = vpack.c.bf16 %v14122_v6, %v14131_v44 }
 0xe3b   : > { %v6498_v18 = vpop.xlane.xlu0 %6497  ;;  %v6672_v37 = vmul.f32 %v6528_v59, %v6528_v59 }
 0xe3c   : > { %v6693_v22 = vsub.f32 %v6645_v33, %v6669_v49  ;;  %v14119_v17 = vmul.f32 0.015625, %v6498_v18  ;;  %v14128_v4 = vadd.f32 %v13976_v46, %v6810_v52 }
 0xe3d   : > { %v6621_v11 = vpop.xlane.xlu1 %6620  ;;  %v9478_v42 = vpop.eup %9477 }
 0xe3e   : > { %v6741_v38 = vadd.f32 1e-05, %v6693_v22  ;;  %v6647_v54 = vmul.f32 0.015625, %v6621_v11  ;;  %v6855_v30 = vpack.c.bf16 %v14128_v4, %v14125_v9  ;;  %v6670_v3 = vmul.f32 %v14119_v17, %v14119_v17 }
 0xe3f   : > { %v6618_v25 = vpop.xlane.xlu0 %6617  ;;  %v6787_v49 = vmul.f32 %v9478_v42, %v6715_v8 }
 0xe40   : > { %9485 = vrsqrt.f32 %v6741_v38  ;;  %v6646_v63 = vmul.f32 0.015625, %v6618_v25  ;;  %v6695_v36 = vsub.f32 %v6647_v54, %v6671_v24  ;;  %8777 = vmatprep.mubr.msk.bf16.mxu0 %vm414_vm0, %v6855_v30 }
 0xe41   : > { %v9480_v43 = vpop.eup %9479  ;;  %8778 = vmatmul.mubr.msk.bf16.gmra.mxu0 %vm414_vm0, %v6856_v31  ;;  %v6815_v26 = vmul.f32 %v13964_v15, %v6787_v49 }
 0xe42   : > { %v6694_v16 = vsub.f32 %v6646_v63, %v6670_v3  ;;  %v6743_v19 = vadd.f32 1e-05, %v6695_v36  ;;  %v6785_v35 = vmul.f32 %v9480_v43, %v6713_v1  ;;  %v6719_v3 = vsub.f32 %v13887_v56, %v14116_v12  ;;  %v8867_v1 = vld [vmem:[%s14859_s4 + $0x50] ss:$28 sps:$4 sm:$0xff]  }
 0xe43   : > { %v9482_v39 = vpop.eup %9481  ;;  %v6624_v48 = vpop.xlane.xlu0 %6623  ;;  %v14167_v38 = vadd.f32 %v13976_v46, %v6815_v26  ;;  %v6718_v63 = vsub.f32 %v13910_v13, %v14119_v17  ;;  %v6720_v36 = vsub.f32 %v13901_v0, %v6528_v59  ;;  %8789 = vmatprep.subr.bf16.mxu1 %v8867_v1 }
 0xe44   : > { %v6788_v53 = vmul.f32 %v9482_v39, %v6716_v40  ;;  %v6742_v58 = vadd.f32 1e-05, %v6694_v16  ;;  %v6648_v23 = vmul.f32 0.015625, %v6624_v48  ;;  %9487 = vrsqrt.f32 %v6743_v19  ;;  %8790 = vmatpush3.bf16.msra.mxu1 %v8867_v1 }
 0xe45   : > { %v6813_v55 = vmul.f32 %v13964_v15, %v6785_v35 }
 0xe46   : > { %9489 = vrsqrt.f32 %v6742_v58  ;;  %v6696_v2 = vsub.f32 %v6648_v23, %v6672_v37  ;;  %v6816_v50 = vmul.f32 %v13964_v15, %v6788_v53 }
 0xe47   : > { %v9484_v33 = vpop.eup %9483  ;;  %v14159_v11 = vadd.f32 %v13976_v46, %v6813_v55 }
 0xe48   : > { %v6744_v27 = vadd.f32 1e-05, %v6696_v2  ;;  %v6786_v20 = vmul.f32 %v9484_v33, %v6714_v47  ;;  %v14156_v52 = vadd.f32 %v13976_v46, %v6816_v50 }
 0xe4a   : > { %9491 = vrsqrt.f32 %v6744_v27  ;;  %v6814_v18 = vmul.f32 %v13964_v15, %v6786_v20  ;;  %v6858_v54 = vpack.c.bf16 %v14156_v52, %v14167_v38 }
 0xe4c   : > { %v14162_v62 = vadd.f32 %v13976_v46, %v6814_v18 }
 0xe4d   : > { %v9486_v22 = vpop.eup %9485 }
 0xe4e   : > { %v6857_v24 = vpack.c.bf16 %v14162_v62, %v14159_v11  ;;  %v6789_v25 = vmul.f32 %v9486_v22, %v6717_v28 }
 0xe50   : > { %8781 = vmatprep.mubr.msk.bf16.mxu0 %vm414_vm0, %v6857_v24  ;;  %v6817_v42 = vmul.f32 %v13964_v15, %v6789_v25 }
 0xe51   : > { %v9488_v30 = vpop.eup %9487  ;;  %8782 = vmatmul.mubr.msk.bf16.gmra.mxu0 %vm414_vm0, %v6858_v54 }
 0xe52   : > { %v6791_v5 = vmul.f32 %v9488_v30, %v6719_v3  ;;  %v14183_v39 = vadd.f32 %v13976_v46, %v6817_v42 }
 0xe53   : > { %v9490_v60 = vpop.eup %9489 }
 0xe54   : > { %v6790_v31 = vmul.f32 %v9490_v60, %v6718_v63  ;;  %v6819_v13 = vmul.f32 %v13964_v15, %v6791_v5 }
 0xe56   : > { %v6818_v43 = vmul.f32 %v13964_v15, %v6790_v31  ;;  %v14194_v0 = vadd.f32 %v13976_v46, %v6819_v13 }
 0xe57   : > { %v9492_v40 = vpop.eup %9491 }
 0xe58   : > { %v6792_v16 = vmul.f32 %v9492_v40, %v6720_v36  ;;  %v14186_v56 = vadd.f32 %v13976_v46, %v6818_v43 }
 0xe5a   : > { %v6859_v12 = vpack.c.bf16 %v14186_v56, %v14183_v39  ;;  %v6820_v17 = vmul.f32 %v13964_v15, %v6792_v16  ;;  %v8868_v15 = vld [vmem:[%s14859_s4 + $0x18] ss:$28 sps:$4 sm:$0xff]  }
 0xe5b   : > { %8791 = vmatprep.subr.bf16.mxu1 %v8868_v15 }
 0xe5c   : > { %8785 = vmatprep.mubr.msk.bf16.mxu0 %vm414_vm0, %v6859_v12  ;;  %v14197_v59 = vadd.f32 %v13976_v46, %v6820_v17  ;;  %8792 = vmatpush3.bf16.msra.mxu1 %v8868_v15  ;;  %v14211_v46 = vld [vmem:[%s14860_s5 + $0x13] ss:$0 sm:$0xff] }
 0xe5e   : > { %v6860_v8 = vpack.c.bf16 %v14197_v59, %v14194_v0 }
 0xe60   : > { %8786 = vmatmul.mubr.msk.bf16.gmra.mxu0 %vm414_vm0, %v6860_v8 }
 0xed1   : > { %v8767_v19 = vpop.f32.mrf.mxu0 }
 0xed2   : > { %v14214_v48 = vadd.f32 %v8767_v19, %v14211_v46 }
 0xed3   : > { %v6960_v53 = vpop.f32.mrf.mxu0 }
 0xed4   : > { %v7081_v37 = vmul.f32 0.044715, %v14214_v48  ;;  %v14218_v58 = vadd.f32 %v14211_v46, %v6960_v53 }
 0xed5   : > { %v8768_v23 = vpop.f32.mrf.mxu0 }
 0xed6   : > { %v7105_v35 = vmul.f32 %v7081_v37, %v14214_v48  ;;  %v7079_v49 = vmul.f32 0.044715, %v14218_v58  ;;  %v6972_v2 = vadd.f32 %v8768_v23, %v14211_v46 }
 0xed7   : > { %v6963_v47 = vpop.f32.mrf.mxu0 }
 0xed8   : > { %v7129_v33 = vmul.f32 %v7105_v35, %v14214_v48  ;;  %v7103_v27 = vmul.f32 %v7079_v49, %v14218_v58  ;;  %v7082_v50 = vmul.f32 0.044715, %v6972_v2  ;;  %v6964_v20 = vadd.f32 %v14211_v46, %v6963_v47 }
 0xeda   : > { %v7153_v55 = vadd.f32 %v7129_v33, %v14214_v48  ;;  %v7127_v26 = vmul.f32 %v7103_v27, %v14218_v58  ;;  %v7106_v18 = vmul.f32 %v7082_v50, %v6972_v2  ;;  %v7080_v22 = vmul.f32 0.044715, %v6964_v20 }
 0xedc   : > { %v7177_v28 = vmul.f32 0.7978846, %v7153_v55  ;;  %v7151_v24 = vadd.f32 %v7127_v26, %v14218_v58  ;;  %v7130_v54 = vmul.f32 %v7106_v18, %v6972_v2  ;;  %v7104_v25 = vmul.f32 %v7080_v22, %v6964_v20 }
 0xede   : > { %v7175_v30 = vmul.f32 0.7978846, %v7151_v24  ;;  %v7154_v3 = vadd.f32 %v7130_v54, %v6972_v2  ;;  %v7128_v63 = vmul.f32 %v7104_v25, %v6964_v20  ;;  %9493 = vtanh.f32 %v7177_v28 }
 0xee0   : > { %v7178_v60 = vmul.f32 0.7978846, %v7154_v3  ;;  %9495 = vtanh.f32 %v7175_v30  ;;  %v7152_v5 = vadd.f32 %v7128_v63, %v6964_v20 }
 0xee1   : > { %v8771_v31 = vpop.f32.mrf.mxu0 }
 0xee2   : > { %9497 = vtanh.f32 %v7178_v60  ;;  %v14230_v42 = vadd.f32 %v8771_v31, %v14211_v46  ;;  %v7176_v36 = vmul.f32 0.7978846, %v7152_v5 }
 0xee3   : > { %v6976_v43 = vpop.f32.mrf.mxu0 }
 0xee4   : > { %v7085_v40 = vmul.f32 0.044715, %v14230_v42  ;;  %v14234_v16 = vadd.f32 %v14211_v46, %v6976_v43  ;;  %9499 = vtanh.f32 %v7176_v36  ;;  %v7058_v36 = vmul.f32 0.5, %v6972_v2 }
 0xee5   : > { %v8772_v13 = vpop.f32.mrf.mxu0 }
 0xee6   : > { %v7109_v12 = vmul.f32 %v7085_v40, %v14230_v42  ;;  %v7083_v17 = vmul.f32 0.044715, %v14234_v16  ;;  %v14239_v8 = vadd.f32 %v8772_v13, %v14211_v46 }
 0xee7   : > { %v6979_v1 = vpop.f32.mrf.mxu0 }
 0xee8   : > { %v7133_v15 = vmul.f32 %v7109_v12, %v14230_v42  ;;  %v7107_v19 = vmul.f32 %v7083_v17, %v14234_v16  ;;  %v7086_v53 = vmul.f32 0.044715, %v14239_v8  ;;  %v14245_v37 = vadd.f32 %v14211_v46, %v6979_v1 }
 0xee9   : > { %v7055_v12 = vmul.f32 0.5, %v14218_v58  ;;  %v7056_v17 = vmul.f32 0.5, %v6964_v20 }
 0xeea   : > { %v7157_v23 = vadd.f32 %v7133_v15, %v14230_v42  ;;  %v7131_v35 = vmul.f32 %v7107_v19, %v14234_v16  ;;  %v7110_v49 = vmul.f32 %v7086_v53, %v14239_v8  ;;  %v7084_v47 = vmul.f32 0.044715, %v14245_v37 }
 0xeeb   : > { %v9494_v55 = vpop.eup %9493  ;;  %v7057_v15 = vmul.f32 0.5, %v14214_v48 }
 0xeec   : > { %v7181_v33 = vmul.f32 0.7978846, %v7157_v23  ;;  %v7155_v27 = vadd.f32 %v7131_v35, %v14234_v16  ;;  %v7134_v50 = vmul.f32 %v7110_v49, %v14239_v8  ;;  %v7108_v26 = vmul.f32 %v7084_v47, %v14245_v37 }
 0xeed   : > { %v9496_v18 = vpop.eup %9495  ;;  %v7225_v31 = vadd.f32 1.0, %v9494_v55 }
 0xeee   : > { %v7179_v22 = vmul.f32 0.7978846, %v7155_v27  ;;  %v7158_v28 = vadd.f32 %v7134_v50, %v14239_v8  ;;  %v7132_v54 = vmul.f32 %v7108_v26, %v14245_v37  ;;  %9501 = vtanh.f32 %v7181_v33 }
 0xeef   : > { %v9498_v24 = vpop.eup %9497  ;;  %v7223_v60 = vadd.f32 1.0, %v9496_v18  ;;  %v7249_v47 = vmul.f32 %v7225_v31, %v7057_v15 }
 0xef0   : > { %v7226_v25 = vadd.f32 1.0, %v9498_v24  ;;  %v7182_v30 = vmul.f32 0.7978846, %v7158_v28  ;;  %9503 = vtanh.f32 %v7179_v22  ;;  %v7156_v3 = vadd.f32 %v7132_v54, %v14245_v37 }
 0xef1   : > { %v8775_v63 = vpop.f32.mrf.mxu0  ;;  %v9500_v5 = vpop.eup %9499  ;;  %v7247_v35 = vmul.f32 %v7223_v60, %v7055_v12 }
 0xef2   : > { %9505 = vtanh.f32 %v7182_v30  ;;  %v14258_v43 = vadd.f32 %v8775_v63, %v14211_v46  ;;  %v7180_v40 = vmul.f32 0.7978846, %v7156_v3  ;;  %v7224_v1 = vadd.f32 1.0, %v9500_v5 }
 0xef3   : > { %v6992_v13 = vpop.f32.mrf.mxu0  ;;  %v7250_v19 = vmul.f32 %v7226_v25, %v7058_v36 }
 0xef4   : > { %v7089_v53 = vmul.f32 0.044715, %v14258_v43  ;;  %v14264_v23 = vadd.f32 %v14211_v46, %v6992_v13  ;;  %9507 = vtanh.f32 %v7180_v40  ;;  %v7248_v49 = vmul.f32 %v7224_v1, %v7056_v17 }
 0xef5   : > { %v8776_v2 = vpop.f32.mrf.mxu0  ;;  %v7272_v50 = vpack.c.bf16 %v7250_v19, %v7249_v47 }
 0xef6   : > { %v7113_v33 = vmul.f32 %v7089_v53, %v14258_v43  ;;  %v7087_v27 = vmul.f32 0.044715, %v14264_v23  ;;  %v14269_v58 = vadd.f32 %v8776_v2, %v14211_v46  ;;  %v7271_v48 = vpack.c.bf16 %v7248_v49, %v7247_v35 }
 0xef7   : > { %v6995_v20 = vpop.f32.mrf.mxu0  ;;  %v7062_v35 = vmul.f32 0.5, %v14239_v8 }
 0xef8   : > { %v7137_v55 = vmul.f32 %v7113_v33, %v14258_v43  ;;  %v7111_v26 = vmul.f32 %v7087_v27, %v14264_v23  ;;  %v7090_v18 = vmul.f32 0.044715, %v14269_v58  ;;  %v14275_v22 = vadd.f32 %v14211_v46, %v6995_v20  ;;  %8793 = vmatprep.mubr.msk.bf16.mxu1 %vm582_vm1, %v7271_v48 }
 0xef9   : > { %8794 = vmatmul.mubr.msk.bf16.vlgmr.msra.gmra.mxu1 %vm582_vm1, %v7272_v50  ;;  %v7059_v20 = vmul.f32 0.5, %v14234_v16  ;;  %v7060_v48 = vmul.f32 0.5, %v14245_v37 }
 0xefa   : > { %v7161_v28 = vadd.f32 %v7137_v55, %v14258_v43  ;;  %v7135_v24 = vmul.f32 %v7111_v26, %v14264_v23  ;;  %v7114_v54 = vmul.f32 %v7090_v18, %v14269_v58  ;;  %v7088_v25 = vmul.f32 0.044715, %v14275_v22 }
 0xefb   : > { %v9502_v60 = vpop.eup %9501  ;;  %v7061_v55 = vmul.f32 0.5, %v14230_v42 }
 0xefc   : > { %v7185_v30 = vmul.f32 0.7978846, %v7161_v28  ;;  %v7159_v3 = vadd.f32 %v7135_v24, %v14264_v23  ;;  %v7138_v63 = vmul.f32 %v7114_v54, %v14269_v58  ;;  %v7112_v5 = vmul.f32 %v7088_v25, %v14275_v22 }
 0xefd   : > { %v9504_v31 = vpop.eup %9503  ;;  %v7229_v47 = vadd.f32 1.0, %v9502_v60 }
 0xefe   : > { %v7183_v36 = vmul.f32 0.7978846, %v7159_v3  ;;  %v7162_v40 = vadd.f32 %v7138_v63, %v14269_v58  ;;  %v7136_v12 = vmul.f32 %v7112_v5, %v14275_v22  ;;  %9509 = vtanh.f32 %v7185_v30 }
 0xeff   : > { %v9506_v13 = vpop.eup %9505  ;;  %v7227_v53 = vadd.f32 1.0, %v9504_v31  ;;  %v7253_v37 = vmul.f32 %v7229_v47, %v7061_v55 }
 0xf00   : > { %v7186_v17 = vmul.f32 0.7978846, %v7162_v40  ;;  %v7230_v1 = vadd.f32 1.0, %v9506_v13  ;;  %9511 = vtanh.f32 %v7183_v36  ;;  %v7160_v15 = vadd.f32 %v7136_v12, %v14275_v22 }
 0xf01   : > { %v8779_v19 = vpop.f32.mrf.mxu0  ;;  %v9508_v2 = vpop.eup %9507  ;;  %v7251_v24 = vmul.f32 %v7227_v53, %v7059_v20 }
 0xf02   : > { %9513 = vtanh.f32 %v7186_v17  ;;  %v14291_v49 = vadd.f32 %v8779_v19, %v14211_v46  ;;  %v7184_v33 = vmul.f32 0.7978846, %v7160_v15  ;;  %v7228_v50 = vadd.f32 1.0, %v9508_v2 }
 0xf03   : > { %v7008_v27 = vpop.f32.mrf.mxu0  ;;  %v7254_v8 = vmul.f32 %v7230_v1, %v7062_v35 }
 0xf04   : > { %v7093_v26 = vmul.f32 0.044715, %v14291_v49  ;;  %v14298_v18 = vadd.f32 %v14211_v46, %v7008_v27  ;;  %9515 = vtanh.f32 %v7184_v33  ;;  %v7252_v54 = vmul.f32 %v7228_v50, %v7060_v48 }
 0xf05   : > { %v8780_v28 = vpop.f32.mrf.mxu0  ;;  %v7274_v31 = vpack.c.bf16 %v7254_v8, %v7253_v37 }
 0xf06   : > { %v7117_v25 = vmul.f32 %v7093_v26, %v14291_v49  ;;  %v7091_v30 = vmul.f32 0.044715, %v14298_v18  ;;  %v14303_v16 = vadd.f32 %v8780_v28, %v14211_v46  ;;  %v7273_v42 = vpack.c.bf16 %v7252_v54, %v7251_v24 }
 0xf07   : > { %v7011_v3 = vpop.f32.mrf.mxu0  ;;  %v7066_v24 = vmul.f32 0.5, %v14269_v58 }
 0xf08   : > { %v7141_v63 = vmul.f32 %v7117_v25, %v14291_v49  ;;  %v7115_v60 = vmul.f32 %v7091_v30, %v14298_v18  ;;  %v7094_v5 = vmul.f32 0.044715, %v14303_v16  ;;  %v14309_v36 = vadd.f32 %v14211_v46, %v7011_v3  ;;  %8797 = vmatprep.mubr.msk.bf16.mxu1 %vm582_vm1, %v7273_v42 }
 0xf09   : > { %8798 = vmatmul.mubr.msk.bf16.gmra.mxu1 %vm582_vm1, %v7274_v31  ;;  %v7063_v3 = vmul.f32 0.5, %v14264_v23  ;;  %v7064_v42 = vmul.f32 0.5, %v14275_v22 }
 0xf0a   : > { %v7165_v40 = vadd.f32 %v7141_v63, %v14291_v49  ;;  %v7139_v13 = vmul.f32 %v7115_v60, %v14298_v18  ;;  %v7118_v12 = vmul.f32 %v7094_v5, %v14303_v16  ;;  %v7092_v17 = vmul.f32 0.044715, %v14309_v36 }
 0xf0b   : > { %v9510_v53 = vpop.eup %9509  ;;  %v7065_v60 = vmul.f32 0.5, %v14258_v43 }
 0xf0c   : > { %v7189_v1 = vmul.f32 0.7978846, %v7165_v40  ;;  %v7163_v15 = vadd.f32 %v7139_v13, %v14298_v18  ;;  %v7142_v19 = vmul.f32 %v7118_v12, %v14303_v16  ;;  %v7116_v2 = vmul.f32 %v7092_v17, %v14309_v36 }
 0xf0d   : > { %v9512_v35 = vpop.eup %9511  ;;  %v7233_v25 = vadd.f32 1.0, %v9510_v53 }
 0xf0e   : > { %v7187_v47 = vmul.f32 0.7978846, %v7163_v15  ;;  %v7166_v33 = vadd.f32 %v7142_v19, %v14303_v16  ;;  %v7140_v20 = vmul.f32 %v7116_v2, %v14309_v36  ;;  %9517 = vtanh.f32 %v7189_v1 }
 0xf0f   : > { %v9514_v27 = vpop.eup %9513  ;;  %v7231_v8 = vadd.f32 1.0, %v9512_v35  ;;  %v7257_v22 = vmul.f32 %v7233_v25, %v7065_v60  ;;  %v7070_v60 = vmul.f32 0.5, %v14303_v16 }
 0xf10   : > { %v7190_v48 = vmul.f32 0.7978846, %v7166_v33  ;;  %v7234_v50 = vadd.f32 1.0, %v9514_v27  ;;  %9519 = vtanh.f32 %v7187_v47  ;;  %v7164_v55 = vadd.f32 %v7140_v20, %v14309_v36 }
 0xf11   : > { %v8783_v26 = vpop.f32.mrf.mxu0  ;;  %v9516_v28 = vpop.eup %9515  ;;  %v7255_v13 = vmul.f32 %v7231_v8, %v7063_v3  ;;  %v7069_v3 = vmul.f32 0.5, %v14291_v49 }
 0xf12   : > { %9521 = vtanh.f32 %v7190_v48  ;;  %v14325_v54 = vadd.f32 %v8783_v26, %v14211_v46  ;;  %v7188_v30 = vmul.f32 0.7978846, %v7164_v55  ;;  %v7232_v63 = vadd.f32 1.0, %v9516_v28 }
 0xf13   : > { %v7024_v37 = vpop.f32.mrf.mxu0  ;;  %v7258_v58 = vmul.f32 %v7234_v50, %v7066_v24 }
 0xf14   : > { %v7097_v5 = vmul.f32 0.044715, %v14325_v54  ;;  %v14332_v31 = vadd.f32 %v14211_v46, %v7024_v37  ;;  %9523 = vtanh.f32 %v7188_v30  ;;  %v7256_v12 = vmul.f32 %v7232_v63, %v7064_v42 }
 0xf15   : > { %v8784_v40 = vpop.f32.mrf.mxu0  ;;  %v7276_v35 = vpack.c.bf16 %v7258_v58, %v7257_v22 }
 0xf16   : > { %v7121_v17 = vmul.f32 %v7097_v5, %v14325_v54  ;;  %v7095_v1 = vmul.f32 0.044715, %v14332_v31  ;;  %v14337_v23 = vadd.f32 %v8784_v40, %v14211_v46  ;;  %v7275_v43 = vpack.c.bf16 %v7256_v12, %v7255_v13 }
 0xf17   : > { %v7027_v15 = vpop.f32.mrf.mxu0 }
 0xf18   : > { %v7145_v19 = vmul.f32 %v7121_v17, %v14325_v54  ;;  %v7119_v53 = vmul.f32 %v7095_v1, %v14332_v31  ;;  %v7098_v2 = vmul.f32 0.044715, %v14337_v23  ;;  %v14343_v47 = vadd.f32 %v14211_v46, %v7027_v15  ;;  %8801 = vmatprep.mubr.msk.bf16.mxu1 %vm582_vm1, %v7275_v43 }
 0xf19   : > { %8802 = vmatmul.mubr.msk.bf16.gmra.mxu1 %vm582_vm1, %v7276_v35 }
 0xf1a   : > { %v7169_v33 = vadd.f32 %v7145_v19, %v14325_v54  ;;  %v7143_v27 = vmul.f32 %v7119_v53, %v14332_v31  ;;  %v7122_v20 = vmul.f32 %v7098_v2, %v14337_v23  ;;  %v7096_v48 = vmul.f32 0.044715, %v14343_v47 }
 0xf1b   : > { %v9518_v8 = vpop.eup %9517  ;;  %v7067_v19 = vmul.f32 0.5, %v14298_v18  ;;  %v7068_v53 = vmul.f32 0.5, %v14309_v36 }
 0xf1c   : > { %v7193_v50 = vmul.f32 0.7978846, %v7169_v33  ;;  %v7167_v55 = vadd.f32 %v7143_v27, %v14332_v31  ;;  %v7146_v26 = vmul.f32 %v7122_v20, %v14337_v23  ;;  %v7120_v28 = vmul.f32 %v7096_v48, %v14343_v47 }
 0xf1d   : > { %v9520_v24 = vpop.eup %9519  ;;  %v7237_v15 = vadd.f32 1.0, %v9518_v8 }
 0xf1e   : > { %v7191_v25 = vmul.f32 0.7978846, %v7167_v55  ;;  %v7170_v30 = vadd.f32 %v7146_v26, %v14337_v23  ;;  %v7144_v42 = vmul.f32 %v7120_v28, %v14343_v47  ;;  %9525 = vtanh.f32 %v7193_v50 }
 0xf1f   : > { %v9522_v37 = vpop.eup %9521  ;;  %v7235_v12 = vadd.f32 1.0, %v9520_v24  ;;  %v7261_v18 = vmul.f32 %v7237_v15, %v7069_v3 }
 0xf20   : > { %v8787_v63 = vpop.f32.mrf.mxu0  ;;  %v7194_v5 = vmul.f32 0.7978846, %v7170_v30  ;;  %9527 = vtanh.f32 %v7191_v25  ;;  %v7168_v40 = vadd.f32 %v7144_v42, %v14343_v47  ;;  %v7238_v17 = vadd.f32 1.0, %v9522_v37 }
 0xf21   : > { %v14359_v58 = vadd.f32 %v8787_v63, %v14211_v46  ;;  %v9524_v1 = vpop.eup %9523  ;;  %v7259_v50 = vmul.f32 %v7235_v12, %v7067_v19 }
 0xf22   : > { %v7040_v13 = vpop.f32.mrf.mxu0  ;;  %9529 = vtanh.f32 %v7194_v5  ;;  %v7192_v16 = vmul.f32 0.7978846, %v7168_v40  ;;  %v7236_v2 = vadd.f32 1.0, %v9524_v1  ;;  %v7262_v20 = vmul.f32 %v7238_v17, %v7070_v60 }
 0xf23   : > { %v7101_v49 = vmul.f32 0.044715, %v14359_v58  ;;  %v14364_v22 = vadd.f32 %v14211_v46, %v7040_v13 }
 0xf24   : > { %v8788_v43 = vpop.f32.mrf.mxu0  ;;  %9531 = vtanh.f32 %v7192_v16  ;;  %v7260_v55 = vmul.f32 %v7236_v2, %v7068_v53  ;;  %v7278_v42 = vpack.c.bf16 %v7262_v20, %v7261_v18  ;;  %v7071_v20 = vmul.f32 0.5, %v14332_v31 }
 0xf25   : > { %v7125_v35 = vmul.f32 %v7101_v49, %v14359_v58  ;;  %v7099_v33 = vmul.f32 0.044715, %v14364_v22  ;;  %v7052_v27 = vadd.f32 %v8788_v43, %v14211_v46 }
 0xf26   : > { %v7043_v48 = vpop.f32.mrf.mxu0  ;;  %v7277_v24 = vpack.c.bf16 %v7260_v55, %v7259_v50  ;;  %v7073_v55 = vmul.f32 0.5, %v14325_v54  ;;  %v7075_v54 = vmul.f32 0.5, %v14364_v22 }
 0xf27   : > { %v7149_v26 = vmul.f32 %v7125_v35, %v14359_v58  ;;  %v7123_v8 = vmul.f32 %v7099_v33, %v14364_v22  ;;  %v7102_v28 = vmul.f32 0.044715, %v7052_v27  ;;  %v7044_v36 = vadd.f32 %v14211_v46, %v7043_v48 }
 0xf28   : > { %8805 = vmatprep.mubr.msk.bf16.mxu1 %vm582_vm1, %v7277_v24  ;;  %v7074_v35 = vmul.f32 0.5, %v14337_v23  ;;  %v7072_v48 = vmul.f32 0.5, %v14343_v47  ;;  %v7078_v47 = vmul.f32 0.5, %v7052_v27 }
 0xf29   : > { %v7173_v25 = vadd.f32 %v7149_v26, %v14359_v58  ;;  %v7147_v30 = vmul.f32 %v7123_v8, %v14364_v22  ;;  %v7126_v37 = vmul.f32 %v7102_v28, %v7052_v27  ;;  %v7100_v63 = vmul.f32 0.044715, %v7044_v36  ;;  %8806 = vmatmul.mubr.msk.bf16.gmra.mxu1 %vm582_vm1, %v7278_v42 }
 0xf2b   : > { %v7197_v60 = vmul.f32 0.7978846, %v7173_v25  ;;  %v7171_v5 = vadd.f32 %v7147_v30, %v14364_v22  ;;  %v7150_v40 = vmul.f32 %v7126_v37, %v7052_v27  ;;  %v7124_v13 = vmul.f32 %v7100_v63, %v7044_v36  ;;  %v9526_v46 = vpop.eup %9525 }
 0xf2c   : > { %v7241_v33 = vadd.f32 1.0, %v9526_v46 }
 0xf2d   : > { %v7195_v3 = vmul.f32 0.7978846, %v7171_v5  ;;  %v7174_v12 = vadd.f32 %v7150_v40, %v7052_v27  ;;  %v7148_v17 = vmul.f32 %v7124_v13, %v7044_v36  ;;  %v9528_v1 = vpop.eup %9527  ;;  %9533 = vtanh.f32 %v7197_v60  ;;  %v14392_v27 = vld [vmem:[%s14860_s5 + $0x14] ss:$0 sm:$0xff] }
 0xf2e   : > { %v7239_v53 = vadd.f32 1.0, %v9528_v1  ;;  %v7265_v18 = vmul.f32 %v7241_v33, %v7073_v55  ;;  %v7076_v5 = vmul.f32 0.5, %v7044_v36  ;;  %v7077_v13 = vmul.f32 0.5, %v14359_v58 }
 0xf2f   : > { %v7198_v49 = vmul.f32 0.7978846, %v7174_v12  ;;  %v9530_v15 = vpop.eup %9529  ;;  %9535 = vtanh.f32 %v7195_v3  ;;  %v7172_v16 = vadd.f32 %v7148_v17, %v7044_v36 }
 0xf30   : > { %v7242_v43 = vadd.f32 1.0, %v9530_v15  ;;  %v7263_v8 = vmul.f32 %v7239_v53, %v7071_v20 }
 0xf31   : > { %9537 = vtanh.f32 %v7198_v49  ;;  %v7196_v19 = vmul.f32 0.7978846, %v7172_v16  ;;  %v9532_v2 = vpop.eup %9531 }
 0xf32   : > { %v7240_v50 = vadd.f32 1.0, %v9532_v2  ;;  %v7266_v26 = vmul.f32 %v7242_v43, %v7074_v35 }
 0xf33   : > { %9539 = vtanh.f32 %v7196_v19 }
 0xf34   : > { %v7264_v28 = vmul.f32 %v7240_v50, %v7072_v48  ;;  %v7280_v25 = vpack.c.bf16 %v7266_v26, %v7265_v18 }
 0xf36   : > { %v7279_v24 = vpack.c.bf16 %v7264_v28, %v7263_v8 }
 0xf38   : > { %8809 = vmatprep.mubr.msk.bf16.mxu1 %vm582_vm1, %v7279_v24 }
 0xf39   : > { %8810 = vmatmul.mubr.msk.bf16.gmra.mxu1 %vm582_vm1, %v7280_v25 }
 0xf3a   : > { %v9534_v23 = vpop.eup %9533 }
 0xf3b   : > { %v7245_v60 = vadd.f32 1.0, %v9534_v23 }
 0xf3c   : > { %v9536_v30 = vpop.eup %9535 }
 0xf3d   : > { %v7243_v31 = vadd.f32 1.0, %v9536_v30  ;;  %v7269_v17 = vmul.f32 %v7245_v60, %v7077_v13 }
 0xf3e   : > { %v9538_v37 = vpop.eup %9537 }
 0xf3f   : > { %v7246_v42 = vadd.f32 1.0, %v9538_v37  ;;  %v7267_v12 = vmul.f32 %v7243_v31, %v7075_v54 }
 0xf40   : > { %v9540_v63 = vpop.eup %9539 }
 0xf41   : > { %v7244_v40 = vadd.f32 1.0, %v9540_v63  ;;  %v7270_v3 = vmul.f32 %v7246_v42, %v7078_v47 }
 0xf43   : > { %v7268_v46 = vmul.f32 %v7244_v40, %v7076_v5  ;;  %v7282_v49 = vpack.c.bf16 %v7270_v3, %v7269_v17 }
 0xf45   : > { %v7281_v1 = vpack.c.bf16 %v7268_v46, %v7267_v12 }
 0xf47   : > { %8813 = vmatprep.mubr.msk.bf16.mxu1 %vm582_vm1, %v7281_v1 }
 0xf48   : > { %8814 = vmatmul.mubr.msk.bf16.gmra.mxu1 %vm582_vm1, %v7282_v49 }
 0xfb9   : > { %v8795_v22 = vpop.f32.mrf.mxu1 }
 0xfba   : > { %v7379_v36 = vadd.f32 %v8795_v22, %v14392_v27 }
 0xfbb   : > { %v7370_v15 = vpop.f32.mrf.mxu1 }
 0xfbc   : > { %v14396_v58 = vadd.f32 %v7379_v36, %v13993_v41  ;;  %v7371_v16 = vadd.f32 %v14392_v27, %v7370_v15 }
 0xfbd   : > { %v8796_v43 = vpop.f32.mrf.mxu1 }
 0xfbe   : > { %v14400_v19 = vadd.f32 %v7371_v16, %v13987_v10  ;;  %v7382_v53 = vadd.f32 %v8796_v43, %v14392_v27  ;;  %v7497_v2 = vsel %vm414_vm0, %v14396_v58, 0.0  ;;  %v7589_v50 = vmul.f32 %v14396_v58, %v14396_v58 }
 0xfbf   : > { %7498 = vadd.xlane.f32.xlu1 %v7497_v2  ;;  %v7373_v35 = vpop.f32.mrf.mxu1 }
 0xfc0   : > { %v14406_v33 = vadd.f32 %v7382_v53, %v13982_v32  ;;  %v7374_v20 = vadd.f32 %v14392_v27, %v7373_v35  ;;  %v7491_v10 = vsel %vm414_vm0, %v14400_v19, 0.0  ;;  %v7617_v55 = vsel %vm414_vm0, %v7589_v50, 0.0 }
 0xfc1   : > { %v7587_v26 = vmul.f32 %v14400_v19, %v14400_v19 }
 0xfc2   : > { %v14410_v41 = vadd.f32 %v7374_v20, %v13990_v45  ;;  %v7500_v48 = vsel %vm414_vm0, %v14406_v33, 0.0  ;;  %v7590_v45 = vmul.f32 %v14406_v33, %v14406_v33 }
 0xfc3   : > { %7501 = vadd.xlane.f32.xlu0 %v7500_v48  ;;  %7492 = vadd.xlane.f32.xlu1 %v7491_v10  ;;  %v7611_v24 = vsel %vm414_vm0, %v7587_v26, 0.0 }
 0xfc4   : > { %v7494_v32 = vsel %vm414_vm0, %v14410_v41, 0.0  ;;  %v7620_v18 = vsel %vm414_vm0, %v7590_v45, 0.0  ;;  %v7588_v25 = vmul.f32 %v14410_v41, %v14410_v41 }
 0xfc6   : > { %v7614_v47 = vsel %vm414_vm0, %v7588_v25, 0.0 }
 0xfc7   : > { %7495 = vadd.xlane.f32.xlu0 %v7494_v32  ;;  %7618 = vadd.xlane.f32.xlu1 %v7617_v55 }
 0xfc9   : > { %v8799_v8 = vpop.f32.mrf.mxu1 }
 0xfca   : > { %v7395_v28 = vadd.f32 %v8799_v8, %v14392_v27 }
 0xfcb   : > { %7621 = vadd.xlane.f32.xlu0 %v7620_v18  ;;  %7612 = vadd.xlane.f32.xlu1 %v7611_v24  ;;  %v7386_v23 = vpop.f32.mrf.mxu1 }
 0xfcc   : > { %v14431_v30 = vadd.f32 %v7395_v28, %v14039_v29  ;;  %v7387_v37 = vadd.f32 %v14392_v27, %v7386_v23 }
 0xfcd   : > { %v8800_v42 = vpop.f32.mrf.mxu1 }
 0xfce   : > { %v14435_v31 = vadd.f32 %v7387_v37, %v14033_v34  ;;  %v7398_v63 = vadd.f32 %v8800_v42, %v14392_v27  ;;  %v7509_v60 = vsel %vm414_vm0, %v14431_v30, 0.0  ;;  %v7593_v3 = vmul.f32 %v14431_v30, %v14431_v30 }
 0xfcf   : > { %7615 = vadd.xlane.f32.xlu0 %v7614_v47  ;;  %7510 = vadd.xlane.f32.xlu1 %v7509_v60  ;;  %v7389_v54 = vpop.f32.mrf.mxu1 }
 0xfd0   : > { %v14442_v5 = vadd.f32 %v7398_v63, %v14030_v57  ;;  %v7390_v29 = vadd.f32 %v14392_v27, %v7389_v54  ;;  %v7503_v13 = vsel %vm414_vm0, %v14435_v31, 0.0  ;;  %v7629_v12 = vsel %vm414_vm0, %v7593_v3, 0.0 }
 0xfd1   : > { %v7591_v46 = vmul.f32 %v14435_v31, %v14435_v31 }
 0xfd2   : > { %v14446_v40 = vadd.f32 %v7390_v29, %v14036_v7  ;;  %v7512_v34 = vsel %vm414_vm0, %v14442_v5, 0.0  ;;  %v7594_v7 = vmul.f32 %v14442_v5, %v14442_v5 }
 0xfd3   : > { %7513 = vadd.xlane.f32.xlu0 %v7512_v34  ;;  %7504 = vadd.xlane.f32.xlu1 %v7503_v13  ;;  %v7623_v22 = vsel %vm414_vm0, %v7591_v46, 0.0 }
 0xfd4   : > { %v7506_v57 = vsel %vm414_vm0, %v14446_v40, 0.0  ;;  %v7632_v49 = vsel %vm414_vm0, %v7594_v7, 0.0  ;;  %v7592_v36 = vmul.f32 %v14446_v40, %v14446_v40 }
 0xfd6   : > { %v7626_v20 = vsel %vm414_vm0, %v7592_v36, 0.0 }
 0xfd7   : > { %7507 = vadd.xlane.f32.xlu0 %v7506_v57  ;;  %7630 = vadd.xlane.f32.xlu1 %v7629_v12 }
 0xfd9   : > { %v8803_v17 = vpop.f32.mrf.mxu1 }
 0xfda   : > { %v7411_v1 = vadd.f32 %v8803_v17, %v14392_v27 }
 0xfdb   : > { %7633 = vadd.xlane.f32.xlu0 %v7632_v49  ;;  %7624 = vadd.xlane.f32.xlu1 %v7623_v22  ;;  %v7402_v15 = vpop.f32.mrf.mxu1 }
 0xfdc   : > { %v14467_v16 = vadd.f32 %v7411_v1, %v14085_v14  ;;  %v7403_v43 = vadd.f32 %v14392_v27, %v7402_v15 }
 0xfdd   : > { %v8804_v53 = vpop.f32.mrf.mxu1 }
 0xfde   : > { %v14471_v2 = vadd.f32 %v7403_v43, %v14079_v61  ;;  %v7414_v35 = vadd.f32 %v8804_v53, %v14392_v27  ;;  %v7521_v48 = vsel %vm414_vm0, %v14467_v16, 0.0  ;;  %v7597_v45 = vmul.f32 %v14467_v16, %v14467_v16 }
 0xfdf   : > { %7627 = vadd.xlane.f32.xlu0 %v7626_v20  ;;  %7522 = vadd.xlane.f32.xlu1 %v7521_v48  ;;  %v7405_v10 = vpop.f32.mrf.mxu1 }
 0xfe0   : > { %v14478_v50 = vadd.f32 %v7414_v35, %v14076_v21  ;;  %v7406_v14 = vadd.f32 %v14392_v27, %v7405_v10  ;;  %v7515_v55 = vsel %vm414_vm0, %v14471_v2, 0.0  ;;  %v7641_v26 = vsel %vm414_vm0, %v7597_v45, 0.0 }
 0xfe1   : > { %v7595_v8 = vmul.f32 %v14471_v2, %v14471_v2 }
 0xfe2   : > { %v14482_v32 = vadd.f32 %v7406_v14, %v14082_v51  ;;  %v7524_v61 = vsel %vm414_vm0, %v14478_v50, 0.0  ;;  %v7598_v51 = vmul.f32 %v14478_v50, %v14478_v50 }
 0xfe3   : > { %7525 = vadd.xlane.f32.xlu0 %v7524_v61  ;;  %7516 = vadd.xlane.f32.xlu1 %v7515_v55  ;;  %v7635_v25 = vsel %vm414_vm0, %v7595_v8, 0.0 }
 0xfe4   : > { %v7518_v21 = vsel %vm414_vm0, %v14482_v32, 0.0  ;;  %v7644_v24 = vsel %vm414_vm0, %v7598_v51, 0.0  ;;  %v7596_v23 = vmul.f32 %v14482_v32, %v14482_v32 }
 0xfe6   : > { %v7638_v29 = vsel %vm414_vm0, %v7596_v23, 0.0 }
 0xfe7   : > { %7519 = vadd.xlane.f32.xlu0 %v7518_v21  ;;  %7642 = vadd.xlane.f32.xlu1 %v7641_v26 }
 0xfe9   : > { %v8807_v28 = vpop.f32.mrf.mxu1 }
 0xfea   : > { %v7427_v18 = vadd.f32 %v8807_v28, %v14392_v27 }
 0xfeb   : > { %7645 = vadd.xlane.f32.xlu0 %v7644_v24  ;;  %7636 = vadd.xlane.f32.xlu1 %v7635_v25  ;;  %v7418_v37 = vpop.f32.mrf.mxu1 }
 0xfec   : > { %v14503_v42 = vadd.f32 %v7427_v18, %v14131_v44  ;;  %v7419_v63 = vadd.f32 %v14392_v27, %v7418_v37 }
 0xfed   : > { %v8808_v47 = vpop.f32.mrf.mxu1 }
 0xfee   : > { %v14507_v60 = vadd.f32 %v7419_v63, %v14125_v9  ;;  %v7430_v54 = vadd.f32 %v8808_v47, %v14392_v27  ;;  %v7533_v34 = vsel %vm414_vm0, %v14503_v42, 0.0  ;;  %v7601_v7 = vmul.f32 %v14503_v42, %v14503_v42 }
 0xfef   : > { %7639 = vadd.xlane.f32.xlu0 %v7638_v29  ;;  %7534 = vadd.xlane.f32.xlu1 %v7533_v34  ;;  %v7421_v13 = vpop.f32.mrf.mxu1 }
 0xff0   : > { %v14514_v3 = vadd.f32 %v7430_v54, %v14122_v6  ;;  %v7422_v44 = vadd.f32 %v14392_v27, %v7421_v13  ;;  %v7527_v12 = vsel %vm414_vm0, %v14507_v60, 0.0  ;;  %v7653_v46 = vsel %vm414_vm0, %v7601_v7, 0.0 }
 0xff1   : > { %v7599_v17 = vmul.f32 %v14507_v60, %v14507_v60 }
 0xff2   : > { %v14518_v57 = vadd.f32 %v7422_v44, %v14128_v4  ;;  %v7536_v9 = vsel %vm414_vm0, %v14514_v3, 0.0  ;;  %v7602_v4 = vmul.f32 %v14514_v3, %v14514_v3 }
 0xff3   : > { %7537 = vadd.xlane.f32.xlu0 %v7536_v9  ;;  %7528 = vadd.xlane.f32.xlu1 %v7527_v12  ;;  %v7647_v36 = vsel %vm414_vm0, %v7599_v17, 0.0 }
 0xff4   : > { %v7530_v6 = vsel %vm414_vm0, %v14518_v57, 0.0  ;;  %v7656_v22 = vsel %vm414_vm0, %v7602_v4, 0.0  ;;  %v7600_v15 = vmul.f32 %v14518_v57, %v14518_v57 }
 0xff6   : > { %v7650_v14 = vsel %vm414_vm0, %v7600_v15, 0.0 }
 0xff7   : > { %7531 = vadd.xlane.f32.xlu0 %v7530_v6  ;;  %7654 = vadd.xlane.f32.xlu1 %v7653_v46 }
 0xff9   : > { %v8811_v1 = vpop.f32.mrf.mxu1 }
 0xffa   : > { %v7443_v49 = vadd.f32 %v8811_v1, %v14392_v27 }
 0xffb   : > { %7657 = vadd.xlane.f32.xlu0 %v7656_v22  ;;  %7648 = vadd.xlane.f32.xlu1 %v7647_v36  ;;  %v7434_v43 = vpop.f32.mrf.mxu1 }
 0xffc   : > { %v14539_v53 = vadd.f32 %v7443_v49, %v14167_v38  ;;  %v7435_v35 = vadd.f32 %v14392_v27, %v7434_v43 }
 0xffd   : > { %v8812_v20 = vpop.f32.mrf.mxu1 }
 0xffe   : > { %v14543_v48 = vadd.f32 %v7435_v35, %v14159_v11  ;;  %v7446_v10 = vadd.f32 %v8812_v20, %v14392_v27  ;;  %v7545_v61 = vsel %vm414_vm0, %v14539_v53, 0.0  ;;  %v7605_v51 = vmul.f32 %v14539_v53, %v14539_v53 }
 0xfff   : > { %7651 = vadd.xlane.f32.xlu0 %v7650_v14  ;;  %7546 = vadd.xlane.f32.xlu1 %v7545_v61  ;;  %v7437_v55 = vpop.f32.mrf.mxu1 }
0x1000   : > { %v14550_v45 = vadd.f32 %v7446_v10, %v14156_v52  ;;  %v7438_v38 = vadd.f32 %v14392_v27, %v7437_v55  ;;  %v7539_v26 = vsel %vm414_vm0, %v14543_v48, 0.0  ;;  %v7603_v52 = vmul.f32 %v14543_v48, %v14543_v48 }
0x1002   : > { %v14554_v21 = vadd.f32 %v7438_v38, %v14162_v62  ;;  %v7548_v11 = vsel %vm414_vm0, %v14550_v45, 0.0  ;;  %v7665_v62 = vsel %vm414_vm0, %v7605_v51, 0.0  ;;  %v7606_v28 = vmul.f32 %v14550_v45, %v14550_v45 }
0x1003   : > { %7549 = vadd.xlane.f32.xlu0 %v7548_v11  ;;  %7540 = vadd.xlane.f32.xlu1 %v7539_v26  ;;  %v7659_v23 = vsel %vm414_vm0, %v7603_v52, 0.0 }
0x1004   : > { %v7542_v8 = vsel %vm414_vm0, %v14554_v21, 0.0  ;;  %v7668_v47 = vsel %vm414_vm0, %v7606_v28, 0.0  ;;  %v7604_v54 = vmul.f32 %v14554_v21, %v14554_v21 }
0x1006   : > { %v7662_v7 = vsel %vm414_vm0, %v7604_v54, 0.0 }
0x1007   : > { %7543 = vadd.xlane.f32.xlu0 %v7542_v8  ;;  %7666 = vadd.xlane.f32.xlu1 %v7665_v62 }
0x1008   : > { %v8815_v18 = vpop.f32.mrf.mxu1 }
0x1009   : > { %v7459_v24 = vadd.f32 %v8815_v18, %v14392_v27 }
0x100a   : > { %v7450_v25 = vpop.f32.mrf.mxu1 }
0x100b   : > { %v14572_v37 = vadd.f32 %v7459_v24, %v14194_v0  ;;  %v7451_v63 = vadd.f32 %v14392_v27, %v7450_v25  ;;  %7669 = vadd.xlane.f32.xlu0 %v7668_v47  ;;  %7660 = vadd.xlane.f32.xlu1 %v7659_v23 }
0x100c   : > { %v8816_v29 = vpop.f32.mrf.mxu1 }
0x100d   : > { %v7462_v34 = vadd.f32 %v8816_v29, %v14392_v27  ;;  %v7557_v13 = vsel %vm414_vm0, %v14572_v37, 0.0  ;;  %v14582_v9 = vadd.f32 %v7451_v63, %v14183_v39 }
0x100e   : > { %v7453_v44 = vpop.f32.mrf.mxu1 }
0x100f   : > { %v14585_v0 = vadd.f32 %v7462_v34, %v14197_v59  ;;  %v7454_v12 = vadd.f32 %v14392_v27, %v7453_v44  ;;  %7663 = vadd.xlane.f32.xlu0 %v7662_v7  ;;  %7558 = vadd.xlane.f32.xlu1 %v7557_v13  ;;  %v7551_v4 = vsel %vm414_vm0, %v14582_v9, 0.0  ;;  %v7607_v39 = vmul.f32 %v14582_v9, %v14582_v9 }
0x1011   : > { %v7560_v6 = vsel %vm414_vm0, %v14585_v0, 0.0  ;;  %v14592_v46 = vadd.f32 %v7454_v12, %v14186_v56  ;;  %v7671_v27 = vsel %vm414_vm0, %v7607_v39, 0.0  ;;  %v7609_v56 = vmul.f32 %v14572_v37, %v14572_v37 }
0x1012   : > { %v7610_v22 = vmul.f32 %v14585_v0, %v14585_v0 }
0x1013   : > { %7561 = vadd.xlane.f32.xlu0 %v7560_v6  ;;  %7552 = vadd.xlane.f32.xlu1 %v7551_v4  ;;  %v7554_v59 = vsel %vm414_vm0, %v14592_v46, 0.0  ;;  %v7608_v17 = vmul.f32 %v14592_v46, %v14592_v46  ;;  %v7677_v49 = vsel %vm414_vm0, %v7609_v56, 0.0 }
0x1014   : > { %v7680_v36 = vsel %vm414_vm0, %v7610_v22, 0.0 }
0x1015   : > { %v7674_v1 = vsel %vm414_vm0, %v7608_v17, 0.0 }
0x1017   : > { %7555 = vadd.xlane.f32.xlu0 %v7554_v59  ;;  %7672 = vadd.xlane.f32.xlu1 %v7671_v27 }
0x101b   : > { %7675 = vadd.xlane.f32.xlu0 %v7674_v1  ;;  %7678 = vadd.xlane.f32.xlu1 %v7677_v49 }
0x101f   : > { %7681 = vadd.xlane.f32.xlu0 %v7680_v36 }
0x1048   : > { %v7499_v15 = vpop.xlane.xlu1 %7498 }
0x1049   : > { %v7565_v20 = vmul.f32 0.015625, %v7499_v15 }
0x104b   : > { %v7709_v38 = vmul.f32 %v7565_v20, %v7565_v20  ;;  %v7757_v22 = vsub.f32 %v14396_v58, %v7565_v20 }
0x104c   : > { %v7493_v43 = vpop.xlane.xlu1 %7492  ;;  %v7502_v35 = vpop.xlane.xlu0 %7501 }
0x104d   : > { %v14610_v10 = vmul.f32 0.015625, %v7493_v43  ;;  %v14612_v14 = vmul.f32 0.015625, %v7502_v35  ;;  %v14634_v43 = vld [vmem:[%s14860_s5 + $0x15] ss:$0 sm:$0xff] }
0x104f   : > { %v7707_v51 = vmul.f32 %v14610_v10, %v14610_v10  ;;  %v7710_v52 = vmul.f32 %v14612_v14, %v14612_v14  ;;  %v7755_v20 = vsub.f32 %v14400_v19, %v14610_v10  ;;  %v7758_v19 = vsub.f32 %v14406_v33, %v14612_v14 }
0x1050   : > { %v7619_v61 = vpop.xlane.xlu1 %7618  ;;  %v7496_v55 = vpop.xlane.xlu0 %7495 }
0x1051   : > { %v7685_v11 = vmul.f32 0.015625, %v7619_v61  ;;  %v14618_v18 = vmul.f32 0.015625, %v7496_v55 }
0x1053   : > { %v7733_v26 = vsub.f32 %v7685_v11, %v7709_v38  ;;  %v7708_v29 = vmul.f32 %v14618_v18, %v14618_v18 }
0x1054   : > { %v7613_v8 = vpop.xlane.xlu1 %7612  ;;  %v7622_v62 = vpop.xlane.xlu0 %7621 }
0x1055   : > { %v7781_v28 = vadd.f32 1e-05, %v7733_v26  ;;  %v7683_v24 = vmul.f32 0.015625, %v7613_v8  ;;  %v7686_v25 = vmul.f32 0.015625, %v7622_v62 }
0x1057   : > { %9541 = vrsqrt.f32 %v7781_v28  ;;  %v7731_v23 = vsub.f32 %v7683_v24, %v7707_v51  ;;  %v7734_v63 = vsub.f32 %v7686_v25, %v7710_v52  ;;  %v14645_v52 = vld [vmem:[%s14860_s5 + $0x16] ss:$0 sm:$0xff] }
0x1058   : > { %v7511_v47 = vpop.xlane.xlu1 %7510  ;;  %v7616_v54 = vpop.xlane.xlu0 %7615 }
0x1059   : > { %v7779_v34 = vadd.f32 1e-05, %v7731_v23  ;;  %v7782_v13 = vadd.f32 1e-05, %v7734_v63  ;;  %v7684_v44 = vmul.f32 0.015625, %v7616_v54  ;;  %v14622_v4 = vmul.f32 0.015625, %v7511_v47 }
0x105b   : > { %9543 = vrsqrt.f32 %v7779_v34  ;;  %v7732_v12 = vsub.f32 %v7684_v44, %v7708_v29  ;;  %v7713_v1 = vmul.f32 %v14622_v4, %v14622_v4 }
0x105c   : > { %9545 = vrsqrt.f32 %v7782_v13  ;;  %v7505_v7 = vpop.xlane.xlu1 %7504  ;;  %v7514_v6 = vpop.xlane.xlu0 %7513 }
0x105d   : > { %v7780_v39 = vadd.f32 1e-05, %v7732_v12  ;;  %v14624_v59 = vmul.f32 0.015625, %v7505_v7  ;;  %v14626_v27 = vmul.f32 0.015625, %v7514_v6  ;;  %v7756_v12 = vsub.f32 %v14410_v41, %v14618_v18 }
0x105f   : > { %9547 = vrsqrt.f32 %v7780_v39  ;;  %v7711_v35 = vmul.f32 %v14624_v59, %v14624_v59  ;;  %v7714_v61 = vmul.f32 %v14626_v27, %v14626_v27 }
0x1060   : > { %v7631_v17 = vpop.xlane.xlu1 %7630  ;;  %v7508_v56 = vpop.xlane.xlu0 %7507 }
0x1061   : > { %v7689_v49 = vmul.f32 0.015625, %v7631_v17  ;;  %v14647_v8 = vmul.f32 0.015625, %v7508_v56 }
0x1063   : > { %v7737_v36 = vsub.f32 %v7689_v49, %v7713_v1  ;;  %v7712_v33 = vmul.f32 %v14647_v8, %v14647_v8 }
0x1064   : > { %v9542_v15 = vpop.eup %9541  ;;  %v7625_v55 = vpop.xlane.xlu1 %7624 }
0x1065   : > { %v7634_v38 = vpop.xlane.xlu0 %7633  ;;  %v7829_v11 = vmul.f32 %v9542_v15, %v7757_v22  ;;  %v7785_v26 = vadd.f32 1e-05, %v7737_v36  ;;  %v7687_v51 = vmul.f32 0.015625, %v7625_v55 }
0x1066   : > { %v7690_v58 = vmul.f32 0.015625, %v7634_v38 }
0x1067   : > { %v7857_v62 = vmul.f32 %v14634_v43, %v7829_v11  ;;  %9549 = vrsqrt.f32 %v7785_v26  ;;  %v7735_v28 = vsub.f32 %v7687_v51, %v7711_v35  ;;  %v7761_v51 = vsub.f32 %v14431_v30, %v14622_v4 }
0x1068   : > { %v7738_v24 = vsub.f32 %v7690_v58, %v7714_v61  ;;  %v9544_v25 = vpop.eup %9543  ;;  %v7523_v10 = vpop.xlane.xlu1 %7522 }
0x1069   : > { %v7628_v23 = vpop.xlane.xlu0 %7627  ;;  %v9546_v63 = vpop.eup %9545  ;;  %v7885_v47 = vadd.f32 %v14645_v52, %v7857_v62  ;;  %v7827_v54 = vmul.f32 %v9544_v25, %v7755_v20  ;;  %v7783_v29 = vadd.f32 1e-05, %v7735_v28  ;;  %v14669_v49 = vmul.f32 0.015625, %v7523_v10 }
0x106a   : > { %v7786_v34 = vadd.f32 1e-05, %v7738_v24  ;;  %v7830_v13 = vmul.f32 %v9546_v63, %v7758_v19  ;;  %v7688_v44 = vmul.f32 0.015625, %v7628_v23 }
0x106b   : > { %7909 = vst.msk [vmem:[%s14655_s27 + $0x10] sm:$0xff] %vm414_vm0, %v7885_v47  ;;  %v7855_v7 = vmul.f32 %v14634_v43, %v7827_v54  ;;  %9551 = vrsqrt.f32 %v7783_v29  ;;  %v7717_v11 = vmul.f32 %v14669_v49, %v14669_v49  ;;  %v7759_v47 = vsub.f32 %v14435_v31, %v14624_v59 }
0x106c   : > { %v9548_v14 = vpop.eup %9547  ;;  %v7858_v6 = vmul.f32 %v14634_v43, %v7830_v13  ;;  %9553 = vrsqrt.f32 %v7786_v34  ;;  %v7517_v39 = vpop.xlane.xlu1 %7516  ;;  %v7736_v41 = vsub.f32 %v7688_v44, %v7712_v33  ;;  %v7762_v13 = vsub.f32 %v14442_v5, %v14626_v27 }
0x106d   : > { %v7526_v17 = vpop.xlane.xlu0 %7525  ;;  %v7883_v56 = vadd.f32 %v14645_v52, %v7855_v7  ;;  %v7828_v1 = vmul.f32 %v9548_v14, %v7756_v12  ;;  %v14677_v15 = vmul.f32 0.015625, %v7517_v39 }
0x106e   : > { %v7886_v18 = vadd.f32 %v14645_v52, %v7858_v6  ;;  %v7784_v36 = vadd.f32 1e-05, %v7736_v41  ;;  %v14679_v35 = vmul.f32 0.015625, %v7526_v17  ;;  %v7760_v41 = vsub.f32 %v14446_v40, %v14647_v8 }
0x106f   : > { %7907 = vst.msk [vmem:[%s14655_s27] sm:$0xff] %vm414_vm0, %v7883_v56  ;;  %v7856_v22 = vmul.f32 %v14634_v43, %v7828_v1  ;;  %v7715_v62 = vmul.f32 %v14677_v15, %v14677_v15 }
0x1070   : > { %7910 = vst.msk [vmem:[%s14655_s27 + $0x18] sm:$0xff] %vm414_vm0, %v7886_v18  ;;  %v7643_v61 = vpop.xlane.xlu1 %7642  ;;  %9555 = vrsqrt.f32 %v7784_v36  ;;  %v7718_v28 = vmul.f32 %v14679_v35, %v14679_v35 }
0x1071   : > { %v7520_v55 = vpop.xlane.xlu0 %7519  ;;  %v7884_v38 = vadd.f32 %v14645_v52, %v7856_v22  ;;  %v7693_v26 = vmul.f32 0.015625, %v7643_v61 }
0x1072   : > { %v14694_v30 = vmul.f32 0.015625, %v7520_v55 }
0x1073   : > { %7908 = vst.msk [vmem:[%s14655_s27 + $0x8] sm:$0xff] %vm414_vm0, %v7884_v38  ;;  %v7741_v58 = vsub.f32 %v7693_v26, %v7717_v11 }
0x1074   : > { %v9550_v20 = vpop.eup %9549  ;;  %v7637_v24 = vpop.xlane.xlu1 %7636  ;;  %v7716_v56 = vmul.f32 %v14694_v30, %v14694_v30 }
0x1075   : > { %v7646_v25 = vpop.xlane.xlu0 %7645  ;;  %v7833_v19 = vmul.f32 %v9550_v20, %v7761_v51  ;;  %v7789_v10 = vadd.f32 1e-05, %v7741_v58  ;;  %v7691_v23 = vmul.f32 0.015625, %v7637_v24 }
0x1076   : > { %v7694_v63 = vmul.f32 0.015625, %v7646_v25 }
0x1077   : > { %v7861_v4 = vmul.f32 %v14634_v43, %v7833_v19  ;;  %9557 = vrsqrt.f32 %v7789_v10  ;;  %v7739_v54 = vsub.f32 %v7691_v23, %v7715_v62 }
0x1078   : > { %v7742_v29 = vsub.f32 %v7694_v63, %v7718_v28  ;;  %v9552_v34 = vpop.eup %9551  ;;  %v7535_v44 = vpop.xlane.xlu1 %7534  ;;  %v7765_v28 = vsub.f32 %v14467_v16, %v14669_v49  ;;  %v7763_v16 = vsub.f32 %v14471_v2, %v14677_v15 }
0x1079   : > { %v7640_v12 = vpop.xlane.xlu0 %7639  ;;  %v9554_v7 = vpop.eup %9553  ;;  %v7889_v33 = vadd.f32 %v14645_v52, %v7861_v4  ;;  %v7831_v14 = vmul.f32 %v9552_v34, %v7759_v47  ;;  %v7787_v6 = vadd.f32 1e-05, %v7739_v54  ;;  %v14709_v22 = vmul.f32 0.015625, %v7535_v44 }
0x107a   : > { %v7790_v31 = vadd.f32 1e-05, %v7742_v29  ;;  %v7834_v59 = vmul.f32 %v9554_v7, %v7762_v13  ;;  %v7692_v39 = vmul.f32 0.015625, %v7640_v12 }
0x107b   : > { %7913 = vst.msk [vmem:[%s14655_s27 + $0x30] sm:$0xff] %vm414_vm0, %v7889_v33  ;;  %v7859_v17 = vmul.f32 %v14634_v43, %v7831_v14  ;;  %9559 = vrsqrt.f32 %v7787_v6  ;;  %v7721_v20 = vmul.f32 %v14709_v22, %v14709_v22  ;;  %v7766_v33 = vsub.f32 %v14478_v50, %v14679_v35 }
0x107c   : > { %v7862_v5 = vmul.f32 %v14634_v43, %v7834_v59  ;;  %9561 = vrsqrt.f32 %v7790_v31  ;;  %v7529_v27 = vpop.xlane.xlu1 %7528  ;;  %v7740_v36 = vsub.f32 %v7692_v39, %v7716_v56 }
0x107d   : > { %v7538_v1 = vpop.xlane.xlu0 %7537  ;;  %v7887_v18 = vadd.f32 %v14645_v52, %v7859_v17  ;;  %v9556_v61 = vpop.eup %9555  ;;  %v14716_v26 = vmul.f32 0.015625, %v7529_v27 }
0x107e   : > { %v7890_v55 = vadd.f32 %v14645_v52, %v7862_v5  ;;  %v7832_v38 = vmul.f32 %v9556_v61, %v7760_v41  ;;  %v7788_v11 = vadd.f32 1e-05, %v7740_v36  ;;  %v14718_v51 = vmul.f32 0.015625, %v7538_v1 }
0x107f   : > { %7911 = vst.msk [vmem:[%s14655_s27 + $0x20] sm:$0xff] %vm414_vm0, %v7887_v18  ;;  %v7719_v10 = vmul.f32 %v14716_v26, %v14716_v26  ;;  %v7764_v41 = vsub.f32 %v14482_v32, %v14694_v30 }
0x1080   : > { %7914 = vst.msk [vmem:[%s14655_s27 + $0x38] sm:$0xff] %vm414_vm0, %v7890_v55  ;;  %v7655_v40 = vpop.xlane.xlu1 %7654  ;;  %v7860_v58 = vmul.f32 %v14634_v43, %v7832_v38  ;;  %9563 = vrsqrt.f32 %v7788_v11  ;;  %v7722_v23 = vmul.f32 %v14718_v51, %v14718_v51 }
0x1081   : > { %v7532_v8 = vpop.xlane.xlu0 %7531  ;;  %v7697_v62 = vmul.f32 0.015625, %v7655_v40 }
0x1082   : > { %v7888_v24 = vadd.f32 %v14645_v52, %v7860_v58  ;;  %v14734_v49 = vmul.f32 0.015625, %v7532_v8 }
0x1083   : > { %v7745_v25 = vsub.f32 %v7697_v62, %v7721_v20 }
0x1084   : > { %v9558_v19 = vpop.eup %9557  ;;  %v7649_v63 = vpop.xlane.xlu1 %7648  ;;  %7912 = vst.msk [vmem:[%s14655_s27 + $0x28] sm:$0xff] %vm414_vm0, %v7888_v24  ;;  %v7720_v27 = vmul.f32 %v14734_v49, %v14734_v49  ;;  %v7769_v24 = vsub.f32 %v14503_v42, %v14709_v22  ;;  %v7767_v42 = vsub.f32 %v14507_v60, %v14716_v26 }
0x1085   : > { %v7658_v47 = vpop.xlane.xlu0 %7657  ;;  %v7837_v4 = vmul.f32 %v9558_v19, %v7765_v28  ;;  %v7793_v54 = vadd.f32 1e-05, %v7745_v25  ;;  %v7695_v29 = vmul.f32 0.015625, %v7649_v63 }
0x1086   : > { %v7698_v34 = vmul.f32 0.015625, %v7658_v47 }
0x1087   : > { %v7865_v13 = vmul.f32 %v14634_v43, %v7837_v4  ;;  %9565 = vrsqrt.f32 %v7793_v54  ;;  %v7743_v44 = vsub.f32 %v7695_v29, %v7719_v10 }
0x1088   : > { %v7746_v12 = vsub.f32 %v7698_v34, %v7722_v23  ;;  %v9560_v7 = vpop.eup %9559  ;;  %v7547_v14 = vpop.xlane.xlu1 %7546 }
0x1089   : > { %v7652_v6 = vpop.xlane.xlu0 %7651  ;;  %v9562_v31 = vpop.eup %9561  ;;  %v7893_v59 = vadd.f32 %v14645_v52, %v7865_v13  ;;  %v7835_v39 = vmul.f32 %v9560_v7, %v7763_v16  ;;  %v7791_v17 = vadd.f32 1e-05, %v7743_v44  ;;  %v14749_v36 = vmul.f32 0.015625, %v7547_v14 }
0x108a   : > { %v7794_v2 = vadd.f32 1e-05, %v7746_v12  ;;  %v7838_v15 = vmul.f32 %v9562_v31, %v7766_v33  ;;  %v7696_v56 = vmul.f32 0.015625, %v7652_v6  ;;  %v7770_v33 = vsub.f32 %v14514_v3, %v14718_v51 }
0x108b   : > { %7917 = vst.msk [vmem:[%s14655_s27 + $0x50] sm:$0xff] %vm414_vm0, %v7893_v59  ;;  %v7863_v5 = vmul.f32 %v14634_v43, %v7835_v39  ;;  %9567 = vrsqrt.f32 %v7791_v17  ;;  %v7725_v62 = vmul.f32 %v14749_v36, %v14749_v36 }
0x108c   : > { %v7866_v50 = vmul.f32 %v14634_v43, %v7838_v15  ;;  %9569 = vrsqrt.f32 %v7794_v2  ;;  %v7541_v35 = vpop.xlane.xlu1 %7540  ;;  %v7744_v61 = vsub.f32 %v7696_v56, %v7720_v27  ;;  %v7768_v27 = vsub.f32 %v14518_v57, %v14734_v49 }
0x108d   : > { %v7550_v1 = vpop.xlane.xlu0 %7549  ;;  %v7891_v18 = vadd.f32 %v14645_v52, %v7863_v5  ;;  %v9564_v55 = vpop.eup %9563  ;;  %v14756_v8 = vmul.f32 0.015625, %v7541_v35 }
0x108e   : > { %v7894_v38 = vadd.f32 %v14645_v52, %v7866_v50  ;;  %v7836_v11 = vmul.f32 %v9564_v55, %v7764_v41  ;;  %v7792_v40 = vadd.f32 1e-05, %v7744_v61  ;;  %v14758_v58 = vmul.f32 0.015625, %v7550_v1 }
0x108f   : > { %7915 = vst.msk [vmem:[%s14655_s27 + $0x40] sm:$0xff] %vm414_vm0, %v7891_v18  ;;  %v7723_v23 = vmul.f32 %v14756_v8, %v14756_v8 }
0x1090   : > { %7918 = vst.msk [vmem:[%s14655_s27 + $0x58] sm:$0xff] %vm414_vm0, %v7894_v38  ;;  %v7667_v32 = vpop.xlane.xlu1 %7666  ;;  %v7864_v20 = vmul.f32 %v14634_v43, %v7836_v11  ;;  %9571 = vrsqrt.f32 %v7792_v40  ;;  %v7726_v63 = vmul.f32 %v14758_v58, %v14758_v58 }
0x1091   : > { %v7544_v30 = vpop.xlane.xlu0 %7543  ;;  %v7701_v28 = vmul.f32 0.015625, %v7667_v32 }
0x1092   : > { %v7892_v25 = vadd.f32 %v14645_v52, %v7864_v20  ;;  %v14774_v22 = vmul.f32 0.015625, %v7544_v30  ;;  %v7773_v20 = vsub.f32 %v14539_v53, %v14749_v36 }
0x1093   : > { %v7749_v19 = vsub.f32 %v7701_v28, %v7725_v62 }
0x1094   : > { %v9566_v10 = vpop.eup %9565  ;;  %v7661_v47 = vpop.xlane.xlu1 %7660  ;;  %7916 = vst.msk [vmem:[%s14655_s27 + $0x48] sm:$0xff] %vm414_vm0, %v7892_v25  ;;  %v7724_v56 = vmul.f32 %v14774_v22, %v14774_v22 }
0x1095   : > { %v7670_v4 = vpop.xlane.xlu0 %7669  ;;  %v7841_v54 = vmul.f32 %v9566_v10, %v7769_v24  ;;  %v7797_v29 = vadd.f32 1e-05, %v7749_v19  ;;  %v7699_v34 = vmul.f32 0.015625, %v7661_v47 }
0x1096   : > { %v7702_v16 = vmul.f32 0.015625, %v7670_v4 }
0x1097   : > { %v7869_v13 = vmul.f32 %v14634_v43, %v7841_v54  ;;  %9573 = vrsqrt.f32 %v7797_v29  ;;  %v7747_v44 = vsub.f32 %v7699_v34, %v7723_v23  ;;  %v7771_v29 = vsub.f32 %v14543_v48, %v14756_v8 }
0x1098   : > { %v7750_v12 = vsub.f32 %v7702_v16, %v7726_v63  ;;  %v9568_v7 = vpop.eup %9567  ;;  %v7559_v14 = vpop.xlane.xlu1 %7558 }
0x1099   : > { %v7664_v6 = vpop.xlane.xlu0 %7663  ;;  %v9570_v31 = vpop.eup %9569  ;;  %v7897_v59 = vadd.f32 %v14645_v52, %v7869_v13  ;;  %v7839_v39 = vmul.f32 %v9568_v7, %v7767_v42  ;;  %v7795_v17 = vadd.f32 1e-05, %v7747_v44  ;;  %v14796_v38 = vmul.f32 0.015625, %v7559_v14 }
0x109a   : > { %v7798_v60 = vadd.f32 1e-05, %v7750_v12  ;;  %v7842_v26 = vmul.f32 %v9570_v31, %v7770_v33  ;;  %v7700_v2 = vmul.f32 0.015625, %v7664_v6  ;;  %v7774_v13 = vsub.f32 %v14550_v45, %v14758_v58 }
0x109b   : > { %7921 = vst.msk [vmem:[%s14655_s27 + $0x70] sm:$0xff] %vm414_vm0, %v7897_v59  ;;  %v7867_v15 = vmul.f32 %v14634_v43, %v7839_v39  ;;  %9575 = vrsqrt.f32 %v7795_v17  ;;  %v7729_v25 = vmul.f32 %v14796_v38, %v14796_v38  ;;  %v7772_v58 = vsub.f32 %v14554_v21, %v14774_v22 }
0x109c   : > { %v7870_v3 = vmul.f32 %v14634_v43, %v7842_v26  ;;  %9577 = vrsqrt.f32 %v7798_v60  ;;  %v7553_v51 = vpop.xlane.xlu1 %7552  ;;  %v7748_v35 = vsub.f32 %v7700_v2, %v7724_v56 }
0x109d   : > { %v7562_v5 = vpop.xlane.xlu0 %7561  ;;  %v7895_v50 = vadd.f32 %v14645_v52, %v7867_v15  ;;  %v14789_v1 = vmul.f32 0.015625, %v7553_v51  ;;  %v9572_v41 = vpop.eup %9571 }
0x109e   : > { %v7898_v18 = vadd.f32 %v14645_v52, %v7870_v3  ;;  %v7840_v61 = vmul.f32 %v9572_v41, %v7768_v27  ;;  %v7796_v55 = vadd.f32 1e-05, %v7748_v35  ;;  %v7586_v53 = vmul.f32 0.015625, %v7562_v5 }
0x109f   : > { %7919 = vst.msk [vmem:[%s14655_s27 + $0x60] sm:$0xff] %vm414_vm0, %v7895_v50  ;;  %v7727_v57 = vmul.f32 %v14789_v1, %v14789_v1  ;;  %v7775_v21 = vsub.f32 %v14582_v9, %v14789_v1  ;;  %v7777_v5 = vsub.f32 %v14572_v37, %v14796_v38 }
0x10a0   : > { %7922 = vst.msk [vmem:[%s14655_s27 + $0x78] sm:$0xff] %vm414_vm0, %v7898_v18  ;;  %v7673_v49 = vpop.xlane.xlu1 %7672  ;;  %v7868_v40 = vmul.f32 %v14634_v43, %v7840_v61  ;;  %9579 = vrsqrt.f32 %v7796_v55  ;;  %v7730_v8 = vmul.f32 %v7586_v53, %v7586_v53  ;;  %v7778_v55 = vsub.f32 %v14585_v0, %v7586_v53 }
0x10a1   : > { %v7556_v11 = vpop.xlane.xlu0 %7555  ;;  %v7703_v32 = vmul.f32 0.015625, %v7673_v49 }
0x10a2   : > { %v7584_v30 = vmul.f32 0.015625, %v7556_v11  ;;  %v7896_v62 = vadd.f32 %v14645_v52, %v7868_v40 }
0x10a3   : > { %v7751_v28 = vsub.f32 %v7703_v32, %v7727_v57 }
0x10a4   : > { %v9574_v24 = vpop.eup %9573  ;;  %v7728_v19 = vmul.f32 %v7584_v30, %v7584_v30  ;;  %v7679_v10 = vpop.xlane.xlu1 %7678  ;;  %7920 = vst.msk [vmem:[%s14655_s27 + $0x68] sm:$0xff] %vm414_vm0, %v7896_v62  ;;  %v7776_v35 = vsub.f32 %v14592_v46, %v7584_v30 }
0x10a5   : > { %v7676_v23 = vpop.xlane.xlu0 %7675  ;;  %v7845_v63 = vmul.f32 %v9574_v24, %v7773_v20  ;;  %v7799_v47 = vadd.f32 1e-05, %v7751_v28  ;;  %v7705_v4 = vmul.f32 0.015625, %v7679_v10 }
0x10a6   : > { %v7704_v54 = vmul.f32 0.015625, %v7676_v23 }
0x10a7   : > { %v7873_v36 = vmul.f32 %v14634_v43, %v7845_v63  ;;  %9581 = vrsqrt.f32 %v7799_v47  ;;  %v7753_v34 = vsub.f32 %v7705_v4, %v7729_v25 }
0x10a8   : > { %v7752_v16 = vsub.f32 %v7704_v54, %v7728_v19  ;;  %v9576_v42 = vpop.eup %9575 }
0x10a9   : > { %v7682_v44 = vpop.xlane.xlu0 %7681  ;;  %v9578_v12 = vpop.eup %9577  ;;  %v7901_v7 = vadd.f32 %v14645_v52, %v7873_v36  ;;  %v7843_v33 = vmul.f32 %v9576_v42, %v7771_v29  ;;  %v7801_v14 = vadd.f32 1e-05, %v7753_v34 }
0x10aa   : > { %v7800_v6 = vadd.f32 1e-05, %v7752_v16  ;;  %v7846_v48 = vmul.f32 %v9578_v12, %v7774_v13  ;;  %v7706_v31 = vmul.f32 0.015625, %v7682_v44 }
0x10ab   : > { %7925 = vst.msk [vmem:[%s14655_s27 + $0x90] sm:$0xff] %vm414_vm0, %v7901_v7  ;;  %v7871_v59 = vmul.f32 %v14634_v43, %v7843_v33  ;;  %9583 = vrsqrt.f32 %v7801_v14 }
0x10ac   : > { %v7874_v39 = vmul.f32 %v14634_v43, %v7846_v48  ;;  %9585 = vrsqrt.f32 %v7800_v6  ;;  %v7754_v45 = vsub.f32 %v7706_v31, %v7730_v8 }
0x10ad   : > { %v7899_v17 = vadd.f32 %v14645_v52, %v7871_v59  ;;  %v9580_v60 = vpop.eup %9579 }
0x10ae   : > { %v7902_v26 = vadd.f32 %v14645_v52, %v7874_v39  ;;  %v7802_v2 = vadd.f32 1e-05, %v7754_v45  ;;  %v7844_v15 = vmul.f32 %v9580_v60, %v7772_v58 }
0x10af   : > { %7923 = vst.msk [vmem:[%s14655_s27 + $0x80] sm:$0xff] %vm414_vm0, %v7899_v17 }
0x10b0   : > { %7926 = vst.msk [vmem:[%s14655_s27 + $0x98] sm:$0xff] %vm414_vm0, %v7902_v26  ;;  %9587 = vrsqrt.f32 %v7802_v2  ;;  %v7872_v56 = vmul.f32 %v14634_v43, %v7844_v15 }
0x10b2   : > { %v7900_v3 = vadd.f32 %v14645_v52, %v7872_v56 }
0x10b4   : > { %v9582_v22 = vpop.eup %9581  ;;  %7924 = vst.msk [vmem:[%s14655_s27 + $0x88] sm:$0xff] %vm414_vm0, %v7900_v3 }
0x10b5   : > { %v7847_v51 = vmul.f32 %v9582_v22, %v7775_v21 }
0x10b7   : > { %v7875_v27 = vmul.f32 %v14634_v43, %v7847_v51 }
0x10b8   : > { %v9584_v50 = vpop.eup %9583 }
0x10b9   : > { %v9586_v41 = vpop.eup %9585  ;;  %v7903_v18 = vadd.f32 %v14645_v52, %v7875_v27  ;;  %v7849_v61 = vmul.f32 %v9584_v50, %v7777_v5 }
0x10ba   : > { %v7848_v9 = vmul.f32 %v9586_v41, %v7776_v35 }
0x10bb   : > { %7927 = vst.msk [vmem:[%s14655_s27 + $0xa0] sm:$0xff] %vm414_vm0, %v7903_v18  ;;  %v7877_v1 = vmul.f32 %v14634_v43, %v7849_v61 }
0x10bc   : > { %v7876_v37 = vmul.f32 %v14634_v43, %v7848_v9 }
0x10bd   : > { %v9588_v38 = vpop.eup %9587  ;;  %v7905_v57 = vadd.f32 %v14645_v52, %v7877_v1 }
0x10be   : > { %v7904_v49 = vadd.f32 %v14645_v52, %v7876_v37  ;;  %v7850_v46 = vmul.f32 %v9588_v38, %v7778_v55 }
0x10bf   : > { %7929 = vst.msk [vmem:[%s14655_s27 + $0xb0] sm:$0xff] %vm414_vm0, %v7905_v57 }
0x10c0   : > { %7928 = vst.msk [vmem:[%s14655_s27 + $0xa8] sm:$0xff] %vm414_vm0, %v7904_v49  ;;  %v7878_v11 = vmul.f32 %v14634_v43, %v7850_v46 }
0x10c2   : > { %v7906_v40 = vadd.f32 %v14645_v52, %v7878_v11 }
0x10c4   : > { %7930 = vst.msk [vmem:[%s14655_s27 + $0xb8] sm:$0xff] %vm414_vm0, %v7906_v40 }
0x10c5 PF: > { %s16_s21 = sadd.s32 1, %s9619_s21  }
0x10c6   : > { %p13_p5 = scmp.ge.s32.totalorder %s16_s21, 4  }
0x10c8   :  { %15 = sbr.rel (!%p13_p5) target bundleno = 1 (0x1), region = 80 }

</bundles_post_ra>
